<compile_context>
chip_gen: v6e
topology: v6e:2x2x1
jax: 0.10.0
libtpu: 0.0.40
codegen_flags: <defaults>
</compile_context>

<pallas_src>
import jax
import jax.numpy as jnp
from jax.experimental import pallas as pl
from jax.experimental.pallas import tpu as pltpu

LN_EPS = 1e-5  # torch.nn.LayerNorm default


def ffn_kernel(x_ref, w1_ref, b1_ref, w2_ref, b2_ref, g_ref, be_ref, y_ref):
    x = x_ref[...]                                                     # (TM, D) f32
    xb = x.astype(jnp.bfloat16)                                        # MXU operand

    # w1: Conv1d(d_model -> ffn_dim, k=1)  ==  x @ W1 + b1, then ReLU  (f32 accum)
    h = jnp.maximum(
        jnp.dot(xb, w1_ref[...], preferred_element_type=jnp.float32) + b1_ref[...],
        0.0)                                                           # (TM, F) f32

    # w2: Conv1d(d_model -> ffn_dim, k=1) applied to h (valid only since F == D)
    f = (jnp.dot(h.astype(jnp.bfloat16), w2_ref[...],
                 preferred_element_type=jnp.float32) + b2_ref[...])    # (TM, D) f32

    # dropout(p=0.0) -> identity; residual + LayerNorm(d_model), one-pass statistics.
    r = x + f                                                          # (TM, D) f32
    inv_d = 1.0 / r.shape[-1]
    s1 = jnp.sum(r, axis=-1, keepdims=True)
    s2 = jnp.sum(r * r, axis=-1, keepdims=True)
    mu = s1 * inv_d
    var = s2 * inv_d - mu * mu                                         # biased var
    y_ref[...] = (r - mu) * jax.lax.rsqrt(var + LN_EPS) * g_ref[...] + be_ref[...]


def _vmem_estimate_bytes(tile_m, D, F):
    in_tiles = 2 * tile_m * D * 4                     # x tile (f32), double-buffered
    out_tiles = 2 * tile_m * D * 4                    # y tile (f32), double-buffered
    weights = 2 * D * F * 2                           # w1 + w2 (bf16), single-buffered
    vectors = (2 * F + 2 * D) * 4 * 2                 # b1, b2, gamma, beta (worst case)
    temps = tile_m * (F + D) * 4 + tile_m * (F + D) * 2   # h/r f32 + bf16 casts
    return in_tiles + out_tiles + weights + vectors + temps


def _build_call(M, D, F, tile_m, n_tiles, vmem_limit, flops, bytes_accessed,
                single_buffer_consts):
    const_kw = dict(pipeline_mode=pl.Buffered(1)) if single_buffer_consts else {}
    row_spec = pl.BlockSpec((tile_m, D), lambda i: (i, 0))
    w1_spec = pl.BlockSpec((D, F), lambda i: (0, 0), **const_kw)
    w2_spec = pl.BlockSpec((F, D), lambda i: (0, 0), **const_kw)
    bF_spec = pl.BlockSpec((1, F), lambda i: (0, 0), **const_kw)
    bD_spec = pl.BlockSpec((1, D), lambda i: (0, 0), **const_kw)

    return pl.pallas_call(
        ffn_kernel,
        grid=(n_tiles,),
        in_specs=[row_spec, w1_spec, bF_spec, w2_spec, bD_spec, bD_spec, bD_spec],
        out_specs=row_spec,
        out_shape=jax.ShapeDtypeStruct((M, D), jnp.float32),
        compiler_params=pltpu.CompilerParams(
            dimension_semantics=("parallel",),   # independent row tiles (v7x 2-TC)
            vmem_limit_bytes=vmem_limit,
        ),
        cost_estimate=pl.CostEstimate(
            flops=flops, transcendentals=M, bytes_accessed=bytes_accessed),
    )


def positional_wise_ffn(x, params, *, tile_m=512):
    """x: (B, S, D) float32.  params: transposed conv weights + LN affine.

    tile_m: rows (B*S folded) per grid step.  512 amortizes per-step overhead while
    staying a few MiB of VMEM at D=F=256; raise toward 1024-2048 on v5e/v6e, keep the
    _vmem_estimate_bytes gate satisfied for v7x (64 MiB physical VMEM).
    """
    B, S, D = x.shape
    F = params["w1"].shape[1]
    assert F == D, ("original module: w2=Conv1d(d_model, ffn_dim, 1) and "
                    "LayerNorm(d_model) only type-check when ffn_dim == d_model")
    assert D % 128 == 0, "keep the channel axis lane-dense (multiple of 128)"
    assert tile_m % 8 == 0, "row tile must stay sublane-aligned"

    # Fold batch*seq into one row axis so the MXU M-dim is tile_m.  No padding: the
    # ragged last block is handled by Pallas (row-independent compute, masked store).
    M = B * S
    xm = x.reshape(M, D)
    n_tiles = pl.cdiv(M, tile_m)

    # Pre-cast the matmul weights to bf16 (halves weight HBM/VMEM; MXU-native dtype).
    w1 = params["w1"].astype(jnp.bfloat16)
    w2 = params["w2"].astype(jnp.bfloat16)

    est = _vmem_estimate_bytes(tile_m, D, F)
    assert est <= 48 * 1024 * 1024, (
        f"tile_m={tile_m} needs ~{est >> 20} MiB VMEM; exceeds the v7x-safe budget")
    vmem_limit = min(max(2 * est, 16 * 1024 * 1024), 64 * 1024 * 1024)

    flops = 2 * M * D * F * 2 + 12 * M * D               # two matmuls + epilogue
    bytes_accessed = 4 * (2 * M * D) + 2 * (2 * D * F) + 4 * (2 * F + 2 * D)

    args = (xm, w1, params["b1"], w2, params["b2"], params["g"], params["be"])
    try:
        out = _build_call(M, D, F, tile_m, n_tiles, vmem_limit, flops,
                          bytes_accessed, single_buffer_consts=True)(*args)
    except Exception:
        # Fallback for jax builds without pipeline_mode=pl.Buffered support.
        out = _build_call(M, D, F, tile_m, n_tiles, vmem_limit, flops,
                          bytes_accessed, single_buffer_consts=False)(*args)

    return out.reshape(B, S, D)


def ref_positional_wise_ffn(x, p, matmul_dtype=jnp.float32):
    """Pure-JAX reference.  matmul_dtype=bf16 mirrors the kernel's operand precision."""
    w1 = p["w1"].astype(matmul_dtype)
    w2 = p["w2"].astype(matmul_dtype)
    h = jax.nn.relu(
        jnp.dot(x.astype(matmul_dtype), w1, preferred_element_type=jnp.float32)
        + p["b1"][0])
    f = (jnp.dot(h.astype(matmul_dtype), w2, preferred_element_type=jnp.float32)
         + p["b2"][0])
    r = x + f
    mu = r.mean(-1, keepdims=True)
    var = ((r - mu) ** 2).mean(-1, keepdims=True)
    return (r - mu) / jnp.sqrt(var + LN_EPS) * p["g"][0] + p["be"][0]


def make_params(key, d_model, ffn_dim):
    assert ffn_dim == d_model, "module constraint (see header)"
    ks = jax.random.split(key, 6)
    D, F = d_model, ffn_dim

    # torch Conv1d weight is (out, in, 1); store pre-transposed (in, out).
    return dict(
        w1=0.05 * jax.random.normal(ks[0], (D, F), jnp.float32),
        b1=(0.05 * jax.random.normal(ks[1], (F,), jnp.float32)).reshape(1, F),
        w2=0.05 * jax.random.normal(ks[2], (F, D), jnp.float32),
        b2=(0.05 * jax.random.normal(ks[3], (D,), jnp.float32)).reshape(1, D),
        g=(1.0 + 0.05 * jax.random.normal(ks[4], (D,), jnp.float32)).reshape(1, D),
        be=(0.05 * jax.random.normal(ks[5], (D,), jnp.float32)).reshape(1, D),
    )


if __name__ == "__main__":
    # Small shapes consistent with the module (ffn_dim == d_model required for the
    # original forward to type-check).  M = B*S = 640 with the default tile_m=512
    # -> 2 grid steps, the second one ragged (exercises the masked boundary store).
    B, S, D = 2, 320, 256
    FFN_DIM = D

    key = jax.random.PRNGKey(0)
    kx, kp = jax.random.split(key)
    x = jax.random.normal(kx, (B, S, D), jnp.float32)
    params = make_params(kp, D, FFN_DIM)

    y = positional_wise_ffn(x, params)          # default tile_m=512
    y = jax.block_until_ready(y)
    assert y.shape == (B, S, D)
    assert bool(jnp.all(jnp.isfinite(y)))

    # Tight check vs a reference using the same bf16 matmul operands / f32 accumulation.
    y_ref_matched = ref_positional_wise_ffn(x, params, matmul_dtype=jnp.bfloat16)
    assert jnp.max(jnp.abs(y - y_ref_matched)) < 2e-3

    # Loose sanity check vs the full-f32 PyTorch-equivalent forward (bf16 operand
    # rounding is the only difference).
    y_ref_f32 = ref_positional_wise_ffn(x, params, matmul_dtype=jnp.float32)
    assert jnp.max(jnp.abs(y - y_ref_f32)) < 5e-2

    print("KERNEL_OK")
</pallas_src>

<mosaic_0001>
module attributes {stable_mosaic.version = 11 : i64} {
  func.func @ffn_kernel(%arg0: i32, %arg1: memref<512x256xf32, #tpu.memory_space<vmem>>, %arg2: memref<256x256xbf16, #tpu.memory_space<vmem>>, %arg3: memref<1x256xf32, #tpu.memory_space<vmem>>, %arg4: memref<256x256xbf16, #tpu.memory_space<vmem>>, %arg5: memref<1x256xf32, #tpu.memory_space<vmem>>, %arg6: memref<1x256xf32, #tpu.memory_space<vmem>>, %arg7: memref<1x256xf32, #tpu.memory_space<vmem>>, %arg8: memref<512x256xf32, #tpu.memory_space<vmem>>) attributes {dimension_semantics = [#tpu.dimension_semantics<parallel>], iteration_bounds = array<i64: 2>, scalar_prefetch = 0 : i64, scratch_operands = 0 : i64, tpu.core_type = #tpu.core_type<tc>, window_params = [{transform_indices = @transform_0, window_bounds = array<i64: 512, 256>}, {pipeline_mode = #tpu.pipeline_mode<synchronous>, transform_indices = @transform_1, window_bounds = array<i64: 256, 256>}, {pipeline_mode = #tpu.pipeline_mode<synchronous>, transform_indices = @transform_2, window_bounds = array<i64: 1, 256>}, {pipeline_mode = #tpu.pipeline_mode<synchronous>, transform_indices = @transform_3, window_bounds = array<i64: 256, 256>}, {pipeline_mode = #tpu.pipeline_mode<synchronous>, transform_indices = @transform_4, window_bounds = array<i64: 1, 256>}, {pipeline_mode = #tpu.pipeline_mode<synchronous>, transform_indices = @transform_5, window_bounds = array<i64: 1, 256>}, {pipeline_mode = #tpu.pipeline_mode<synchronous>, transform_indices = @transform_6, window_bounds = array<i64: 1, 256>}, {transform_indices = @transform_7, window_bounds = array<i64: 512, 256>}]} {
    %c0 = arith.constant 0 : index
    %c0_0 = arith.constant 0 : index
    %0 = vector.load %arg1[%c0, %c0_0] : memref<512x256xf32, #tpu.memory_space<vmem>>, vector<512x256xf32>
    %1 = arith.truncf %0 : vector<512x256xf32> to vector<512x256xbf16>
    %c0_1 = arith.constant 0 : index
    %c0_2 = arith.constant 0 : index
    %2 = vector.load %arg2[%c0_1, %c0_2] : memref<256x256xbf16, #tpu.memory_space<vmem>>, vector<256x256xbf16>
    %cst = arith.constant dense<0.000000e+00> : vector<512x256xf32>
    %3 = tpu.matmul %1, %2, %cst {dimension_numbers = #tpu.dot_dimension_numbers<[1], [0], [0], [1], [0, 0, 1, 1], [], []>} : vector<512x256xbf16>, vector<256x256xbf16>, vector<512x256xf32> -> vector<512x256xf32>
    %c0_3 = arith.constant 0 : index
    %c0_4 = arith.constant 0 : index
    %4 = vector.load %arg3[%c0_3, %c0_4] : memref<1x256xf32, #tpu.memory_space<vmem>>, vector<1x256xf32>
    %5 = vector.broadcast %4 : vector<1x256xf32> to vector<512x256xf32>
    %6 = arith.addf %3, %5 : vector<512x256xf32>
    %cst_5 = arith.constant 0.000000e+00 : f32
    %7 = vector.broadcast %cst_5 : f32 to vector<512x256xf32>
    %8 = arith.maximumf %6, %7 : vector<512x256xf32>
    %9 = arith.truncf %8 : vector<512x256xf32> to vector<512x256xbf16>
    %c0_6 = arith.constant 0 : index
    %c0_7 = arith.constant 0 : index
    %10 = vector.load %arg4[%c0_6, %c0_7] : memref<256x256xbf16, #tpu.memory_space<vmem>>, vector<256x256xbf16>
    %cst_8 = arith.constant dense<0.000000e+00> : vector<512x256xf32>
    %11 = tpu.matmul %9, %10, %cst_8 {dimension_numbers = #tpu.dot_dimension_numbers<[1], [0], [0], [1], [0, 0, 1, 1], [], []>} : vector<512x256xbf16>, vector<256x256xbf16>, vector<512x256xf32> -> vector<512x256xf32>
    %c0_9 = arith.constant 0 : index
    %c0_10 = arith.constant 0 : index
    %12 = vector.load %arg5[%c0_9, %c0_10] : memref<1x256xf32, #tpu.memory_space<vmem>>, vector<1x256xf32>
    %13 = vector.broadcast %12 : vector<1x256xf32> to vector<512x256xf32>
    %14 = arith.addf %11, %13 : vector<512x256xf32>
    %15 = arith.addf %0, %14 : vector<512x256xf32>
    %cst_11 = arith.constant dense<0.000000e+00> : vector<512xf32>
    %16 = vector.multi_reduction <add>, %15, %cst_11 [1] : vector<512x256xf32> to vector<512xf32>
    %17 = vector.shape_cast %16 : vector<512xf32> to vector<512x1xf32>
    %18 = arith.mulf %15, %15 : vector<512x256xf32>
    %cst_12 = arith.constant dense<0.000000e+00> : vector<512xf32>
    %19 = vector.multi_reduction <add>, %18, %cst_12 [1] : vector<512x256xf32> to vector<512xf32>
    %20 = vector.shape_cast %19 : vector<512xf32> to vector<512x1xf32>
    %cst_13 = arith.constant 3.906250e-03 : f32
    %21 = vector.broadcast %cst_13 : f32 to vector<512x1xf32>
    %22 = arith.mulf %17, %21 : vector<512x1xf32>
    %cst_14 = arith.constant 3.906250e-03 : f32
    %23 = vector.broadcast %cst_14 : f32 to vector<512x1xf32>
    %24 = arith.mulf %20, %23 : vector<512x1xf32>
    %25 = arith.mulf %22, %22 : vector<512x1xf32>
    %26 = arith.subf %24, %25 : vector<512x1xf32>
    %27 = vector.broadcast %22 : vector<512x1xf32> to vector<512x256xf32>
    %28 = arith.subf %15, %27 : vector<512x256xf32>
    %cst_15 = arith.constant 9.99999974E-6 : f32
    %29 = vector.broadcast %cst_15 : f32 to vector<512x1xf32>
    %30 = arith.addf %26, %29 : vector<512x1xf32>
    %31 = math.rsqrt %30 : vector<512x1xf32>
    %32 = vector.broadcast %31 : vector<512x1xf32> to vector<512x256xf32>
    %33 = arith.mulf %28, %32 : vector<512x256xf32>
    %c0_16 = arith.constant 0 : index
    %c0_17 = arith.constant 0 : index
    %34 = vector.load %arg6[%c0_16, %c0_17] : memref<1x256xf32, #tpu.memory_space<vmem>>, vector<1x256xf32>
    %35 = vector.broadcast %34 : vector<1x256xf32> to vector<512x256xf32>
    %36 = arith.mulf %33, %35 : vector<512x256xf32>
    %c0_18 = arith.constant 0 : index
    %c0_19 = arith.constant 0 : index
    %37 = vector.load %arg7[%c0_18, %c0_19] : memref<1x256xf32, #tpu.memory_space<vmem>>, vector<1x256xf32>
    %38 = vector.broadcast %37 : vector<1x256xf32> to vector<512x256xf32>
    %39 = arith.addf %36, %38 : vector<512x256xf32>
    %c0_20 = arith.constant 0 : index
    %c0_21 = arith.constant 0 : index
    %40 = vector.load %arg8[%c0_20, %c0_21] : memref<512x256xf32, #tpu.memory_space<vmem>>, vector<512x256xf32>
    tpu.vector_store %arg8[%c0_20, %c0_21], %39 {strides = array<i32>} : memref<512x256xf32, #tpu.memory_space<vmem>>, vector<512x256xf32>,
    return
  }
  func.func @transform_0(%arg0: i32) -> (i32, i32) {
    %c0_i32 = arith.constant 0 : i32
    %c0_i32_0 = arith.constant 0 : i32
    return %arg0, %c0_i32 : i32, i32
  }
  func.func @transform_1(%arg0: i32) -> (i32, i32) {
    %c0_i32 = arith.constant 0 : i32
    %c0_i32_0 = arith.constant 0 : i32
    %c0_i32_1 = arith.constant 0 : i32
    return %c0_i32, %c0_i32_0 : i32, i32
  }
  func.func @transform_2(%arg0: i32) -> (i32, i32) {
    %c0_i32 = arith.constant 0 : i32
    %c0_i32_0 = arith.constant 0 : i32
    %c0_i32_1 = arith.constant 0 : i32
    return %c0_i32, %c0_i32_0 : i32, i32
  }
  func.func @transform_3(%arg0: i32) -> (i32, i32) {
    %c0_i32 = arith.constant 0 : i32
    %c0_i32_0 = arith.constant 0 : i32
    %c0_i32_1 = arith.constant 0 : i32
    return %c0_i32, %c0_i32_0 : i32, i32
  }
  func.func @transform_4(%arg0: i32) -> (i32, i32) {
    %c0_i32 = arith.constant 0 : i32
    %c0_i32_0 = arith.constant 0 : i32
    %c0_i32_1 = arith.constant 0 : i32
    return %c0_i32, %c0_i32_0 : i32, i32
  }
  func.func @transform_5(%arg0: i32) -> (i32, i32) {
    %c0_i32 = arith.constant 0 : i32
    %c0_i32_0 = arith.constant 0 : i32
    %c0_i32_1 = arith.constant 0 : i32
    return %c0_i32, %c0_i32_0 : i32, i32
  }
  func.func @transform_6(%arg0: i32) -> (i32, i32) {
    %c0_i32 = arith.constant 0 : i32
    %c0_i32_0 = arith.constant 0 : i32
    %c0_i32_1 = arith.constant 0 : i32
    return %c0_i32, %c0_i32_0 : i32, i32
  }
  func.func @transform_7(%arg0: i32) -> (i32, i32) {
    %c0_i32 = arith.constant 0 : i32
    %c0_i32_0 = arith.constant 0 : i32
    return %arg0, %c0_i32 : i32, i32
  }
}

module attributes {stable_mosaic.version = 11 : i64} {
  func.func @ffn_kernel(%arg0: i32, %arg1: memref<512x256xf32, #tpu.memory_space<vmem>>, %arg2: memref<256x256xbf16, #tpu.memory_space<vmem>>, %arg3: memref<1x256xf32, #tpu.memory_space<vmem>>, %arg4: memref<256x256xbf16, #tpu.memory_space<vmem>>, %arg5: memref<1x256xf32, #tpu.memory_space<vmem>>, %arg6: memref<1x256xf32, #tpu.memory_space<vmem>>, %arg7: memref<1x256xf32, #tpu.memory_space<vmem>>, %arg8: memref<512x256xf32, #tpu.memory_space<vmem>>) attributes {dimension_semantics = [#tpu.dimension_semantics<parallel>], iteration_bounds = array<i64: 2>, scalar_prefetch = 0 : i64, scratch_operands = 0 : i64, tpu.core_type = #tpu.core_type<tc>, window_params = [{transform_indices = @transform_0, window_bounds = array<i64: 512, 256>}, {pipeline_mode = #tpu.pipeline_mode<synchronous>, transform_indices = @transform_1, window_bounds = array<i64: 256, 256>}, {pipeline_mode = #tpu.pipeline_mode<synchronous>, transform_indices = @transform_2, window_bounds = array<i64: 1, 256>}, {pipeline_mode = #tpu.pipeline_mode<synchronous>, transform_indices = @transform_3, window_bounds = array<i64: 256, 256>}, {pipeline_mode = #tpu.pipeline_mode<synchronous>, transform_indices = @transform_4, window_bounds = array<i64: 1, 256>}, {pipeline_mode = #tpu.pipeline_mode<synchronous>, transform_indices = @transform_5, window_bounds = array<i64: 1, 256>}, {pipeline_mode = #tpu.pipeline_mode<synchronous>, transform_indices = @transform_6, window_bounds = array<i64: 1, 256>}, {transform_indices = @transform_7, window_bounds = array<i64: 512, 256>}]} {
    %c0 = arith.constant 0 : index
    %c0_0 = arith.constant 0 : index
    %0 = vector.load %arg1[%c0, %c0_0] : memref<512x256xf32, #tpu.memory_space<vmem>>, vector<512x256xf32>
    %1 = arith.truncf %0 : vector<512x256xf32> to vector<512x256xbf16>
    %c0_1 = arith.constant 0 : index
    %c0_2 = arith.constant 0 : index
    %2 = vector.load %arg2[%c0_1, %c0_2] : memref<256x256xbf16, #tpu.memory_space<vmem>>, vector<256x256xbf16>
    %cst = arith.constant dense<0.000000e+00> : vector<512x256xf32>
    %3 = tpu.matmul %1, %2, %cst {dimension_numbers = #tpu.dot_dimension_numbers<[1], [0], [0], [1], [0, 0, 1, 1], [], []>} : vector<512x256xbf16>, vector<256x256xbf16>, vector<512x256xf32> -> vector<512x256xf32>
    %c0_3 = arith.constant 0 : index
    %c0_4 = arith.constant 0 : index
    %4 = vector.load %arg3[%c0_3, %c0_4] : memref<1x256xf32, #tpu.memory_space<vmem>>, vector<1x256xf32>
    %5 = vector.broadcast %4 : vector<1x256xf32> to vector<512x256xf32>
    %6 = arith.addf %3, %5 : vector<512x256xf32>
    %cst_5 = arith.constant 0.000000e+00 : f32
    %7 = vector.broadcast %cst_5 : f32 to vector<512x256xf32>
    %8 = arith.maximumf %6, %7 : vector<512x256xf32>
    %9 = arith.truncf %8 : vector<512x256xf32> to vector<512x256xbf16>
    %c0_6 = arith.constant 0 : index
    %c0_7 = arith.constant 0 : index
    %10 = vector.load %arg4[%c0_6, %c0_7] : memref<256x256xbf16, #tpu.memory_space<vmem>>, vector<256x256xbf16>
    %cst_8 = arith.constant dense<0.000000e+00> : vector<512x256xf32>
    %11 = tpu.matmul %9, %10, %cst_8 {dimension_numbers = #tpu.dot_dimension_numbers<[1], [0], [0], [1], [0, 0, 1, 1], [], []>} : vector<512x256xbf16>, vector<256x256xbf16>, vector<512x256xf32> -> vector<512x256xf32>
    %c0_9 = arith.constant 0 : index
    %c0_10 = arith.constant 0 : index
    %12 = vector.load %arg5[%c0_9, %c0_10] : memref<1x256xf32, #tpu.memory_space<vmem>>, vector<1x256xf32>
    %13 = vector.broadcast %12 : vector<1x256xf32> to vector<512x256xf32>
    %14 = arith.addf %11, %13 : vector<512x256xf32>
    %15 = arith.addf %0, %14 : vector<512x256xf32>
    %cst_11 = arith.constant dense<0.000000e+00> : vector<512xf32>
    %16 = vector.multi_reduction <add>, %15, %cst_11 [1] : vector<512x256xf32> to vector<512xf32>
    %17 = vector.shape_cast %16 : vector<512xf32> to vector<512x1xf32>
    %18 = arith.mulf %15, %15 : vector<512x256xf32>
    %cst_12 = arith.constant dense<0.000000e+00> : vector<512xf32>
    %19 = vector.multi_reduction <add>, %18, %cst_12 [1] : vector<512x256xf32> to vector<512xf32>
    %20 = vector.shape_cast %19 : vector<512xf32> to vector<512x1xf32>
    %cst_13 = arith.constant 3.906250e-03 : f32
    %21 = vector.broadcast %cst_13 : f32 to vector<512x1xf32>
    %22 = arith.mulf %17, %21 : vector<512x1xf32>
    %cst_14 = arith.constant 3.906250e-03 : f32
    %23 = vector.broadcast %cst_14 : f32 to vector<512x1xf32>
    %24 = arith.mulf %20, %23 : vector<512x1xf32>
    %25 = arith.mulf %22, %22 : vector<512x1xf32>
    %26 = arith.subf %24, %25 : vector<512x1xf32>
    %27 = vector.broadcast %22 : vector<512x1xf32> to vector<512x256xf32>
    %28 = arith.subf %15, %27 : vector<512x256xf32>
    %cst_15 = arith.constant 9.99999974E-6 : f32
    %29 = vector.broadcast %cst_15 : f32 to vector<512x1xf32>
    %30 = arith.addf %26, %29 : vector<512x1xf32>
    %31 = math.rsqrt %30 : vector<512x1xf32>
    %32 = vector.broadcast %31 : vector<512x1xf32> to vector<512x256xf32>
    %33 = arith.mulf %28, %32 : vector<512x256xf32>
    %c0_16 = arith.constant 0 : index
    %c0_17 = arith.constant 0 : index
    %34 = vector.load %arg6[%c0_16, %c0_17] : memref<1x256xf32, #tpu.memory_space<vmem>>, vector<1x256xf32>
    %35 = vector.broadcast %34 : vector<1x256xf32> to vector<512x256xf32>
    %36 = arith.mulf %33, %35 : vector<512x256xf32>
    %c0_18 = arith.constant 0 : index
    %c0_19 = arith.constant 0 : index
    %37 = vector.load %arg7[%c0_18, %c0_19] : memref<1x256xf32, #tpu.memory_space<vmem>>, vector<1x256xf32>
    %38 = vector.broadcast %37 : vector<1x256xf32> to vector<512x256xf32>
    %39 = arith.addf %36, %38 : vector<512x256xf32>
    %c0_20 = arith.constant 0 : index
    %c0_21 = arith.constant 0 : index
    %40 = vector.load %arg8[%c0_20, %c0_21] : memref<512x256xf32, #tpu.memory_space<vmem>>, vector<512x256xf32>
    tpu.vector_store %arg8[%c0_20, %c0_21], %39 {strides = array<i32>} : memref<512x256xf32, #tpu.memory_space<vmem>>, vector<512x256xf32>,
    return
  }
  func.func @transform_0(%arg0: i32) -> (i32, i32) {
    %c0_i32 = arith.constant 0 : i32
    %c0_i32_0 = arith.constant 0 : i32
    return %arg0, %c0_i32 : i32, i32
  }
  func.func @transform_1(%arg0: i32) -> (i32, i32) {
    %c0_i32 = arith.constant 0 : i32
    %c0_i32_0 = arith.constant 0 : i32
    %c0_i32_1 = arith.constant 0 : i32
    return %c0_i32, %c0_i32_0 : i32, i32
  }
  func.func @transform_2(%arg0: i32) -> (i32, i32) {
    %c0_i32 = arith.constant 0 : i32
    %c0_i32_0 = arith.constant 0 : i32
    %c0_i32_1 = arith.constant 0 : i32
    return %c0_i32, %c0_i32_0 : i32, i32
  }
  func.func @transform_3(%arg0: i32) -> (i32, i32) {
    %c0_i32 = arith.constant 0 : i32
    %c0_i32_0 = arith.constant 0 : i32
    %c0_i32_1 = arith.constant 0 : i32
    return %c0_i32, %c0_i32_0 : i32, i32
  }
  func.func @transform_4(%arg0: i32) -> (i32, i32) {
    %c0_i32 = arith.constant 0 : i32
    %c0_i32_0 = arith.constant 0 : i32
    %c0_i32_1 = arith.constant 0 : i32
    return %c0_i32, %c0_i32_0 : i32, i32
  }
  func.func @transform_5(%arg0: i32) -> (i32, i32) {
    %c0_i32 = arith.constant 0 : i32
    %c0_i32_0 = arith.constant 0 : i32
    %c0_i32_1 = arith.constant 0 : i32
    return %c0_i32, %c0_i32_0 : i32, i32
  }
  func.func @transform_6(%arg0: i32) -> (i32, i32) {
    %c0_i32 = arith.constant 0 : i32
    %c0_i32_0 = arith.constant 0 : i32
    %c0_i32_1 = arith.constant 0 : i32
    return %c0_i32, %c0_i32_0 : i32, i32
  }
  func.func @transform_7(%arg0: i32) -> (i32, i32) {
    %c0_i32 = arith.constant 0 : i32
    %c0_i32_0 = arith.constant 0 : i32
    return %arg0, %c0_i32 : i32, i32
  }
}

</mosaic_0001>

<bundles_post_ra>
// kernel: tpu_custom_call.1
= control target key start
LH: loop header
LB: loop body
LE: loop exit
PB: predicated region body
PF: predicated region fallthrough
CT: control target
= control target key end

     0   :  { %s7013_s0 = inlined_call_operand.hbm [shape: f32[640,256], index: 0, kind: input, shape index: {}]   ;;  %s7014_s1 = inlined_call_operand.hbm [shape: bf16[256,256], index: 1, kind: input, shape index: {}]   ;;  %s7015_s2 = inlined_call_operand.vmem [shape: f32[1,256], index: 2, kind: input, shape index: {}]   ;;  %s7016_s3 = inlined_call_operand.hbm [shape: bf16[256,256], index: 3, kind: input, shape index: {}]   ;;  %s7017_s4 = inlined_call_operand.vmem [shape: f32[1,256], index: 4, kind: input, shape index: {}]   ;;  %s7018_s5 = inlined_call_operand.vmem [shape: f32[1,256], index: 5, kind: input, shape index: {}]   ;;  %s7019_s6 = inlined_call_operand.vmem [shape: f32[1,256], index: 6, kind: input, shape index: {}]   ;;  %s7020_s7 = inlined_call_operand.hbm [shape: f32[640,256], index: 7, kind: output, shape index: {}]  }
   0x1   :  { %7118 = sst [smem:[#allocation83_spill]] %s7014_s1 }
   0x2   :  { %7119 = sst [smem:[#allocation84_spill]] %s7016_s3 }
   0x3   :  { %12 = vsyncpa [#allocation3], 0 }
   0x4   :  { %14 = vsyncpa [#allocation3 + $0x1], 0 }
   0x5   :  { %15 = vsyncpa [#allocation6], 0 }
   0x6   :  { %16 = vsyncpa [#allocation4], 0 }
   0x7   :  { %18 = vsyncpa [#allocation4 + $0x1], 0  ;;  %s4362_s24 = smov 0   ;;  %s4364_s25 = smov 0  }
   0x8   :  { %s4366_s26 = smov 0   ;;  %s4368_s27 = smov 0  }
   0x9 LB: > { %s4383_s28 = sadd.s32 4294967295, %s4310_s27   ;;  %s3646_s29 = sadd.s32 4294967294, %s4310_s27   ;;  %s4310_s27 = sphi %s4368_s27, %s7323_s27   ;;  %s4306_s26 = sphi %s4366_s26, %s7322_s26   ;;  %s4302_s25 = sphi %s4364_s25, %s7321_s25   ;;  %s4298_s24 = sphi %s4362_s24, %s7320_s24  }
   0xa   : > { %s4387_s30 = sadd.s32 1, %s4310_s27   ;;  %s31_s8 = sadd.s32 1, %s4306_s26 }
   0xb   : > { %s28_s9 = ssub.s32 %s4310_s27, %s4387_s30  ;;  %p38_p0 = scmp.ne.s32.totalorder %s4306_s26, %s4302_s25 }
   0xc   : > { %p29_p1 = scmp.eq.s32.totalorder %s28_s9, 0  ;;  %p39_p2 = scmp.eq.s32.totalorder %s4310_s27, 0 }
   0xd   : > { %p44_p3 = scmp.ne.s32.totalorder %s4302_s25, %s4298_s24  ;;  %p7021_p4 = scmp.eq.s32.totalorder %s4383_s28, 0 }
   0xe   : > { %s4399_s10 = scalar_select %p29_p1, %s4306_s26, %s31_s8  }
   0xf   : > { %p4401_p5 = por %p39_p2, %p38_p0  ;;  %p4407_p6 = por %p7021_p4, %p44_p3 }
  0x10   : > { %p194_p7 = scmp.eq.s32.totalorder %s4383_s28, 1  ;;  %p200_p8 = scmp.eq.s32.totalorder %s3646_s29, 1 }
  0x11   : > { %s7121_s12 = scalar_select %p4407_p6, 1, 0 }
  0x12   : > { %p3647_p9 = scmp.ge.s32.totalorder %s4310_s27, 1  ;;  %p207_p10 = scmp.lt.s32.totalorder %s4310_s27, 3 }
  0x13   : > { %p4414_p11 = por %p194_p7, %p38_p0  ;;  %p4418_p12 = por %p200_p8, %p44_p3 }
  0x14   : > { %p4422_p13 = pnand %p3647_p9, %p207_p10  ;;  %s4312_s16 = smov [#allocation5]  }
  0x15   : > { %s7122_s13 = scalar_select %p4414_p11, 1, 0 }
  0x16   : > { %s7123_s14 = scalar_select %p4418_p12, 1, 0 }
  0x17   : > { %p3756_p1 = pneg %p4422_p13  ;;  %s219_s17 = sshll.u32 %s4312_s16, 4  ;;  %s220_s17 = int_to_ptr.vmem [resolvable:$true] %s219_s17 }
  0x18   : > { %s4313_s19 = smov [#allocation7]   ;;  %s4175_s21 = scalar_lea.vmem %s220_s17, 4096 }
  0x19   : > { %p4430_p2 = pnand %p3756_p1, %p7021_p4  ;;  %s235_s20 = sshll.u32 %s4313_s19, 4  ;;  %s236_s20 = int_to_ptr.vmem [resolvable:$true] %s235_s20 }
  0x1a   : > { %p4176_p3 = scmp.ne.s32.totalorder %s220_s17, %s4175_s21  ;;  %p4183_p9 = scmp.lt.s32.totalorder %s220_s17, %s220_s17 }
  0x1b   : > { %p4166_p0 = pneg %p4430_p2  ;;  %p4184_p10 = scmp.lt.s32.totalorder %s4175_s21, %s4175_s21 }
  0x1d   : > { %p4178_p7 = pnand %p4176_p3, %p4166_p0  ;;  %p4185_p12 = por %p4184_p10, %p4183_p9 }
  0x1f   : > { %p4179_p8 = pneg %p4178_p7 }
  0x21   : > { %p4186_p1 = pnand %p4185_p12, %p4179_p8 }
  0x23   : > { %4189 = shalt.err (!%p4186_p1)
}
  0x24   : > { %s4314_s22 = smov 128   ;;  %s4315_s23 = smov 8  }
  0x25   : > { %s7126_s1 = sld [smem:[#allocation83_spill]]  ;;  %s4201_s9 = scalar_lea.vmem %s236_s20, 4096 }
  0x26   : > { %p4202_p4 = scmp.ne.s32.totalorder %s236_s20, %s4201_s9  ;;  %p4209_p11 = scmp.lt.s32.totalorder %s236_s20, %s236_s20 }
  0x27   : > { %p4210_p6 = scmp.lt.s32.totalorder %s4201_s9, %s4201_s9 }
  0x28   : > { %p4204_p3 = pnand %p4202_p4, %p4166_p0 }
  0x29   : > { %p4211_p9 = por %p4210_p6, %p4209_p11 }
  0x2a   : > { %p4205_p7 = pneg %p4204_p3 }
  0x2b   : > { %3759 = dma.hbm_to_vmem [thread:$0]  (!%p4430_p2), %s7126_s1, 4096, %s220_s17, [#allocation6], %s4314_s22, %s4314_s22, %s4315_s23  }
  0x2c   : > { %p4212_p12 = pnand %p4211_p9, %p4205_p7 }
  0x2e   : > { %4215 = shalt.err (!%p4212_p12)
}
  0x2f   : > { %s7127_s3 = sld [smem:[#allocation84_spill]]  ;;  %p3650_p8 = scmp.ge.s32.totalorder %s4310_s27, 2 }
  0x31   : > { %254 = sbr.rel (%p3650_p8) target bundleno = 86 (0x56), region = 40 }
  0x35   : > { %3762 = dma.hbm_to_vmem [thread:$0]  (!%p4430_p2), %s7127_s3, 4096, %s236_s20, [#allocation6], %s4314_s22, %s4314_s22, %s4315_s23  }
  0x36   : > { %257 = sbr.rel (!%p4401_p5) target bundleno = 86 (0x56), region = 44  ;;  %s258_s17 = sand.u32 (%p4401_p5), 1, %s4306_s26  }
  0x37   : > { %s3652_s21 = sshll.u32 (%p4401_p5), %s4310_s27, 6  ;;  %s3651_s29 = sshll.u32 (%p4401_p5), %s258_s17, 10 }
  0x38   : > { %s264_s8 = ssub.s32 (%p4401_p5), 80, %s3652_s21  ;;  %s4462_s22 = scalar_lea.sflag (%p4401_p5), [#allocation3], %s258_s17 }
  0x39   : > { %p265_p4 = scmp.lt.s32.totalorder (%p4401_p5), %s264_s8, 64  ;;  %s262_s23 = scalar_lea.vmem (%p4401_p5), [#allocation2], %s3651_s29 }
  0x3b   : > { %s7325_s8 = smov (!%p265_p4, %s264_s8), 64 }
  0x3c   : > { %s4459_s18 = sshll.u32 %s7325_s8, 8 }
  0x3d   : > { %s270_s20 = ssub.s32 16384, %s4459_s18 }
  0x3e   : > { %271 = vsyncadd %s4462_s22, %s270_s20  ;;  %p3655_p5 = scmp.ne.s32.totalorder %s4459_s18, 0  ;;  %s3742_s11 = sshll.u32 %s4310_s27, 14 }
  0x3f   : > { %s4470_s19 = scalar_lea.hbm %s7013_s0, %s3742_s11  ;;  %s277_s21 = sshll.u32 %s262_s23, 4  ;;  %s4472_s21 = int_to_ptr.vmem [resolvable:$true] %s277_s21 }
  0x40   : > { %s4216_s17 = scalar_lea.hbm %s4470_s19, %s4459_s18  ;;  %s4220_s20 = scalar_lea.hbm %s7013_s0, 20480 }
  0x41   : > { %p4217_p6 = scmp.ne.s32.totalorder %s4470_s19, %s4216_s17  ;;  %p4221_p0 = scmp.lt.s32.totalorder %s4470_s19, %s7013_s0 }
  0x42   : > { %p4222_p10 = scmp.lt.s32.totalorder %s4220_s20, %s4216_s17 }
  0x43   : > { %p4218_p11 = pnand %p4217_p6, %p3655_p5 }
  0x44   : > { %p4223_p1 = por %p4222_p10, %p4221_p0 }
  0x45   : > { %p4219_p2 = pneg %p4218_p11 }
  0x47   : > { %p4224_p3 = pnand %p4223_p1, %p4219_p2 }
  0x49   : > { %4227 = shalt.err (!%p4224_p3)
}
  0x4a   : > { %s4228_s23 = scalar_lea.vmem %s4472_s21, %s4459_s18  ;;  %s4316_s11 = smov [#allocation2]  }
  0x4b   : > { %p4229_p7 = scmp.ne.s32.totalorder %s4472_s21, %s4228_s23  ;;  %s4232_s9 = sshll.u32 %s4316_s11, 4  ;;  %s4233_s9 = int_to_ptr.vmem [resolvable:$false] %s4232_s9 }
  0x4c   : > { %s4234_s16 = scalar_lea.vmem %s4233_s9, 32768  ;;  %p4235_p4 = scmp.lt.s32.totalorder %s4472_s21, %s4233_s9 }
  0x4d   : > { %p4230_p9 = pnand %p4229_p7, %p3655_p5  ;;  %p4236_p6 = scmp.lt.s32.totalorder %s4234_s16, %s4228_s23 }
  0x4f   : > { %p4231_p12 = pneg %p4230_p9  ;;  %p4237_p11 = por %p4236_p6, %p4235_p4 }
  0x51   : > { %p4238_p0 = pnand %p4237_p11, %p4231_p12 }
  0x53   : > { %4241 = shalt.err (!%p4238_p0)
}
  0x54   : > { %s4317_s1 = smov 256   ;;  %s4318_s3 = smov 16  }
  0x55   : > { %283 = dma.hbm_to_vmem [thread:$0]  (%p3655_p5), %s4470_s19, %s4459_s18, %s4472_s21, %s4462_s22, %s4317_s1, %s4317_s1, %s4318_s3  }
  0x56 PF: > { %289 = sbr.rel (%p4422_p13) target bundleno = 1061 (0x425), region = 48 }
  0x5b   : > { %s4501_s17 = sand.u32 1, %s4302_s25   ;;  %p7128_p2 = scmp.ne.s32.totalorder %s7121_s12, 0 }
  0x5c   : > { %s3661_s29 = sshll.u32 %s4501_s17, 10  ;;  %s292_s8 = scalar_lea.sflag [#allocation3], %s4501_s17 }
  0x5d   : > { %s4507_s20 = scalar_lea.vmem [#allocation2], %s3661_s29 }
  0x5e   : > { %4285 = dma.done.wait (%p7128_p2), %s292_s8, 16384  }
  0x5f   : > { %4287 = vsyncadd (%p7128_p2), %s292_s8, 4294950912  ;;  %p7129_p5 = scmp.eq.s32.totalorder %s4383_s28, 0 }
  0x61   : > { %4289 = dma.done.wait (%p7129_p5), [#allocation6], 8192   ;;  %p7130_p13 = pmov %p7129_p5 }
  0x62   : > { %v3812_v0 = vld [vmem:[#allocation5 + $0x74] ss:$8 sps:$4 sm:$0xff]   ;;  %v3814_v1 = vld [vmem:[#allocation5 + $0x70] ss:$8 sps:$4 sm:$0xff]   ;;  %v3815_v2 = vld [vmem:[#allocation5 + $0x64] ss:$8 sps:$4 sm:$0xff]  }
  0x63   : > { %4291 = vsyncadd (%p7130_p13), [#allocation6], 4294959104  ;;  %742 = vmatprep.subr.bf16.mxu0 %v3812_v0  ;;  %v3817_v3 = vld [vmem:[#allocation5 + $0x60] ss:$8 sps:$4 sm:$0xff]   ;;  %v3818_v4 = vld [vmem:[#allocation5 + $0x54] ss:$8 sps:$4 sm:$0xff]  }
  0x64   : > { %743 = vmatpush1.bf16.msra.mxu0 %v3814_v1  ;;  %v3820_v5 = vld [vmem:[#allocation5 + $0x50] ss:$8 sps:$4 sm:$0xff]   ;;  %v3821_v6 = vld [vmem:[#allocation5 + $0x44] ss:$8 sps:$4 sm:$0xff]   ;;  %v3823_v7 = vld [vmem:[#allocation5 + $0x40] ss:$8 sps:$4 sm:$0xff]  }
  0x65   : > { %744 = vmatprep.subr.bf16.mxu0 %v3815_v2  ;;  %v3824_v8 = vld [vmem:[#allocation5 + $0x34] ss:$8 sps:$4 sm:$0xff]   ;;  %v3826_v9 = vld [vmem:[#allocation5 + $0x30] ss:$8 sps:$4 sm:$0xff]   ;;  %v3827_v10 = vld [vmem:[#allocation5 + $0x24] ss:$8 sps:$4 sm:$0xff]  }
  0x66   : > { %v3829_v11 = vld [vmem:[#allocation5 + $0x20] ss:$8 sps:$4 sm:$0xff]   ;;  %v3830_v12 = vld [vmem:[#allocation5 + $0x14] ss:$8 sps:$4 sm:$0xff]   ;;  %v3832_v16 = vld [vmem:[#allocation5 + $0x10] ss:$8 sps:$4 sm:$0xff]  }
  0x67   : > { %v347_v13 = vld [vmem:[%s4507_s20 + $0x8] sm:$0xff]  ;;  %v349_v14 = vld [vmem:[%s4507_s20 + $0x18] sm:$0xff]  ;;  %v346_v35 = vld [vmem:[%s4507_s20] sm:$0xff]  ;;  %s5455_s9 = scalar_lea.vmem [#allocation8], %s3661_s29  ;;  %s3533_s16 = scalar_lea.sflag [#allocation4], %s4501_s17 }
  0x68   : > { %745 = vmatpush1.bf16.msra.mxu0 %v3817_v3  ;;  %v475_v15 = vpack.c.bf16 %v349_v14, %v347_v13  ;;  %v3833_v17 = vld [vmem:[#allocation5 + $0x4] ss:$8 sps:$4 sm:$0xff]   ;;  %v3835_v18 = vld [vmem:[#allocation5] ss:$8 sps:$4 sm:$0xff]   ;;  %v3836_v19 = vld [vmem:[#allocation5 + $0xf4] ss:$8 sps:$4 sm:$0xff]  }
  0x69   : > { %746 = vmatprep.subr.bf16.mxu0 %v3818_v4  ;;  %v3838_v20 = vld [vmem:[#allocation5 + $0xf0] ss:$8 sps:$4 sm:$0xff]   ;;  %v3839_v21 = vld [vmem:[#allocation5 + $0xe4] ss:$8 sps:$4 sm:$0xff]   ;;  %v3841_v22 = vld [vmem:[#allocation5 + $0xe0] ss:$8 sps:$4 sm:$0xff]  }
  0x6a   : > { %774 = vmatprep.mubr.bf16.mxu0 %v475_v15  ;;  %v3842_v23 = vld [vmem:[#allocation5 + $0xd4] ss:$8 sps:$4 sm:$0xff]   ;;  %v3844_v24 = vld [vmem:[#allocation5 + $0xd0] ss:$8 sps:$4 sm:$0xff]   ;;  %v3845_v25 = vld [vmem:[#allocation5 + $0xc4] ss:$8 sps:$4 sm:$0xff]  }
  0x6b   : > { %v3847_v26 = vld [vmem:[#allocation5 + $0xc0] ss:$8 sps:$4 sm:$0xff]   ;;  %v3848_v27 = vld [vmem:[#allocation5 + $0xb4] ss:$8 sps:$4 sm:$0xff]   ;;  %v3850_v28 = vld [vmem:[#allocation5 + $0xb0] ss:$8 sps:$4 sm:$0xff]  }
  0x6c   : > { %747 = vmatpush1.bf16.msra.mxu0 %v3820_v5  ;;  %v3851_v29 = vld [vmem:[#allocation5 + $0xa4] ss:$8 sps:$4 sm:$0xff]   ;;  %v3853_v30 = vld [vmem:[#allocation5 + $0xa0] ss:$8 sps:$4 sm:$0xff]   ;;  %v3854_v31 = vld [vmem:[#allocation5 + $0x94] ss:$8 sps:$4 sm:$0xff]  }
  0x6d   : > { %748 = vmatprep.subr.bf16.mxu0 %v3821_v6  ;;  %v3856_v32 = vld [vmem:[#allocation5 + $0x90] ss:$8 sps:$4 sm:$0xff]   ;;  %v3857_v33 = vld [vmem:[#allocation5 + $0x84] ss:$8 sps:$4 sm:$0xff]   ;;  %v3859_v34 = vld [vmem:[#allocation5 + $0x80] ss:$8 sps:$4 sm:$0xff]  }
  0x6e   : > { %v348_v36 = vld [vmem:[%s4507_s20 + $0x10] sm:$0xff]  ;;  %v351_v37 = vld [vmem:[%s4507_s20 + $0x28] sm:$0xff]  ;;  %v353_v38 = vld [vmem:[%s4507_s20 + $0x38] sm:$0xff]  ;;  %p7318_p10 = scmp.ne.s32.totalorder %s7122_s13, 0 }
  0x6f   : > { %v474_v39 = vpack.c.bf16 %v348_v36, %v346_v35  ;;  %v477_v40 = vpack.c.bf16 %v353_v38, %v351_v37  ;;  %v350_v41 = vld [vmem:[%s4507_s20 + $0x20] sm:$0xff]  ;;  %v352_v42 = vld [vmem:[%s4507_s20 + $0x30] sm:$0xff]  ;;  %v355_v43 = vld [vmem:[%s4507_s20 + $0x48] sm:$0xff]  ;;  %s3730_s1 = sshll.u32 (%p7318_p10), %s4383_s28, 6 }
  0x70   : > { %749 = vmatpush1.bf16.msra.mxu0 %v3823_v7  ;;  %v357_v44 = vld [vmem:[%s4507_s20 + $0x58] sm:$0xff]  ;;  %v476_v45 = vpack.c.bf16 %v352_v42, %v350_v41  ;;  %v354_v48 = vld [vmem:[%s4507_s20 + $0x40] sm:$0xff]  ;;  %v356_v49 = vld [vmem:[%s4507_s20 + $0x50] sm:$0xff]  ;;  %s3541_s3 = ssub.s32 (%p7318_p10), 80, %s3730_s1 }
  0x71   : > { %750 = vmatprep.subr.bf16.mxu0 %v3824_v8  ;;  %v479_v46 = vpack.c.bf16 %v357_v44, %v355_v43  ;;  %v3860_v47 = vld [vmem:[#allocation7 + $0x74] ss:$8 sps:$4 sm:$0xff]   ;;  %v3862_v50 = vld [vmem:[#allocation7 + $0x70] ss:$8 sps:$4 sm:$0xff]   ;;  %v359_v51 = vld [vmem:[%s4507_s20 + $0x68] sm:$0xff]  ;;  %v478_v53 = vpack.c.bf16 %v356_v49, %v354_v48  ;;  %p3542_p1 = scmp.lt.s32.totalorder (%p7318_p10), %s3541_s3, 64 }
  0x72   : > { %v361_v52 = vld [vmem:[%s4507_s20 + $0x78] sm:$0xff]  ;;  %1491 = vmatprep.subr.bf16.mxu1 %v3860_v47  ;;  %v3863_v55 = vld [vmem:[#allocation7 + $0x64] ss:$8 sps:$4 sm:$0xff]   ;;  %v3865_v56 = vld [vmem:[#allocation7 + $0x60] ss:$8 sps:$4 sm:$0xff]  }
  0x73   : > { %1492 = vmatpush1.bf16.msra.mxu1 %v3862_v50  ;;  %v481_v54 = vpack.c.bf16 %v361_v52, %v359_v51  ;;  %v3866_v57 = vld [vmem:[#allocation7 + $0x54] ss:$8 sps:$4 sm:$0xff]   ;;  %v358_v58 = vld [vmem:[%s4507_s20 + $0x60] sm:$0xff]  ;;  %v363_v60 = vld [vmem:[%s4507_s20 + $0x88] sm:$0xff] }
  0x74   : > { %751 = vmatpush1.bf16.msra.mxu0 %v3826_v9  ;;  %v360_v59 = vld [vmem:[%s4507_s20 + $0x70] sm:$0xff]  ;;  %v365_v61 = vld [vmem:[%s4507_s20 + $0x98] sm:$0xff]  ;;  %1493 = vmatprep.subr.bf16.mxu1 %v3863_v55  ;;  %v3869_v1 = vld [vmem:[#allocation7 + $0x44] ss:$8 sps:$4 sm:$0xff]  }
  0x75   : > { %752 = vmatprep.subr.bf16.mxu0 %v3827_v10  ;;  %v3868_v62 = vld [vmem:[#allocation7 + $0x50] ss:$8 sps:$4 sm:$0xff]   ;;  %v480_v63 = vpack.c.bf16 %v360_v59, %v358_v58  ;;  %v483_v0 = vpack.c.bf16 %v365_v61, %v363_v60  ;;  %v3871_v2 = vld [vmem:[#allocation7 + $0x40] ss:$8 sps:$4 sm:$0xff]   ;;  %v3872_v3 = vld [vmem:[#allocation7 + $0x34] ss:$8 sps:$4 sm:$0xff]  }
  0x76   : > { %v362_v4 = vld [vmem:[%s4507_s20 + $0x80] sm:$0xff]  ;;  %v364_v5 = vld [vmem:[%s4507_s20 + $0x90] sm:$0xff]  ;;  %v367_v6 = vld [vmem:[%s4507_s20 + $0xa8] sm:$0xff] }
  0x77   : > { %1494 = vmatpush1.bf16.msra.mxu1 %v3865_v56  ;;  %v369_v7 = vld [vmem:[%s4507_s20 + $0xb8] sm:$0xff]  ;;  %v482_v9 = vpack.c.bf16 %v364_v5, %v362_v4  ;;  %v366_v14 = vld [vmem:[%s4507_s20 + $0xa0] sm:$0xff]  ;;  %v368_v15 = vld [vmem:[%s4507_s20 + $0xb0] sm:$0xff] }
  0x78   : > { %753 = vmatpush1.bf16.msra.mxu0 %v3829_v11  ;;  %1495 = vmatprep.subr.bf16.mxu1 %v3866_v57  ;;  %v3874_v8 = vld [vmem:[#allocation7 + $0x30] ss:$8 sps:$4 sm:$0xff]   ;;  %v485_v10 = vpack.c.bf16 %v369_v7, %v367_v6  ;;  %v3875_v11 = vld [vmem:[#allocation7 + $0x24] ss:$8 sps:$4 sm:$0xff]   ;;  %v3878_v13 = vld [vmem:[#allocation7 + $0x14] ss:$8 sps:$4 sm:$0xff]  }
  0x79   : > { %754 = vmatprep.subr.bf16.mxu0 %v3830_v12  ;;  %v3877_v12 = vld [vmem:[#allocation7 + $0x20] ss:$8 sps:$4 sm:$0xff]   ;;  %v376_v35 = vld [vmem:[%s4507_s20 + $0xf0] sm:$0xff]  ;;  %v381_v37 = vld [vmem:[%s4507_s20 + $0x118] sm:$0xff] }
  0x7a   : > { %v379_v36 = vld [vmem:[%s4507_s20 + $0x108] sm:$0xff]  ;;  %v3892_v38 = vld [vmem:[#allocation7 + $0xd0] ss:$8 sps:$4 sm:$0xff]   ;;  %v3896_v43 = vld [vmem:[#allocation7 + $0xb4] ss:$8 sps:$4 sm:$0xff]  }
  0x7b   : > { %1496 = vmatpush1.bf16.msra.mxu1 %v3868_v62  ;;  %v3893_v41 = vld [vmem:[#allocation7 + $0xc4] ss:$8 sps:$4 sm:$0xff]   ;;  %v3895_v42 = vld [vmem:[#allocation7 + $0xc0] ss:$8 sps:$4 sm:$0xff]   ;;  %v385_v47 = vld [vmem:[%s4507_s20 + $0x138] sm:$0xff] }
  0x7c   : > { %755 = vmatpush1.bf16.msra.mxu0 %v3832_v16  ;;  %1497 = vmatprep.subr.bf16.mxu1 %v3869_v1  ;;  %v371_v16 = vld [vmem:[%s4507_s20 + $0xc8] sm:$0xff]  ;;  %v378_v44 = vld [vmem:[%s4507_s20 + $0x100] sm:$0xff]  ;;  %v3898_v48 = vld [vmem:[#allocation7 + $0xb0] ss:$8 sps:$4 sm:$0xff]  }
  0x7d   : > { %756 = vmatprep.subr.bf16.mxu0 %v3833_v17  ;;  %v373_v17 = vld [vmem:[%s4507_s20 + $0xd8] sm:$0xff]  ;;  %v3899_v51 = vld [vmem:[#allocation7 + $0xa4] ss:$8 sps:$4 sm:$0xff]   ;;  %v392_v6 = vld [vmem:[%s4507_s20 + $0x170] sm:$0xff] }
  0x7e   : > { %v382_v52 = vld [vmem:[%s4507_s20 + $0x120] sm:$0xff]  ;;  %v387_v55 = vld [vmem:[%s4507_s20 + $0x148] sm:$0xff]  ;;  %v389_v56 = vld [vmem:[%s4507_s20 + $0x158] sm:$0xff] }
  0x7f   : > { %1498 = vmatpush1.bf16.msra.mxu1 %v3871_v2  ;;  %v3902_v58 = vld [vmem:[#allocation7 + $0x94] ss:$8 sps:$4 sm:$0xff]   ;;  %v495_v59 = vpack.c.bf16 %v389_v56, %v387_v55  ;;  %v3904_v60 = vld [vmem:[#allocation7 + $0x90] ss:$8 sps:$4 sm:$0xff]   ;;  %v3905_v61 = vld [vmem:[#allocation7 + $0x84] ss:$8 sps:$4 sm:$0xff]  }
  0x80   : > { %757 = vmatpush1.bf16.msra.mxu0 %v3835_v18  ;;  %1499 = vmatprep.subr.bf16.mxu1 %v3872_v3  ;;  %v3880_v18 = vld [vmem:[#allocation7 + $0x10] ss:$8 sps:$4 sm:$0xff]   ;;  %v386_v62 = vld [vmem:[%s4507_s20 + $0x140] sm:$0xff]  ;;  %v391_v1 = vld [vmem:[%s4507_s20 + $0x168] sm:$0xff] }
  0x81   : > { %758 = vmatprep.subr.bf16.mxu0 %v3836_v19  ;;  %v484_v19 = vpack.c.bf16 %v368_v15, %v366_v14  ;;  %v393_v2 = vld [vmem:[%s4507_s20 + $0x178] sm:$0xff]  ;;  %v390_v5 = vld [vmem:[%s4507_s20 + $0x160] sm:$0xff]  ;;  %v395_v7 = vld [vmem:[%s4507_s20 + $0x188] sm:$0xff] }
  0x82   : > { %v497_v4 = vpack.c.bf16 %v393_v2, %v391_v1  ;;  %v401_v14 = vld [vmem:[%s4507_s20 + $0x1b8] sm:$0xff]  ;;  %v427_v55 = vld [vmem:[%s4507_s20 + $0x288] sm:$0xff]  ;;  %v430_v1 = vld [vmem:[%s4507_s20 + $0x2a0] sm:$0xff] }
  0x83   : > { %1500 = vmatpush1.bf16.msra.mxu1 %v3874_v8  ;;  %v397_v8 = vld [vmem:[%s4507_s20 + $0x198] sm:$0xff]  ;;  %v432_v2 = vld [vmem:[%s4507_s20 + $0x2b0] sm:$0xff] }
  0x84   : > { %759 = vmatpush2.bf16.msra.mxu0 %v3838_v20  ;;  %1501 = vmatprep.subr.bf16.mxu1 %v3875_v11  ;;  %v487_v20 = vpack.c.bf16 %v373_v17, %v371_v16  ;;  %v394_v11 = vld [vmem:[%s4507_s20 + $0x180] sm:$0xff]  ;;  %v429_v56 = vld [vmem:[%s4507_s20 + $0x298] sm:$0xff] }
  0x85   : > { %760 = vmatprep.subr.bf16.mxu0 %v3839_v21  ;;  %v3881_v21 = vld [vmem:[#allocation7 + $0x4] ss:$8 sps:$4 sm:$0xff]  }
  0x86   : > { %v398_v17 = vld [vmem:[%s4507_s20 + $0x1a0] sm:$0xff] }
  0x87   : > { %1502 = vmatpush1.bf16.msra.mxu1 %v3877_v12  ;;  %v396_v12 = vld [vmem:[%s4507_s20 + $0x190] sm:$0xff] }
  0x88   : > { %761 = vmatpush2.bf16.msra.mxu0 %v3841_v22  ;;  %1503 = vmatprep.subr.bf16.mxu1 %v3878_v13  ;;  %v3883_v22 = vld [vmem:[#allocation7] ss:$8 sps:$4 sm:$0xff]   ;;  %v498_v15 = vpack.c.bf16 %v396_v12, %v394_v11 }
  0x89   : > { %762 = vmatprep.subr.bf16.mxu0 %v3842_v23  ;;  %v3884_v23 = vld [vmem:[#allocation7 + $0xf4] ss:$8 sps:$4 sm:$0xff]   ;;  %v399_v13 = vld [vmem:[%s4507_s20 + $0x1a8] sm:$0xff] }
  0x8a   : > { %v501_v16 = vpack.c.bf16 %v401_v14, %v399_v13  ;;  %v438_v13 = vld [vmem:[%s4507_s20 + $0x2e0] sm:$0xff]  ;;  %v440_v14 = vld [vmem:[%s4507_s20 + $0x2f0] sm:$0xff] }
  0x8b   : > { %1504 = vmatpush1.bf16.msra.mxu1 %v3880_v18  ;;  %v400_v18 = vld [vmem:[%s4507_s20 + $0x1b0] sm:$0xff] }
  0x8c   : > { %763 = vmatpush2.bf16.msra.mxu0 %v3844_v24  ;;  %v370_v24 = vld [vmem:[%s4507_s20 + $0xc0] sm:$0xff]  ;;  %1505 = vmatprep.subr.bf16.mxu1 %v3881_v21  ;;  %v500_v21 = vpack.c.bf16 %v400_v18, %v398_v17  ;;  %v520_v17 = vpack.c.bf16 %v440_v14, %v438_v13 }
  0x8d   : > { %764 = vmatprep.subr.bf16.mxu0 %v3845_v25  ;;  %v372_v25 = vld [vmem:[%s4507_s20 + $0xd0] sm:$0xff] }
  0x8f   : > { %1506 = vmatpush1.bf16.msra.mxu1 %v3883_v22 }
  0x90   : > { %765 = vmatpush2.bf16.msra.mxu0 %v3847_v26  ;;  %v375_v26 = vld [vmem:[%s4507_s20 + $0xe8] sm:$0xff]  ;;  %1507 = vmatprep.subr.bf16.mxu1 %v3884_v23  ;;  %v402_v23 = vld [vmem:[%s4507_s20 + $0x1c0] sm:$0xff] }
  0x91   : > { %766 = vmatprep.subr.bf16.mxu0 %v3848_v27  ;;  %v377_v27 = vld [vmem:[%s4507_s20 + $0xf8] sm:$0xff] }
  0x94   : > { %767 = vmatpush2.bf16.msra.mxu0 %v3850_v28  ;;  %v3886_v28 = vld [vmem:[#allocation7 + $0xf0] ss:$8 sps:$4 sm:$0xff]  }
  0x95   : > { %768 = vmatprep.subr.bf16.mxu0 %v3851_v29  ;;  %v486_v29 = vpack.c.bf16 %v372_v25, %v370_v24  ;;  %1508 = vmatpush2.bf16.msra.mxu1 %v3886_v28  ;;  %v404_v24 = vld [vmem:[%s4507_s20 + $0x1d0] sm:$0xff]  ;;  %v407_v25 = vld [vmem:[%s4507_s20 + $0x1e8] sm:$0xff] }
  0x98   : > { %769 = vmatpush2.bf16.msra.mxu0 %v3853_v30  ;;  %v489_v30 = vpack.c.bf16 %v377_v27, %v375_v26  ;;  %v409_v26 = vld [vmem:[%s4507_s20 + $0x1f8] sm:$0xff]  ;;  %v502_v27 = vpack.c.bf16 %v404_v24, %v402_v23  ;;  %v447_v23 = vld [vmem:[%s4507_s20 + $0x328] sm:$0xff] }
  0x99   : > { %770 = vmatprep.subr.bf16.mxu0 %v3854_v31  ;;  %v3887_v31 = vld [vmem:[#allocation7 + $0xe4] ss:$8 sps:$4 sm:$0xff]   ;;  %v505_v28 = vpack.c.bf16 %v409_v26, %v407_v25  ;;  %v449_v24 = vld [vmem:[%s4507_s20 + $0x338] sm:$0xff] }
  0x9a   : > { %1509 = vmatprep.subr.bf16.mxu1 %v3887_v31  ;;  %v411_v31 = vld [vmem:[%s4507_s20 + $0x208] sm:$0xff] }
  0x9c   : > { %771 = vmatpush2.bf16.msra.mxu0 %v3856_v32  ;;  %v3889_v32 = vld [vmem:[#allocation7 + $0xe0] ss:$8 sps:$4 sm:$0xff]  }
  0x9d   : > { %772 = vmatprep.subr.bf16.mxu0 %v3857_v33  ;;  %v3890_v33 = vld [vmem:[#allocation7 + $0xd4] ss:$8 sps:$4 sm:$0xff]   ;;  %1510 = vmatpush2.bf16.msra.mxu1 %v3889_v32 }
  0x9e   : > { %1511 = vmatprep.subr.bf16.mxu1 %v3890_v33  ;;  %v413_v32 = vld [vmem:[%s4507_s20 + $0x218] sm:$0xff] }
  0xa0   : > { %773 = vmatpush2.bf16.msra.mxu0 %v3859_v34  ;;  %v374_v34 = vld [vmem:[%s4507_s20 + $0xe0] sm:$0xff] }
  0xa1   : > { %1512 = vmatpush2.bf16.msra.mxu1 %v3892_v38  ;;  %v417_v38 = vld [vmem:[%s4507_s20 + $0x238] sm:$0xff] }
  0xa2   : > { %1513 = vmatprep.subr.bf16.mxu1 %v3893_v41  ;;  %v414_v41 = vld [vmem:[%s4507_s20 + $0x220] sm:$0xff] }
  0xa3   : > { %775 = vmatmul.mubr.bf16.vlgmr.msra.gmra.mxu0 %v474_v39  ;;  %v488_v39 = vpack.c.bf16 %v376_v35, %v374_v34  ;;  %v507_v34 = vpack.c.bf16 %v413_v32, %v411_v31  ;;  %v410_v35 = vld [vmem:[%s4507_s20 + $0x200] sm:$0xff] }
  0xa4   : > { %784 = vmatprep.mubr.bf16.mxu0 %v477_v40  ;;  %v491_v40 = vpack.c.bf16 %v381_v37, %v379_v36  ;;  %v412_v36 = vld [vmem:[%s4507_s20 + $0x210] sm:$0xff]  ;;  %v415_v37 = vld [vmem:[%s4507_s20 + $0x228] sm:$0xff]  ;;  %v446_v32 = vld [vmem:[%s4507_s20 + $0x320] sm:$0xff] }
  0xa5   : > { %1514 = vmatpush2.bf16.msra.mxu1 %v3895_v42  ;;  %v416_v42 = vld [vmem:[%s4507_s20 + $0x230] sm:$0xff] }
  0xa6   : > { %1515 = vmatprep.subr.bf16.mxu1 %v3896_v43  ;;  %v419_v43 = vld [vmem:[%s4507_s20 + $0x248] sm:$0xff] }
  0xa9   : > { %1516 = vmatpush2.bf16.msra.mxu1 %v3898_v48  ;;  %v420_v48 = vld [vmem:[%s4507_s20 + $0x250] sm:$0xff] }
  0xaa   : > { %1517 = vmatprep.subr.bf16.mxu1 %v3899_v51 }
  0xab   : > { %785 = vmatmul.mubr.bf16.gmra.mxu0 %v476_v45  ;;  %v380_v45 = vld [vmem:[%s4507_s20 + $0x110] sm:$0xff] }
  0xac   : > { %794 = vmatprep.mubr.bf16.mxu0 %v479_v46  ;;  %v383_v46 = vld [vmem:[%s4507_s20 + $0x128] sm:$0xff]  ;;  %v490_v49 = vpack.c.bf16 %v380_v45, %v378_v44  ;;  %v421_v44 = vld [vmem:[%s4507_s20 + $0x258] sm:$0xff]  ;;  %v508_v45 = vpack.c.bf16 %v416_v42, %v414_v41 }
  0xad   : > { %v493_v50 = vpack.c.bf16 %v385_v47, %v383_v46  ;;  %v511_v46 = vpack.c.bf16 %v421_v44, %v419_v43  ;;  %v418_v47 = vld [vmem:[%s4507_s20 + $0x240] sm:$0xff] }
  0xae   : > { %v510_v51 = vpack.c.bf16 %v420_v48, %v418_v47 }
  0xb3   : > { %795 = vmatmul.mubr.bf16.gmra.mxu0 %v478_v53  ;;  %v384_v53 = vld [vmem:[%s4507_s20 + $0x130] sm:$0xff] }
  0xb4   : > { %804 = vmatprep.mubr.bf16.mxu0 %v481_v54  ;;  %v3901_v54 = vld [vmem:[#allocation7 + $0xa0] ss:$8 sps:$4 sm:$0xff]   ;;  %v492_v57 = vpack.c.bf16 %v384_v53, %v382_v52 }
  0xb5   : > { %1518 = vmatpush2.bf16.msra.mxu1 %v3901_v54  ;;  %v422_v53 = vld [vmem:[%s4507_s20 + $0x260] sm:$0xff]  ;;  %v424_v54 = vld [vmem:[%s4507_s20 + $0x270] sm:$0xff] }
  0xb6   : > { %1519 = vmatprep.subr.bf16.mxu1 %v3902_v58  ;;  %v515_v58 = vpack.c.bf16 %v429_v56, %v427_v55  ;;  %v457_v55 = vld [vmem:[%s4507_s20 + $0x378] sm:$0xff] }
  0xb9   : > { %1520 = vmatpush2.bf16.msra.mxu1 %v3904_v60  ;;  %v428_v60 = vld [vmem:[%s4507_s20 + $0x290] sm:$0xff] }
  0xba   : > { %1521 = vmatprep.subr.bf16.mxu1 %v3905_v61  ;;  %v431_v61 = vld [vmem:[%s4507_s20 + $0x2a8] sm:$0xff] }
  0xbb   : > { %805 = vmatmul.mubr.bf16.gmra.mxu0 %v480_v63  ;;  %v388_v63 = vld [vmem:[%s4507_s20 + $0x150] sm:$0xff] }
  0xbc   : > { %814 = vmatprep.mubr.bf16.mxu0 %v483_v0  ;;  %v3907_v0 = vld [vmem:[#allocation7 + $0x80] ss:$8 sps:$4 sm:$0xff]   ;;  %v494_v3 = vpack.c.bf16 %v388_v63, %v386_v62  ;;  %v433_v62 = vld [vmem:[%s4507_s20 + $0x2b8] sm:$0xff] }
  0xbd   : > { %1522 = vmatpush2.bf16.msra.mxu1 %v3907_v0  ;;  %v517_v0 = vpack.c.bf16 %v433_v62, %v431_v61 }
  0xc3   : > { %815 = vmatmul.mubr.bf16.gmra.mxu0 %v482_v9  ;;  %v496_v9 = vpack.c.bf16 %v392_v6, %v390_v5  ;;  %v516_v5 = vpack.c.bf16 %v432_v2, %v430_v1 }
  0xc4   : > { %824 = vmatprep.mubr.bf16.mxu0 %v485_v10  ;;  %v499_v10 = vpack.c.bf16 %v397_v8, %v395_v7  ;;  %v434_v7 = vld [vmem:[%s4507_s20 + $0x2c0] sm:$0xff]  ;;  %v436_v8 = vld [vmem:[%s4507_s20 + $0x2d0] sm:$0xff] }
  0xc5   : > { %v518_v11 = vpack.c.bf16 %v436_v8, %v434_v7  ;;  %v456_v7 = vld [vmem:[%s4507_s20 + $0x370] sm:$0xff] }
  0xcb   : > { %825 = vmatmul.mubr.bf16.gmra.mxu0 %v484_v19  ;;  %v403_v19 = vld [vmem:[%s4507_s20 + $0x1c8] sm:$0xff] }
  0xcc   : > { %834 = vmatprep.mubr.bf16.mxu0 %v487_v20  ;;  %v405_v20 = vld [vmem:[%s4507_s20 + $0x1d8] sm:$0xff] }
  0xcd   : > { %v503_v22 = vpack.c.bf16 %v405_v20, %v403_v19  ;;  %v572_v19 = vlaneseq  ;;  %v442_v20 = vld [vmem:[%s4507_s20 + $0x300] sm:$0xff] }
  0xd3   : > { %835 = vmatmul.mubr.bf16.gmra.mxu0 %v486_v29  ;;  %v406_v29 = vld [vmem:[%s4507_s20 + $0x1e0] sm:$0xff] }
  0xd4   : > { %844 = vmatprep.mubr.bf16.mxu0 %v489_v30  ;;  %v408_v30 = vld [vmem:[%s4507_s20 + $0x1f0] sm:$0xff] }
  0xd5   : > { %v504_v33 = vpack.c.bf16 %v408_v30, %v406_v29  ;;  %v570_v29 = vld [vmem:[%s7015_s2] sm:$0x3] }
  0xdb   : > { %845 = vmatmul.mubr.bf16.gmra.mxu0 %v488_v39  ;;  %v506_v39 = vpack.c.bf16 %v412_v36, %v410_v35  ;;  %v451_v36 = vld [vmem:[%s4507_s20 + $0x348] sm:$0xff] }
  0xdc   : > { %854 = vmatprep.mubr.bf16.mxu0 %v491_v40  ;;  %v509_v40 = vpack.c.bf16 %v417_v38, %v415_v37  ;;  %v453_v37 = vld [vmem:[%s4507_s20 + $0x358] sm:$0xff] }
  0xdd   : > { %v527_v42 = vpack.c.bf16 %v453_v37, %v451_v36 }
  0xe3   : > { %855 = vmatmul.mubr.bf16.gmra.mxu0 %v490_v49  ;;  %v423_v49 = vld [vmem:[%s4507_s20 + $0x268] sm:$0xff] }
  0xe4   : > { %864 = vmatprep.mubr.bf16.mxu0 %v493_v50  ;;  %v425_v50 = vld [vmem:[%s4507_s20 + $0x278] sm:$0xff] }
  0xe5   : > { %v513_v52 = vpack.c.bf16 %v425_v50, %v423_v49  ;;  %v450_v50 = vld [vmem:[%s4507_s20 + $0x340] sm:$0xff] }
  0xeb   : > { %865 = vmatmul.mubr.bf16.gmra.mxu0 %v492_v57  ;;  %v512_v57 = vpack.c.bf16 %v424_v54, %v422_v53  ;;  %v455_v54 = vld [vmem:[%s4507_s20 + $0x368] sm:$0xff] }
  0xec   : > { %874 = vmatprep.mubr.bf16.mxu0 %v495_v59  ;;  %v426_v59 = vld [vmem:[%s4507_s20 + $0x280] sm:$0xff]  ;;  %v529_v62 = vpack.c.bf16 %v457_v55, %v455_v54  ;;  %v467_v54 = vld [vmem:[%s4507_s20 + $0x3c8] sm:$0xff]  ;;  %v469_v55 = vld [vmem:[%s4507_s20 + $0x3d8] sm:$0xff] }
  0xed   : > { %v514_v63 = vpack.c.bf16 %v428_v60, %v426_v59 }
  0xf3   : > { %875 = vmatmul.mubr.bf16.gmra.mxu0 %v494_v3  ;;  %v435_v3 = vld [vmem:[%s4507_s20 + $0x2c8] sm:$0xff] }
  0xf4   : > { %884 = vmatprep.mubr.bf16.mxu0 %v497_v4  ;;  %v437_v4 = vld [vmem:[%s4507_s20 + $0x2d8] sm:$0xff] }
  0xf5   : > { %v519_v6 = vpack.c.bf16 %v437_v4, %v435_v3 }
  0xfb   : > { %885 = vmatmul.mubr.bf16.gmra.mxu0 %v496_v9  ;;  %v439_v9 = vld [vmem:[%s4507_s20 + $0x2e8] sm:$0xff] }
  0xfc   : > { %894 = vmatprep.mubr.bf16.mxu0 %v499_v10  ;;  %v441_v10 = vld [vmem:[%s4507_s20 + $0x2f8] sm:$0xff] }
  0xfd   : > { %v521_v12 = vpack.c.bf16 %v441_v10, %v439_v9  ;;  %v459_v10 = vld [vmem:[%s4507_s20 + $0x388] sm:$0xff] }
 0x103   : > { %895 = vmatmul.mubr.bf16.gmra.mxu0 %v498_v15  ;;  %v443_v15 = vld [vmem:[%s4507_s20 + $0x308] sm:$0xff] }
 0x104   : > { %904 = vmatprep.mubr.bf16.mxu0 %v501_v16  ;;  %v445_v16 = vld [vmem:[%s4507_s20 + $0x318] sm:$0xff] }
 0x105   : > { %v523_v18 = vpack.c.bf16 %v445_v16, %v443_v15 }
 0x10b   : > { %905 = vmatmul.mubr.bf16.gmra.mxu0 %v500_v21  ;;  %v444_v21 = vld [vmem:[%s4507_s20 + $0x310] sm:$0xff] }
 0x10c   : > { %914 = vmatprep.mubr.bf16.mxu0 %v503_v22  ;;  %v573_v22 = vshrl.u32 %v572_v19, 7  ;;  %v522_v25 = vpack.c.bf16 %v444_v21, %v442_v20 }
 0x10e   : > { %v4619_v26 = vsub.s32 1, %v573_v22 }
 0x110   : > { %v4627_v31 = vrot.slane %v570_v29, %v4619_v26 }
 0x113   : > { %915 = vmatmul.mubr.bf16.gmra.mxu0 %v502_v27  ;;  %v525_v27 = vpack.c.bf16 %v449_v24, %v447_v23 }
 0x114   : > { %924 = vmatprep.mubr.bf16.mxu0 %v505_v28  ;;  %v4621_v28 = vsub.s32 0, %v573_v22 }
 0x11b   : > { %925 = vmatmul.mubr.bf16.gmra.mxu0 %v504_v33  ;;  %v448_v33 = vld [vmem:[%s4507_s20 + $0x330] sm:$0xff] }
 0x11c   : > { %934 = vmatprep.mubr.bf16.mxu0 %v507_v34  ;;  %v4632_v34 = vrot.slane %v570_v29, %v4621_v28  ;;  %v460_v29 = vld [vmem:[%s4507_s20 + $0x390] sm:$0xff] }
 0x123   : > { %935 = vmatmul.mubr.bf16.gmra.mxu0 %v506_v39  ;;  %v524_v39 = vpack.c.bf16 %v448_v33, %v446_v32  ;;  %v463_v33 = vld [vmem:[%s4507_s20 + $0x3a8] sm:$0xff] }
 0x124   : > { %944 = vmatprep.mubr.bf16.mxu0 %v509_v40 }
 0x12b   : > { %945 = vmatmul.mubr.bf16.gmra.mxu0 %v508_v45 }
 0x12c   : > { %954 = vmatprep.mubr.bf16.mxu0 %v511_v46 }
 0x133   : > { %955 = vmatmul.mubr.bf16.gmra.mxu0 %v510_v51  ;;  %v452_v51 = vld [vmem:[%s4507_s20 + $0x350] sm:$0xff] }
 0x134   : > { %964 = vmatprep.mubr.bf16.mxu0 %v513_v52  ;;  %v526_v59 = vpack.c.bf16 %v452_v51, %v450_v50  ;;  %v462_v50 = vld [vmem:[%s4507_s20 + $0x3a0] sm:$0xff]  ;;  %v464_v51 = vld [vmem:[%s4507_s20 + $0x3b0] sm:$0xff] }
 0x13b   : > { %965 = vmatmul.mubr.bf16.gmra.mxu0 %v512_v57 }
 0x13c   : > { %974 = vmatprep.mubr.bf16.mxu0 %v515_v58 }
 0x143   : > { %975 = vmatmul.mubr.bf16.gmra.mxu0 %v514_v63 }
 0x144   : > { %984 = vmatprep.mubr.bf16.mxu0 %v517_v0 }
 0x14b   : > { %985 = vmatmul.mubr.bf16.gmra.mxu0 %v516_v5 }
 0x14c   : > { %994 = vmatprep.mubr.bf16.mxu0 %v519_v6  ;;  %v454_v6 = vld [vmem:[%s4507_s20 + $0x360] sm:$0xff] }
 0x14d   : > { %v528_v15 = vpack.c.bf16 %v456_v7, %v454_v6  ;;  %v466_v6 = vld [vmem:[%s4507_s20 + $0x3c0] sm:$0xff]  ;;  %v468_v7 = vld [vmem:[%s4507_s20 + $0x3d0] sm:$0xff] }
 0x153   : > { %995 = vmatmul.mubr.bf16.gmra.mxu0 %v518_v11  ;;  %v461_v11 = vld [vmem:[%s4507_s20 + $0x398] sm:$0xff] }
 0x154   : > { %1004 = vmatprep.mubr.bf16.mxu0 %v521_v12 }
 0x15b   : > { %1005 = vmatmul.mubr.bf16.gmra.mxu0 %v520_v17 }
 0x15c   : > { %1014 = vmatprep.mubr.bf16.mxu0 %v523_v18  ;;  %v531_v18 = vpack.c.bf16 %v461_v11, %v459_v10  ;;  %v471_v10 = vld [vmem:[%s4507_s20 + $0x3e8] sm:$0xff]  ;;  %v473_v11 = vld [vmem:[%s4507_s20 + $0x3f8] sm:$0xff] }
 0x163   : > { %v776_v30 = vpop.f32.mrf.mxu0  ;;  %1015 = vmatmul.mubr.bf16.gmra.mxu0 %v522_v25 }
 0x164   : > { %1024 = vmatprep.mubr.bf16.mxu0 %v525_v27  ;;  %v777_v43 = vadd.f32 %v776_v30, %v4632_v34  ;;  %v458_v27 = vld [vmem:[%s4507_s20 + $0x380] sm:$0xff] }
 0x165   : > { %v778_v35 = vpop.f32.mrf.mxu0 }
 0x166   : > { %v779_v40 = vadd.f32 %v778_v35, %v4627_v31  ;;  %v1095_v52 = vmax.f32 %v777_v43, 0.0  ;;  %v465_v35 = vld [vmem:[%s4507_s20 + $0x3b8] sm:$0xff] }
 0x167   : > { %v780_v38 = vpop.f32.mrf.mxu0 }
 0x168   : > { %v781_v41 = vadd.f32 %v780_v38, %v4632_v34  ;;  %v1096_v48 = vmax.f32 %v779_v40, 0.0 }
 0x169   : > { %v782_v44 = vpop.f32.mrf.mxu0 }
 0x16a   : > { %v783_v45 = vadd.f32 %v782_v44, %v4627_v31  ;;  %v1097_v46 = vmax.f32 %v781_v41, 0.0 }
 0x16b   : > { %v786_v47 = vpop.f32.mrf.mxu0  ;;  %1025 = vmatmul.mubr.bf16.gmra.mxu0 %v524_v39  ;;  %v530_v39 = vpack.c.bf16 %v460_v29, %v458_v27  ;;  %v470_v27 = vld [vmem:[%s4507_s20 + $0x3e0] sm:$0xff]  ;;  %v472_v29 = vld [vmem:[%s4507_s20 + $0x3f0] sm:$0xff] }
 0x16c   : > { %v1098_v49 = vmax.f32 %v783_v45, 0.0  ;;  %1034 = vmatprep.mubr.bf16.mxu0 %v527_v42  ;;  %v1223_v57 = vpack.c.bf16 %v1097_v46, %v1095_v52  ;;  %v787_v63 = vadd.f32 %v786_v47, %v4632_v34  ;;  %v533_v42 = vpack.c.bf16 %v465_v35, %v463_v33 }
 0x16d   : > { %v788_v53 = vpop.f32.mrf.mxu0 }
 0x16e   : > { %v1224_v56 = vpack.c.bf16 %v1098_v49, %v1096_v48  ;;  %v789_v60 = vadd.f32 %v788_v53, %v4627_v31  ;;  %v1099_v8 = vmax.f32 %v787_v63, 0.0 }
 0x16f   : > { %v790_v58 = vpop.f32.mrf.mxu0 }
 0x170   : > { %v791_v61 = vadd.f32 %v790_v58, %v4632_v34  ;;  %1523 = vmatprep.mubr.bf16.mxu1 %v1224_v56  ;;  %v1100_v4 = vmax.f32 %v789_v60, 0.0 }
 0x171   : > { %v792_v0 = vpop.f32.mrf.mxu0  ;;  %1524 = vmatmul.mubr.bf16.vlgmr.msra.gmra.mxu1 %v1223_v57 }
 0x172   : > { %v793_v1 = vadd.f32 %v792_v0, %v4627_v31  ;;  %v1101_v2 = vmax.f32 %v791_v61, 0.0 }
 0x173   : > { %v796_v3 = vpop.f32.mrf.mxu0  ;;  %1035 = vmatmul.mubr.bf16.gmra.mxu0 %v526_v59  ;;  %v532_v59 = vpack.c.bf16 %v464_v51, %v462_v50 }
 0x174   : > { %v1102_v5 = vmax.f32 %v793_v1, 0.0  ;;  %1044 = vmatprep.mubr.bf16.mxu0 %v529_v62  ;;  %v1225_v13 = vpack.c.bf16 %v1101_v2, %v1099_v8  ;;  %v797_v19 = vadd.f32 %v796_v3, %v4632_v34  ;;  %v535_v62 = vpack.c.bf16 %v469_v55, %v467_v54 }
 0x175   : > { %v798_v9 = vpop.f32.mrf.mxu0 }
 0x176   : > { %v1226_v12 = vpack.c.bf16 %v1102_v5, %v1100_v4  ;;  %v799_v16 = vadd.f32 %v798_v9, %v4627_v31  ;;  %v1103_v30 = vmax.f32 %v797_v19, 0.0 }
 0x177   : > { %v800_v14 = vpop.f32.mrf.mxu0 }
 0x178   : > { %v801_v17 = vadd.f32 %v800_v14, %v4632_v34  ;;  %1533 = vmatprep.mubr.bf16.mxu1 %v1226_v12  ;;  %v1104_v24 = vmax.f32 %v799_v16, 0.0 }
 0x179   : > { %v802_v20 = vpop.f32.mrf.mxu0  ;;  %1534 = vmatmul.mubr.bf16.gmra.mxu1 %v1225_v13 }
 0x17a   : > { %v803_v21 = vadd.f32 %v802_v20, %v4627_v31  ;;  %v1105_v22 = vmax.f32 %v801_v17, 0.0 }
 0x17b   : > { %v806_v23 = vpop.f32.mrf.mxu0  ;;  %1045 = vmatmul.mubr.bf16.gmra.mxu0 %v528_v15  ;;  %v534_v15 = vpack.c.bf16 %v468_v7, %v466_v6 }
 0x17c   : > { %v1106_v25 = vmax.f32 %v803_v21, 0.0  ;;  %1054 = vmatprep.mubr.bf16.mxu0 %v531_v18  ;;  %v1227_v37 = vpack.c.bf16 %v1105_v22, %v1103_v30  ;;  %v807_v43 = vadd.f32 %v806_v23, %v4632_v34  ;;  %v537_v18 = vpack.c.bf16 %v473_v11, %v471_v10 }
 0x17d   : > { %v808_v32 = vpop.f32.mrf.mxu0 }
 0x17e   : > { %v1228_v36 = vpack.c.bf16 %v1106_v25, %v1104_v24  ;;  %v809_v40 = vadd.f32 %v808_v32, %v4627_v31  ;;  %v1107_v52 = vmax.f32 %v807_v43, 0.0 }
 0x17f   : > { %v810_v38 = vpop.f32.mrf.mxu0 }
 0x180   : > { %v811_v41 = vadd.f32 %v810_v38, %v4632_v34  ;;  %1543 = vmatprep.mubr.bf16.mxu1 %v1228_v36  ;;  %v1108_v48 = vmax.f32 %v809_v40, 0.0 }
 0x181   : > { %v812_v44 = vpop.f32.mrf.mxu0  ;;  %1544 = vmatmul.mubr.bf16.gmra.mxu1 %v1227_v37  ;;  %v536_v37 = vpack.c.bf16 %v472_v29, %v470_v27 }
 0x182   : > { %v813_v45 = vadd.f32 %v812_v44, %v4627_v31  ;;  %v1109_v46 = vmax.f32 %v811_v41, 0.0 }
 0x183   : > { %v816_v47 = vpop.f32.mrf.mxu0  ;;  %1055 = vmatmul.mubr.bf16.gmra.mxu0 %v530_v39 }
 0x184   : > { %v1110_v49 = vmax.f32 %v813_v45, 0.0  ;;  %1064 = vmatprep.mubr.bf16.mxu0 %v533_v42  ;;  %v1229_v57 = vpack.c.bf16 %v1109_v46, %v1107_v52  ;;  %v817_v63 = vadd.f32 %v816_v47, %v4632_v34 }
 0x185   : > { %v818_v53 = vpop.f32.mrf.mxu0 }
 0x186   : > { %v1230_v56 = vpack.c.bf16 %v1110_v49, %v1108_v48  ;;  %v819_v60 = vadd.f32 %v818_v53, %v4627_v31  ;;  %v1111_v8 = vmax.f32 %v817_v63, 0.0 }
 0x187   : > { %v820_v58 = vpop.f32.mrf.mxu0 }
 0x188   : > { %v821_v61 = vadd.f32 %v820_v58, %v4632_v34  ;;  %1553 = vmatprep.mubr.bf16.mxu1 %v1230_v56  ;;  %v1112_v4 = vmax.f32 %v819_v60, 0.0 }
 0x189   : > { %v822_v0 = vpop.f32.mrf.mxu0  ;;  %1554 = vmatmul.mubr.bf16.gmra.mxu1 %v1229_v57 }
 0x18a   : > { %v823_v1 = vadd.f32 %v822_v0, %v4627_v31  ;;  %v1113_v2 = vmax.f32 %v821_v61, 0.0 }
 0x18b   : > { %v826_v3 = vpop.f32.mrf.mxu0  ;;  %1065 = vmatmul.mubr.bf16.gmra.mxu0 %v532_v59 }
 0x18c   : > { %v1114_v5 = vmax.f32 %v823_v1, 0.0  ;;  %1074 = vmatprep.mubr.bf16.mxu0 %v535_v62  ;;  %v1231_v13 = vpack.c.bf16 %v1113_v2, %v1111_v8  ;;  %v827_v19 = vadd.f32 %v826_v3, %v4632_v34 }
 0x18d   : > { %v828_v9 = vpop.f32.mrf.mxu0 }
 0x18e   : > { %v1232_v12 = vpack.c.bf16 %v1114_v5, %v1112_v4  ;;  %v829_v16 = vadd.f32 %v828_v9, %v4627_v31  ;;  %v1115_v30 = vmax.f32 %v827_v19, 0.0 }
 0x18f   : > { %v830_v14 = vpop.f32.mrf.mxu0 }
 0x190   : > { %v831_v17 = vadd.f32 %v830_v14, %v4632_v34  ;;  %1563 = vmatprep.mubr.bf16.mxu1 %v1232_v12  ;;  %v1116_v24 = vmax.f32 %v829_v16, 0.0 }
 0x191   : > { %v832_v20 = vpop.f32.mrf.mxu0  ;;  %1564 = vmatmul.mubr.bf16.gmra.mxu1 %v1231_v13 }
 0x192   : > { %v833_v21 = vadd.f32 %v832_v20, %v4627_v31  ;;  %v1117_v22 = vmax.f32 %v831_v17, 0.0 }
 0x193   : > { %v836_v23 = vpop.f32.mrf.mxu0  ;;  %1075 = vmatmul.mubr.bf16.gmra.mxu0 %v534_v15 }
 0x194   : > { %v1118_v25 = vmax.f32 %v833_v21, 0.0  ;;  %1084 = vmatprep.mubr.bf16.mxu0 %v537_v18  ;;  %v1233_v35 = vpack.c.bf16 %v1117_v22, %v1115_v30  ;;  %v837_v40 = vadd.f32 %v836_v23, %v4632_v34 }
 0x195   : > { %v838_v32 = vpop.f32.mrf.mxu0 }
 0x196   : > { %v1234_v33 = vpack.c.bf16 %v1118_v25, %v1116_v24  ;;  %v839_v38 = vadd.f32 %v838_v32, %v4627_v31  ;;  %v1119_v47 = vmax.f32 %v837_v40, 0.0 }
 0x197   : > { %v840_v36 = vpop.f32.mrf.mxu0 }
 0x198   : > { %v841_v39 = vadd.f32 %v840_v36, %v4632_v34  ;;  %1573 = vmatprep.mubr.bf16.mxu1 %v1234_v33  ;;  %v1120_v45 = vmax.f32 %v839_v38, 0.0 }
 0x199   : > { %v842_v41 = vpop.f32.mrf.mxu0  ;;  %1574 = vmatmul.mubr.bf16.gmra.mxu1 %v1233_v35 }
 0x19a   : > { %v843_v42 = vadd.f32 %v842_v41, %v4627_v31  ;;  %v1121_v43 = vmax.f32 %v841_v39, 0.0 }
 0x19b   : > { %v846_v44 = vpop.f32.mrf.mxu0  ;;  %1085 = vmatmul.mubr.bf16.gmra.mxu0 %v536_v37 }
 0x19c   : > { %v1122_v46 = vmax.f32 %v843_v42, 0.0  ;;  %v1235_v50 = vpack.c.bf16 %v1121_v43, %v1119_v47  ;;  %v847_v54 = vadd.f32 %v846_v44, %v4632_v34 }
 0x19d   : > { %v848_v48 = vpop.f32.mrf.mxu0 }
 0x19e   : > { %v1236_v49 = vpack.c.bf16 %v1122_v46, %v1120_v45  ;;  %v849_v52 = vadd.f32 %v848_v48, %v4627_v31  ;;  %v1123_v61 = vmax.f32 %v847_v54, 0.0 }
 0x19f   : > { %v850_v51 = vpop.f32.mrf.mxu0 }
 0x1a0   : > { %v851_v53 = vadd.f32 %v850_v51, %v4632_v34  ;;  %1583 = vmatprep.mubr.bf16.mxu1 %v1236_v49  ;;  %v1124_v59 = vmax.f32 %v849_v52, 0.0 }
 0x1a1   : > { %v852_v55 = vpop.f32.mrf.mxu0  ;;  %1584 = vmatmul.mubr.bf16.gmra.mxu1 %v1235_v50 }
 0x1a2   : > { %v853_v56 = vadd.f32 %v852_v55, %v4627_v31  ;;  %v1125_v57 = vmax.f32 %v851_v53, 0.0 }
 0x1a3   : > { %v856_v58 = vpop.f32.mrf.mxu0 }
 0x1a4   : > { %v1126_v60 = vmax.f32 %v853_v56, 0.0  ;;  %v1237_v0 = vpack.c.bf16 %v1125_v57, %v1123_v61  ;;  %v857_v4 = vadd.f32 %v856_v58, %v4632_v34 }
 0x1a5   : > { %v858_v62 = vpop.f32.mrf.mxu0 }
 0x1a6   : > { %v1238_v63 = vpack.c.bf16 %v1126_v60, %v1124_v59  ;;  %v859_v2 = vadd.f32 %v858_v62, %v4627_v31  ;;  %v1127_v11 = vmax.f32 %v857_v4, 0.0 }
 0x1a7   : > { %v860_v1 = vpop.f32.mrf.mxu0 }
 0x1a8   : > { %v861_v3 = vadd.f32 %v860_v1, %v4632_v34  ;;  %1593 = vmatprep.mubr.bf16.mxu1 %v1238_v63  ;;  %v1128_v9 = vmax.f32 %v859_v2, 0.0 }
 0x1a9   : > { %v862_v5 = vpop.f32.mrf.mxu0  ;;  %1594 = vmatmul.mubr.bf16.gmra.mxu1 %v1237_v0 }
 0x1aa   : > { %v863_v6 = vadd.f32 %v862_v5, %v4627_v31  ;;  %v1129_v7 = vmax.f32 %v861_v3, 0.0 }
 0x1ab   : > { %v866_v8 = vpop.f32.mrf.mxu0 }
 0x1ac   : > { %v1130_v10 = vmax.f32 %v863_v6, 0.0  ;;  %v1239_v14 = vpack.c.bf16 %v1129_v7, %v1127_v11  ;;  %v867_v18 = vadd.f32 %v866_v8, %v4632_v34 }
 0x1ad   : > { %v868_v12 = vpop.f32.mrf.mxu0 }
 0x1ae   : > { %v1240_v13 = vpack.c.bf16 %v1130_v10, %v1128_v9  ;;  %v869_v16 = vadd.f32 %v868_v12, %v4627_v31  ;;  %v1131_v25 = vmax.f32 %v867_v18, 0.0 }
 0x1af   : > { %v870_v15 = vpop.f32.mrf.mxu0 }
 0x1b0   : > { %v871_v17 = vadd.f32 %v870_v15, %v4632_v34  ;;  %1603 = vmatprep.mubr.bf16.mxu1 %v1240_v13  ;;  %v1132_v23 = vmax.f32 %v869_v16, 0.0 }
 0x1b1   : > { %v872_v19 = vpop.f32.mrf.mxu0  ;;  %1604 = vmatmul.mubr.bf16.gmra.mxu1 %v1239_v14 }
 0x1b2   : > { %v873_v20 = vadd.f32 %v872_v19, %v4627_v31  ;;  %v1133_v21 = vmax.f32 %v871_v17, 0.0 }
 0x1b3   : > { %v876_v22 = vpop.f32.mrf.mxu0 }
 0x1b4   : > { %v1134_v24 = vmax.f32 %v873_v20, 0.0  ;;  %v1241_v30 = vpack.c.bf16 %v1133_v21, %v1131_v25  ;;  %v877_v36 = vadd.f32 %v876_v22, %v4632_v34 }
 0x1b5   : > { %v878_v27 = vpop.f32.mrf.mxu0 }
 0x1b6   : > { %v1242_v29 = vpack.c.bf16 %v1134_v24, %v1132_v23  ;;  %v879_v33 = vadd.f32 %v878_v27, %v4627_v31  ;;  %v1135_v43 = vmax.f32 %v877_v36, 0.0 }
 0x1b7   : > { %v880_v32 = vpop.f32.mrf.mxu0 }
 0x1b8   : > { %v881_v35 = vadd.f32 %v880_v32, %v4632_v34  ;;  %1613 = vmatprep.mubr.bf16.mxu1 %v1242_v29  ;;  %v1136_v41 = vmax.f32 %v879_v33, 0.0 }
 0x1b9   : > { %v882_v37 = vpop.f32.mrf.mxu0  ;;  %1614 = vmatmul.mubr.bf16.gmra.mxu1 %v1241_v30 }
 0x1ba   : > { %v883_v38 = vadd.f32 %v882_v37, %v4627_v31  ;;  %v1137_v39 = vmax.f32 %v881_v35, 0.0 }
 0x1bb   : > { %v886_v40 = vpop.f32.mrf.mxu0 }
 0x1bc   : > { %v1138_v42 = vmax.f32 %v883_v38, 0.0  ;;  %v1243_v46 = vpack.c.bf16 %v1137_v39, %v1135_v43  ;;  %v887_v50 = vadd.f32 %v886_v40, %v4632_v34 }
 0x1bd   : > { %v888_v44 = vpop.f32.mrf.mxu0 }
 0x1be   : > { %v1244_v45 = vpack.c.bf16 %v1138_v42, %v1136_v41  ;;  %v889_v48 = vadd.f32 %v888_v44, %v4627_v31  ;;  %v1139_v57 = vmax.f32 %v887_v50, 0.0 }
 0x1bf   : > { %v890_v47 = vpop.f32.mrf.mxu0 }
 0x1c0   : > { %v891_v49 = vadd.f32 %v890_v47, %v4632_v34  ;;  %1623 = vmatprep.mubr.bf16.mxu1 %v1244_v45  ;;  %v1140_v55 = vmax.f32 %v889_v48, 0.0 }
 0x1c1   : > { %v892_v51 = vpop.f32.mrf.mxu0  ;;  %1624 = vmatmul.mubr.bf16.gmra.mxu1 %v1243_v46 }
 0x1c2   : > { %v893_v52 = vadd.f32 %v892_v51, %v4627_v31  ;;  %v1141_v53 = vmax.f32 %v891_v49, 0.0 }
 0x1c3   : > { %v896_v54 = vpop.f32.mrf.mxu0 }
 0x1c4   : > { %v1142_v56 = vmax.f32 %v893_v52, 0.0  ;;  %v1245_v60 = vpack.c.bf16 %v1141_v53, %v1139_v57  ;;  %v897_v0 = vadd.f32 %v896_v54, %v4632_v34 }
 0x1c5   : > { %v898_v58 = vpop.f32.mrf.mxu0 }
 0x1c6   : > { %v1246_v59 = vpack.c.bf16 %v1142_v56, %v1140_v55  ;;  %v899_v62 = vadd.f32 %v898_v58, %v4627_v31  ;;  %v1143_v7 = vmax.f32 %v897_v0, 0.0 }
 0x1c7   : > { %v900_v61 = vpop.f32.mrf.mxu0 }
 0x1c8   : > { %v901_v63 = vadd.f32 %v900_v61, %v4632_v34  ;;  %1633 = vmatprep.mubr.bf16.mxu1 %v1246_v59  ;;  %v1144_v5 = vmax.f32 %v899_v62, 0.0 }
 0x1c9   : > { %v902_v1 = vpop.f32.mrf.mxu0  ;;  %1634 = vmatmul.mubr.bf16.gmra.mxu1 %v1245_v60 }
 0x1ca   : > { %v903_v2 = vadd.f32 %v902_v1, %v4627_v31  ;;  %v1145_v3 = vmax.f32 %v901_v63, 0.0 }
 0x1cb   : > { %v906_v4 = vpop.f32.mrf.mxu0 }
 0x1cc   : > { %v1146_v6 = vmax.f32 %v903_v2, 0.0  ;;  %v1247_v10 = vpack.c.bf16 %v1145_v3, %v1143_v7  ;;  %v907_v14 = vadd.f32 %v906_v4, %v4632_v34 }
 0x1cd   : > { %v908_v8 = vpop.f32.mrf.mxu0 }
 0x1ce   : > { %v1248_v9 = vpack.c.bf16 %v1146_v6, %v1144_v5  ;;  %v909_v12 = vadd.f32 %v908_v8, %v4627_v31  ;;  %v1147_v21 = vmax.f32 %v907_v14, 0.0 }
 0x1cf   : > { %v910_v11 = vpop.f32.mrf.mxu0 }
 0x1d0   : > { %v911_v13 = vadd.f32 %v910_v11, %v4632_v34  ;;  %1643 = vmatprep.mubr.bf16.mxu1 %v1248_v9  ;;  %v1148_v19 = vmax.f32 %v909_v12, 0.0 }
 0x1d1   : > { %v912_v15 = vpop.f32.mrf.mxu0  ;;  %1644 = vmatmul.mubr.bf16.gmra.mxu1 %v1247_v10 }
 0x1d2   : > { %v913_v16 = vadd.f32 %v912_v15, %v4627_v31  ;;  %v1149_v17 = vmax.f32 %v911_v13, 0.0 }
 0x1d3   : > { %v916_v18 = vpop.f32.mrf.mxu0 }
 0x1d4   : > { %v1150_v20 = vmax.f32 %v913_v16, 0.0  ;;  %v1249_v24 = vpack.c.bf16 %v1149_v17, %v1147_v21  ;;  %v917_v30 = vadd.f32 %v916_v18, %v4632_v34 }
 0x1d5   : > { %v918_v22 = vpop.f32.mrf.mxu0 }
 0x1d6   : > { %v1250_v23 = vpack.c.bf16 %v1150_v20, %v1148_v19  ;;  %v919_v27 = vadd.f32 %v918_v22, %v4627_v31  ;;  %v1151_v39 = vmax.f32 %v917_v30, 0.0 }
 0x1d7   : > { %v920_v25 = vpop.f32.mrf.mxu0 }
 0x1d8   : > { %v921_v29 = vadd.f32 %v920_v25, %v4632_v34  ;;  %1653 = vmatprep.mubr.bf16.mxu1 %v1250_v23  ;;  %v1152_v37 = vmax.f32 %v919_v27, 0.0 }
 0x1d9   : > { %v922_v32 = vpop.f32.mrf.mxu0  ;;  %1654 = vmatmul.mubr.bf16.gmra.mxu1 %v1249_v24 }
 0x1da   : > { %v923_v33 = vadd.f32 %v922_v32, %v4627_v31  ;;  %v1153_v35 = vmax.f32 %v921_v29, 0.0 }
 0x1db   : > { %v926_v36 = vpop.f32.mrf.mxu0 }
 0x1dc   : > { %v1154_v38 = vmax.f32 %v923_v33, 0.0  ;;  %v1251_v42 = vpack.c.bf16 %v1153_v35, %v1151_v39  ;;  %v927_v46 = vadd.f32 %v926_v36, %v4632_v34 }
 0x1dd   : > { %v928_v40 = vpop.f32.mrf.mxu0 }
 0x1de   : > { %v1252_v41 = vpack.c.bf16 %v1154_v38, %v1152_v37  ;;  %v929_v44 = vadd.f32 %v928_v40, %v4627_v31  ;;  %v1155_v53 = vmax.f32 %v927_v46, 0.0 }
 0x1df   : > { %v930_v43 = vpop.f32.mrf.mxu0 }
 0x1e0   : > { %v931_v45 = vadd.f32 %v930_v43, %v4632_v34  ;;  %1663 = vmatprep.mubr.bf16.mxu1 %v1252_v41  ;;  %v1156_v51 = vmax.f32 %v929_v44, 0.0 }
 0x1e1   : > { %v932_v47 = vpop.f32.mrf.mxu0  ;;  %1664 = vmatmul.mubr.bf16.gmra.mxu1 %v1251_v42 }
 0x1e2   : > { %v933_v48 = vadd.f32 %v932_v47, %v4627_v31  ;;  %v1157_v49 = vmax.f32 %v931_v45, 0.0 }
 0x1e3   : > { %v936_v50 = vpop.f32.mrf.mxu0 }
 0x1e4   : > { %v1158_v52 = vmax.f32 %v933_v48, 0.0  ;;  %v1253_v56 = vpack.c.bf16 %v1157_v49, %v1155_v53  ;;  %v937_v60 = vadd.f32 %v936_v50, %v4632_v34 }
 0x1e5   : > { %v938_v54 = vpop.f32.mrf.mxu0 }
 0x1e6   : > { %v1254_v55 = vpack.c.bf16 %v1158_v52, %v1156_v51  ;;  %v939_v58 = vadd.f32 %v938_v54, %v4627_v31  ;;  %v1159_v3 = vmax.f32 %v937_v60, 0.0 }
 0x1e7   : > { %v940_v57 = vpop.f32.mrf.mxu0 }
 0x1e8   : > { %v941_v59 = vadd.f32 %v940_v57, %v4632_v34  ;;  %1673 = vmatprep.mubr.bf16.mxu1 %v1254_v55  ;;  %v1160_v1 = vmax.f32 %v939_v58, 0.0 }
 0x1e9   : > { %v942_v61 = vpop.f32.mrf.mxu0  ;;  %1674 = vmatmul.mubr.bf16.gmra.mxu1 %v1253_v56 }
 0x1ea   : > { %v943_v62 = vadd.f32 %v942_v61, %v4627_v31  ;;  %v1161_v63 = vmax.f32 %v941_v59, 0.0 }
 0x1eb   : > { %v946_v0 = vpop.f32.mrf.mxu0 }
 0x1ec   : > { %v1162_v2 = vmax.f32 %v943_v62, 0.0  ;;  %v1255_v6 = vpack.c.bf16 %v1161_v63, %v1159_v3  ;;  %v947_v10 = vadd.f32 %v946_v0, %v4632_v34 }
 0x1ed   : > { %v948_v4 = vpop.f32.mrf.mxu0 }
 0x1ee   : > { %v1256_v5 = vpack.c.bf16 %v1162_v2, %v1160_v1  ;;  %v949_v8 = vadd.f32 %v948_v4, %v4627_v31  ;;  %v1163_v17 = vmax.f32 %v947_v10, 0.0 }
 0x1ef   : > { %v950_v7 = vpop.f32.mrf.mxu0 }
 0x1f0   : > { %v951_v9 = vadd.f32 %v950_v7, %v4632_v34  ;;  %1683 = vmatprep.mubr.bf16.mxu1 %v1256_v5  ;;  %v1164_v15 = vmax.f32 %v949_v8, 0.0 }
 0x1f1   : > { %v952_v11 = vpop.f32.mrf.mxu0  ;;  %1684 = vmatmul.mubr.bf16.gmra.mxu1 %v1255_v6 }
 0x1f2   : > { %v953_v12 = vadd.f32 %v952_v11, %v4627_v31  ;;  %v1165_v13 = vmax.f32 %v951_v9, 0.0 }
 0x1f3   : > { %v956_v14 = vpop.f32.mrf.mxu0 }
 0x1f4   : > { %v1166_v16 = vmax.f32 %v953_v12, 0.0  ;;  %v1257_v20 = vpack.c.bf16 %v1165_v13, %v1163_v17  ;;  %v957_v24 = vadd.f32 %v956_v14, %v4632_v34 }
 0x1f5   : > { %v958_v18 = vpop.f32.mrf.mxu0 }
 0x1f6   : > { %v1258_v19 = vpack.c.bf16 %v1166_v16, %v1164_v15  ;;  %v959_v22 = vadd.f32 %v958_v18, %v4627_v31  ;;  %v1167_v35 = vmax.f32 %v957_v24, 0.0 }
 0x1f7   : > { %v960_v21 = vpop.f32.mrf.mxu0 }
 0x1f8   : > { %v961_v23 = vadd.f32 %v960_v21, %v4632_v34  ;;  %1693 = vmatprep.mubr.bf16.mxu1 %v1258_v19  ;;  %v1168_v32 = vmax.f32 %v959_v22, 0.0 }
 0x1f9   : > { %v962_v25 = vpop.f32.mrf.mxu0  ;;  %1694 = vmatmul.mubr.bf16.gmra.mxu1 %v1257_v20 }
 0x1fa   : > { %v963_v27 = vadd.f32 %v962_v25, %v4627_v31  ;;  %v1169_v29 = vmax.f32 %v961_v23, 0.0 }
 0x1fb   : > { %v966_v30 = vpop.f32.mrf.mxu0 }
 0x1fc   : > { %v1170_v33 = vmax.f32 %v963_v27, 0.0  ;;  %v1259_v38 = vpack.c.bf16 %v1169_v29, %v1167_v35  ;;  %v967_v42 = vadd.f32 %v966_v30, %v4632_v34 }
 0x1fd   : > { %v968_v36 = vpop.f32.mrf.mxu0 }
 0x1fe   : > { %v1260_v37 = vpack.c.bf16 %v1170_v33, %v1168_v32  ;;  %v969_v40 = vadd.f32 %v968_v36, %v4627_v31  ;;  %v1171_v49 = vmax.f32 %v967_v42, 0.0 }
 0x1ff   : > { %v970_v39 = vpop.f32.mrf.mxu0 }
 0x200   : > { %v971_v41 = vadd.f32 %v970_v39, %v4632_v34  ;;  %1703 = vmatprep.mubr.bf16.mxu1 %v1260_v37  ;;  %v1172_v47 = vmax.f32 %v969_v40, 0.0 }
 0x201   : > { %v972_v43 = vpop.f32.mrf.mxu0  ;;  %1704 = vmatmul.mubr.bf16.gmra.mxu1 %v1259_v38 }
 0x202   : > { %v973_v44 = vadd.f32 %v972_v43, %v4627_v31  ;;  %v1173_v45 = vmax.f32 %v971_v41, 0.0 }
 0x203   : > { %v976_v46 = vpop.f32.mrf.mxu0 }
 0x204   : > { %v1174_v48 = vmax.f32 %v973_v44, 0.0  ;;  %v1261_v52 = vpack.c.bf16 %v1173_v45, %v1171_v49  ;;  %v977_v56 = vadd.f32 %v976_v46, %v4632_v34 }
 0x205   : > { %v978_v50 = vpop.f32.mrf.mxu0 }
 0x206   : > { %v1262_v51 = vpack.c.bf16 %v1174_v48, %v1172_v47  ;;  %v979_v54 = vadd.f32 %v978_v50, %v4627_v31  ;;  %v1175_v63 = vmax.f32 %v977_v56, 0.0 }
 0x207   : > { %v980_v53 = vpop.f32.mrf.mxu0 }
 0x208   : > { %v981_v55 = vadd.f32 %v980_v53, %v4632_v34  ;;  %1713 = vmatprep.mubr.bf16.mxu1 %v1262_v51  ;;  %v1176_v61 = vmax.f32 %v979_v54, 0.0 }
 0x209   : > { %v982_v57 = vpop.f32.mrf.mxu0  ;;  %1714 = vmatmul.mubr.bf16.gmra.mxu1 %v1261_v52 }
 0x20a   : > { %v983_v58 = vadd.f32 %v982_v57, %v4627_v31  ;;  %v1177_v59 = vmax.f32 %v981_v55, 0.0 }
 0x20b   : > { %v986_v60 = vpop.f32.mrf.mxu0 }
 0x20c   : > { %v1178_v62 = vmax.f32 %v983_v58, 0.0  ;;  %v1263_v2 = vpack.c.bf16 %v1177_v59, %v1175_v63  ;;  %v987_v6 = vadd.f32 %v986_v60, %v4632_v34  ;;  %v1319_v59 = vld [vmem:[%s7017_s4] sm:$0x3] }
 0x20d   : > { %v988_v0 = vpop.f32.mrf.mxu0 }
 0x20e   : > { %v1264_v1 = vpack.c.bf16 %v1178_v62, %v1176_v61  ;;  %v989_v4 = vadd.f32 %v988_v0, %v4627_v31  ;;  %v1179_v13 = vmax.f32 %v987_v6, 0.0 }
 0x20f   : > { %v990_v3 = vpop.f32.mrf.mxu0 }
 0x210   : > { %v991_v5 = vadd.f32 %v990_v3, %v4632_v34  ;;  %1723 = vmatprep.mubr.bf16.mxu1 %v1264_v1  ;;  %v1180_v11 = vmax.f32 %v989_v4, 0.0  ;;  %v4762_v1 = vrot.slane %v1319_v59, %v4621_v28 }
 0x211   : > { %v992_v7 = vpop.f32.mrf.mxu0  ;;  %1724 = vmatmul.mubr.bf16.gmra.mxu1 %v1263_v2 }
 0x212   : > { %v993_v8 = vadd.f32 %v992_v7, %v4627_v31  ;;  %v1181_v9 = vmax.f32 %v991_v5, 0.0  ;;  %v4768_v7 = vrot.slane %v1319_v59, %v4619_v26 }
 0x213   : > { %v996_v10 = vpop.f32.mrf.mxu0 }
 0x214   : > { %v1182_v12 = vmax.f32 %v993_v8, 0.0  ;;  %v1265_v16 = vpack.c.bf16 %v1181_v9, %v1179_v13  ;;  %v997_v20 = vadd.f32 %v996_v10, %v4632_v34 }
 0x215   : > { %v998_v14 = vpop.f32.mrf.mxu0 }
 0x216   : > { %v1266_v15 = vpack.c.bf16 %v1182_v12, %v1180_v11  ;;  %v999_v18 = vadd.f32 %v998_v14, %v4627_v31  ;;  %v1183_v29 = vmax.f32 %v997_v20, 0.0 }
 0x217   : > { %v1000_v17 = vpop.f32.mrf.mxu0 }
 0x218   : > { %v1001_v19 = vadd.f32 %v1000_v17, %v4632_v34  ;;  %1733 = vmatprep.mubr.bf16.mxu1 %v1266_v15  ;;  %v1184_v25 = vmax.f32 %v999_v18, 0.0 }
 0x219   : > { %v1002_v21 = vpop.f32.mrf.mxu0  ;;  %1734 = vmatmul.mubr.bf16.gmra.mxu1 %v1265_v16 }
 0x21a   : > { %v1003_v22 = vadd.f32 %v1002_v21, %v4627_v31  ;;  %v1185_v23 = vmax.f32 %v1001_v19, 0.0 }
 0x21b   : > { %v1006_v24 = vpop.f32.mrf.mxu0 }
 0x21c   : > { %v1186_v27 = vmax.f32 %v1003_v22, 0.0  ;;  %v1267_v33 = vpack.c.bf16 %v1185_v23, %v1183_v29  ;;  %v1007_v38 = vadd.f32 %v1006_v24, %v4632_v34  ;;  %v4036_v22 = vld [vmem:[%s4507_s20] sm:$0xff]  ;;  %v4037_v24 = vld [vmem:[%s4507_s20 + $0x8] sm:$0xff] }
 0x21d   : > { %v1008_v30 = vpop.f32.mrf.mxu0 }
 0x21e   : > { %v1268_v32 = vpack.c.bf16 %v1186_v27, %v1184_v25  ;;  %v1009_v36 = vadd.f32 %v1008_v30, %v4627_v31  ;;  %v1187_v45 = vmax.f32 %v1007_v38, 0.0 }
 0x21f   : > { %v1010_v35 = vpop.f32.mrf.mxu0 }
 0x220   : > { %v1011_v37 = vadd.f32 %v1010_v35, %v4632_v34  ;;  %1743 = vmatprep.mubr.bf16.mxu1 %v1268_v32  ;;  %v1188_v43 = vmax.f32 %v1009_v36, 0.0  ;;  %v4038_v36 = vld [vmem:[%s4507_s20 + $0x10] sm:$0xff] }
 0x221   : > { %v1012_v39 = vpop.f32.mrf.mxu0  ;;  %1744 = vmatmul.mubr.bf16.gmra.mxu1 %v1267_v33 }
 0x222   : > { %v1013_v40 = vadd.f32 %v1012_v39, %v4627_v31  ;;  %v1189_v41 = vmax.f32 %v1011_v37, 0.0 }
 0x223   : > { %v1016_v42 = vpop.f32.mrf.mxu0 }
 0x224   : > { %v1190_v44 = vmax.f32 %v1013_v40, 0.0  ;;  %v1269_v48 = vpack.c.bf16 %v1189_v41, %v1187_v45  ;;  %v1017_v52 = vadd.f32 %v1016_v42, %v4632_v34  ;;  %v4039_v42 = vld [vmem:[%s4507_s20 + $0x18] sm:$0xff] }
 0x225   : > { %v1018_v46 = vpop.f32.mrf.mxu0 }
 0x226   : > { %v1270_v47 = vpack.c.bf16 %v1190_v44, %v1188_v43  ;;  %v1019_v50 = vadd.f32 %v1018_v46, %v4627_v31  ;;  %v1191_v60 = vmax.f32 %v1017_v52, 0.0 }
 0x227   : > { %v1020_v49 = vpop.f32.mrf.mxu0 }
 0x228   : > { %v1021_v51 = vadd.f32 %v1020_v49, %v4632_v34  ;;  %1753 = vmatprep.mubr.bf16.mxu1 %v1270_v47  ;;  %v1192_v57 = vmax.f32 %v1019_v50, 0.0 }
 0x229   : > { %v1022_v53 = vpop.f32.mrf.mxu0  ;;  %1754 = vmatmul.mubr.bf16.gmra.mxu1 %v1269_v48 }
 0x22a   : > { %v1023_v54 = vadd.f32 %v1022_v53, %v4627_v31  ;;  %v1193_v55 = vmax.f32 %v1021_v51, 0.0 }
 0x22b   : > { %v1026_v56 = vpop.f32.mrf.mxu0 }
 0x22c   : > { %v1194_v58 = vmax.f32 %v1023_v54, 0.0  ;;  %v1271_v63 = vpack.c.bf16 %v1193_v55, %v1191_v60  ;;  %v1027_v4 = vadd.f32 %v1026_v56, %v4632_v34 }
 0x22d   : > { %v1028_v61 = vpop.f32.mrf.mxu0 }
 0x22e   : > { %v1272_v62 = vpack.c.bf16 %v1194_v58, %v1192_v57  ;;  %v1029_v2 = vadd.f32 %v1028_v61, %v4627_v31  ;;  %v1195_v15 = vmax.f32 %v1027_v4, 0.0  ;;  %v4040_v61 = vld [vmem:[%s4507_s20 + $0x20] sm:$0xff] }
 0x22f   : > { %v1030_v0 = vpop.f32.mrf.mxu0 }
 0x230   : > { %v1031_v3 = vadd.f32 %v1030_v0, %v4632_v34  ;;  %1763 = vmatprep.mubr.bf16.mxu1 %v1272_v62  ;;  %v1196_v13 = vmax.f32 %v1029_v2, 0.0 }
 0x231   : > { %v1032_v5 = vpop.f32.mrf.mxu0  ;;  %v1525_v6 = vpop.f32.mrf.mxu1  ;;  %1764 = vmatmul.mubr.bf16.gmra.mxu1 %v1271_v63  ;;  %v4041_v63 = vld [vmem:[%s4507_s20 + $0x28] sm:$0xff] }
 0x232   : > { %v1033_v8 = vadd.f32 %v1032_v5, %v4627_v31  ;;  %v1197_v9 = vmax.f32 %v1031_v3, 0.0  ;;  %v1526_v10 = vadd.f32 %v1525_v6, %v4762_v1 }
 0x233   : > { %v1036_v11 = vpop.f32.mrf.mxu0  ;;  %v1527_v12 = vpop.f32.mrf.mxu1 }
 0x234   : > { %v1198_v14 = vmax.f32 %v1033_v8, 0.0  ;;  %v1528_v16 = vadd.f32 %v1527_v12, %v4768_v7  ;;  %v1273_v21 = vpack.c.bf16 %v1197_v9, %v1195_v15  ;;  %v4775_v23 = vadd.f32 %v4036_v22, %v1526_v10 }
 0x235   : > { %v1038_v17 = vpop.f32.mrf.mxu0  ;;  %v1529_v18 = vpop.f32.mrf.mxu1  ;;  %v1037_v30 = vadd.f32 %v1036_v11, %v4632_v34 }
 0x236   : > { %v1274_v19 = vpack.c.bf16 %v1198_v14, %v1196_v13  ;;  %v1530_v20 = vadd.f32 %v1529_v18, %v4762_v1  ;;  %v4778_v25 = vadd.f32 %v4037_v24, %v1528_v16  ;;  %v1039_v32 = vadd.f32 %v1038_v17, %v4627_v31  ;;  %v4042_v17 = vld [vmem:[%s4507_s20 + $0x38] sm:$0xff] }
 0x237   : > { %v1040_v27 = vpop.f32.mrf.mxu0  ;;  %v1531_v29 = vpop.f32.mrf.mxu1  ;;  %v2164_v49 = vmul.f32 %v4775_v23, %v4775_v23  ;;  %v1199_v50 = vmax.f32 %v1037_v30, 0.0 }
 0x238   : > { %v1041_v33 = vadd.f32 %v1040_v27, %v4632_v34  ;;  %v1532_v35 = vadd.f32 %v1531_v29, %v4768_v7  ;;  %1773 = vmatprep.mubr.bf16.mxu1 %v1274_v19  ;;  %v4785_v37 = vadd.f32 %v4038_v36, %v1530_v20  ;;  %v1972_v40 = vadd.f32 %v4778_v25, %v4775_v23 }
 0x239   : > { %v1042_v38 = vpop.f32.mrf.mxu0  ;;  %v1535_v39 = vpop.f32.mrf.mxu1  ;;  %1774 = vmatmul.mubr.bf16.gmra.mxu1 %v1273_v21  ;;  %v2165_v41 = vmul.f32 %v4778_v25, %v4778_v25  ;;  %v1200_v51 = vmax.f32 %v1039_v32, 0.0  ;;  %v4043_v32 = vld [vmem:[%s4507_s20 + $0x30] sm:$0xff] }
 0x23a   : > { %v4792_v43 = vadd.f32 %v4039_v42, %v1532_v35  ;;  %v1043_v44 = vadd.f32 %v1042_v38, %v4627_v31  ;;  %v1201_v45 = vmax.f32 %v1041_v33, 0.0  ;;  %v1536_v46 = vadd.f32 %v1535_v39, %v4762_v1  ;;  %1973 = vadd.xlane.f32.xlu0 %v1972_v40 }
 0x23b   : > { %v1046_v47 = vpop.f32.mrf.mxu0  ;;  %v1537_v48 = vpop.f32.mrf.mxu1  ;;  %v2292_v56 = vadd.f32 %v2165_v41, %v2164_v49  ;;  %v2166_v57 = vmul.f32 %v4785_v37, %v4785_v37 }
 0x23c   : > { %v1202_v52 = vmax.f32 %v1043_v44, 0.0  ;;  %v1538_v53 = vadd.f32 %v1537_v48, %v4768_v7  ;;  %v2167_v58 = vmul.f32 %v4792_v43, %v4792_v43  ;;  %v1275_v60 = vpack.c.bf16 %v1201_v45, %v1199_v50  ;;  %v4044_v44 = vld [vmem:[%s4507_s20 + $0x40] sm:$0xff] }
 0x23d   : > { %v1048_v54 = vpop.f32.mrf.mxu0  ;;  %v1539_v55 = vpop.f32.mrf.mxu1  ;;  %v4804_v62 = vadd.f32 %v4040_v61, %v1536_v46  ;;  %v1047_v5 = vadd.f32 %v1046_v47, %v4632_v34  ;;  %v1975_v13 = vadd.f32 %v4792_v43, %v4785_v37  ;;  %v4045_v46 = vld [vmem:[%s4507_s20 + $0x48] sm:$0xff]  ;;  %v4046_v61 = vld [vmem:[%s4507_s20 + $0x50] sm:$0xff] }
 0x23e   : > { %v1276_v59 = vpack.c.bf16 %v1202_v52, %v1200_v51  ;;  %v4807_v0 = vadd.f32 %v4041_v63, %v1538_v53  ;;  %2293 = vadd.xlane.f32.xlu0 %v2292_v56  ;;  %v2295_v4 = vadd.f32 %v2167_v58, %v2166_v57  ;;  %v1049_v6 = vadd.f32 %v1048_v54, %v4627_v31 }
 0x23f   : > { %v1050_v2 = vpop.f32.mrf.mxu0  ;;  %v1541_v3 = vpop.f32.mrf.mxu1  ;;  %v1540_v10 = vadd.f32 %v1539_v55, %v4762_v1  ;;  %v2168_v24 = vmul.f32 %v4804_v62, %v4804_v62  ;;  %v1203_v27 = vmax.f32 %v1047_v5, 0.0 }
 0x240   : > { %v1051_v8 = vadd.f32 %v1050_v2, %v4632_v34  ;;  %v1542_v9 = vadd.f32 %v1541_v3, %v4768_v7  ;;  %1783 = vmatprep.mubr.bf16.mxu1 %v1276_v59  ;;  %2296 = vadd.xlane.f32.xlu1 %v2295_v4  ;;  %v2169_v14 = vmul.f32 %v4807_v0, %v4807_v0  ;;  %v1204_v29 = vmax.f32 %v1049_v6, 0.0  ;;  %v4047_v4 = vld [vmem:[%s4507_s20 + $0x58] sm:$0xff] }
 0x241   : > { %v1052_v11 = vpop.f32.mrf.mxu0  ;;  %v1545_v12 = vpop.f32.mrf.mxu1  ;;  %1784 = vmatmul.mubr.bf16.gmra.mxu1 %v1275_v60  ;;  %v1978_v22 = vadd.f32 %v4807_v0, %v4804_v62  ;;  %v4828_v33 = vadd.f32 %v4043_v32, %v1540_v10 }
 0x242   : > { %v1205_v15 = vmax.f32 %v1051_v8, 0.0  ;;  %v1053_v16 = vadd.f32 %v1052_v11, %v4627_v31  ;;  %v4820_v18 = vadd.f32 %v4042_v17, %v1542_v9  ;;  %v1546_v19 = vadd.f32 %v1545_v12, %v4762_v1  ;;  %1976 = vadd.xlane.f32.xlu0 %v1975_v13 }
 0x243   : > { %v1056_v20 = vpop.f32.mrf.mxu0  ;;  %v1547_v21 = vpop.f32.mrf.mxu1  ;;  %v2298_v39 = vadd.f32 %v2169_v14, %v2168_v24  ;;  %v2170_v59 = vmul.f32 %v4828_v33, %v4828_v33  ;;  %v4048_v24 = vld [vmem:[%s4507_s20 + $0x60] sm:$0xff] }
 0x244   : > { %v1206_v30 = vmax.f32 %v1053_v16, 0.0  ;;  %v1548_v35 = vadd.f32 %v1547_v21, %v4768_v7  ;;  %1979 = vadd.xlane.f32.xlu1 %v1978_v22  ;;  %v1277_v40 = vpack.c.bf16 %v1205_v15, %v1203_v27  ;;  %v4833_v45 = vadd.f32 %v4044_v44, %v1546_v19 }
 0x245   : > { %v1058_v36 = vpop.f32.mrf.mxu0  ;;  %v1549_v38 = vpop.f32.mrf.mxu1  ;;  %v1981_v50 = vadd.f32 %v4820_v18, %v4828_v33  ;;  %v2171_v51 = vmul.f32 %v4820_v18, %v4820_v18  ;;  %v1057_v52 = vadd.f32 %v1056_v20, %v4632_v34 }
 0x246   : > { %v1278_v41 = vpack.c.bf16 %v1206_v30, %v1204_v29  ;;  %v1550_v42 = vadd.f32 %v1549_v38, %v4762_v1  ;;  %v4836_v47 = vadd.f32 %v4045_v46, %v1548_v35  ;;  %2299 = vadd.xlane.f32.xlu0 %v2298_v39  ;;  %v1059_v53 = vadd.f32 %v1058_v36, %v4627_v31  ;;  %v4049_v29 = vld [vmem:[%s4507_s20 + $0x68] sm:$0xff] }
 0x247   : > { %v1060_v48 = vpop.f32.mrf.mxu0  ;;  %v1551_v49 = vpop.f32.mrf.mxu1  ;;  %v2301_v10 = vadd.f32 %v2171_v51, %v2170_v59  ;;  %v2172_v11 = vmul.f32 %v4833_v45, %v4833_v45  ;;  %v1207_v12 = vmax.f32 %v1057_v52, 0.0 }
 0x248   : > { %v1061_v54 = vadd.f32 %v1060_v48, %v4632_v34  ;;  %v1552_v55 = vadd.f32 %v1551_v49, %v4768_v7  ;;  %1793 = vmatprep.mubr.bf16.mxu1 %v1278_v41  ;;  %1982 = vadd.xlane.f32.xlu1 %v1981_v50  ;;  %v1984_v58 = vadd.f32 %v4836_v47, %v4833_v45  ;;  %v1208_v13 = vmax.f32 %v1059_v53, 0.0  ;;  %v4050_v53 = vld [vmem:[%s4507_s20 + $0x78] sm:$0xff] }
 0x249   : > { %v1062_v56 = vpop.f32.mrf.mxu0  ;;  %v1555_v57 = vpop.f32.mrf.mxu1  ;;  %1794 = vmatmul.mubr.bf16.gmra.mxu1 %v1277_v40  ;;  %v2173_v60 = vmul.f32 %v4836_v47, %v4836_v47  ;;  %v4853_v63 = vadd.f32 %v4046_v61, %v1550_v42 }
 0x24a   : > { %v1209_v2 = vmax.f32 %v1061_v54, 0.0  ;;  %v1063_v3 = vadd.f32 %v1062_v56, %v4627_v31  ;;  %v4857_v5 = vadd.f32 %v4047_v4, %v1552_v55  ;;  %v1556_v6 = vadd.f32 %v1555_v57, %v4762_v1  ;;  %1985 = vadd.xlane.f32.xlu0 %v1984_v58 }
 0x24b   : > { %v1066_v8 = vpop.f32.mrf.mxu0  ;;  %v1557_v9 = vpop.f32.mrf.mxu1  ;;  %v2304_v19 = vadd.f32 %v2173_v60, %v2172_v11  ;;  %v2174_v22 = vmul.f32 %v4853_v63, %v4853_v63 }
 0x24c   : > { %v1210_v14 = vmax.f32 %v1063_v3, 0.0  ;;  %v1558_v15 = vadd.f32 %v1557_v9, %v4768_v7  ;;  %2302 = vadd.xlane.f32.xlu1 %v2301_v10  ;;  %v1279_v20 = vpack.c.bf16 %v1209_v2, %v1207_v12  ;;  %v4866_v27 = vadd.f32 %v4048_v24, %v1556_v6  ;;  %v4051_v3 = vld [vmem:[%s4507_s20 + $0x70] sm:$0xff] }
 0x24d   : > { %v1068_v16 = vpop.f32.mrf.mxu0  ;;  %v1559_v17 = vpop.f32.mrf.mxu1  ;;  %v1987_v36 = vadd.f32 %v4857_v5, %v4853_v63  ;;  %v2175_v38 = vmul.f32 %v4857_v5, %v4857_v5  ;;  %v1067_v39 = vadd.f32 %v1066_v8, %v4632_v34 }
 0x24e   : > { %v1280_v21 = vpack.c.bf16 %v1210_v14, %v1208_v13  ;;  %v4869_v30 = vadd.f32 %v4049_v29, %v1558_v15  ;;  %2305 = vadd.xlane.f32.xlu0 %v2304_v19  ;;  %v1069_v40 = vadd.f32 %v1068_v16, %v4627_v31  ;;  %v1560_v44 = vadd.f32 %v1559_v17, %v4762_v1  ;;  %v4052_v14 = vld [vmem:[%s4507_s20 + $0x80] sm:$0xff]  ;;  %v4053_v16 = vld [vmem:[%s4507_s20 + $0x88] sm:$0xff] }
 0x24f   : > { %v1070_v32 = vpop.f32.mrf.mxu0  ;;  %v1561_v35 = vpop.f32.mrf.mxu1  ;;  %v2307_v58 = vadd.f32 %v2175_v38, %v2174_v22  ;;  %v2176_v59 = vmul.f32 %v4866_v27, %v4866_v27  ;;  %v1211_v60 = vmax.f32 %v1067_v39, 0.0 }
 0x250   : > { %v1071_v41 = vadd.f32 %v1070_v32, %v4632_v34  ;;  %v1562_v42 = vadd.f32 %v1561_v35, %v4768_v7  ;;  %1803 = vmatprep.mubr.bf16.mxu1 %v1280_v21  ;;  %1988 = vadd.xlane.f32.xlu1 %v1987_v36  ;;  %v1990_v49 = vadd.f32 %v4869_v30, %v4866_v27  ;;  %v1212_v61 = vmax.f32 %v1069_v40, 0.0 }
 0x251   : > { %v1072_v46 = vpop.f32.mrf.mxu0  ;;  %v1565_v48 = vpop.f32.mrf.mxu1  ;;  %1804 = vmatmul.mubr.bf16.gmra.mxu1 %v1279_v20  ;;  %v2177_v50 = vmul.f32 %v4869_v30, %v4869_v30  ;;  %v4892_v4 = vadd.f32 %v4051_v3, %v1560_v44 }
 0x252   : > { %v1213_v51 = vmax.f32 %v1071_v41, 0.0  ;;  %v1073_v52 = vadd.f32 %v1072_v46, %v4627_v31  ;;  %v4886_v54 = vadd.f32 %v4050_v53, %v1562_v42  ;;  %v1566_v55 = vadd.f32 %v1565_v48, %v4762_v1  ;;  %1991 = vadd.xlane.f32.xlu0 %v1990_v49  ;;  %v4054_v42 = vld [vmem:[%s4507_s20 + $0x90] sm:$0xff]  ;;  %v4055_v49 = vld [vmem:[%s4507_s20 + $0x98] sm:$0xff] }
 0x253   : > { %v1076_v56 = vpop.f32.mrf.mxu0  ;;  %v1567_v57 = vpop.f32.mrf.mxu1  ;;  %v2310_v10 = vadd.f32 %v2177_v50, %v2176_v59  ;;  %v2178_v40 = vmul.f32 %v4892_v4, %v4892_v4 }
 0x254   : > { %v1214_v2 = vmax.f32 %v1073_v52, 0.0  ;;  %v1568_v6 = vadd.f32 %v1567_v57, %v4768_v7  ;;  %2308 = vadd.xlane.f32.xlu1 %v2307_v58  ;;  %v1281_v11 = vpack.c.bf16 %v1213_v51, %v1211_v60  ;;  %v4897_v15 = vadd.f32 %v4052_v14, %v1566_v55 }
 0x255   : > { %v1078_v8 = vpop.f32.mrf.mxu0  ;;  %v1569_v9 = vpop.f32.mrf.mxu1  ;;  %v1993_v21 = vadd.f32 %v4886_v54, %v4892_v4  ;;  %v2179_v22 = vmul.f32 %v4886_v54, %v4886_v54  ;;  %v1077_v24 = vadd.f32 %v1076_v56, %v4632_v34 }
 0x256   : > { %v1282_v12 = vpack.c.bf16 %v1214_v2, %v1212_v61  ;;  %v1570_v13 = vadd.f32 %v1569_v9, %v4762_v1  ;;  %v4900_v17 = vadd.f32 %v4053_v16, %v1568_v6  ;;  %2311 = vadd.xlane.f32.xlu0 %v2310_v10  ;;  %v1079_v29 = vadd.f32 %v1078_v8, %v4627_v31  ;;  %v4056_v10 = vld [vmem:[%s4507_s20 + $0xa0] sm:$0xff] }
 0x257   : > { %v1080_v19 = vpop.f32.mrf.mxu0  ;;  %v1571_v20 = vpop.f32.mrf.mxu1  ;;  %v2313_v55 = vadd.f32 %v2179_v22, %v2178_v40  ;;  %v2180_v56 = vmul.f32 %v4897_v15, %v4897_v15  ;;  %v1215_v57 = vmax.f32 %v1077_v24, 0.0 }
 0x258   : > { %v1081_v32 = vadd.f32 %v1080_v19, %v4632_v34  ;;  %v1572_v35 = vadd.f32 %v1571_v20, %v4768_v7  ;;  %1813 = vmatprep.mubr.bf16.mxu1 %v1282_v12  ;;  %1994 = vadd.xlane.f32.xlu1 %v1993_v21  ;;  %v1996_v39 = vadd.f32 %v4900_v17, %v4897_v15  ;;  %v1216_v58 = vmax.f32 %v1079_v29, 0.0  ;;  %v4057_v12 = vld [vmem:[%s4507_s20 + $0xa8] sm:$0xff] }
 0x259   : > { %v1082_v36 = vpop.f32.mrf.mxu0  ;;  %v1575_v38 = vpop.f32.mrf.mxu1  ;;  %1814 = vmatmul.mubr.bf16.gmra.mxu1 %v1281_v11  ;;  %v2181_v41 = vmul.f32 %v4900_v17, %v4900_v17  ;;  %v4917_v44 = vadd.f32 %v4054_v42, %v1570_v13  ;;  %v4058_v42 = vld [vmem:[%s4507_s20 + $0xb8] sm:$0xff] }
 0x25a   : > { %v1217_v46 = vmax.f32 %v1081_v32, 0.0  ;;  %v1083_v48 = vadd.f32 %v1082_v36, %v4627_v31  ;;  %v4921_v50 = vadd.f32 %v4055_v49, %v1572_v35  ;;  %v1576_v51 = vadd.f32 %v1575_v38, %v4762_v1  ;;  %1997 = vadd.xlane.f32.xlu0 %v1996_v39 }
 0x25b   : > { %v1086_v52 = vpop.f32.mrf.mxu0  ;;  %v1577_v53 = vpop.f32.mrf.mxu1  ;;  %v2316_v3 = vadd.f32 %v2181_v41, %v2180_v56  ;;  %v2182_v9 = vmul.f32 %v4917_v44, %v4917_v44 }
 0x25c   : > { %v1218_v59 = vmax.f32 %v1083_v48, 0.0  ;;  %v1578_v60 = vadd.f32 %v1577_v53, %v4768_v7  ;;  %2314 = vadd.xlane.f32.xlu1 %v2313_v55  ;;  %v1283_v6 = vpack.c.bf16 %v1217_v46, %v1215_v57  ;;  %v4930_v11 = vadd.f32 %v4056_v10, %v1576_v51 }
 0x25d   : > { %v1088_v61 = vpop.f32.mrf.mxu0  ;;  %v1579_v2 = vpop.f32.mrf.mxu1  ;;  %v1999_v19 = vadd.f32 %v4921_v50, %v4917_v44  ;;  %v2183_v20 = vmul.f32 %v4921_v50, %v4921_v50  ;;  %v1087_v21 = vadd.f32 %v1086_v52, %v4632_v34 }
 0x25e   : > { %v1284_v8 = vpack.c.bf16 %v1218_v59, %v1216_v58  ;;  %v4933_v13 = vadd.f32 %v4057_v12, %v1578_v60  ;;  %2317 = vadd.xlane.f32.xlu0 %v2316_v3  ;;  %v1089_v22 = vadd.f32 %v1088_v61, %v4627_v31  ;;  %v1580_v32 = vadd.f32 %v1579_v2, %v4762_v1  ;;  %v4060_v61 = vld [vmem:[%s4507_s20 + $0xc0] sm:$0xff]  ;;  %v4061_v3 = vld [vmem:[%s4507_s20 + $0xc8] sm:$0xff] }
 0x25f   : > { %v1090_v14 = vpop.f32.mrf.mxu0  ;;  %v1581_v16 = vpop.f32.mrf.mxu1  ;;  %v2319_v49 = vadd.f32 %v2183_v20, %v2182_v9  ;;  %v2184_v51 = vmul.f32 %v4930_v11, %v4930_v11  ;;  %v1219_v56 = vmax.f32 %v1087_v21, 0.0 }
 0x260   : > { %v1091_v24 = vadd.f32 %v1090_v14, %v4632_v34  ;;  %v1582_v29 = vadd.f32 %v1581_v16, %v4768_v7  ;;  %1823 = vmatprep.mubr.bf16.mxu1 %v1284_v8  ;;  %2000 = vadd.xlane.f32.xlu1 %v1999_v19  ;;  %v2002_v38 = vadd.f32 %v4933_v13, %v4930_v11  ;;  %v1220_v52 = vmax.f32 %v1089_v22, 0.0 }
 0x261   : > { %v1092_v35 = vpop.f32.mrf.mxu0  ;;  %v1585_v36 = vpop.f32.mrf.mxu1  ;;  %1824 = vmatmul.mubr.bf16.gmra.mxu1 %v1283_v6  ;;  %v2185_v39 = vmul.f32 %v4933_v13, %v4933_v13 }
 0x262   : > { %v1093_v40 = vadd.f32 %v1092_v35, %v4627_v31  ;;  %v1586_v34 = vadd.f32 %v1585_v36, %v4762_v1  ;;  %v1221_v41 = vmax.f32 %v1091_v24, 0.0  ;;  %v4951_v46 = vadd.f32 %v4058_v42, %v1582_v29  ;;  %2003 = vadd.xlane.f32.xlu0 %v2002_v38  ;;  %v4059_v31 = vld [vmem:[%s4507_s20 + $0xb0] sm:$0xff]  ;;  %v4062_v29 = vld [vmem:[%s4507_s20 + $0xd8] sm:$0xff] }
 0x263   : > { %v1587_v48 = vpop.f32.mrf.mxu1  ;;  %v4957_v57 = vadd.f32 %v4059_v31, %v1580_v32  ;;  %v2322_v59 = vadd.f32 %v2185_v39, %v2184_v51  ;;  %v4065_v51 = vld [vmem:[%s4507_s20 + $0xe8] sm:$0xff] }
 0x264   : > { %v1222_v53 = vmax.f32 %v1093_v40, 0.0  ;;  %v1588_v55 = vadd.f32 %v1587_v48, %v4768_v7  ;;  %2320 = vadd.xlane.f32.xlu1 %v2319_v49  ;;  %v4960_v2 = vadd.f32 %v4060_v61, %v1586_v34  ;;  %v1285_v8 = vpack.c.bf16 %v1221_v41, %v1219_v56  ;;  %v4063_v40 = vld [vmem:[%s4507_s20 + $0xd0] sm:$0xff]  ;;  %v4064_v48 = vld [vmem:[%s4507_s20 + $0xe0] sm:$0xff] }
 0x265   : > { %v1589_v58 = vpop.f32.mrf.mxu1  ;;  %v2005_v10 = vadd.f32 %v4951_v46, %v4957_v57  ;;  %v2187_v12 = vmul.f32 %v4951_v46, %v4951_v46  ;;  %v2186_v21 = vmul.f32 %v4957_v57, %v4957_v57 }
 0x266   : > { %v1286_v60 = vpack.c.bf16 %v1222_v53, %v1220_v52  ;;  %v4963_v6 = vadd.f32 %v4061_v3, %v1588_v55  ;;  %2323 = vadd.xlane.f32.xlu0 %v2322_v59  ;;  %v1590_v19 = vadd.f32 %v1589_v58, %v4762_v1  ;;  %v2188_v38 = vmul.f32 %v4960_v2, %v4960_v2 }
 0x267   : > { %v1591_v9 = vpop.f32.mrf.mxu1  ;;  %v2325_v36 = vadd.f32 %v2187_v12, %v2186_v21 }
 0x268   : > { %v1592_v14 = vadd.f32 %v1591_v9, %v4768_v7  ;;  %1833 = vmatprep.mubr.bf16.mxu1 %v1286_v60  ;;  %v2008_v16 = vadd.f32 %v4963_v6, %v4960_v2  ;;  %2006 = vadd.xlane.f32.xlu1 %v2005_v10  ;;  %v2189_v22 = vmul.f32 %v4963_v6, %v4963_v6  ;;  %v4066_v9 = vld [vmem:[%s4507_s20 + $0xf8] sm:$0xff] }
 0x269   : > { %v1595_v20 = vpop.f32.mrf.mxu1  ;;  %1834 = vmatmul.mubr.bf16.gmra.mxu1 %v1285_v8  ;;  %v4985_v34 = vadd.f32 %v4063_v40, %v1590_v19 }
 0x26a   : > { %v1596_v24 = vadd.f32 %v1595_v20, %v4762_v1  ;;  %v4979_v32 = vadd.f32 %v4062_v29, %v1592_v14  ;;  %2009 = vadd.xlane.f32.xlu0 %v2008_v16  ;;  %v2328_v42 = vadd.f32 %v2189_v22, %v2188_v38  ;;  %v4067_v20 = vld [vmem:[%s4507_s20 + $0xf0] sm:$0xff]  ;;  %v4068_v29 = vld [vmem:[%s4507_s20 + $0x100] sm:$0xff] }
 0x26b   : > { %v1597_v35 = vpop.f32.mrf.mxu1  ;;  %v2190_v61 = vmul.f32 %v4985_v34, %v4985_v34 }
 0x26c   : > { %v1598_v39 = vadd.f32 %v1597_v35, %v4768_v7  ;;  %2326 = vadd.xlane.f32.xlu1 %v2325_v36  ;;  %v4988_v49 = vadd.f32 %v4064_v48, %v1596_v24  ;;  %v2011_v55 = vadd.f32 %v4979_v32, %v4985_v34  ;;  %v2191_v56 = vmul.f32 %v4979_v32, %v4979_v32  ;;  %v4069_v36 = vld [vmem:[%s4507_s20 + $0x108] sm:$0xff] }
 0x26d   : > { %v1599_v41 = vpop.f32.mrf.mxu1 }
 0x26e   : > { %7131 = vst [vmem:[#allocation12_spill] sm:$0xff] %v4988_v49  ;;  %v4991_v52 = vadd.f32 %v4065_v51, %v1598_v39  ;;  %2329 = vadd.xlane.f32.xlu0 %v2328_v42  ;;  %v1600_v59 = vadd.f32 %v1599_v41, %v4762_v1  ;;  %v2331_v14 = vadd.f32 %v2191_v56, %v2190_v61 }
 0x26f   : > { %v1601_v53 = vpop.f32.mrf.mxu1  ;;  %v2192_v16 = vmul.f32 %v4988_v49, %v4988_v49 }
 0x270   : > { %7132 = vst [vmem:[#allocation13_spill] sm:$0xff] %v4991_v52  ;;  %v1602_v31 = vadd.f32 %v1601_v53, %v4768_v7  ;;  %v2014_v58 = vadd.f32 %v4991_v52, %v4988_v49  ;;  %2012 = vadd.xlane.f32.xlu1 %v2011_v55  ;;  %v2193_v3 = vmul.f32 %v4991_v52, %v4991_v52 }
 0x271   : > { %v1605_v60 = vpop.f32.mrf.mxu1  ;;  %v5013_v21 = vadd.f32 %v4067_v20, %v1600_v59 }
 0x272   : > { %v1606_v8 = vadd.f32 %v1605_v60, %v4762_v1  ;;  %v5007_v10 = vadd.f32 %v4066_v9, %v1602_v31  ;;  %2015 = vadd.xlane.f32.xlu0 %v2014_v58  ;;  %v2334_v24 = vadd.f32 %v2193_v3, %v2192_v16  ;;  %v4070_v58 = vld [vmem:[%s4507_s20 + $0x118] sm:$0xff]  ;;  %v4071_v9 = vld [vmem:[%s4507_s20 + $0x110] sm:$0xff] }
 0x273   : > { %v1607_v12 = vpop.f32.mrf.mxu1  ;;  %7134 = vst [vmem:[#allocation15_spill] sm:$0xff] %v5013_v21  ;;  %v2194_v55 = vmul.f32 %v5013_v21, %v5013_v21 }
 0x274   : > { %7133 = vst [vmem:[#allocation14_spill] sm:$0xff] %v5007_v10  ;;  %v1608_v19 = vadd.f32 %v1607_v12, %v4768_v7  ;;  %2332 = vadd.xlane.f32.xlu1 %v2331_v14  ;;  %v5016_v35 = vadd.f32 %v4068_v29, %v1606_v8  ;;  %v2017_v40 = vadd.f32 %v5007_v10, %v5013_v21 }
 0x275   : > { %v1609_v22 = vpop.f32.mrf.mxu1  ;;  %v2195_v41 = vmul.f32 %v5007_v10, %v5007_v10 }
 0x276   : > { %7135 = vst [vmem:[#allocation16_spill] sm:$0xff] %v5016_v35  ;;  %v5019_v38 = vadd.f32 %v4069_v36, %v1608_v19  ;;  %2335 = vadd.xlane.f32.xlu0 %v2334_v24  ;;  %v1610_v51 = vadd.f32 %v1609_v22, %v4762_v1  ;;  %v2196_v3 = vmul.f32 %v5016_v35, %v5016_v35  ;;  %v4072_v19 = vld [vmem:[%s4507_s20 + $0x120] sm:$0xff]  ;;  %v4073_v22 = vld [vmem:[%s4507_s20 + $0x128] sm:$0xff] }
 0x277   : > { %v1611_v39 = vpop.f32.mrf.mxu1  ;;  %v2337_v61 = vadd.f32 %v2195_v41, %v2194_v55 }
 0x278   : > { %7136 = vst [vmem:[#allocation17_spill] sm:$0xff] %v5019_v38  ;;  %v1612_v42 = vadd.f32 %v1611_v39, %v4768_v7  ;;  %v2020_v48 = vadd.f32 %v5019_v38, %v5016_v35  ;;  %2018 = vadd.xlane.f32.xlu1 %v2017_v40  ;;  %v2197_v56 = vmul.f32 %v5019_v38, %v5019_v38 }
 0x279   : > { %v1615_v53 = vpop.f32.mrf.mxu1  ;;  %v5041_v12 = vadd.f32 %v4071_v9, %v1610_v51 }
 0x27a   : > { %v1616_v31 = vadd.f32 %v1615_v53, %v4762_v1  ;;  %v5035_v59 = vadd.f32 %v4070_v58, %v1612_v42  ;;  %2021 = vadd.xlane.f32.xlu0 %v2020_v48  ;;  %v2340_v16 = vadd.f32 %v2197_v56, %v2196_v3  ;;  %v4074_v56 = vld [vmem:[%s4507_s20 + $0x138] sm:$0xff] }
 0x27b   : > { %v1617_v60 = vpop.f32.mrf.mxu1  ;;  %7138 = vst [vmem:[#allocation19_spill] sm:$0xff] %v5041_v12  ;;  %v2198_v51 = vmul.f32 %v5041_v12, %v5041_v12 }
 0x27c   : > { %7137 = vst [vmem:[#allocation18_spill] sm:$0xff] %v5035_v59  ;;  %v1618_v8 = vadd.f32 %v1617_v60, %v4768_v7  ;;  %2338 = vadd.xlane.f32.xlu1 %v2337_v61  ;;  %v5044_v20 = vadd.f32 %v4072_v19, %v1616_v31  ;;  %v2023_v36 = vadd.f32 %v5035_v59, %v5041_v12  ;;  %v4076_v19 = vld [vmem:[%s4507_s20 + $0x140] sm:$0xff] }
 0x27d   : > { %v1619_v14 = vpop.f32.mrf.mxu1  ;;  %v2199_v39 = vmul.f32 %v5035_v59, %v5035_v59 }
 0x27e   : > { %7139 = vst [vmem:[#allocation20_spill] sm:$0xff] %v5044_v20  ;;  %v5047_v24 = vadd.f32 %v4073_v22, %v1618_v8  ;;  %2341 = vadd.xlane.f32.xlu0 %v2340_v16  ;;  %v1620_v42 = vadd.f32 %v1619_v14, %v4762_v1  ;;  %v2200_v61 = vmul.f32 %v5044_v20, %v5044_v20  ;;  %v4075_v8 = vld [vmem:[%s4507_s20 + $0x130] sm:$0xff] }
 0x27f   : > { %v1621_v29 = vpop.f32.mrf.mxu1  ;;  %v2343_v60 = vadd.f32 %v2199_v39, %v2198_v51 }
 0x280   : > { %7140 = vst [vmem:[#allocation21_spill] sm:$0xff] %v5047_v24  ;;  %v1622_v40 = vadd.f32 %v1621_v29, %v4768_v7  ;;  %v2026_v41 = vadd.f32 %v5047_v24, %v5044_v20  ;;  %2024 = vadd.xlane.f32.xlu1 %v2023_v36  ;;  %v2201_v53 = vmul.f32 %v5047_v24, %v5047_v24  ;;  %v4077_v29 = vld [vmem:[%s4507_s20 + $0x148] sm:$0xff] }
 0x281   : > { %v1625_v48 = vpop.f32.mrf.mxu1  ;;  %v5069_v9 = vadd.f32 %v4075_v8, %v1620_v42 }
 0x282   : > { %v1626_v55 = vadd.f32 %v1625_v48, %v4762_v1  ;;  %v5063_v31 = vadd.f32 %v4074_v56, %v1622_v40  ;;  %2027 = vadd.xlane.f32.xlu0 %v2026_v41  ;;  %v2346_v16 = vadd.f32 %v2201_v53, %v2200_v61 }
 0x283   : > { %v1627_v58 = vpop.f32.mrf.mxu1  ;;  %7142 = vst [vmem:[#allocation23_spill] sm:$0xff] %v5069_v9 }
 0x284   : > { %7141 = vst [vmem:[#allocation22_spill] sm:$0xff] %v5063_v31  ;;  %v1628_v3 = vadd.f32 %v1627_v58, %v4768_v7  ;;  %2344 = vadd.xlane.f32.xlu1 %v2343_v60  ;;  %v5072_v22 = vadd.f32 %v4076_v19, %v1626_v55  ;;  %v2029_v40 = vadd.f32 %v5063_v31, %v5069_v9  ;;  %v4078_v60 = vld [vmem:[%s4507_s20 + $0x158] sm:$0xff]  ;;  %v4079_v19 = vld [vmem:[%s4507_s20 + $0x150] sm:$0xff] }
 0x285   : > { %v1629_v14 = vpop.f32.mrf.mxu1  ;;  %v2203_v41 = vmul.f32 %v5063_v31, %v5063_v31  ;;  %v2202_v55 = vmul.f32 %v5069_v9, %v5069_v9  ;;  %v4108_v31 = vld [vmem:[%s4507_s20 + $0x240] sm:$0xff] }
 0x286   : > { %7143 = vst [vmem:[#allocation24_spill] sm:$0xff] %v5072_v22  ;;  %v5075_v36 = vadd.f32 %v4077_v29, %v1628_v3  ;;  %2347 = vadd.xlane.f32.xlu0 %v2346_v16  ;;  %v1630_v51 = vadd.f32 %v1629_v14, %v4762_v1  ;;  %v2204_v14 = vmul.f32 %v5072_v22, %v5072_v22 }
 0x287   : > { %v1631_v39 = vpop.f32.mrf.mxu1  ;;  %v2349_v8 = vadd.f32 %v2203_v41, %v2202_v55 }
 0x288   : > { %7144 = vst [vmem:[#allocation25_spill] sm:$0xff] %v5075_v36  ;;  %v1632_v42 = vadd.f32 %v1631_v39, %v4768_v7  ;;  %v2032_v48 = vadd.f32 %v5075_v36, %v5072_v22  ;;  %2030 = vadd.xlane.f32.xlu1 %v2029_v40  ;;  %v2205_v56 = vmul.f32 %v5075_v36, %v5075_v36  ;;  %v4080_v36 = vld [vmem:[%s4507_s20 + $0x160] sm:$0xff] }
 0x289   : > { %v1635_v53 = vpop.f32.mrf.mxu1  ;;  %v5097_v29 = vadd.f32 %v4079_v19, %v1630_v51  ;;  %v4084_v22 = vld [vmem:[%s4507_s20 + $0x180] sm:$0xff] }
 0x28a   : > { %v1636_v58 = vadd.f32 %v1635_v53, %v4762_v1  ;;  %v5091_v61 = vadd.f32 %v4078_v60, %v1632_v42  ;;  %2033 = vadd.xlane.f32.xlu0 %v2032_v48  ;;  %v2352_v40 = vadd.f32 %v2205_v56, %v2204_v14  ;;  %v4081_v42 = vld [vmem:[%s4507_s20 + $0x168] sm:$0xff] }
 0x28b   : > { %v1637_v3 = vpop.f32.mrf.mxu1  ;;  %7146 = vst [vmem:[#allocation27_spill] sm:$0xff] %v5097_v29 }
 0x28c   : > { %7145 = vst [vmem:[#allocation26_spill] sm:$0xff] %v5091_v61  ;;  %v1638_v16 = vadd.f32 %v1637_v3, %v4768_v7  ;;  %2350 = vadd.xlane.f32.xlu1 %v2349_v8  ;;  %v5100_v53 = vadd.f32 %v4080_v36, %v1636_v58  ;;  %v2035_v48 = vadd.f32 %v5091_v61, %v5097_v29 }
 0x28d   : > { %v1639_v39 = vpop.f32.mrf.mxu1  ;;  %v2207_v55 = vmul.f32 %v5091_v61, %v5091_v61  ;;  %v2206_v3 = vmul.f32 %v5097_v29, %v5097_v29 }
 0x28e   : > { %7147 = vst [vmem:[#allocation28_spill] sm:$0xff] %v5100_v53  ;;  %v5103_v60 = vadd.f32 %v4081_v42, %v1638_v16  ;;  %2353 = vadd.xlane.f32.xlu0 %v2352_v40  ;;  %v1640_v36 = vadd.f32 %v1639_v39, %v4762_v1  ;;  %v4082_v16 = vld [vmem:[%s4507_s20 + $0x178] sm:$0xff]  ;;  %v2208_v39 = vmul.f32 %v5100_v53, %v5100_v53 }
 0x28f   : > { %v1641_v41 = vpop.f32.mrf.mxu1  ;;  %v2355_v42 = vadd.f32 %v2207_v55, %v2206_v3 }
 0x290   : > { %7148 = vst [vmem:[#allocation29_spill] sm:$0xff] %v5103_v60  ;;  %v1642_v51 = vadd.f32 %v1641_v41, %v4768_v7  ;;  %v2038_v56 = vadd.f32 %v5103_v60, %v5100_v53  ;;  %2036 = vadd.xlane.f32.xlu1 %v2035_v48  ;;  %v2209_v8 = vmul.f32 %v5103_v60, %v5103_v60  ;;  %v4083_v48 = vld [vmem:[%s4507_s20 + $0x170] sm:$0xff]  ;;  %v4088_v53 = vld [vmem:[%s4507_s20 + $0x1a0] sm:$0xff] }
 0x291   : > { %v1645_v58 = vpop.f32.mrf.mxu1  ;;  %v5125_v61 = vadd.f32 %v4083_v48, %v1640_v36 }
 0x292   : > { %v1646_v14 = vadd.f32 %v1645_v58, %v4762_v1  ;;  %v5119_v19 = vadd.f32 %v4082_v16, %v1642_v51  ;;  %2039 = vadd.xlane.f32.xlu0 %v2038_v56  ;;  %v2358_v60 = vadd.f32 %v2209_v8, %v2208_v39  ;;  %v4085_v51 = vld [vmem:[%s4507_s20 + $0x188] sm:$0xff]  ;;  %v4086_v39 = vld [vmem:[%s4507_s20 + $0x198] sm:$0xff] }
 0x293   : > { %v1647_v40 = vpop.f32.mrf.mxu1  ;;  %7150 = vst [vmem:[#allocation31_spill] sm:$0xff] %v5125_v61 }
 0x294   : > { %7149 = vst [vmem:[#allocation30_spill] sm:$0xff] %v5119_v19  ;;  %v1648_v41 = vadd.f32 %v1647_v40, %v4768_v7  ;;  %2356 = vadd.xlane.f32.xlu1 %v2355_v42  ;;  %v5128_v58 = vadd.f32 %v4084_v22, %v1646_v14  ;;  %v2041_v56 = vadd.f32 %v5119_v19, %v5125_v61 }
 0x295   : > { %v1649_v29 = vpop.f32.mrf.mxu1  ;;  %v2211_v3 = vmul.f32 %v5119_v19, %v5119_v19 }
 0x296   : > { %7151 = vst [vmem:[#allocation32_spill] sm:$0xff] %v5128_v58  ;;  %v5131_v16 = vadd.f32 %v4085_v51, %v1648_v41  ;;  %2359 = vadd.xlane.f32.xlu0 %v2358_v60  ;;  %v1650_v22 = vadd.f32 %v1649_v29, %v4762_v1  ;;  %v2210_v60 = vmul.f32 %v5125_v61, %v5125_v61 }
 0x297   : > { %v1651_v55 = vpop.f32.mrf.mxu1  ;;  %v2212_v29 = vmul.f32 %v5128_v58, %v5128_v58 }
 0x298   : > { %7152 = vst [vmem:[#allocation33_spill] sm:$0xff] %v5131_v16  ;;  %v1652_v36 = vadd.f32 %v1651_v55, %v4768_v7  ;;  %v2044_v8 = vadd.f32 %v5131_v16, %v5128_v58  ;;  %2042 = vadd.xlane.f32.xlu1 %v2041_v56  ;;  %v2213_v40 = vmul.f32 %v5131_v16, %v5131_v16  ;;  %v4087_v56 = vld [vmem:[%s4507_s20 + $0x190] sm:$0xff]  ;;  %v4092_v58 = vld [vmem:[%s4507_s20 + $0x1c0] sm:$0xff] }
 0x299   : > { %v1655_v14 = vpop.f32.mrf.mxu1  ;;  %v2361_v51 = vadd.f32 %v2211_v3, %v2210_v60  ;;  %v5153_v19 = vadd.f32 %v4087_v56, %v1650_v22 }
 0x29a   : > { %v1656_v42 = vadd.f32 %v1655_v14, %v4762_v1  ;;  %v5147_v41 = vadd.f32 %v4086_v39, %v1652_v36  ;;  %2045 = vadd.xlane.f32.xlu0 %v2044_v8  ;;  %v2364_v16 = vadd.f32 %v2213_v40, %v2212_v29  ;;  %v4089_v36 = vld [vmem:[%s4507_s20 + $0x1a8] sm:$0xff]  ;;  %v4090_v29 = vld [vmem:[%s4507_s20 + $0x1b8] sm:$0xff] }
 0x29b   : > { %v1657_v48 = vpop.f32.mrf.mxu1  ;;  %7154 = vst [vmem:[#allocation35_spill] sm:$0xff] %v5153_v19 }
 0x29c   : > { %7153 = vst [vmem:[#allocation34_spill] sm:$0xff] %v5147_v41  ;;  %v1658_v55 = vadd.f32 %v1657_v48, %v4768_v7  ;;  %2362 = vadd.xlane.f32.xlu1 %v2361_v51  ;;  %v5156_v14 = vadd.f32 %v4088_v53, %v1656_v42  ;;  %v2047_v8 = vadd.f32 %v5147_v41, %v5153_v19 }
 0x29d   : > { %v1659_v61 = vpop.f32.mrf.mxu1  ;;  %v2215_v60 = vmul.f32 %v5147_v41, %v5147_v41 }
 0x29e   : > { %7155 = vst [vmem:[#allocation36_spill] sm:$0xff] %v5156_v14  ;;  %v5159_v39 = vadd.f32 %v4089_v36, %v1658_v55  ;;  %2365 = vadd.xlane.f32.xlu0 %v2364_v16  ;;  %v1660_v53 = vadd.f32 %v1659_v61, %v4762_v1  ;;  %v2214_v16 = vmul.f32 %v5153_v19, %v5153_v19 }
 0x29f   : > { %v1661_v3 = vpop.f32.mrf.mxu1  ;;  %v2216_v61 = vmul.f32 %v5156_v14, %v5156_v14 }
 0x2a0   : > { %7156 = vst [vmem:[#allocation37_spill] sm:$0xff] %v5159_v39  ;;  %v1662_v22 = vadd.f32 %v1661_v3, %v4768_v7  ;;  %v2050_v40 = vadd.f32 %v5159_v39, %v5156_v14  ;;  %2048 = vadd.xlane.f32.xlu1 %v2047_v8  ;;  %v2217_v48 = vmul.f32 %v5159_v39, %v5159_v39  ;;  %v4091_v8 = vld [vmem:[%s4507_s20 + $0x1b0] sm:$0xff]  ;;  %v4096_v14 = vld [vmem:[%s4507_s20 + $0x1e0] sm:$0xff] }
 0x2a1   : > { %v1665_v42 = vpop.f32.mrf.mxu1  ;;  %v2367_v36 = vadd.f32 %v2215_v60, %v2214_v16  ;;  %v5181_v41 = vadd.f32 %v4091_v8, %v1660_v53 }
 0x2a2   : > { %v1666_v51 = vadd.f32 %v1665_v42, %v4762_v1  ;;  %v5175_v55 = vadd.f32 %v4090_v29, %v1662_v22  ;;  %2051 = vadd.xlane.f32.xlu0 %v2050_v40  ;;  %v2370_v39 = vadd.f32 %v2217_v48, %v2216_v61  ;;  %v4093_v22 = vld [vmem:[%s4507_s20 + $0x1c8] sm:$0xff]  ;;  %v4094_v61 = vld [vmem:[%s4507_s20 + $0x1d8] sm:$0xff] }
 0x2a3   : > { %v1667_v56 = vpop.f32.mrf.mxu1  ;;  %7158 = vst [vmem:[#allocation39_spill] sm:$0xff] %v5181_v41 }
 0x2a4   : > { %7157 = vst [vmem:[#allocation38_spill] sm:$0xff] %v5175_v55  ;;  %v1668_v3 = vadd.f32 %v1667_v56, %v4768_v7  ;;  %2368 = vadd.xlane.f32.xlu1 %v2367_v36  ;;  %v5184_v42 = vadd.f32 %v4092_v58, %v1666_v51  ;;  %v2053_v40 = vadd.f32 %v5175_v55, %v5181_v41 }
 0x2a5   : > { %v1669_v19 = vpop.f32.mrf.mxu1  ;;  %v2219_v16 = vmul.f32 %v5175_v55, %v5175_v55 }
 0x2a6   : > { %7159 = vst [vmem:[#allocation40_spill] sm:$0xff] %v5184_v42  ;;  %v5187_v29 = vadd.f32 %v4093_v22, %v1668_v3  ;;  %2371 = vadd.xlane.f32.xlu0 %v2370_v39  ;;  %v1670_v58 = vadd.f32 %v1669_v19, %v4762_v1  ;;  %v2218_v39 = vmul.f32 %v5181_v41, %v5181_v41 }
 0x2a7   : > { %v1671_v60 = vpop.f32.mrf.mxu1  ;;  %v2220_v19 = vmul.f32 %v5184_v42, %v5184_v42 }
 0x2a8   : > { %7160 = vst [vmem:[#allocation41_spill] sm:$0xff] %v5187_v29  ;;  %v1672_v53 = vadd.f32 %v1671_v60, %v4768_v7  ;;  %v2056_v48 = vadd.f32 %v5187_v29, %v5184_v42  ;;  %2054 = vadd.xlane.f32.xlu1 %v2053_v40  ;;  %v2221_v56 = vmul.f32 %v5187_v29, %v5187_v29  ;;  %v4095_v40 = vld [vmem:[%s4507_s20 + $0x1d0] sm:$0xff]  ;;  %v4100_v42 = vld [vmem:[%s4507_s20 + $0x200] sm:$0xff] }
 0x2a9   : > { %v1675_v51 = vpop.f32.mrf.mxu1  ;;  %v2373_v22 = vadd.f32 %v2219_v16, %v2218_v39  ;;  %v5209_v55 = vadd.f32 %v4095_v40, %v1670_v58 }
 0x2aa   : > { %v1676_v36 = vadd.f32 %v1675_v51, %v4762_v1  ;;  %v5203_v3 = vadd.f32 %v4094_v61, %v1672_v53  ;;  %2057 = vadd.xlane.f32.xlu0 %v2056_v48  ;;  %v2376_v29 = vadd.f32 %v2221_v56, %v2220_v19  ;;  %v4097_v53 = vld [vmem:[%s4507_s20 + $0x1e8] sm:$0xff]  ;;  %v4098_v19 = vld [vmem:[%s4507_s20 + $0x1f8] sm:$0xff] }
 0x2ab   : > { %v1677_v8 = vpop.f32.mrf.mxu1  ;;  %7162 = vst [vmem:[#allocation43_spill] sm:$0xff] %v5209_v55 }
 0x2ac   : > { %7161 = vst [vmem:[#allocation42_spill] sm:$0xff] %v5203_v3  ;;  %v1678_v60 = vadd.f32 %v1677_v8, %v4768_v7  ;;  %2374 = vadd.xlane.f32.xlu1 %v2373_v22  ;;  %v5212_v51 = vadd.f32 %v4096_v14, %v1676_v36  ;;  %v2059_v48 = vadd.f32 %v5203_v3, %v5209_v55 }
 0x2ad   : > { %v1679_v41 = vpop.f32.mrf.mxu1  ;;  %v2223_v39 = vmul.f32 %v5203_v3, %v5203_v3 }
 0x2ae   : > { %7163 = vst [vmem:[#allocation44_spill] sm:$0xff] %v5212_v51  ;;  %v5215_v61 = vadd.f32 %v4097_v53, %v1678_v60  ;;  %2377 = vadd.xlane.f32.xlu0 %v2376_v29  ;;  %v1680_v14 = vadd.f32 %v1679_v41, %v4762_v1  ;;  %v2222_v29 = vmul.f32 %v5209_v55, %v5209_v55 }
 0x2af   : > { %v1681_v16 = vpop.f32.mrf.mxu1  ;;  %v2224_v41 = vmul.f32 %v5212_v51, %v5212_v51 }
 0x2b0   : > { %7164 = vst [vmem:[#allocation45_spill] sm:$0xff] %v5215_v61  ;;  %v1682_v58 = vadd.f32 %v1681_v16, %v4768_v7  ;;  %v2062_v56 = vadd.f32 %v5215_v61, %v5212_v51  ;;  %2060 = vadd.xlane.f32.xlu1 %v2059_v48  ;;  %v2225_v8 = vmul.f32 %v5215_v61, %v5215_v61  ;;  %v4099_v48 = vld [vmem:[%s4507_s20 + $0x1f0] sm:$0xff]  ;;  %v4104_v51 = vld [vmem:[%s4507_s20 + $0x220] sm:$0xff] }
 0x2b1   : > { %v1685_v36 = vpop.f32.mrf.mxu1  ;;  %v2379_v53 = vadd.f32 %v2223_v39, %v2222_v29  ;;  %v5237_v3 = vadd.f32 %v4099_v48, %v1680_v14 }
 0x2b2   : > { %v1686_v22 = vadd.f32 %v1685_v36, %v4762_v1  ;;  %v5231_v60 = vadd.f32 %v4098_v19, %v1682_v58  ;;  %2063 = vadd.xlane.f32.xlu0 %v2062_v56  ;;  %v2382_v61 = vadd.f32 %v2225_v8, %v2224_v41  ;;  %v4101_v58 = vld [vmem:[%s4507_s20 + $0x208] sm:$0xff]  ;;  %v4102_v41 = vld [vmem:[%s4507_s20 + $0x218] sm:$0xff] }
 0x2b3   : > { %v1687_v40 = vpop.f32.mrf.mxu1  ;;  %7166 = vst [vmem:[#allocation47_spill] sm:$0xff] %v5237_v3 }
 0x2b4   : > { %7165 = vst [vmem:[#allocation46_spill] sm:$0xff] %v5231_v60  ;;  %v1688_v16 = vadd.f32 %v1687_v40, %v4768_v7  ;;  %2380 = vadd.xlane.f32.xlu1 %v2379_v53  ;;  %v5240_v36 = vadd.f32 %v4100_v42, %v1686_v22  ;;  %v2065_v56 = vadd.f32 %v5231_v60, %v5237_v3 }
 0x2b5   : > { %v1689_v55 = vpop.f32.mrf.mxu1  ;;  %v2227_v29 = vmul.f32 %v5231_v60, %v5231_v60 }
 0x2b6   : > { %7167 = vst [vmem:[#allocation48_spill] sm:$0xff] %v5240_v36  ;;  %v5243_v19 = vadd.f32 %v4101_v58, %v1688_v16  ;;  %2383 = vadd.xlane.f32.xlu0 %v2382_v61  ;;  %v1690_v42 = vadd.f32 %v1689_v55, %v4762_v1  ;;  %v2226_v61 = vmul.f32 %v5237_v3, %v5237_v3 }
 0x2b7   : > { %v1691_v39 = vpop.f32.mrf.mxu1  ;;  %v2228_v55 = vmul.f32 %v5240_v36, %v5240_v36 }
 0x2b8   : > { %7168 = vst [vmem:[#allocation49_spill] sm:$0xff] %v5243_v19  ;;  %v1692_v14 = vadd.f32 %v1691_v39, %v4768_v7  ;;  %v2068_v8 = vadd.f32 %v5243_v19, %v5240_v36  ;;  %2066 = vadd.xlane.f32.xlu1 %v2065_v56  ;;  %v2229_v40 = vmul.f32 %v5243_v19, %v5243_v19  ;;  %v4103_v56 = vld [vmem:[%s4507_s20 + $0x210] sm:$0xff] }
 0x2b9   : > { %v1695_v22 = vpop.f32.mrf.mxu1  ;;  %v2385_v58 = vadd.f32 %v2227_v29, %v2226_v61  ;;  %v5265_v60 = vadd.f32 %v4103_v56, %v1690_v42 }
 0x2ba   : > { %v1696_v53 = vadd.f32 %v1695_v22, %v4762_v1  ;;  %v5259_v16 = vadd.f32 %v4102_v41, %v1692_v14  ;;  %2069 = vadd.xlane.f32.xlu0 %v2068_v8  ;;  %v2388_v19 = vadd.f32 %v2229_v40, %v2228_v55  ;;  %v4105_v14 = vld [vmem:[%s4507_s20 + $0x228] sm:$0xff]  ;;  %v4106_v55 = vld [vmem:[%s4507_s20 + $0x238] sm:$0xff] }
 0x2bb   : > { %v1697_v48 = vpop.f32.mrf.mxu1  ;;  %7170 = vst [vmem:[#allocation51_spill] sm:$0xff] %v5265_v60 }
 0x2bc   : > { %7169 = vst [vmem:[#allocation50_spill] sm:$0xff] %v5259_v16  ;;  %v1698_v39 = vadd.f32 %v1697_v48, %v4768_v7  ;;  %2386 = vadd.xlane.f32.xlu1 %v2385_v58  ;;  %v5268_v22 = vadd.f32 %v4104_v51, %v1696_v53  ;;  %v2071_v8 = vadd.f32 %v5259_v16, %v5265_v60 }
 0x2bd   : > { %v1699_v3 = vpop.f32.mrf.mxu1  ;;  %v2231_v61 = vmul.f32 %v5259_v16, %v5259_v16  ;;  %v4107_v16 = vld [vmem:[%s4507_s20 + $0x230] sm:$0xff] }
 0x2be   : > { %7171 = vst [vmem:[#allocation52_spill] sm:$0xff] %v5268_v22  ;;  %v5271_v41 = vadd.f32 %v4105_v14, %v1698_v39  ;;  %2389 = vadd.xlane.f32.xlu0 %v2388_v19  ;;  %v1700_v51 = vadd.f32 %v1699_v3, %v4762_v1  ;;  %v2230_v19 = vmul.f32 %v5265_v60, %v5265_v60 }
 0x2bf   : > { %v1701_v29 = vpop.f32.mrf.mxu1  ;;  %v2232_v3 = vmul.f32 %v5268_v22, %v5268_v22 }
 0x2c0   : > { %7172 = vst [vmem:[#allocation53_spill] sm:$0xff] %v5271_v41  ;;  %v1702_v42 = vadd.f32 %v1701_v29, %v4768_v7  ;;  %v2074_v40 = vadd.f32 %v5271_v41, %v5268_v22  ;;  %2072 = vadd.xlane.f32.xlu1 %v2071_v8  ;;  %v2233_v48 = vmul.f32 %v5271_v41, %v5271_v41 }
 0x2c1   : > { %v1705_v53 = vpop.f32.mrf.mxu1  ;;  %v2391_v14 = vadd.f32 %v2231_v61, %v2230_v19  ;;  %v5293_v60 = vadd.f32 %v4107_v16, %v1700_v51 }
 0x2c2   : > { %v1706_v58 = vadd.f32 %v1705_v53, %v4762_v1  ;;  %v5287_v39 = vadd.f32 %v4106_v55, %v1702_v42  ;;  %2075 = vadd.xlane.f32.xlu0 %v2074_v40  ;;  %v2394_v36 = vadd.f32 %v2233_v48, %v2232_v3  ;;  %v4109_v40 = vld [vmem:[%s4507_s20 + $0x248] sm:$0xff] }
 0x2c3   : > { %v1707_v56 = vpop.f32.mrf.mxu1  ;;  %v1974_v8 = vpop.xlane.xlu0 %1973  ;;  %7174 = vst [vmem:[#allocation55_spill] sm:$0xff] %v5293_v60  ;;  %v2234_v3 = vmul.f32 %v5293_v60, %v5293_v60 }
 0x2c4   : > { %7173 = vst [vmem:[#allocation54_spill] sm:$0xff] %v5287_v39  ;;  %v1708_v29 = vadd.f32 %v1707_v56, %v4768_v7  ;;  %v5295_v41 = vmul.f32 0.00390625, %v1974_v8  ;;  %2392 = vadd.xlane.f32.xlu1 %v2391_v14  ;;  %v5298_v42 = vadd.f32 %v4108_v31, %v1706_v58  ;;  %v2077_v55 = vadd.f32 %v5287_v39, %v5293_v60  ;;  %v4110_v8 = vld [vmem:[%s4507_s20 + $0x258] sm:$0xff] }
 0x2c5   : > { %v1709_v53 = vpop.f32.mrf.mxu1  ;;  %v2235_v16 = vmul.f32 %v5287_v39, %v5287_v39  ;;  %v3264_v39 = vld [vmem:[%s7019_s6] sm:$0x3] }
 0x2c6   : > { %7175 = vst [vmem:[#allocation56_spill] sm:$0xff] %v5298_v42  ;;  %v5301_v61 = vadd.f32 %v4109_v40, %v1708_v29  ;;  %2395 = vadd.xlane.f32.xlu0 %v2394_v36  ;;  %v1710_v51 = vadd.f32 %v1709_v53, %v4762_v1  ;;  %v2612_v58 = vmul.f32 %v5295_v41, %v5295_v41 }
 0x2c7   : > { %v1711_v19 = vpop.f32.mrf.mxu1  ;;  %v2294_v48 = vpop.xlane.xlu0 %2293  ;;  %v2397_v22 = vadd.f32 %v2235_v16, %v2234_v3  ;;  %v2236_v60 = vmul.f32 %v5298_v42, %v5298_v42 }
 0x2c8   : > { %7176 = vst [vmem:[#allocation57_spill] sm:$0xff] %v5301_v61  ;;  %v1712_v56 = vadd.f32 %v1711_v19, %v4768_v7  ;;  %v2080_v31 = vadd.f32 %v5301_v61, %v5298_v42  ;;  %v2548_v36 = vmul.f32 0.00390625, %v2294_v48  ;;  %2078 = vadd.xlane.f32.xlu1 %v2077_v55  ;;  %v2237_v29 = vmul.f32 %v5301_v61, %v5301_v61  ;;  %v4111_v61 = vld [vmem:[%s4507_s20 + $0x250] sm:$0xff] }
 0x2c9   : > { %v1715_v14 = vpop.f32.mrf.mxu1  ;;  %v2297_v19 = vpop.xlane.xlu1 %2296  ;;  %v5327_v9 = vadd.f32 %v4111_v61, %v1710_v51 }
 0x2ca   : > { %v5318_v53 = vadd.f32 %v4110_v8, %v1712_v56  ;;  %v1716_v40 = vadd.f32 %v1715_v14, %v4762_v1  ;;  %v2676_v48 = vsub.f32 %v2548_v36, %v2612_v58  ;;  %2081 = vadd.xlane.f32.xlu0 %v2080_v31  ;;  %v2400_v59 = vadd.f32 %v2237_v29, %v2236_v60  ;;  %v4112_v58 = vld [vmem:[%s4507_s20 + $0x260] sm:$0xff]  ;;  %v4113_v36 = vld [vmem:[%s4507_s20 + $0x268] sm:$0xff] }
 0x2cb   : > { %v1717_v55 = vpop.f32.mrf.mxu1  ;;  %7178 = vst [vmem:[#allocation59_spill] sm:$0xff] %v5327_v9  ;;  %v1977_v14 = vpop.xlane.xlu0 %1976  ;;  %v5333_v31 = vrot.slane %v3264_v39, %v4619_v26 }
 0x2cc   : > { %7177 = vst [vmem:[#allocation58_spill] sm:$0xff] %v5318_v53  ;;  %v1718_v56 = vadd.f32 %v1717_v55, %v4768_v7  ;;  %v2868_v8 = vadd.f32 1e-05, %v2676_v48  ;;  %v5330_v24 = vmul.f32 0.00390625, %v1977_v14  ;;  %2398 = vadd.xlane.f32.xlu1 %v2397_v22  ;;  %v5336_v16 = vadd.f32 %v4112_v58, %v1716_v40  ;;  %v3124_v48 = vld [vmem:[%s7018_s5] sm:$0x3] }
 0x2cd   : > { %v1719_v20 = vpop.f32.mrf.mxu1  ;;  %v1980_v61 = vpop.xlane.xlu1 %1979  ;;  %v2239_v51 = vmul.f32 %v5318_v53, %v5318_v53  ;;  %v2549_v22 = vmul.f32 0.00390625, %v2297_v19  ;;  %v2083_v40 = vadd.f32 %v5318_v53, %v5327_v9  ;;  %v2238_v19 = vmul.f32 %v5327_v9, %v5327_v9 }
 0x2ce   : > { %7179 = vst [vmem:[#allocation60_spill] sm:$0xff] %v5336_v16  ;;  %v5339_v3 = vadd.f32 %v4113_v36, %v1718_v56  ;;  %3908 = vrsqrt.f32 %v2868_v8  ;;  %v2613_v60 = vmul.f32 %v5330_v24, %v5330_v24  ;;  %2401 = vadd.xlane.f32.xlu0 %v2400_v59  ;;  %v5350_v55 = vmul.f32 0.00390625, %v1980_v61 }
 0x2cf   : > { %v1721_v29 = vpop.f32.mrf.mxu1  ;;  %v2300_v14 = vpop.xlane.xlu0 %2299  ;;  %v1720_v36 = vadd.f32 %v1719_v20, %v4762_v1  ;;  %v5361_v53 = vrot.slane %v3124_v48, %v4621_v28  ;;  %v4114_v20 = vld [vmem:[%s4507_s20 + $0x278] sm:$0xff]  ;;  %v2240_v9 = vmul.f32 %v5336_v16, %v5336_v16 }
 0x2d0   : > { %7180 = vst [vmem:[#allocation61_spill] sm:$0xff] %v5339_v3  ;;  %v1722_v56 = vadd.f32 %v1721_v29, %v4768_v7  ;;  %v2086_v58 = vadd.f32 %v5339_v3, %v5336_v16  ;;  %v2677_v8 = vsub.f32 %v2549_v22, %v2613_v60  ;;  %v2550_v59 = vmul.f32 0.00390625, %v2300_v14  ;;  %2084 = vadd.xlane.f32.xlu1 %v2083_v40 }
 0x2d1   : > { %v1725_v42 = vpop.f32.mrf.mxu1  ;;  %v2241_v61 = vmul.f32 %v5339_v3, %v5339_v3  ;;  %v5364_v29 = vrot.slane %v3124_v48, %v4619_v26  ;;  %v2614_v12 = vmul.f32 %v5350_v55, %v5350_v55  ;;  %v1983_v38 = vpop.xlane.xlu1 %1982  ;;  %v2403_v22 = vadd.f32 %v2239_v51, %v2238_v19 }
 0x2d2   : > { %v2869_v60 = vadd.f32 1e-05, %v2677_v8  ;;  %v5369_v14 = vadd.f32 %v4114_v20, %v1722_v56  ;;  %v5371_v40 = vmul.f32 0.00390625, %v1983_v38  ;;  %2087 = vadd.xlane.f32.xlu0 %v2086_v58  ;;  %v5376_v26 = vrot.slane %v3264_v39, %v4621_v28  ;;  %v4115_v38 = vld [vmem:[%s4507_s20 + $0x270] sm:$0xff]  ;;  %v4116_v39 = vld [vmem:[%s4507_s20 + $0x288] sm:$0xff] }
 0x2d3   : > { %v1727_v3 = vpop.f32.mrf.mxu1  ;;  %v2678_v48 = vsub.f32 %v2550_v59, %v2614_v12  ;;  %v1726_v35 = vadd.f32 %v1725_v42, %v4762_v1  ;;  %v1986_v19 = vpop.xlane.xlu0 %1985  ;;  %v2740_v56 = vsub.f32 %v4775_v23, %v5295_v41  ;;  %v5383_v58 = vadd.f32 %v4115_v38, %v1720_v36 }
 0x2d4   : > { %7181 = vst [vmem:[#allocation62_spill] sm:$0xff] %v5369_v14  ;;  %v1728_v51 = vadd.f32 %v1727_v3, %v4768_v7  ;;  %3910 = vrsqrt.f32 %v2869_v60  ;;  %2404 = vadd.xlane.f32.xlu1 %v2403_v22  ;;  %v2406_v20 = vadd.f32 %v2241_v61, %v2240_v9  ;;  %v2741_v28 = vsub.f32 %v4778_v25, %v5295_v41  ;;  %v4117_v22 = vld [vmem:[%s4507_s20 + $0x280] sm:$0xff] }
 0x2d5   : > { %7182 = vst [vmem:[#allocation63_spill] sm:$0xff] %v5383_v58  ;;  %v1729_v8 = vpop.f32.mrf.mxu1  ;;  %v2870_v12 = vadd.f32 1e-05, %v2678_v48  ;;  %v5390_v3 = vmul.f32 0.00390625, %v1986_v19  ;;  %v2303_v59 = vpop.xlane.xlu1 %2302  ;;  %v2615_v23 = vmul.f32 %v5371_v40, %v5371_v40  ;;  %v2089_v9 = vadd.f32 %v5369_v14, %v5383_v58 }
 0x2d6   : > { %v5388_v42 = vadd.f32 %v4116_v39, %v1728_v51  ;;  %v2551_v60 = vmul.f32 0.00390625, %v2303_v59  ;;  %2407 = vadd.xlane.f32.xlu0 %v2406_v20  ;;  %v2243_v61 = vmul.f32 %v5369_v14, %v5369_v14  ;;  %v5403_v48 = vadd.f32 %v4117_v22, %v1726_v35 }
 0x2d7   : > { %v1731_v36 = vpop.f32.mrf.mxu1  ;;  %3912 = vrsqrt.f32 %v2870_v12  ;;  %v2306_v51 = vpop.xlane.xlu0 %2305  ;;  %v2616_v38 = vmul.f32 %v5390_v3, %v5390_v3  ;;  %v2242_v59 = vmul.f32 %v5383_v58, %v5383_v58 }
 0x2d8   : > { %7183 = vst [vmem:[#allocation64_spill] sm:$0xff] %v5388_v42  ;;  %7184 = vst [vmem:[#allocation65_spill] sm:$0xff] %v5403_v48  ;;  %v2679_v19 = vsub.f32 %v2551_v60, %v2615_v23  ;;  %v2552_v20 = vmul.f32 0.00390625, %v2306_v51  ;;  %2090 = vadd.xlane.f32.xlu1 %v2089_v9  ;;  %v1732_v41 = vadd.f32 %v1731_v36, %v4768_v7 }
 0x2d9   : > { %v1735_v39 = vpop.f32.mrf.mxu1  ;;  %v1989_v12 = vpop.xlane.xlu1 %1988  ;;  %v2092_v35 = vadd.f32 %v5388_v42, %v5403_v48  ;;  %v2245_v23 = vmul.f32 %v5388_v42, %v5388_v42  ;;  %v1730_v60 = vadd.f32 %v1729_v8, %v4762_v1  ;;  %v2409_v14 = vadd.f32 %v2243_v61, %v2242_v59 }
 0x2da   : > { %v2871_v22 = vadd.f32 1e-05, %v2679_v19  ;;  %v2680_v9 = vsub.f32 %v2552_v20, %v2616_v38  ;;  %v1736_v16 = vadd.f32 %v1735_v39, %v4762_v1  ;;  %v5418_v25 = vmul.f32 0.00390625, %v1989_v12  ;;  %v4118_v38 = vld [vmem:[%s4507_s20 + $0x298] sm:$0xff] }
 0x2db   : > { %v1737_v51 = vpop.f32.mrf.mxu1  ;;  %v3909_v58 = vpop.eup %3908  ;;  %2093 = vadd.xlane.f32.xlu0 %v2092_v35  ;;  %v2244_v21 = vmul.f32 %v5403_v48, %v5403_v48  ;;  %v2745_v19 = vsub.f32 %v4807_v0, %v5350_v55  ;;  %v5426_v20 = vadd.f32 %v4118_v38, %v1732_v41  ;;  %v4120_v0 = vld [vmem:[%s4507_s20 + $0x2a8] sm:$0xff] }
 0x2dc   : > { %v1738_v36 = vadd.f32 %v1737_v51, %v4768_v7  ;;  %v1992_v10 = vpop.xlane.xlu0 %1991  ;;  %v2996_v42 = vmul.f32 %v3909_v58, %v2740_v56  ;;  %v2997_v52 = vmul.f32 %v3909_v58, %v2741_v28  ;;  %3914 = vrsqrt.f32 %v2871_v22  ;;  %2410 = vadd.xlane.f32.xlu1 %v2409_v14  ;;  %v4119_v28 = vld [vmem:[%s4507_s20 + $0x290] sm:$0xff]  ;;  %v4121_v51 = vld [vmem:[%s4507_s20 + $0x2a0] sm:$0xff] }
 0x2dd   : > { %v2872_v8 = vadd.f32 1e-05, %v2680_v9  ;;  %v1739_v61 = vpop.f32.mrf.mxu1  ;;  %7185 = vst [vmem:[#allocation66_spill] sm:$0xff] %v5426_v20  ;;  %v5428_v39 = vmul.f32 0.00390625, %v1992_v10  ;;  %v2309_v59 = vpop.xlane.xlu1 %2308  ;;  %v2412_v12 = vadd.f32 %v2245_v23, %v2244_v21  ;;  %v5435_v22 = vadd.f32 %v4119_v28, %v1730_v60 }
 0x2de   : > { %v3136_v35 = vmul.f32 %v5361_v53, %v2996_v42  ;;  %v3137_v56 = vmul.f32 %v5364_v29, %v2997_v52  ;;  %v5438_v41 = vadd.f32 %v4120_v0, %v1738_v36  ;;  %v2617_v10 = vmul.f32 %v5418_v25, %v5418_v25 }
 0x2df   : > { %3916 = vrsqrt.f32 %v2872_v8  ;;  %v1741_v14 = vpop.f32.mrf.mxu1  ;;  %7186 = vst [vmem:[#allocation67_spill] sm:$0xff] %v5435_v22  ;;  %v2553_v21 = vmul.f32 0.00390625, %v2309_v59  ;;  %2413 = vadd.xlane.f32.xlu0 %v2412_v12  ;;  %v5447_v60 = vadd.f32 %v4121_v51, %v1736_v16  ;;  %v2618_v28 = vmul.f32 %v5428_v39, %v5428_v39 }
 0x2e0   : > { %v2312_v42 = vpop.xlane.xlu0 %2311  ;;  %v3276_v52 = vadd.f32 %v5376_v26, %v3136_v35  ;;  %v3277_v23 = vadd.f32 %v5333_v31, %v3137_v56  ;;  %v2095_v59 = vadd.f32 %v5426_v20, %v5435_v22  ;;  %v7187_v16 = vsub.f32 %v4785_v37, %v5330_v24 }
 0x2e1   : > { %v1745_v8 = vpop.f32.mrf.mxu1  ;;  %v3911_v36 = vpop.eup %3910  ;;  %v2681_v38 = vsub.f32 %v2553_v21, %v2617_v10  ;;  %v2554_v0 = vmul.f32 0.00390625, %v2312_v42  ;;  %v7188_v56 = vsub.f32 %v4792_v43, %v5330_v24  ;;  %v1740_v42 = vadd.f32 %v1739_v61, %v4762_v1 }
 0x2e2   : > { %v1995_v12 = vpop.xlane.xlu1 %1994  ;;  %3404 = vst [vmem:[%s5455_s9] sm:$0xff] %v3276_v52  ;;  %3405 = vst [vmem:[%s5455_s9 + $0x8] sm:$0xff] %v3277_v23  ;;  %v2998_v35 = vmul.f32 %v3911_v36, %v7187_v16  ;;  %v1742_v58 = vadd.f32 %v1741_v14, %v4768_v7  ;;  %2096 = vadd.xlane.f32.xlu1 %v2095_v59  ;;  %v2098_v52 = vadd.f32 %v5438_v41, %v5447_v60 }
 0x2e3   : > { %v2999_v10 = vmul.f32 %v3911_v36, %v7188_v56  ;;  %v1747_v51 = vpop.f32.mrf.mxu1  ;;  %v2873_v9 = vadd.f32 1e-05, %v2681_v38  ;;  %v2682_v48 = vsub.f32 %v2554_v0, %v2618_v28  ;;  %v1746_v24 = vadd.f32 %v1745_v8, %v4762_v1 }
 0x2e4   : > { %v1998_v37 = vpop.xlane.xlu0 %1997  ;;  %v3913_v23 = vpop.eup %3912  ;;  %v3138_v16 = vmul.f32 %v5361_v53, %v2998_v35  ;;  %v5474_v36 = vmul.f32 0.00390625, %v1995_v12  ;;  %v7189_v38 = vsub.f32 %v4804_v62, %v5350_v55  ;;  %2099 = vadd.xlane.f32.xlu0 %v2098_v52  ;;  %v2749_v12 = vsub.f32 %v4836_v47, %v5390_v3 }
 0x2e5   : > { %v3139_v43 = vmul.f32 %v5364_v29, %v2999_v10  ;;  %v1749_v61 = vpop.f32.mrf.mxu1  ;;  %v3001_v28 = vmul.f32 %v3913_v23, %v2745_v19  ;;  %3918 = vrsqrt.f32 %v2873_v9  ;;  %v2874_v0 = vadd.f32 1e-05, %v2682_v48  ;;  %v4122_v10 = vld [vmem:[%s4507_s20 + $0x2b0] sm:$0xff] }
 0x2e6   : > { %v3000_v14 = vmul.f32 %v3913_v23, %v7189_v38  ;;  %v2315_v59 = vpop.xlane.xlu1 %2314  ;;  %v3278_v35 = vadd.f32 %v5376_v26, %v3138_v16  ;;  %v1748_v62 = vadd.f32 %v1747_v51, %v4768_v7  ;;  %v2246_v48 = vmul.f32 %v5435_v22, %v5435_v22  ;;  %v4123_v23 = vld [vmem:[%s4507_s20 + $0x2b8] sm:$0xff]  ;;  %v4124_v51 = vld [vmem:[%s4507_s20 + $0x2c0] sm:$0xff] }
 0x2e7   : > { %v3279_v8 = vadd.f32 %v5333_v31, %v3139_v43  ;;  %v1751_v55 = vpop.f32.mrf.mxu1  ;;  %v3141_v9 = vmul.f32 %v5364_v29, %v3001_v28  ;;  %3920 = vrsqrt.f32 %v2874_v0  ;;  %v5491_v52 = vadd.f32 %v4122_v10, %v1740_v42 }
 0x2e8   : > { %v3140_v19 = vmul.f32 %v5361_v53, %v3000_v14  ;;  %v2318_v56 = vpop.xlane.xlu0 %2317  ;;  %3406 = vst [vmem:[%s5455_s9 + $0x10] sm:$0xff] %v3278_v35  ;;  %v5494_v47 = vadd.f32 %v4123_v23, %v1742_v58  ;;  %v5497_v16 = vadd.f32 %v4124_v51, %v1746_v24  ;;  %v2247_v43 = vmul.f32 %v5426_v20, %v5426_v20  ;;  %v4125_v51 = vld [vmem:[%s4507_s20 + $0x2c8] sm:$0xff] }
 0x2e9   : > { %3407 = vst [vmem:[%s5455_s9 + $0x18] sm:$0xff] %v3279_v8  ;;  %v1755_v38 = vpop.f32.mrf.mxu1  ;;  %v3915_v14 = vpop.eup %3914  ;;  %v3281_v0 = vadd.f32 %v5333_v31, %v3141_v9  ;;  %v2619_v42 = vmul.f32 %v5474_v36, %v5474_v36  ;;  %v2555_v35 = vmul.f32 0.00390625, %v2315_v59  ;;  %v7191_v24 = vsub.f32 %v4828_v33, %v5371_v40 }
 0x2ea   : > { %7190 = vst [vmem:[#allocation68_spill] sm:$0xff] %v5497_v16  ;;  %v3280_v28 = vadd.f32 %v5376_v26, %v3140_v19  ;;  %v5505_v58 = vpop.xlane.xlu1 %2000  ;;  %v7192_v10 = vsub.f32 %v4820_v18, %v5371_v40  ;;  %v5514_v21 = vadd.f32 %v4125_v51, %v1748_v62  ;;  %v5516_v19 = vmul.f32 0.00390625, %v1998_v37 }
 0x2eb   : > { %v3002_v8 = vmul.f32 %v3915_v14, %v7191_v24  ;;  %v1757_v9 = vpop.f32.mrf.mxu1  ;;  %3409 = vst [vmem:[%s5455_s9 + $0x28] sm:$0xff] %v3281_v0  ;;  %v2415_v59 = vadd.f32 %v2247_v43, %v2246_v48  ;;  %v2683_v22 = vsub.f32 %v2555_v35, %v2619_v42  ;;  %v2248_v49 = vmul.f32 %v5447_v60, %v5447_v60 }
 0x2ec   : > { %v3003_v23 = vmul.f32 %v3915_v14, %v7192_v10  ;;  %7193 = vst [vmem:[#allocation69_spill] sm:$0xff] %v5514_v21  ;;  %v3917_v20 = vpop.eup %3916  ;;  %3408 = vst [vmem:[%s5455_s9 + $0x20] sm:$0xff] %v3280_v28  ;;  %v2249_v33 = vmul.f32 %v5438_v41, %v5438_v41  ;;  %v2004_v24 = vpop.xlane.xlu0 %2003  ;;  %v7194_v37 = vsub.f32 %v4833_v45, %v5390_v3 }
 0x2ed   : > { %v3142_v18 = vmul.f32 %v5361_v53, %v3002_v8  ;;  %v3005_v14 = vmul.f32 %v3917_v20, %v2749_v12  ;;  %v5529_v28 = vpop.f32.mrf.mxu1  ;;  %2416 = vadd.xlane.f32.xlu1 %v2415_v59  ;;  %v1750_v48 = vadd.f32 %v1749_v61, %v4762_v1  ;;  %v2875_v43 = vadd.f32 1e-05, %v2683_v22 }
 0x2ee   : > { %v3143_v40 = vmul.f32 %v5364_v29, %v3003_v23  ;;  %v3004_v62 = vmul.f32 %v3917_v20, %v7194_v37  ;;  %v2418_v0 = vadd.f32 %v2249_v33, %v2248_v49  ;;  %v1752_v42 = vadd.f32 %v1751_v55, %v4768_v7  ;;  %v5533_v35 = vpop.xlane.xlu1 %2320 }
 0x2ef   : > { %v3282_v8 = vadd.f32 %v5376_v26, %v3142_v18  ;;  %v3145_v3 = vmul.f32 %v5364_v29, %v3005_v14  ;;  %v5539_v20 = vpop.f32.mrf.mxu1  ;;  %3922 = vrsqrt.f32 %v2875_v43  ;;  %v2620_v22 = vmul.f32 %v5516_v19, %v5516_v19 }
 0x2f0   : > { %v3283_v10 = vadd.f32 %v5333_v31, %v3143_v40  ;;  %v3144_v45 = vmul.f32 %v5361_v53, %v3004_v62  ;;  %2419 = vadd.xlane.f32.xlu0 %v2418_v0  ;;  %v2556_v49 = vmul.f32 0.00390625, %v2318_v56  ;;  %v2101_v61 = vadd.f32 %v5494_v47, %v5491_v52  ;;  %v5545_v12 = vpop.xlane.xlu0 %2323 }
 0x2f1   : > { %3410 = vst [vmem:[%s5455_s9 + $0x30] sm:$0xff] %v3282_v8  ;;  %v3285_v23 = vadd.f32 %v5333_v31, %v3145_v3  ;;  %v2750_v51 = vsub.f32 %v4853_v63, %v5418_v25  ;;  %v2751_v56 = vsub.f32 %v4857_v5, %v5418_v25  ;;  %v5555_v59 = vpop.f32.mrf.mxu1  ;;  %v2752_v33 = vsub.f32 %v4866_v27, %v5428_v39  ;;  %v4126_v25 = vld [vmem:[%s4507_s20 + $0x2d0] sm:$0xff]  ;;  %v4127_v8 = vld [vmem:[%s4507_s20 + $0x2d8] sm:$0xff] }
 0x2f2   : > { %3411 = vst [vmem:[%s5455_s9 + $0x38] sm:$0xff] %v3283_v10  ;;  %v3284_v55 = vadd.f32 %v5376_v26, %v3144_v45  ;;  %v2753_v18 = vsub.f32 %v4869_v30, %v5428_v39  ;;  %v2684_v40 = vsub.f32 %v2556_v49, %v2620_v22  ;;  %2102 = vadd.xlane.f32.xlu1 %v2101_v61  ;;  %v5563_v62 = vpop.xlane.xlu1 %2006  ;;  %v3919_v63 = vpop.eup %3918 }
 0x2f3   : > { %v2104_v37 = vadd.f32 %v5514_v21, %v5497_v16  ;;  %3413 = vst [vmem:[%s5455_s9 + $0x48] sm:$0xff] %v3285_v23  ;;  %v2754_v5 = vsub.f32 %v4892_v4, %v5474_v36  ;;  %v5570_v14 = vadd.f32 %v4126_v25, %v1750_v48  ;;  %v1756_v27 = vadd.f32 %v1755_v38, %v4762_v1  ;;  %v5574_v39 = vpop.f32.mrf.mxu1 }
 0x2f4   : > { %3412 = vst [vmem:[%s5455_s9 + $0x40] sm:$0xff] %v3284_v55  ;;  %v1758_v30 = vadd.f32 %v1757_v9, %v4768_v7  ;;  %v3006_v43 = vmul.f32 %v3919_v63, %v2750_v51  ;;  %v3007_v0 = vmul.f32 %v3919_v63, %v2751_v56  ;;  %v5577_v10 = vadd.f32 %v4127_v8, %v1752_v42  ;;  %v5579_v3 = vpop.xlane.xlu0 %2009  ;;  %v3921_v22 = vpop.eup %3920 }
 0x2f5   : > { %7195 = vst [vmem:[#allocation70_spill] sm:$0xff] %v5570_v14  ;;  %v2876_v45 = vadd.f32 1e-05, %v2684_v40  ;;  %2105 = vadd.xlane.f32.xlu0 %v2104_v37  ;;  %v5582_v48 = vmul.f32 0.00390625, %v5505_v58  ;;  %v5584_v38 = vmul.f32 0.00390625, %v2004_v24  ;;  %v2250_v9 = vmul.f32 %v5491_v52, %v5491_v52  ;;  %v5590_v42 = vpop.f32.mrf.mxu1  ;;  %v4128_v58 = vld [vmem:[%s4507_s20 + $0x2e0] sm:$0xff] }
 0x2f6   : > { %7196 = vst [vmem:[#allocation71_spill] sm:$0xff] %v5577_v10  ;;  %v2251_v49 = vmul.f32 %v5494_v47, %v5494_v47  ;;  %v3146_v61 = vmul.f32 %v5361_v53, %v3006_v43  ;;  %v3147_v55 = vmul.f32 %v5364_v29, %v3007_v0  ;;  %v3008_v23 = vmul.f32 %v3921_v22, %v2752_v33  ;;  %v5594_v56 = vpop.xlane.xlu1 %2326  ;;  %v4129_v40 = vld [vmem:[%s4507_s20 + $0x2e8] sm:$0xff] }
 0x2f7   : > { %v3009_v51 = vmul.f32 %v3921_v22, %v2753_v18  ;;  %3924 = vrsqrt.f32 %v2876_v45  ;;  %v5597_v24 = vadd.f32 %v4128_v58, %v1756_v27  ;;  %v5600_v37 = vadd.f32 %v4129_v40, %v1758_v30  ;;  %v5602_v25 = vpop.f32.mrf.mxu1 }
 0x2f8   : > { %v2421_v63 = vadd.f32 %v2251_v49, %v2250_v9  ;;  %v3286_v43 = vadd.f32 %v5376_v26, %v3146_v61  ;;  %v3287_v0 = vadd.f32 %v5333_v31, %v3147_v55  ;;  %v3148_v33 = vmul.f32 %v5361_v53, %v3008_v23  ;;  %v5608_v8 = vpop.xlane.xlu0 %2329 }
 0x2f9   : > { %7197 = vst [vmem:[#allocation72_spill] sm:$0xff] %v5597_v24  ;;  %7198 = vst [vmem:[#allocation73_spill] sm:$0xff] %v5600_v37  ;;  %v3149_v18 = vmul.f32 %v5364_v29, %v3009_v51  ;;  %v2621_v27 = vmul.f32 %v5582_v48, %v5582_v48  ;;  %v2557_v30 = vmul.f32 0.00390625, %v5533_v35  ;;  %v2252_v45 = vmul.f32 %v5497_v16, %v5497_v16  ;;  %v5617_v9 = vpop.f32.mrf.mxu1 }
 0x2fa   : > { %2422 = vadd.xlane.f32.xlu1 %v2421_v63  ;;  %v2253_v22 = vmul.f32 %v5514_v21, %v5514_v21  ;;  %3414 = vst [vmem:[%s5455_s9 + $0x50] sm:$0xff] %v3286_v43  ;;  %3415 = vst [vmem:[%s5455_s9 + $0x58] sm:$0xff] %v3287_v0  ;;  %v3288_v49 = vadd.f32 %v5376_v26, %v3148_v33  ;;  %v2622_v55 = vmul.f32 %v5584_v38, %v5584_v38  ;;  %v5626_v23 = vpop.xlane.xlu1 %2012 }
 0x2fb   : > { %v3289_v61 = vadd.f32 %v5333_v31, %v3149_v18  ;;  %v2558_v35 = vmul.f32 0.00390625, %v5545_v12  ;;  %v1760_v51 = vadd.f32 %v5529_v28, %v4762_v1  ;;  %v2685_v58 = vsub.f32 %v2557_v30, %v2621_v27  ;;  %v5632_v43 = vpop.f32.mrf.mxu1 }
 0x2fc   : > { %v2424_v40 = vadd.f32 %v2253_v22, %v2252_v45  ;;  %v2107_v63 = vadd.f32 %v5577_v10, %v5570_v14  ;;  %3416 = vst [vmem:[%s5455_s9 + $0x60] sm:$0xff] %v3288_v49  ;;  %v2755_v0 = vsub.f32 %v4886_v54, %v5474_v36  ;;  %v2756_v12 = vsub.f32 %v4897_v15, %v5516_v19  ;;  %v5642_v28 = vpop.xlane.xlu0 %2015  ;;  %v3923_v27 = vpop.eup %3922 }
 0x2fd   : > { %3417 = vst [vmem:[%s5455_s9 + $0x68] sm:$0xff] %v3289_v61  ;;  %v2757_v33 = vsub.f32 %v4900_v17, %v5516_v19  ;;  %v2686_v18 = vsub.f32 %v2558_v35, %v2622_v55  ;;  %v2877_v30 = vadd.f32 1e-05, %v2685_v58  ;;  %v1762_v45 = vadd.f32 %v5539_v20, %v4768_v7  ;;  %v5650_v22 = vpop.f32.mrf.mxu1  ;;  %v4130_v55 = vld [vmem:[%s4507_s20 + $0x2f0] sm:$0xff] }
 0x2fe   : > { %2425 = vadd.xlane.f32.xlu0 %v2424_v40  ;;  %2108 = vadd.xlane.f32.xlu1 %v2107_v63  ;;  %v1766_v54 = vadd.f32 %v5555_v59, %v4762_v1  ;;  %v2110_v15 = vadd.f32 %v5600_v37, %v5597_v24  ;;  %v3010_v17 = vmul.f32 %v3923_v27, %v2754_v5  ;;  %v5656_v61 = vmul.f32 0.00390625, %v5563_v62  ;;  %v5658_v20 = vpop.xlane.xlu1 %2332  ;;  %v4131_v63 = vld [vmem:[%s4507_s20 + $0x2f8] sm:$0xff] }
 0x2ff   : > { %v3011_v19 = vmul.f32 %v3923_v27, %v2755_v0  ;;  %v2878_v49 = vadd.f32 1e-05, %v2686_v18  ;;  %v5663_v35 = vadd.f32 %v4130_v55, %v1760_v51  ;;  %3926 = vrsqrt.f32 %v2877_v30  ;;  %v5667_v36 = vpop.f32.mrf.mxu1  ;;  %v4132_v0 = vld [vmem:[%s4507_s20 + $0x300] sm:$0xff] }
 0x300   : > { %v1768_v4 = vadd.f32 %v5574_v39, %v4768_v7  ;;  %v3150_v5 = vmul.f32 %v5361_v53, %v3010_v17  ;;  %v5672_v62 = vmul.f32 0.00390625, %v5579_v3  ;;  %v5674_v40 = vpop.xlane.xlu0 %2335  ;;  %v5677_v51 = vadd.f32 %v4131_v63, %v1762_v45 }
 0x301   : > { %7199 = vst [vmem:[#allocation74_spill] sm:$0xff] %v5663_v35  ;;  %v3151_v58 = vmul.f32 %v5364_v29, %v3011_v19  ;;  %3928 = vrsqrt.f32 %v2878_v49  ;;  %v5680_v18 = vadd.f32 %v4132_v0, %v1766_v54  ;;  %v2254_v39 = vmul.f32 %v5570_v14, %v5570_v14  ;;  %v5686_v30 = vpop.f32.mrf.mxu1  ;;  %v4133_v19 = vld [vmem:[%s4507_s20 + $0x308] sm:$0xff] }
 0x302   : > { %7200 = vst [vmem:[#allocation75_spill] sm:$0xff] %v5677_v51  ;;  %2111 = vadd.xlane.f32.xlu0 %v2110_v15  ;;  %v2255_v27 = vmul.f32 %v5577_v10, %v5577_v10  ;;  %v3290_v3 = vadd.f32 %v5376_v26, %v3150_v5  ;;  %v2623_v45 = vmul.f32 %v5656_v61, %v5656_v61  ;;  %v2559_v54 = vmul.f32 0.00390625, %v5594_v56  ;;  %v5693_v15 = vpop.xlane.xlu1 %2018 }
 0x303   : > { %7201 = vst [vmem:[#allocation76_spill] sm:$0xff] %v5680_v18  ;;  %v3291_v17 = vadd.f32 %v5333_v31, %v3151_v58  ;;  %v5696_v49 = vadd.f32 %v4133_v19, %v1768_v4  ;;  %v2256_v63 = vmul.f32 %v5597_v24, %v5597_v24  ;;  %v2257_v0 = vmul.f32 %v5600_v37, %v5600_v37  ;;  %v5702_v5 = vpop.f32.mrf.mxu1 }
 0x304   : > { %v2427_v55 = vadd.f32 %v2255_v27, %v2254_v39  ;;  %v3925_v58 = vpop.eup %3924  ;;  %3418 = vst [vmem:[%s5455_s9 + $0x70] sm:$0xff] %v3290_v3  ;;  %v1770_v56 = vadd.f32 %v5590_v42, %v4762_v1  ;;  %v2687_v59 = vsub.f32 %v2559_v54, %v2623_v45  ;;  %v2624_v4 = vmul.f32 %v5672_v62, %v5672_v62  ;;  %v5711_v27 = vpop.xlane.xlu0 %2021 }
 0x305   : > { %7202 = vst [vmem:[#allocation77_spill] sm:$0xff] %v5696_v49  ;;  %3419 = vst [vmem:[%s5455_s9 + $0x78] sm:$0xff] %v3291_v17  ;;  %v2560_v39 = vmul.f32 0.00390625, %v5608_v8  ;;  %v3012_v19 = vmul.f32 %v3925_v58, %v2756_v12  ;;  %v3013_v24 = vmul.f32 %v3925_v58, %v2757_v33  ;;  %v2430_v37 = vadd.f32 %v2257_v0, %v2256_v63  ;;  %v5715_v3 = vpop.f32.mrf.mxu1  ;;  %v4134_v58 = vld [vmem:[%s4507_s20 + $0x310] sm:$0xff] }
 0x306   : > { %2428 = vadd.xlane.f32.xlu1 %v2427_v55  ;;  %v1772_v10 = vadd.f32 %v5602_v25, %v4768_v7  ;;  %v2879_v17 = vadd.f32 1e-05, %v2687_v59  ;;  %v2113_v42 = vadd.f32 %v5677_v51, %v5663_v35  ;;  %v1776_v45 = vadd.f32 %v5617_v9, %v4762_v1  ;;  %v5721_v8 = vpop.xlane.xlu1 %2338 }
 0x307   : > { %v2688_v14 = vsub.f32 %v2560_v39, %v2624_v4  ;;  %v3152_v12 = vmul.f32 %v5361_v53, %v3012_v19  ;;  %v3153_v33 = vmul.f32 %v5364_v29, %v3013_v24  ;;  %2431 = vadd.xlane.f32.xlu0 %v2430_v37  ;;  %v5726_v25 = vmul.f32 0.00390625, %v5626_v23  ;;  %v5730_v54 = vpop.f32.mrf.mxu1 }
 0x308   : > { %v2116_v59 = vadd.f32 %v5696_v49, %v5680_v18  ;;  %v2759_v55 = vsub.f32 %v4921_v50, %v5582_v48  ;;  %v2760_v9 = vsub.f32 %v4930_v11, %v5584_v38  ;;  %3930 = vrsqrt.f32 %v2879_v17  ;;  %v5736_v37 = vpop.xlane.xlu0 %2341 }
 0x309   : > { %v2880_v24 = vadd.f32 1e-05, %v2688_v14  ;;  %v3292_v23 = vadd.f32 %v5376_v26, %v3152_v12  ;;  %v3293_v63 = vadd.f32 %v5333_v31, %v3153_v33  ;;  %v2761_v0 = vsub.f32 %v4933_v13, %v5584_v38  ;;  %v5744_v11 = vpop.f32.mrf.mxu1  ;;  %v4135_v13 = vld [vmem:[%s4507_s20 + $0x318] sm:$0xff] }
 0x30a   : > { %2114 = vadd.xlane.f32.xlu1 %v2113_v42  ;;  %v1778_v50 = vadd.f32 %v5632_v43, %v4768_v7  ;;  %v5747_v4 = vadd.f32 %v4134_v58, %v1770_v56  ;;  %v2258_v14 = vmul.f32 %v5663_v35, %v5663_v35  ;;  %v2259_v39 = vmul.f32 %v5677_v51, %v5677_v51  ;;  %v5753_v19 = vpop.xlane.xlu1 %2024  ;;  %v4136_v43 = vld [vmem:[%s4507_s20 + $0x320] sm:$0xff] }
 0x30b   : > { %3932 = vrsqrt.f32 %v2880_v24  ;;  %3420 = vst [vmem:[%s5455_s9 + $0x80] sm:$0xff] %v3292_v23  ;;  %3421 = vst [vmem:[%s5455_s9 + $0x88] sm:$0xff] %v3293_v63  ;;  %v5758_v38 = vadd.f32 %v4135_v13, %v1772_v10  ;;  %v5761_v17 = vadd.f32 %v4136_v43, %v1776_v45  ;;  %2117 = vadd.xlane.f32.xlu0 %v2116_v59  ;;  %v2561_v42 = vmul.f32 0.00390625, %v5658_v20  ;;  %v5766_v12 = vpop.f32.mrf.mxu1  ;;  %v4137_v43 = vld [vmem:[%s4507_s20 + $0x328] sm:$0xff] }
 0x30c   : > { %v2625_v56 = vmul.f32 %v5726_v25, %v5726_v25  ;;  %v3927_v33 = vpop.eup %3926  ;;  %v5769_v24 = vmul.f32 0.00390625, %v5642_v28  ;;  %v2433_v23 = vadd.f32 %v2259_v39, %v2258_v14  ;;  %v2260_v10 = vmul.f32 %v5680_v18, %v5680_v18  ;;  %v5775_v63 = vpop.xlane.xlu0 %2027 }
 0x30d   : > { %v2261_v45 = vmul.f32 %v5696_v49, %v5696_v49  ;;  %v7203_v58 = vsub.f32 %v4917_v44, %v5582_v48  ;;  %v3015_v13 = vmul.f32 %v3927_v33, %v2759_v55  ;;  %v5781_v51 = vadd.f32 %v4137_v43, %v1778_v50  ;;  %v5783_v35 = vpop.f32.mrf.mxu1 }
 0x30e   : > { %v3929_v59 = vpop.eup %3928  ;;  %v2689_v28 = vsub.f32 %v2561_v42, %v2625_v56  ;;  %2434 = vadd.xlane.f32.xlu1 %v2433_v23  ;;  %v1780_v49 = vadd.f32 %v5650_v22, %v4762_v1  ;;  %v5787_v21 = vpop.xlane.xlu1 %2344  ;;  %v1782_v55 = vadd.f32 %v5667_v36, %v4768_v7  ;;  %v2626_v22 = vmul.f32 %v5769_v24, %v5769_v24 }
 0x30f   : > { %v3014_v20 = vmul.f32 %v3927_v33, %v7203_v58  ;;  %7204 = vst [vmem:[#allocation78_spill] sm:$0xff] %v5781_v51  ;;  %v3016_v14 = vmul.f32 %v3929_v59, %v2760_v9  ;;  %v3017_v39 = vmul.f32 %v3929_v59, %v2761_v0  ;;  %v2436_v18 = vadd.f32 %v2261_v45, %v2260_v10  ;;  %v5793_v50 = vpop.f32.mrf.mxu1 }
 0x310   : > { %v3155_v44 = vmul.f32 %v5364_v29, %v3015_v13  ;;  %v2881_v48 = vadd.f32 1e-05, %v2689_v28  ;;  %v2562_v56 = vmul.f32 0.00390625, %v5674_v40  ;;  %v5800_v42 = vpop.xlane.xlu0 %2347  ;;  %v2119_v23 = vadd.f32 %v5758_v38, %v5747_v4 }
 0x311   : > { %v3154_v16 = vmul.f32 %v5361_v53, %v3014_v20  ;;  %v3156_v9 = vmul.f32 %v5361_v53, %v3016_v14  ;;  %v3157_v0 = vmul.f32 %v5364_v29, %v3017_v39  ;;  %2437 = vadd.xlane.f32.xlu0 %v2436_v18  ;;  %v2762_v45 = vsub.f32 %v4957_v57, %v5656_v61  ;;  %v5823_v13 = vpop.f32.mrf.mxu1  ;;  %v4138_v14 = vld [vmem:[%s4507_s20 + $0x330] sm:$0xff] }
 0x312   : > { %v3295_v36 = vadd.f32 %v5333_v31, %v3155_v44  ;;  %3934 = vrsqrt.f32 %v2881_v48  ;;  %v2690_v40 = vsub.f32 %v2562_v56, %v2626_v22  ;;  %v5810_v59 = vpop.xlane.xlu1 %2030  ;;  %2120 = vadd.xlane.f32.xlu1 %v2119_v23  ;;  %v1786_v58 = vadd.f32 %v5686_v30, %v4762_v1  ;;  %v4139_v44 = vld [vmem:[%s4507_s20 + $0x338] sm:$0xff]  ;;  %v4140_v56 = vld [vmem:[%s4507_s20 + $0x340] sm:$0xff] }
 0x313   : > { %v3294_v33 = vadd.f32 %v5376_v26, %v3154_v16  ;;  %v3296_v10 = vadd.f32 %v5376_v26, %v3156_v9  ;;  %v3297_v18 = vadd.f32 %v5333_v31, %v3157_v0  ;;  %v2763_v16 = vsub.f32 %v4951_v46, %v5656_v61  ;;  %v5856_v23 = vpop.f32.mrf.mxu1 }
 0x314   : > { %3423 = vst [vmem:[%s5455_s9 + $0x98] sm:$0xff] %v3295_v36  ;;  %v5819_v20 = vmul.f32 0.00390625, %v5693_v15  ;;  %v2122_v57 = vadd.f32 %v5781_v51, %v5761_v17  ;;  %v2764_v43 = vsub.f32 %v4960_v2, %v5672_v62  ;;  %v2765_v46 = vsub.f32 %v4963_v6, %v5672_v62  ;;  %v5833_v15 = vpop.xlane.xlu0 %2033 }
 0x315   : > { %3422 = vst [vmem:[%s5455_s9 + $0x90] sm:$0xff] %v3294_v33  ;;  %3424 = vst [vmem:[%s5455_s9 + $0xa0] sm:$0xff] %v3296_v10  ;;  %v2882_v61 = vadd.f32 1e-05, %v2690_v40  ;;  %v2263_v30 = vmul.f32 %v5758_v38, %v5758_v38  ;;  %v3931_v28 = vpop.eup %3930  ;;  %v5836_v39 = vadd.f32 %v4138_v14, %v1780_v49  ;;  %v5839_v48 = vadd.f32 %v4139_v44, %v1782_v55 }
 0x316   : > { %3425 = vst [vmem:[%s5455_s9 + $0xa8] sm:$0xff] %v3297_v18  ;;  %2123 = vadd.xlane.f32.xlu0 %v2122_v57  ;;  %v1788_v2 = vadd.f32 %v5702_v5, %v4768_v7  ;;  %v2262_v6 = vmul.f32 %v5747_v4, %v5747_v4  ;;  %v3018_v62 = vmul.f32 %v3931_v28, %v2762_v45  ;;  %v5846_v0 = vmul.f32 0.00390625, %v5711_v27  ;;  %v5848_v22 = vpop.xlane.xlu1 %2350 }
 0x317   : > { %7205 = vst [vmem:[#allocation79_spill] sm:$0xff] %v5836_v39  ;;  %7206 = vst [vmem:[#allocation80_spill] sm:$0xff] %v5839_v48  ;;  %v3019_v9 = vmul.f32 %v3931_v28, %v2763_v16  ;;  %3936 = vrsqrt.f32 %v2882_v61  ;;  %v5851_v55 = vadd.f32 %v4140_v56, %v1786_v58  ;;  %v2627_v5 = vmul.f32 %v5819_v20, %v5819_v20  ;;  %v4141_v16 = vld [vmem:[%s4507_s20 + $0x348] sm:$0xff] }
 0x318   : > { %v3933_v49 = vpop.eup %3932  ;;  %v2439_v33 = vadd.f32 %v2263_v30, %v2262_v6  ;;  %v2563_v36 = vmul.f32 0.00390625, %v5721_v8  ;;  %v3158_v10 = vmul.f32 %v5361_v53, %v3018_v62  ;;  %v5860_v40 = vpop.xlane.xlu0 %2353  ;;  %v5863_v58 = vadd.f32 %v4141_v16, %v1788_v2 }
 0x319   : > { %7207 = vst [vmem:[#allocation81_spill] sm:$0xff] %v5851_v55  ;;  %v3159_v18 = vmul.f32 %v5364_v29, %v3019_v9  ;;  %v3020_v27 = vmul.f32 %v3933_v49, %v2764_v43  ;;  %v3021_v45 = vmul.f32 %v3933_v49, %v2765_v46  ;;  %v2264_v8 = vmul.f32 %v5761_v17, %v5761_v17  ;;  %v5879_v9 = vpop.f32.mrf.mxu1 }
 0x31a   : > { %7208 = vst [vmem:[#allocation82_spill] sm:$0xff] %v5863_v58  ;;  %2440 = vadd.xlane.f32.xlu1 %v2439_v33  ;;  %v2691_v57 = vsub.f32 %v2563_v36, %v2627_v5  ;;  %v2265_v61 = vmul.f32 %v5781_v51, %v5781_v51  ;;  %v3298_v30 = vadd.f32 %v5376_v26, %v3158_v10  ;;  %v5873_v14 = vpop.xlane.xlu1 %2036  ;;  %v2564_v33 = vmul.f32 0.00390625, %v5736_v37  ;;  %v7210_v37 = vld [vmem:[#allocation13_spill] sm:$0xff] }
 0x31b   : > { %v3299_v43 = vadd.f32 %v5333_v31, %v3159_v18  ;;  %v3160_v46 = vmul.f32 %v5361_v53, %v3020_v27  ;;  %v3161_v28 = vmul.f32 %v5364_v29, %v3021_v45  ;;  %v1790_v44 = vadd.f32 %v5715_v3, %v4762_v1  ;;  %v7209_v18 = vld [vmem:[#allocation12_spill] sm:$0xff] }
 0x31c   : > { %v2883_v2 = vadd.f32 1e-05, %v2691_v57  ;;  %v2442_v6 = vadd.f32 %v2265_v61, %v2264_v8  ;;  %v2628_v62 = vmul.f32 %v5846_v0, %v5846_v0  ;;  %3426 = vst [vmem:[%s5455_s9 + $0xb0] sm:$0xff] %v3298_v30  ;;  %v2125_v3 = vadd.f32 %v5839_v48, %v5836_v39  ;;  %v5888_v5 = vpop.xlane.xlu0 %2039  ;;  %v7211_v57 = vld [vmem:[#allocation15_spill] sm:$0xff] }
 0x31d   : > { %3427 = vst [vmem:[%s5455_s9 + $0xb8] sm:$0xff] %v3299_v43  ;;  %v3300_v49 = vadd.f32 %v5376_v26, %v3160_v46  ;;  %v3301_v56 = vadd.f32 %v5333_v31, %v3161_v28  ;;  %v2766_v36 = vsub.f32 %v4985_v34, %v5726_v25  ;;  %v2767_v10 = vsub.f32 %v4979_v32, %v5726_v25  ;;  %v7212_v43 = vld [vmem:[#allocation14_spill] sm:$0xff] }
 0x31e   : > { %v2768_v27 = vsub.f32 %v7209_v18, %v5769_v24  ;;  %3938 = vrsqrt.f32 %v2883_v2  ;;  %2443 = vadd.xlane.f32.xlu0 %v2442_v6  ;;  %v2769_v16 = vsub.f32 %v7210_v37, %v5769_v24  ;;  %v2692_v61 = vsub.f32 %v2564_v33, %v2628_v62  ;;  %2126 = vadd.xlane.f32.xlu1 %v2125_v3  ;;  %v5904_v34 = vpop.xlane.xlu1 %2356  ;;  %v5911_v2 = vpop.f32.mrf.mxu1  ;;  %v7213_v24 = vld [vmem:[#allocation16_spill] sm:$0xff]  ;;  %v4142_v62 = vld [vmem:[%s4507_s20 + $0x350] sm:$0xff] }
 0x31f   : > { %v3935_v45 = vpop.eup %3934  ;;  %3428 = vst [vmem:[%s5455_s9 + $0xc0] sm:$0xff] %v3300_v49  ;;  %3429 = vst [vmem:[%s5455_s9 + $0xc8] sm:$0xff] %v3301_v56  ;;  %v2128_v32 = vadd.f32 %v5863_v58, %v5851_v55  ;;  %v5909_v28 = vmul.f32 0.00390625, %v5753_v19  ;;  %v5916_v49 = vadd.f32 %v4142_v62, %v1790_v44  ;;  %v1792_v56 = vadd.f32 %v5730_v54, %v4768_v7 }
 0x320   : > { %v3022_v25 = vmul.f32 %v3935_v45, %v2766_v36  ;;  %v3023_v30 = vmul.f32 %v3935_v45, %v2767_v10  ;;  %v2884_v33 = vadd.f32 1e-05, %v2692_v61  ;;  %v5920_v3 = vpop.xlane.xlu0 %2359  ;;  %v1796_v19 = vadd.f32 %v5744_v11, %v4762_v1 }
 0x321   : > { %7214 = vst [vmem:[#allocation12_spill] sm:$0xff] %v5916_v49  ;;  %v1798_v18 = vadd.f32 %v5766_v12, %v4768_v7  ;;  %v5929_v44 = vmul.f32 0.00390625, %v5775_v63  ;;  %v2266_v54 = vmul.f32 %v5836_v39, %v5836_v39  ;;  %v2267_v45 = vmul.f32 %v5839_v48, %v5839_v48 }
 0x322   : > { %v3162_v36 = vmul.f32 %v5361_v53, %v3022_v25  ;;  %v3163_v10 = vmul.f32 %v5364_v29, %v3023_v30  ;;  %2129 = vadd.xlane.f32.xlu0 %v2128_v32  ;;  %3940 = vrsqrt.f32 %v2884_v33  ;;  %v5935_v37 = vpop.xlane.xlu1 %2042  ;;  %v2629_v63 = vmul.f32 %v5909_v28, %v5909_v28  ;;  %v5942_v25 = vpop.f32.mrf.mxu1  ;;  %v4143_v33 = vld [vmem:[%s4507_s20 + $0x358] sm:$0xff] }
 0x323   : > { %v2565_v32 = vmul.f32 0.00390625, %v5787_v21  ;;  %v5945_v6 = vadd.f32 %v4143_v33, %v1792_v56  ;;  %v2445_v46 = vadd.f32 %v2267_v45, %v2266_v54  ;;  %v2268_v21 = vmul.f32 %v5851_v55, %v5851_v55 }
 0x324   : > { %v3937_v11 = vpop.eup %3936  ;;  %v3302_v61 = vadd.f32 %v5376_v26, %v3162_v36  ;;  %v3303_v12 = vadd.f32 %v5333_v31, %v3163_v10  ;;  %v5947_v8 = vpop.xlane.xlu0 %2045  ;;  %v4144_v36 = vld [vmem:[%s4507_s20 + $0x368] sm:$0xff]  ;;  %v2630_v54 = vmul.f32 %v5929_v44, %v5929_v44  ;;  %v2566_v45 = vmul.f32 0.00390625, %v5800_v42 }
 0x325   : > { %v3024_v30 = vmul.f32 %v3937_v11, %v2768_v27  ;;  %v3025_v62 = vmul.f32 %v3937_v11, %v2769_v16  ;;  %7215 = vst [vmem:[#allocation13_spill] sm:$0xff] %v5945_v6  ;;  %v5952_v10 = vadd.f32 %v4144_v36, %v1798_v18  ;;  %v2693_v48 = vsub.f32 %v2565_v32, %v2629_v63  ;;  %v4145_v18 = vld [vmem:[%s4507_s20 + $0x360] sm:$0xff] }
 0x326   : > { %3430 = vst [vmem:[%s5455_s9 + $0xd0] sm:$0xff] %v3302_v61  ;;  %3431 = vst [vmem:[%s5455_s9 + $0xd8] sm:$0xff] %v3303_v12  ;;  %v2269_v27 = vmul.f32 %v5863_v58, %v5863_v58  ;;  %2446 = vadd.xlane.f32.xlu1 %v2445_v46  ;;  %v5963_v11 = vpop.xlane.xlu1 %2362  ;;  %v5966_v61 = vadd.f32 %v4145_v18, %v1796_v19  ;;  %v1802_v32 = vadd.f32 %v5793_v50, %v4768_v7  ;;  %v7218_v19 = vld [vmem:[#allocation17_spill] sm:$0xff]  ;;  %v4146_v58 = vld [vmem:[%s4507_s20 + $0x378] sm:$0xff] }
 0x327   : > { %7216 = vst [vmem:[#allocation15_spill] sm:$0xff] %v5952_v10  ;;  %v3164_v16 = vmul.f32 %v5361_v53, %v3024_v30  ;;  %v3165_v56 = vmul.f32 %v5364_v29, %v3025_v62  ;;  %v2885_v12 = vadd.f32 1e-05, %v2693_v48  ;;  %v5970_v30 = vpop.f32.mrf.mxu1  ;;  %v2694_v33 = vsub.f32 %v2566_v45, %v2630_v54  ;;  %v7220_v54 = vld [vmem:[#allocation18_spill] sm:$0xff] }
 0x328   : > { %7217 = vst [vmem:[#allocation14_spill] sm:$0xff] %v5966_v61  ;;  %v2448_v63 = vadd.f32 %v2269_v27, %v2268_v21  ;;  %v2131_v42 = vadd.f32 %v5945_v6, %v5916_v49  ;;  %v5976_v36 = vpop.xlane.xlu0 %2365  ;;  %v2773_v48 = vsub.f32 %v7218_v19, %v5846_v0  ;;  %v5981_v50 = vmul.f32 0.00390625, %v5810_v59 }
 0x329   : > { %v3304_v46 = vadd.f32 %v5376_v26, %v3164_v16  ;;  %v3305_v62 = vadd.f32 %v5333_v31, %v3165_v56  ;;  %3942 = vrsqrt.f32 %v2885_v12  ;;  %v2134_v21 = vadd.f32 %v5952_v10, %v5966_v61  ;;  %v7219_v16 = vld [vmem:[#allocation19_spill] sm:$0xff]  ;;  %v6006_v55 = vpop.f32.mrf.mxu1 }
 0x32a   : > { %2449 = vadd.xlane.f32.xlu0 %v2448_v63  ;;  %v1800_v18 = vadd.f32 %v5783_v35, %v4762_v1  ;;  %v2886_v12 = vadd.f32 1e-05, %v2694_v33  ;;  %2132 = vadd.xlane.f32.xlu1 %v2131_v42  ;;  %v5993_v63 = vpop.xlane.xlu1 %2048  ;;  %v7221_v59 = vsub.f32 %v7211_v57, %v5819_v20  ;;  %v6002_v56 = vadd.f32 %v4146_v58, %v1802_v32 }
 0x32b   : > { %v3939_v27 = vpop.eup %3938  ;;  %3432 = vst [vmem:[%s5455_s9 + $0xe0] sm:$0xff] %v3304_v46  ;;  %3433 = vst [vmem:[%s5455_s9 + $0xe8] sm:$0xff] %v3305_v62  ;;  %v7222_v46 = vsub.f32 %v7212_v43, %v5819_v20  ;;  %v1808_v45 = vadd.f32 %v5856_v23, %v4768_v7  ;;  %v1806_v35 = vadd.f32 %v5823_v13, %v4762_v1  ;;  %v6019_v32 = vmul.f32 0.00390625, %v5833_v15 }
 0x32c   : > { %v3026_v19 = vmul.f32 %v3939_v27, %v7221_v59  ;;  %7223 = vst [vmem:[#allocation16_spill] sm:$0xff] %v6002_v56  ;;  %3944 = vrsqrt.f32 %v2886_v12  ;;  %v2270_v57 = vmul.f32 %v5916_v49, %v5916_v49  ;;  %v2271_v20 = vmul.f32 %v5945_v6, %v5945_v6  ;;  %v6014_v43 = vpop.xlane.xlu0 %2051 }
 0x32d   : > { %v3027_v62 = vmul.f32 %v3939_v27, %v7222_v46  ;;  %v2631_v13 = vmul.f32 %v5981_v50, %v5981_v50  ;;  %v2567_v42 = vmul.f32 0.00390625, %v5848_v22  ;;  %v2272_v27 = vmul.f32 %v5966_v61, %v5966_v61  ;;  %v4147_v46 = vld [vmem:[%s4507_s20 + $0x370] sm:$0xff]  ;;  %v4148_v22 = vld [vmem:[%s4507_s20 + $0x388] sm:$0xff] }
 0x32e   : > { %v3166_v58 = vmul.f32 %v5361_v53, %v3026_v19  ;;  %2135 = vadd.xlane.f32.xlu0 %v2134_v21  ;;  %v2451_v33 = vadd.f32 %v2271_v20, %v2270_v57  ;;  %v2273_v12 = vmul.f32 %v5952_v10, %v5952_v10  ;;  %v6028_v59 = vpop.xlane.xlu1 %2368  ;;  %v6036_v57 = vadd.f32 %v4148_v22, %v1808_v45  ;;  %v6038_v20 = vpop.f32.mrf.mxu1 }
 0x32f   : > { %v3167_v23 = vmul.f32 %v5364_v29, %v3027_v62  ;;  %v3941_v21 = vpop.eup %3940  ;;  %v6033_v62 = vadd.f32 %v4147_v46, %v1800_v18  ;;  %v7225_v10 = vsub.f32 %v7213_v24, %v5846_v0  ;;  %v2695_v49 = vsub.f32 %v2567_v42, %v2631_v13 }
 0x330   : > { %v3306_v15 = vadd.f32 %v5376_v26, %v3166_v58  ;;  %7224 = vst [vmem:[#allocation17_spill] sm:$0xff] %v6036_v57  ;;  %v3029_v6 = vmul.f32 %v3941_v21, %v2773_v48  ;;  %2452 = vadd.xlane.f32.xlu1 %v2451_v33  ;;  %v2454_v39 = vadd.f32 %v2273_v12, %v2272_v27  ;;  %v6043_v51 = vpop.xlane.xlu0 %2371  ;;  %v4149_v58 = vld [vmem:[%s4507_s20 + $0x380] sm:$0xff]  ;;  %v2568_v0 = vmul.f32 0.00390625, %v5860_v40 }
 0x331   : > { %v3307_v19 = vadd.f32 %v5333_v31, %v3167_v23  ;;  %v3028_v61 = vmul.f32 %v3941_v21, %v7225_v10  ;;  %v6048_v18 = vadd.f32 %v4149_v58, %v1806_v35  ;;  %v1810_v45 = vadd.f32 %v5879_v9, %v4762_v1  ;;  %v7227_v35 = vld [vmem:[#allocation20_spill] sm:$0xff] }
 0x332   : > { %3434 = vst [vmem:[%s5455_s9 + $0xf0] sm:$0xff] %v3306_v15  ;;  %v2632_v23 = vmul.f32 %v6019_v32, %v6019_v32  ;;  %v3169_v10 = vmul.f32 %v5364_v29, %v3029_v6  ;;  %v2887_v48 = vadd.f32 1e-05, %v2695_v49  ;;  %2455 = vadd.xlane.f32.xlu0 %v2454_v39  ;;  %v2137_v13 = vadd.f32 %v6002_v56, %v6033_v62  ;;  %v6059_v33 = vpop.xlane.xlu1 %2054  ;;  %v6067_v6 = vpop.f32.mrf.mxu1  ;;  %v7229_v15 = vld [vmem:[#allocation23_spill] sm:$0xff] }
 0x333   : > { %3435 = vst [vmem:[%s5455_s9 + $0xf8] sm:$0xff] %v3307_v19  ;;  %7226 = vst [vmem:[#allocation19_spill] sm:$0xff] %v6048_v18  ;;  %v3168_v24 = vmul.f32 %v5361_v53, %v3028_v61  ;;  %v2776_v42 = vsub.f32 %v7227_v35, %v5929_v44  ;;  %v1812_v9 = vadd.f32 %v5911_v2, %v4768_v7  ;;  %v7228_v2 = vld [vmem:[#allocation21_spill] sm:$0xff]  ;;  %v6080_v22 = vmul.f32 0.00390625, %v5873_v14 }
 0x334   : > { %v2696_v40 = vsub.f32 %v2568_v0, %v2632_v23  ;;  %v2140_v61 = vadd.f32 %v6036_v57, %v6048_v18  ;;  %v3309_v49 = vadd.f32 %v5333_v31, %v3169_v10  ;;  %3946 = vrsqrt.f32 %v2887_v48  ;;  %2138 = vadd.xlane.f32.xlu1 %v2137_v13  ;;  %v6073_v12 = vpop.xlane.xlu0 %2057  ;;  %v7230_v23 = vld [vmem:[#allocation22_spill] sm:$0xff] }
 0x335   : > { %v3308_v39 = vadd.f32 %v5376_v26, %v3168_v24  ;;  %v1818_v27 = vadd.f32 %v5970_v30, %v4768_v7  ;;  %v2777_v21 = vsub.f32 %v7228_v2, %v5929_v44  ;;  %v4150_v0 = vld [vmem:[%s4507_s20 + $0x390] sm:$0xff]  ;;  %v2274_v44 = vmul.f32 %v6033_v62, %v6033_v62  ;;  %v4152_v2 = vld [vmem:[%s4507_s20 + $0x3a8] sm:$0xff] }
 0x336   : > { %v2888_v46 = vadd.f32 1e-05, %v2696_v40  ;;  %v3943_v58 = vpop.eup %3942  ;;  %3437 = vst [vmem:[%s5455_s9 + $0x108] sm:$0xff] %v3309_v49  ;;  %v6087_v24 = vadd.f32 %v4150_v0, %v1810_v45  ;;  %2141 = vadd.xlane.f32.xlu0 %v2140_v61  ;;  %v2275_v10 = vmul.f32 %v6002_v56, %v6002_v56  ;;  %v6093_v14 = vpop.xlane.xlu1 %2374  ;;  %v7232_v48 = vsub.f32 %v7219_v16, %v5909_v28 }
 0x337   : > { %3436 = vst [vmem:[%s5455_s9 + $0x100] sm:$0xff] %v3308_v39  ;;  %v7233_v35 = vsub.f32 %v7220_v54, %v5909_v28  ;;  %v1816_v45 = vadd.f32 %v5942_v25, %v4762_v1  ;;  %v1827_v61 = vpop.f32.mrf.mxu1  ;;  %v4151_v39 = vld [vmem:[%s4507_s20 + $0x398] sm:$0xff]  ;;  %v6107_v0 = vadd.f32 %v4152_v2, %v1818_v27  ;;  %v6110_v30 = vmul.f32 0.00390625, %v5888_v5 }
 0x338   : > { %7231 = vst [vmem:[#allocation18_spill] sm:$0xff] %v6087_v24  ;;  %v3030_v13 = vmul.f32 %v3943_v58, %v7232_v48  ;;  %3948 = vrsqrt.f32 %v2888_v46  ;;  %v6104_v49 = vadd.f32 %v4151_v39, %v1812_v9  ;;  %v2457_v16 = vadd.f32 %v2275_v10, %v2274_v44  ;;  %v6112_v48 = vpop.xlane.xlu0 %2377 }
 0x339   : > { %v3031_v40 = vmul.f32 %v3943_v58, %v7233_v35  ;;  %7235 = vst [vmem:[#allocation21_spill] sm:$0xff] %v6107_v0  ;;  %v3945_v28 = vpop.eup %3944  ;;  %v2633_v25 = vmul.f32 %v6080_v22, %v6080_v22  ;;  %v2569_v9 = vmul.f32 0.00390625, %v5904_v34  ;;  %v2276_v5 = vmul.f32 %v6048_v18, %v6048_v18 }
 0x33a   : > { %7234 = vst [vmem:[#allocation20_spill] sm:$0xff] %v6104_v49  ;;  %v3170_v54 = vmul.f32 %v5361_v53, %v3030_v13  ;;  %v3032_v58 = vmul.f32 %v3945_v28, %v2776_v42  ;;  %v3033_v27 = vmul.f32 %v3945_v28, %v2777_v21  ;;  %2458 = vadd.xlane.f32.xlu1 %v2457_v16  ;;  %v6123_v10 = vpop.xlane.xlu1 %2060  ;;  %v6130_v42 = vpop.f32.mrf.mxu1 }
 0x33b   : > { %v3171_v46 = vmul.f32 %v5364_v29, %v3031_v40  ;;  %v2277_v44 = vmul.f32 %v6036_v57, %v6036_v57  ;;  %v4153_v40 = vld [vmem:[%s4507_s20 + $0x3a0] sm:$0xff]  ;;  %v2697_v34 = vsub.f32 %v2569_v9, %v2633_v25  ;;  %v1820_v16 = vadd.f32 %v6006_v55, %v4762_v1 }
 0x33c   : > { %v3310_v13 = vadd.f32 %v5376_v26, %v3170_v54  ;;  %v6128_v39 = vadd.f32 %v4153_v40, %v1816_v45  ;;  %v3172_v21 = vmul.f32 %v5361_v53, %v3032_v58  ;;  %v3173_v2 = vmul.f32 %v5364_v29, %v3033_v27  ;;  %v6136_v19 = vpop.xlane.xlu0 %2063  ;;  %v1831_v40 = vpop.f32.mrf.mxu1 }
 0x33d   : > { %v3311_v35 = vadd.f32 %v5333_v31, %v3171_v46  ;;  %v2460_v28 = vadd.f32 %v2277_v44, %v2276_v5  ;;  %v2889_v54 = vadd.f32 1e-05, %v2697_v34  ;;  %v2634_v45 = vmul.f32 %v6110_v30, %v6110_v30  ;;  %v7237_v44 = vld [vmem:[#allocation24_spill] sm:$0xff] }
 0x33e   : > { %7236 = vst [vmem:[#allocation23_spill] sm:$0xff] %v6128_v39  ;;  %3438 = vst [vmem:[%s5455_s9 + $0x110] sm:$0xff] %v3310_v13  ;;  %v2570_v46 = vmul.f32 0.00390625, %v5920_v3  ;;  %v2143_v25 = vadd.f32 %v6104_v49, %v6087_v24  ;;  %v3312_v9 = vadd.f32 %v5376_v26, %v3172_v21  ;;  %v3313_v55 = vadd.f32 %v5333_v31, %v3173_v2  ;;  %v6151_v5 = vpop.xlane.xlu1 %2380  ;;  %v7239_v21 = vld [vmem:[#allocation27_spill] sm:$0xff] }
 0x33f   : > { %3439 = vst [vmem:[%s5455_s9 + $0x118] sm:$0xff] %v3311_v35  ;;  %2461 = vadd.xlane.f32.xlu0 %v2460_v28  ;;  %v1822_v58 = vadd.f32 %v6038_v20, %v4768_v7  ;;  %v2146_v27 = vadd.f32 %v6107_v0, %v6128_v39  ;;  %v2780_v3 = vsub.f32 %v7237_v44, %v6019_v32  ;;  %3950 = vrsqrt.f32 %v2889_v54  ;;  %v7238_v20 = vld [vmem:[#allocation25_spill] sm:$0xff]  ;;  %v7240_v28 = vld [vmem:[#allocation26_spill] sm:$0xff]  ;;  %v4155_v2 = vld [vmem:[%s4507_s20 + $0x3b8] sm:$0xff] }
 0x340   : > { %v2698_v13 = vsub.f32 %v2570_v46, %v2634_v45  ;;  %2144 = vadd.xlane.f32.xlu1 %v2143_v25  ;;  %v1828_v35 = vadd.f32 %v1827_v61, %v4768_v7  ;;  %3440 = vst [vmem:[%s5455_s9 + $0x120] sm:$0xff] %v3312_v9  ;;  %3441 = vst [vmem:[%s5455_s9 + $0x128] sm:$0xff] %v3313_v55  ;;  %v2781_v34 = vsub.f32 %v7238_v20, %v6019_v32  ;;  %v6167_v54 = vpop.xlane.xlu0 %2383  ;;  %v4154_v45 = vld [vmem:[%s4507_s20 + $0x3b0] sm:$0xff] }
 0x341   : > { %v6165_v44 = vmul.f32 0.00390625, %v5935_v37  ;;  %v3947_v61 = vpop.eup %3946  ;;  %v6170_v46 = vadd.f32 %v4154_v45, %v1820_v16  ;;  %v2278_v32 = vmul.f32 %v6087_v24, %v6087_v24  ;;  %v2279_v9 = vmul.f32 %v6104_v49, %v6104_v49  ;;  %v4156_v45 = vld [vmem:[%s4507_s20 + $0x3c8] sm:$0xff] }
 0x342   : > { %v2890_v25 = vadd.f32 1e-05, %v2698_v13  ;;  %v7242_v55 = vsub.f32 %v7229_v15, %v5981_v50  ;;  %v7243_v37 = vsub.f32 %v7230_v23, %v5981_v50  ;;  %v6183_v18 = vadd.f32 %v4155_v2, %v1822_v58  ;;  %v6187_v13 = vpop.xlane.xlu1 %2066  ;;  %v1835_v50 = vpop.f32.mrf.mxu1  ;;  %v4161_v24 = vld [vmem:[%s4507_s20 + $0x3e8] sm:$0xff] }
 0x343   : > { %7241 = vst [vmem:[#allocation22_spill] sm:$0xff] %v6170_v46  ;;  %v1826_v16 = vadd.f32 %v6067_v6, %v4762_v1  ;;  %2147 = vadd.xlane.f32.xlu0 %v2146_v27  ;;  %v6190_v49 = vadd.f32 %v4156_v45, %v1828_v35  ;;  %v6193_v15 = vmul.f32 0.00390625, %v5947_v8  ;;  %v2635_v6 = vmul.f32 %v6165_v44, %v6165_v44 }
 0x344   : > { %v3034_v20 = vmul.f32 %v3947_v61, %v7242_v55  ;;  %v3035_v57 = vmul.f32 %v3947_v61, %v7243_v37  ;;  %7244 = vst [vmem:[#allocation24_spill] sm:$0xff] %v6183_v18  ;;  %3952 = vrsqrt.f32 %v2890_v25  ;;  %v2463_v55 = vadd.f32 %v2279_v9, %v2278_v32  ;;  %v6200_v61 = vpop.xlane.xlu0 %2069 }
 0x345   : > { %7245 = vst [vmem:[#allocation25_spill] sm:$0xff] %v6190_v49  ;;  %v3949_v23 = vpop.eup %3948  ;;  %v2571_v27 = vmul.f32 0.00390625, %v5963_v11  ;;  %v2280_v8 = vmul.f32 %v6128_v39, %v6128_v39  ;;  %v2281_v32 = vmul.f32 %v6107_v0, %v6107_v0  ;;  %v1837_v39 = vpop.f32.mrf.mxu1 }
 0x346   : > { %v3174_v58 = vmul.f32 %v5361_v53, %v3034_v20  ;;  %v3175_v2 = vmul.f32 %v5364_v29, %v3035_v57  ;;  %v3036_v35 = vmul.f32 %v3949_v23, %v2780_v3  ;;  %v3037_v25 = vmul.f32 %v3949_v23, %v2781_v34  ;;  %2464 = vadd.xlane.f32.xlu1 %v2463_v55  ;;  %v4157_v20 = vld [vmem:[%s4507_s20 + $0x3c0] sm:$0xff]  ;;  %v6211_v45 = vpop.xlane.xlu1 %2386 }
 0x347   : > { %v6209_v37 = vadd.f32 %v4157_v20, %v1826_v16  ;;  %v2699_v11 = vsub.f32 %v2571_v27, %v2635_v6  ;;  %v1830_v55 = vadd.f32 %v6130_v42, %v4762_v1  ;;  %v2466_v23 = vadd.f32 %v2281_v32, %v2280_v8  ;;  %v7246_v20 = vld [vmem:[#allocation28_spill] sm:$0xff] }
 0x348   : > { %v3314_v57 = vadd.f32 %v5376_v26, %v3174_v58  ;;  %v3315_v9 = vadd.f32 %v5333_v31, %v3175_v2  ;;  %v3176_v3 = vmul.f32 %v5361_v53, %v3036_v35  ;;  %v3177_v34 = vmul.f32 %v5364_v29, %v3037_v25  ;;  %v6224_v27 = vpop.xlane.xlu0 %2389 }
 0x349   : > { %v2891_v58 = vadd.f32 1e-05, %v2699_v11  ;;  %v2636_v16 = vmul.f32 %v6193_v15, %v6193_v15  ;;  %v2572_v2 = vmul.f32 0.00390625, %v5976_v36  ;;  %v2149_v6 = vadd.f32 %v6183_v18, %v6170_v46  ;;  %2467 = vadd.xlane.f32.xlu0 %v2466_v23 }
 0x34a   : > { %3442 = vst [vmem:[%s5455_s9 + $0x130] sm:$0xff] %v3314_v57  ;;  %3443 = vst [vmem:[%s5455_s9 + $0x138] sm:$0xff] %v3315_v9  ;;  %v3316_v35 = vadd.f32 %v5376_v26, %v3176_v3  ;;  %v3317_v42 = vadd.f32 %v5333_v31, %v3177_v34  ;;  %v1832_v25 = vadd.f32 %v1831_v40, %v4768_v7  ;;  %v6233_v9 = vpop.xlane.xlu1 %2072  ;;  %v7247_v40 = vld [vmem:[#allocation29_spill] sm:$0xff]  ;;  %v7248_v34 = vld [vmem:[#allocation31_spill] sm:$0xff] }
 0x34b   : > { %v2152_v8 = vadd.f32 %v6190_v49, %v6209_v37  ;;  %3954 = vrsqrt.f32 %v2891_v58  ;;  %v2700_v32 = vsub.f32 %v2572_v2, %v2636_v16  ;;  %2150 = vadd.xlane.f32.xlu1 %v2149_v6  ;;  %v1836_v36 = vadd.f32 %v1835_v50, %v4762_v1 }
 0x34c   : > { %v1838_v57 = vadd.f32 %v1837_v39, %v4768_v7  ;;  %3444 = vst [vmem:[%s5455_s9 + $0x140] sm:$0xff] %v3316_v35  ;;  %3445 = vst [vmem:[%s5455_s9 + $0x148] sm:$0xff] %v3317_v42  ;;  %v2784_v11 = vsub.f32 %v7246_v20, %v6110_v30  ;;  %v2785_v3 = vsub.f32 %v7247_v40, %v6110_v30  ;;  %v6244_v58 = vmul.f32 0.00390625, %v5993_v63  ;;  %v1839_v39 = vpop.f32.mrf.mxu1  ;;  %v3951_v50 = vpop.eup %3950 }
 0x34d   : > { %v2892_v16 = vadd.f32 1e-05, %v2700_v32  ;;  %v6247_v2 = vmul.f32 0.00390625, %v6014_v43  ;;  %v2282_v6 = vmul.f32 %v6170_v46, %v6170_v46  ;;  %v2283_v30 = vmul.f32 %v6183_v18, %v6183_v18  ;;  %v6253_v35 = vpop.xlane.xlu0 %2075  ;;  %v4158_v32 = vld [vmem:[%s4507_s20 + $0x3d0] sm:$0xff]  ;;  %v4159_v43 = vld [vmem:[%s4507_s20 + $0x3d8] sm:$0xff]  ;;  %2153 = vadd.xlane.f32.xlu0 %v2152_v8  ;;  %v4160_v46 = vld [vmem:[%s4507_s20 + $0x3e0] sm:$0xff] }
 0x34e   : > { %v7249_v63 = vsub.f32 %v7239_v21, %v6080_v22  ;;  %v7250_v20 = vsub.f32 %v7240_v28, %v6080_v22  ;;  %v6262_v23 = vadd.f32 %v4158_v32, %v1830_v55  ;;  %v6265_v0 = vadd.f32 %v4159_v43, %v1832_v25  ;;  %v1841_v8 = vpop.f32.mrf.mxu1 }
 0x34f   : > { %3956 = vrsqrt.f32 %v2892_v16  ;;  %v6268_v18 = vadd.f32 %v4160_v46, %v1836_v36  ;;  %v6271_v56 = vadd.f32 %v4161_v24, %v1838_v57  ;;  %v2469_v21 = vadd.f32 %v2283_v30, %v2282_v6 }
 0x350   : > { %v3038_v42 = vmul.f32 %v3951_v50, %v7249_v63  ;;  %v3039_v40 = vmul.f32 %v3951_v50, %v7250_v20  ;;  %v6273_v63 = vpop.xlane.xlu1 %2392  ;;  %v2637_v55 = vmul.f32 %v6244_v58, %v6244_v58  ;;  %v2573_v25 = vmul.f32 0.00390625, %v6028_v59 }
 0x351   : > { %v3953_v50 = vpop.eup %3952  ;;  %2470 = vadd.xlane.f32.xlu1 %v2469_v21  ;;  %v2284_v24 = vmul.f32 %v6209_v37, %v6209_v37  ;;  %v2285_v46 = vmul.f32 %v6190_v49, %v6190_v49  ;;  %v2638_v36 = vmul.f32 %v6247_v2, %v6247_v2  ;;  %v2574_v57 = vmul.f32 0.00390625, %v6043_v51  ;;  %v6287_v16 = vpop.xlane.xlu0 %2395 }
 0x352   : > { %v3178_v22 = vmul.f32 %v5361_v53, %v3038_v42  ;;  %v3179_v28 = vmul.f32 %v5364_v29, %v3039_v40  ;;  %v3040_v30 = vmul.f32 %v3953_v50, %v2784_v11  ;;  %v3041_v42 = vmul.f32 %v3953_v50, %v2785_v3  ;;  %v7251_v3 = vld [vmem:[#allocation30_spill] sm:$0xff] }
 0x353   : > { %v2701_v20 = vsub.f32 %v2573_v25, %v2637_v55  ;;  %v2472_v40 = vadd.f32 %v2285_v46, %v2284_v24  ;;  %v1842_v32 = vadd.f32 %v1841_v8, %v4768_v7  ;;  %v2702_v43 = vsub.f32 %v2574_v57, %v2638_v36 }
 0x354   : > { %v3318_v59 = vadd.f32 %v5376_v26, %v3178_v22  ;;  %v3319_v6 = vadd.f32 %v5333_v31, %v3179_v28  ;;  %v6292_v21 = vpop.xlane.xlu1 %2078  ;;  %v3180_v49 = vmul.f32 %v5361_v53, %v3040_v30  ;;  %v3181_v51 = vmul.f32 %v5364_v29, %v3041_v42 }
 0x355   : > { %v2155_v22 = vadd.f32 %v6265_v0, %v6262_v23  ;;  %v6301_v11 = vmul.f32 0.00390625, %v6059_v33  ;;  %v2787_v28 = vsub.f32 %v7251_v3, %v6165_v44  ;;  %v2893_v7 = vadd.f32 1e-05, %v2701_v20  ;;  %2473 = vadd.xlane.f32.xlu0 %v2472_v40  ;;  %v6307_v8 = vpop.xlane.xlu0 %2081  ;;  %v7252_v33 = vld [vmem:[#allocation32_spill] sm:$0xff] }
 0x356   : > { %3446 = vst [vmem:[%s5455_s9 + $0x150] sm:$0xff] %v3318_v59  ;;  %3447 = vst [vmem:[%s5455_s9 + $0x158] sm:$0xff] %v3319_v6  ;;  %v2894_v55 = vadd.f32 1e-05, %v2702_v43  ;;  %v2158_v25 = vadd.f32 %v6271_v56, %v6268_v18  ;;  %v3320_v50 = vadd.f32 %v5376_v26, %v3180_v49  ;;  %v3321_v24 = vadd.f32 %v5333_v31, %v3181_v51  ;;  %v4162_v59 = vld [vmem:[%s4507_s20 + $0x3f8] sm:$0xff] }
 0x357   : > { %v2788_v46 = vsub.f32 %v7252_v33, %v6193_v15  ;;  %2156 = vadd.xlane.f32.xlu1 %v2155_v22  ;;  %v6314_v36 = vmul.f32 0.00390625, %v6073_v12  ;;  %v1840_v57 = vadd.f32 %v1839_v39, %v4762_v1  ;;  %3958 = vrsqrt.f32 %v2893_v7 }
 0x358   : > { %v6318_v6 = vadd.f32 %v4162_v59, %v1842_v32  ;;  %v2286_v30 = vmul.f32 %v6262_v23, %v6262_v23  ;;  %v6322_v42 = vpop.xlane.xlu1 %2398  ;;  %v3955_v49 = vpop.eup %3954  ;;  %3448 = vst [vmem:[%s5455_s9 + $0x160] sm:$0xff] %v3320_v50  ;;  %3449 = vst [vmem:[%s5455_s9 + $0x168] sm:$0xff] %v3321_v24  ;;  %3960 = vrsqrt.f32 %v2894_v55  ;;  %v2287_v20 = vmul.f32 %v6265_v0, %v6265_v0  ;;  %v4163_v59 = vld [vmem:[%s4507_s20 + $0x3f0] sm:$0xff] }
 0x359   : > { %v2639_v12 = vmul.f32 %v6301_v11, %v6301_v11  ;;  %v2575_v1 = vmul.f32 0.00390625, %v6093_v14  ;;  %v7253_v39 = vsub.f32 %v7248_v34, %v6165_v44  ;;  %v3043_v32 = vmul.f32 %v3955_v49, %v2787_v28  ;;  %2159 = vadd.xlane.f32.xlu0 %v2158_v25  ;;  %v6338_v22 = vpop.xlane.xlu0 %2401  ;;  %v7254_v44 = vld [vmem:[#allocation33_spill] sm:$0xff] }
 0x35a   : > { %v2288_v43 = vmul.f32 %v6268_v18, %v6268_v18  ;;  %v2289_v51 = vmul.f32 %v6271_v56, %v6271_v56  ;;  %v2475_v3 = vadd.f32 %v2287_v20, %v2286_v30  ;;  %v2640_v14 = vmul.f32 %v6314_v36, %v6314_v36 }
 0x35b   : > { %v3042_v40 = vmul.f32 %v3955_v49, %v7253_v39  ;;  %v2703_v7 = vsub.f32 %v2575_v1, %v2639_v12  ;;  %v2576_v55 = vmul.f32 0.00390625, %v6112_v48  ;;  %v2789_v34 = vsub.f32 %v7254_v44, %v6193_v15 }
 0x35c   : > { %v3183_v25 = vmul.f32 %v5364_v29, %v3043_v32  ;;  %v2478_v50 = vadd.f32 %v2289_v51, %v2288_v43  ;;  %v6347_v24 = vpop.xlane.xlu1 %2084  ;;  %v3957_v33 = vpop.eup %3956  ;;  %v6350_v30 = vadd.f32 %v4163_v59, %v1840_v57  ;;  %2476 = vadd.xlane.f32.xlu1 %v2475_v3  ;;  %v6353_v48 = vmul.f32 0.00390625, %v6123_v10 }
 0x35d   : > { %v3182_v28 = vmul.f32 %v5361_v53, %v3042_v40  ;;  %v2895_v49 = vadd.f32 1e-05, %v2703_v7  ;;  %v2704_v20 = vsub.f32 %v2576_v55, %v2640_v14  ;;  %v3044_v1 = vmul.f32 %v3957_v33, %v2788_v46  ;;  %v6357_v40 = vpop.xlane.xlu0 %2087  ;;  %v7255_v46 = vld [vmem:[#allocation35_spill] sm:$0xff]  ;;  %v7256_v7 = vld [vmem:[#allocation34_spill] sm:$0xff] }
 0x35e   : > { %v3323_v12 = vadd.f32 %v5333_v31, %v3183_v25  ;;  %v3045_v39 = vmul.f32 %v3957_v33, %v2789_v34  ;;  %2479 = vadd.xlane.f32.xlu0 %v2478_v50  ;;  %v2161_v57 = vadd.f32 %v6318_v6, %v6350_v30  ;;  %v6362_v43 = vmul.f32 0.00390625, %v6136_v19 }
 0x35f   : > { %v3322_v15 = vadd.f32 %v5376_v26, %v3182_v28  ;;  %3962 = vrsqrt.f32 %v2895_v49  ;;  %v2896_v32 = vadd.f32 1e-05, %v2704_v20  ;;  %v3184_v10 = vmul.f32 %v5361_v53, %v3044_v1  ;;  %v7257_v20 = vld [vmem:[#allocation36_spill] sm:$0xff] }
 0x360   : > { %3451 = vst [vmem:[%s5455_s9 + $0x178] sm:$0xff] %v3323_v12  ;;  %v3185_v51 = vmul.f32 %v5364_v29, %v3045_v39  ;;  %v2790_v3 = vsub.f32 %v7255_v46, %v6244_v58  ;;  %v2791_v14 = vsub.f32 %v7256_v7, %v6244_v58  ;;  %2162 = vadd.xlane.f32.xlu1 %v2161_v57  ;;  %v6376_v44 = vpop.xlane.xlu1 %2404  ;;  %v2577_v50 = vmul.f32 0.00390625, %v6151_v5  ;;  %v7258_v12 = vld [vmem:[#allocation37_spill] sm:$0xff] }
 0x361   : > { %3450 = vst [vmem:[%s5455_s9 + $0x170] sm:$0xff] %v3322_v15  ;;  %3964 = vrsqrt.f32 %v2896_v32  ;;  %v2290_v19 = vmul.f32 %v6350_v30, %v6350_v30  ;;  %v2291_v55 = vmul.f32 %v6318_v6, %v6318_v6  ;;  %v3324_v34 = vadd.f32 %v5376_v26, %v3184_v10  ;;  %v6398_v32 = vpop.xlane.xlu0 %2407 }
 0x362   : > { %v3325_v28 = vadd.f32 %v5333_v31, %v3185_v51  ;;  %v2641_v25 = vmul.f32 %v6353_v48, %v6353_v48  ;;  %v2642_v33 = vmul.f32 %v6362_v43, %v6362_v43  ;;  %v2578_v59 = vmul.f32 0.00390625, %v6167_v54  ;;  %v7259_v54 = vld [vmem:[#allocation39_spill] sm:$0xff] }
 0x363   : > { %v2481_v58 = vadd.f32 %v2291_v55, %v2290_v19  ;;  %v6387_v49 = vmul.f32 0.00390625, %v6187_v13  ;;  %3452 = vst [vmem:[%s5455_s9 + $0x180] sm:$0xff] %v3324_v34  ;;  %v2792_v15 = vsub.f32 %v7257_v20, %v6247_v2  ;;  %v2793_v1 = vsub.f32 %v7258_v12, %v6247_v2 }
 0x364   : > { %3453 = vst [vmem:[%s5455_s9 + $0x188] sm:$0xff] %v3325_v28  ;;  %v2705_v39 = vsub.f32 %v2577_v50, %v2641_v25  ;;  %v6396_v5 = vmul.f32 0.00390625, %v6200_v61  ;;  %v3959_v57 = vpop.eup %3958  ;;  %v2794_v10 = vsub.f32 %v7259_v54, %v6301_v11  ;;  %v2706_v13 = vsub.f32 %v2578_v59, %v2642_v33  ;;  %v6409_v20 = vpop.xlane.xlu1 %2090 }
 0x365   : > { %2482 = vadd.xlane.f32.xlu1 %v2481_v58  ;;  %v2579_v51 = vmul.f32 0.00390625, %v6211_v45  ;;  %v2580_v46 = vmul.f32 0.00390625, %v6224_v27  ;;  %v3961_v7 = vpop.eup %3960  ;;  %v3046_v19 = vmul.f32 %v3959_v57, %v2790_v3  ;;  %v3047_v55 = vmul.f32 %v3959_v57, %v2791_v14 }
 0x366   : > { %v2897_v2 = vadd.f32 1e-05, %v2705_v39  ;;  %v6405_v34 = vmul.f32 0.00390625, %v6233_v9  ;;  %v3048_v61 = vmul.f32 %v3961_v7, %v2792_v15  ;;  %v3049_v28 = vmul.f32 %v3961_v7, %v2793_v1  ;;  %v7260_v15 = vld [vmem:[#allocation38_spill] sm:$0xff]  ;;  %v6421_v39 = vpop.xlane.xlu0 %2093 }
 0x367   : > { %v2898_v25 = vadd.f32 1e-05, %v2706_v13  ;;  %v2643_v50 = vmul.f32 %v6387_v49, %v6387_v49  ;;  %v3186_v58 = vmul.f32 %v5361_v53, %v3046_v19  ;;  %v3187_v45 = vmul.f32 %v5364_v29, %v3047_v55  ;;  %v7261_v13 = vld [vmem:[#allocation40_spill] sm:$0xff] }
 0x368   : > { %3966 = vrsqrt.f32 %v2897_v2  ;;  %v2644_v27 = vmul.f32 %v6396_v5, %v6396_v5  ;;  %v3188_v9 = vmul.f32 %v5361_v53, %v3048_v61  ;;  %v3189_v3 = vmul.f32 %v5364_v29, %v3049_v28  ;;  %v7262_v61 = vld [vmem:[#allocation41_spill] sm:$0xff] }
 0x369   : > { %3968 = vrsqrt.f32 %v2898_v25  ;;  %v2707_v14 = vsub.f32 %v2579_v51, %v2643_v50  ;;  %v3326_v33 = vadd.f32 %v5376_v26, %v3186_v58  ;;  %v3327_v59 = vadd.f32 %v5333_v31, %v3187_v45  ;;  %v6439_v58 = vpop.xlane.xlu1 %2410 }
 0x36a   : > { %v2795_v12 = vsub.f32 %v7260_v15, %v6301_v11  ;;  %v2708_v1 = vsub.f32 %v2580_v46, %v2644_v27  ;;  %v3328_v57 = vadd.f32 %v5376_v26, %v3188_v9  ;;  %v3329_v54 = vadd.f32 %v5333_v31, %v3189_v3  ;;  %v7263_v27 = vld [vmem:[#allocation43_spill] sm:$0xff] }
 0x36b   : > { %v2796_v7 = vsub.f32 %v7261_v13, %v6314_v36  ;;  %v2899_v51 = vadd.f32 1e-05, %v2707_v14  ;;  %3454 = vst [vmem:[%s5455_s9 + $0x190] sm:$0xff] %v3326_v33  ;;  %3455 = vst [vmem:[%s5455_s9 + $0x198] sm:$0xff] %v3327_v59  ;;  %v6430_v2 = vmul.f32 0.00390625, %v6253_v35  ;;  %v2645_v11 = vmul.f32 %v6405_v34, %v6405_v34 }
 0x36c   : > { %v3963_v19 = vpop.eup %3962  ;;  %v2900_v55 = vadd.f32 1e-05, %v2708_v1  ;;  %v2581_v46 = vmul.f32 0.00390625, %v6273_v63  ;;  %3456 = vst [vmem:[%s5455_s9 + $0x1a0] sm:$0xff] %v3328_v57  ;;  %3457 = vst [vmem:[%s5455_s9 + $0x1a8] sm:$0xff] %v3329_v54  ;;  %v2797_v28 = vsub.f32 %v7262_v61, %v6314_v36  ;;  %v2798_v35 = vsub.f32 %v7263_v27, %v6353_v48  ;;  %v6454_v1 = vpop.xlane.xlu0 %2413 }
 0x36d   : > { %v3050_v25 = vmul.f32 %v3963_v19, %v2794_v10  ;;  %v3051_v50 = vmul.f32 %v3963_v19, %v2795_v12  ;;  %3970 = vrsqrt.f32 %v2899_v51  ;;  %v2582_v3 = vmul.f32 0.00390625, %v6287_v16  ;;  %v7265_v19 = vld [vmem:[#allocation44_spill] sm:$0xff] }
 0x36e   : > { %v3965_v45 = vpop.eup %3964  ;;  %3972 = vrsqrt.f32 %v2900_v55  ;;  %v2709_v9 = vsub.f32 %v2581_v46, %v2645_v11  ;;  %v2646_v59 = vmul.f32 %v6430_v2, %v6430_v2  ;;  %v6449_v15 = vmul.f32 0.00390625, %v6292_v21  ;;  %v7266_v46 = vld [vmem:[#allocation45_spill] sm:$0xff] }
 0x36f   : > { %v3190_v63 = vmul.f32 %v5361_v53, %v3050_v25  ;;  %v3191_v14 = vmul.f32 %v5364_v29, %v3051_v50  ;;  %v3052_v33 = vmul.f32 %v3965_v45, %v2796_v7  ;;  %v3053_v36 = vmul.f32 %v3965_v45, %v2797_v28  ;;  %v7264_v7 = vld [vmem:[#allocation42_spill] sm:$0xff]  ;;  %v7267_v28 = vld [vmem:[#allocation47_spill] sm:$0xff] }
 0x370   : > { %v2901_v10 = vadd.f32 1e-05, %v2709_v9  ;;  %v6452_v12 = vmul.f32 0.00390625, %v6307_v8  ;;  %v2799_v51 = vsub.f32 %v7264_v7, %v6353_v48  ;;  %v2800_v21 = vsub.f32 %v7265_v19, %v6362_v43  ;;  %v6472_v48 = vpop.xlane.xlu1 %2096  ;;  %v7268_v50 = vld [vmem:[#allocation46_spill] sm:$0xff]  ;;  %v7271_v19 = vld [vmem:[#allocation51_spill] sm:$0xff] }
 0x371   : > { %v3330_v16 = vadd.f32 %v5376_v26, %v3190_v63  ;;  %v3331_v57 = vadd.f32 %v5333_v31, %v3191_v14  ;;  %v3192_v54 = vmul.f32 %v5361_v53, %v3052_v33  ;;  %v3193_v13 = vmul.f32 %v5364_v29, %v3053_v36  ;;  %v7269_v14 = vld [vmem:[#allocation48_spill] sm:$0xff]  ;;  %v7270_v33 = vld [vmem:[#allocation49_spill] sm:$0xff] }
 0x372   : > { %3974 = vrsqrt.f32 %v2901_v10  ;;  %v2710_v8 = vsub.f32 %v2582_v3, %v2646_v59  ;;  %v2801_v61 = vsub.f32 %v7266_v46, %v6362_v43  ;;  %v2802_v25 = vsub.f32 %v7267_v28, %v6387_v49 }
 0x373   : > { %3458 = vst [vmem:[%s5455_s9 + $0x1b0] sm:$0xff] %v3330_v16  ;;  %3459 = vst [vmem:[%s5455_s9 + $0x1b8] sm:$0xff] %v3331_v57  ;;  %v3332_v55 = vadd.f32 %v5376_v26, %v3192_v54  ;;  %v3333_v11 = vadd.f32 %v5333_v31, %v3193_v13  ;;  %v2803_v45 = vsub.f32 %v7268_v50, %v6387_v49  ;;  %v2583_v3 = vmul.f32 0.00390625, %v6322_v42  ;;  %v6488_v42 = vpop.xlane.xlu0 %2099 }
 0x374   : > { %v2902_v27 = vadd.f32 1e-05, %v2710_v8  ;;  %v2647_v9 = vmul.f32 %v6449_v15, %v6449_v15  ;;  %v2804_v43 = vsub.f32 %v7269_v14, %v6396_v5  ;;  %v2805_v36 = vsub.f32 %v7270_v33, %v6396_v5 }
 0x375   : > { %v3967_v63 = vpop.eup %3966  ;;  %3460 = vst [vmem:[%s5455_s9 + $0x1c0] sm:$0xff] %v3332_v55  ;;  %3461 = vst [vmem:[%s5455_s9 + $0x1c8] sm:$0xff] %v3333_v11  ;;  %v2648_v10 = vmul.f32 %v6452_v12, %v6452_v12  ;;  %v2584_v49 = vmul.f32 0.00390625, %v6338_v22  ;;  %v2806_v8 = vsub.f32 %v7271_v19, %v6405_v34  ;;  %v6495_v22 = vmul.f32 0.00390625, %v6347_v24 }
 0x376   : > { %v3969_v59 = vpop.eup %3968  ;;  %v3054_v16 = vmul.f32 %v3967_v63, %v2798_v35  ;;  %v3055_v57 = vmul.f32 %v3967_v63, %v2799_v51  ;;  %3976 = vrsqrt.f32 %v2902_v27  ;;  %v2711_v54 = vsub.f32 %v2583_v3, %v2647_v9  ;;  %v6502_v28 = vpop.xlane.xlu1 %2416 }
 0x377   : > { %v3056_v13 = vmul.f32 %v3969_v59, %v2800_v21  ;;  %v3057_v7 = vmul.f32 %v3969_v59, %v2801_v61  ;;  %v2712_v55 = vsub.f32 %v2584_v49, %v2648_v10  ;;  %v6500_v61 = vmul.f32 0.00390625, %v6357_v40 }
 0x378   : > { %v3194_v5 = vmul.f32 %v5361_v53, %v3054_v16  ;;  %v3195_v11 = vmul.f32 %v5364_v29, %v3055_v57  ;;  %v2903_v46 = vadd.f32 1e-05, %v2711_v54  ;;  %v2585_v24 = vmul.f32 0.00390625, %v6376_v44  ;;  %v7272_v54 = vld [vmem:[#allocation50_spill] sm:$0xff] }
 0x379   : > { %v3196_v35 = vmul.f32 %v5361_v53, %v3056_v13  ;;  %v3197_v51 = vmul.f32 %v5364_v29, %v3057_v7  ;;  %v2904_v21 = vadd.f32 1e-05, %v2712_v55  ;;  %v2649_v59 = vmul.f32 %v6495_v22, %v6495_v22  ;;  %v6513_v16 = vpop.xlane.xlu0 %2419 }
 0x37a   : > { %v3971_v50 = vpop.eup %3970  ;;  %v3334_v27 = vadd.f32 %v5376_v26, %v3194_v5  ;;  %v3335_v9 = vadd.f32 %v5333_v31, %v3195_v11  ;;  %3978 = vrsqrt.f32 %v2903_v46  ;;  %v2807_v13 = vsub.f32 %v7272_v54, %v6405_v34 }
 0x37b   : > { %v3973_v3 = vpop.eup %3972  ;;  %v3336_v63 = vadd.f32 %v5376_v26, %v3196_v35  ;;  %v3337_v14 = vadd.f32 %v5333_v31, %v3197_v51  ;;  %v3058_v33 = vmul.f32 %v3971_v50, %v2802_v25  ;;  %v3059_v40 = vmul.f32 %v3971_v50, %v2803_v45  ;;  %v6526_v19 = vpop.xlane.xlu1 %2102  ;;  %v7273_v50 = vld [vmem:[#allocation52_spill] sm:$0xff] }
 0x37c   : > { %3462 = vst [vmem:[%s5455_s9 + $0x1d0] sm:$0xff] %v3334_v27  ;;  %3463 = vst [vmem:[%s5455_s9 + $0x1d8] sm:$0xff] %v3335_v9  ;;  %v3060_v10 = vmul.f32 %v3973_v3, %v2804_v43  ;;  %v3061_v49 = vmul.f32 %v3973_v3, %v2805_v36  ;;  %3980 = vrsqrt.f32 %v2904_v21  ;;  %v2650_v25 = vmul.f32 %v6500_v61, %v6500_v61 }
 0x37d   : > { %3464 = vst [vmem:[%s5455_s9 + $0x1e0] sm:$0xff] %v3336_v63  ;;  %3465 = vst [vmem:[%s5455_s9 + $0x1e8] sm:$0xff] %v3337_v14  ;;  %v3198_v44 = vmul.f32 %v5361_v53, %v3058_v33  ;;  %v3199_v57 = vmul.f32 %v5364_v29, %v3059_v40  ;;  %v2586_v45 = vmul.f32 0.00390625, %v6398_v32  ;;  %v2713_v7 = vsub.f32 %v2585_v24, %v2649_v59  ;;  %v7275_v33 = vld [vmem:[#allocation55_spill] sm:$0xff]  ;;  %v7276_v59 = vld [vmem:[#allocation54_spill] sm:$0xff] }
 0x37e   : > { %v3200_v43 = vmul.f32 %v5361_v53, %v3060_v10  ;;  %v3201_v36 = vmul.f32 %v5364_v29, %v3061_v49  ;;  %v6531_v32 = vmul.f32 0.00390625, %v6409_v20  ;;  %v2808_v27 = vsub.f32 %v7273_v50, %v6430_v2  ;;  %v7274_v20 = vld [vmem:[#allocation53_spill] sm:$0xff]  ;;  %v2106_v10 = vpop.xlane.xlu0 %2105 }
 0x37f   : > { %v3975_v55 = vpop.eup %3974  ;;  %v3338_v5 = vadd.f32 %v5376_v26, %v3198_v44  ;;  %v3339_v11 = vadd.f32 %v5333_v31, %v3199_v57  ;;  %v2714_v46 = vsub.f32 %v2586_v45, %v2650_v25  ;;  %v2905_v9 = vadd.f32 1e-05, %v2713_v7 }
 0x380   : > { %v3340_v35 = vadd.f32 %v5376_v26, %v3200_v43  ;;  %v3341_v51 = vadd.f32 %v5333_v31, %v3201_v36  ;;  %v3062_v21 = vmul.f32 %v3975_v55, %v2806_v8  ;;  %v3063_v34 = vmul.f32 %v3975_v55, %v2807_v13  ;;  %v7277_v55 = vld [vmem:[#allocation56_spill] sm:$0xff] }
 0x381   : > { %3466 = vst [vmem:[%s5455_s9 + $0x1f0] sm:$0xff] %v3338_v5  ;;  %3467 = vst [vmem:[%s5455_s9 + $0x1f8] sm:$0xff] %v3339_v11  ;;  %v2906_v24 = vadd.f32 1e-05, %v2714_v46  ;;  %v6540_v3 = vmul.f32 0.00390625, %v6421_v39  ;;  %v2809_v63 = vsub.f32 %v7274_v20, %v6430_v2  ;;  %v2810_v40 = vsub.f32 %v7275_v33, %v6449_v15  ;;  %v7278_v11 = vld [vmem:[#allocation57_spill] sm:$0xff] }
 0x382   : > { %3468 = vst [vmem:[%s5455_s9 + $0x200] sm:$0xff] %v3340_v35  ;;  %3469 = vst [vmem:[%s5455_s9 + $0x208] sm:$0xff] %v3341_v51  ;;  %v3202_v14 = vmul.f32 %v5361_v53, %v3062_v21  ;;  %v3203_v8 = vmul.f32 %v5364_v29, %v3063_v34  ;;  %v2811_v39 = vsub.f32 %v7276_v59, %v6449_v15  ;;  %3982 = vrsqrt.f32 %v2905_v9 }
 0x383   : > { %v3977_v49 = vpop.eup %3976  ;;  %v2651_v44 = vmul.f32 %v6531_v32, %v6531_v32  ;;  %v2587_v2 = vmul.f32 0.00390625, %v6439_v58  ;;  %v2423_v36 = vpop.xlane.xlu1 %2422  ;;  %3984 = vrsqrt.f32 %v2906_v24  ;;  %v2652_v13 = vmul.f32 %v6540_v3, %v6540_v3 }
 0x384   : > { %v3342_v57 = vadd.f32 %v5376_v26, %v3202_v14  ;;  %v3343_v25 = vadd.f32 %v5333_v31, %v3203_v8  ;;  %v3064_v45 = vmul.f32 %v3977_v49, %v2808_v27  ;;  %v3065_v43 = vmul.f32 %v3977_v49, %v2809_v63 }
 0x385   : > { %v2715_v54 = vsub.f32 %v2587_v2, %v2651_v44  ;;  %v2588_v15 = vmul.f32 0.00390625, %v6454_v1  ;;  %v2812_v5 = vsub.f32 %v7277_v55, %v6452_v12  ;;  %v2813_v46 = vsub.f32 %v7278_v11, %v6452_v12  ;;  %v7279_v12 = vld [vmem:[#allocation59_spill] sm:$0xff]  ;;  %v7280_v11 = vld [vmem:[#allocation58_spill] sm:$0xff] }
 0x386   : > { %3470 = vst [vmem:[%s5455_s9 + $0x210] sm:$0xff] %v3342_v57  ;;  %3471 = vst [vmem:[%s5455_s9 + $0x218] sm:$0xff] %v3343_v25  ;;  %v3204_v7 = vmul.f32 %v5361_v53, %v3064_v45  ;;  %v3205_v58 = vmul.f32 %v5364_v29, %v3065_v43  ;;  %v6569_v34 = vmul.f32 0.00390625, %v6472_v48  ;;  %v6572_v1 = vmul.f32 0.00390625, %v6488_v42 }
 0x387   : > { %v3979_v35 = vpop.eup %3978  ;;  %v2907_v51 = vadd.f32 1e-05, %v2715_v54  ;;  %v2716_v21 = vsub.f32 %v2588_v15, %v2652_v13  ;;  %v2426_v20 = vpop.xlane.xlu0 %2425  ;;  %v2814_v14 = vsub.f32 %v7279_v12, %v6495_v22  ;;  %v2589_v33 = vmul.f32 0.00390625, %v6502_v28 }
 0x388   : > { %v3344_v50 = vadd.f32 %v5376_v26, %v3204_v7  ;;  %v3345_v27 = vadd.f32 %v5333_v31, %v3205_v58  ;;  %v3066_v9 = vmul.f32 %v3979_v35, %v2810_v40  ;;  %v3067_v24 = vmul.f32 %v3979_v35, %v2811_v39  ;;  %v2109_v40 = vpop.xlane.xlu1 %2108  ;;  %v7281_v35 = vld [vmem:[#allocation60_spill] sm:$0xff] }
 0x389   : > { %v3981_v63 = vpop.eup %3980  ;;  %3986 = vrsqrt.f32 %v2907_v51  ;;  %v2908_v8 = vadd.f32 1e-05, %v2716_v21  ;;  %v2653_v39 = vmul.f32 %v6569_v34, %v6569_v34  ;;  %v2654_v44 = vmul.f32 %v6572_v1, %v6572_v1 }
 0x38a   : > { %3472 = vst [vmem:[%s5455_s9 + $0x220] sm:$0xff] %v3344_v50  ;;  %3473 = vst [vmem:[%s5455_s9 + $0x228] sm:$0xff] %v3345_v27  ;;  %v3206_v48 = vmul.f32 %v5361_v53, %v3066_v9  ;;  %v3207_v42 = vmul.f32 %v5364_v29, %v3067_v24  ;;  %v3068_v49 = vmul.f32 %v3981_v63, %v2812_v5  ;;  %v2590_v28 = vmul.f32 0.00390625, %v6513_v16  ;;  %v7283_v9 = vld [vmem:[#allocation63_spill] sm:$0xff] }
 0x38b   : > { %v3069_v59 = vmul.f32 %v3981_v63, %v2813_v46  ;;  %3988 = vrsqrt.f32 %v2908_v8  ;;  %v2112_v43 = vpop.xlane.xlu0 %2111  ;;  %v2717_v54 = vsub.f32 %v2589_v33, %v2653_v39  ;;  %v6593_v15 = vmul.f32 0.00390625, %v6526_v19  ;;  %v7284_v8 = vld [vmem:[#allocation62_spill] sm:$0xff] }
 0x38c   : > { %v3346_v2 = vadd.f32 %v5376_v26, %v3206_v48  ;;  %v3347_v57 = vadd.f32 %v5333_v31, %v3207_v42  ;;  %v3208_v25 = vmul.f32 %v5361_v53, %v3068_v49  ;;  %v2718_v13 = vsub.f32 %v2590_v28, %v2654_v44 }
 0x38d   : > { %v3209_v45 = vmul.f32 %v5364_v29, %v3069_v59  ;;  %v6595_v7 = vmul.f32 0.00390625, %v2106_v10  ;;  %v2591_v55 = vmul.f32 0.00390625, %v2423_v36  ;;  %v2592_v5 = vmul.f32 0.00390625, %v2426_v20  ;;  %v7282_v10 = vld [vmem:[#allocation61_spill] sm:$0xff] }
 0x38e   : > { %3474 = vst [vmem:[%s5455_s9 + $0x230] sm:$0xff] %v3346_v2  ;;  %3475 = vst [vmem:[%s5455_s9 + $0x238] sm:$0xff] %v3347_v57  ;;  %v3348_v16 = vadd.f32 %v5376_v26, %v3208_v25  ;;  %v2815_v46 = vsub.f32 %v7280_v11, %v6495_v22  ;;  %v2816_v51 = vsub.f32 %v7281_v35, %v6500_v61  ;;  %v2909_v21 = vadd.f32 1e-05, %v2717_v54 }
 0x38f   : > { %v3349_v58 = vadd.f32 %v5333_v31, %v3209_v45  ;;  %v2910_v50 = vadd.f32 1e-05, %v2718_v13  ;;  %v3983_v19 = vpop.eup %3982  ;;  %v2817_v27 = vsub.f32 %v7282_v10, %v6500_v61  ;;  %v2818_v24 = vsub.f32 %v7283_v9, %v6531_v32  ;;  %v2429_v20 = vpop.xlane.xlu1 %2428 }
 0x390   : > { %3476 = vst [vmem:[%s5455_s9 + $0x240] sm:$0xff] %v3348_v16  ;;  %v2655_v36 = vmul.f32 %v6593_v15, %v6593_v15  ;;  %v2656_v22 = vmul.f32 %v6595_v7, %v6595_v7  ;;  %v3070_v63 = vmul.f32 %v3983_v19, %v2814_v14  ;;  %v3071_v12 = vmul.f32 %v3983_v19, %v2815_v46  ;;  %v3985_v48 = vpop.eup %3984  ;;  %v2432_v59 = vpop.xlane.xlu0 %2431  ;;  %v7285_v14 = vld [vmem:[#allocation65_spill] sm:$0xff]  ;;  %v7287_v46 = vld [vmem:[#allocation67_spill] sm:$0xff] }
 0x391   : > { %3477 = vst [vmem:[%s5455_s9 + $0x248] sm:$0xff] %v3349_v58  ;;  %v2819_v33 = vsub.f32 %v7284_v8, %v6531_v32  ;;  %3990 = vrsqrt.f32 %v2909_v21  ;;  %v6617_v49 = vmul.f32 0.00390625, %v2109_v40  ;;  %v3072_v28 = vmul.f32 %v3985_v48, %v2816_v51 }
 0x392   : > { %3992 = vrsqrt.f32 %v2910_v50  ;;  %v2719_v42 = vsub.f32 %v2591_v55, %v2655_v36  ;;  %v2720_v61 = vsub.f32 %v2592_v5, %v2656_v22  ;;  %v3210_v39 = vmul.f32 %v5361_v53, %v3070_v63  ;;  %v7286_v5 = vld [vmem:[#allocation64_spill] sm:$0xff] }
 0x393   : > { %v3211_v44 = vmul.f32 %v5364_v29, %v3071_v12  ;;  %v3073_v2 = vmul.f32 %v3985_v48, %v2817_v27  ;;  %v2820_v57 = vsub.f32 %v7285_v14, %v6540_v3  ;;  %v6623_v45 = vmul.f32 0.00390625, %v2112_v43  ;;  %v2115_v54 = vpop.xlane.xlu1 %2114 }
 0x394   : > { %v2911_v32 = vadd.f32 1e-05, %v2719_v42  ;;  %v2912_v25 = vadd.f32 1e-05, %v2720_v61  ;;  %v3350_v40 = vadd.f32 %v5376_v26, %v3210_v39  ;;  %v3212_v16 = vmul.f32 %v5361_v53, %v3072_v28  ;;  %v2118_v51 = vpop.xlane.xlu0 %2117  ;;  %v7288_v28 = vld [vmem:[#allocation66_spill] sm:$0xff] }
 0x395   : > { %v3351_v13 = vadd.f32 %v5333_v31, %v3211_v44  ;;  %v3213_v58 = vmul.f32 %v5364_v29, %v3073_v2  ;;  %v2821_v11 = vsub.f32 %v7286_v5, %v6540_v3  ;;  %v2822_v35 = vsub.f32 %v7287_v46, %v6569_v34 }
 0x396   : > { %v3987_v55 = vpop.eup %3986  ;;  %3994 = vrsqrt.f32 %v2911_v32  ;;  %v2657_v43 = vmul.f32 %v6617_v49, %v6617_v49  ;;  %3478 = vst [vmem:[%s5455_s9 + $0x250] sm:$0xff] %v3350_v40  ;;  %v3352_v21 = vadd.f32 %v5376_v26, %v3212_v16  ;;  %v2593_v3 = vmul.f32 0.00390625, %v2429_v20 }
 0x397   : > { %3479 = vst [vmem:[%s5455_s9 + $0x258] sm:$0xff] %v3351_v13  ;;  %v3353_v50 = vadd.f32 %v5333_v31, %v3213_v58  ;;  %v3074_v19 = vmul.f32 %v3987_v55, %v2818_v24  ;;  %v3075_v10 = vmul.f32 %v3987_v55, %v2819_v33  ;;  %3996 = vrsqrt.f32 %v2912_v25  ;;  %v2435_v48 = vpop.xlane.xlu1 %2434 }
 0x398   : > { %v3989_v27 = vpop.eup %3988  ;;  %v2658_v9 = vmul.f32 %v6623_v45, %v6623_v45  ;;  %v2594_v36 = vmul.f32 0.00390625, %v2432_v59  ;;  %3480 = vst [vmem:[%s5455_s9 + $0x260] sm:$0xff] %v3352_v21  ;;  %v2721_v24 = vsub.f32 %v2593_v3, %v2657_v43  ;;  %v6645_v42 = vmul.f32 0.00390625, %v2115_v54 }
 0x399   : > { %3481 = vst [vmem:[%s5455_s9 + $0x268] sm:$0xff] %v3353_v50  ;;  %v3214_v22 = vmul.f32 %v5361_v53, %v3074_v19  ;;  %v3215_v63 = vmul.f32 %v5364_v29, %v3075_v10  ;;  %v3076_v12 = vmul.f32 %v3989_v27, %v2820_v57  ;;  %v3077_v8 = vmul.f32 %v3989_v27, %v2821_v11  ;;  %v7289_v10 = vld [vmem:[#allocation68_spill] sm:$0xff] }
 0x39a   : > { %v2722_v33 = vsub.f32 %v2594_v36, %v2658_v9  ;;  %v6647_v20 = vmul.f32 0.00390625, %v2118_v51  ;;  %v2823_v2 = vsub.f32 %v7288_v28, %v6569_v34  ;;  %v2824_v14 = vsub.f32 %v5447_v60, %v6572_v1  ;;  %v2438_v25 = vpop.xlane.xlu0 %2437  ;;  %v7290_v36 = vld [vmem:[#allocation69_spill] sm:$0xff] }
 0x39b   : > { %v3354_v61 = vadd.f32 %v5376_v26, %v3214_v22  ;;  %v3355_v59 = vadd.f32 %v5333_v31, %v3215_v63  ;;  %v3216_v39 = vmul.f32 %v5361_v53, %v3076_v12  ;;  %v3217_v44 = vmul.f32 %v5364_v29, %v3077_v8  ;;  %v2121_v5 = vpop.xlane.xlu1 %2120 }
 0x39c   : > { %v2913_v57 = vadd.f32 1e-05, %v2721_v24  ;;  %v2914_v32 = vadd.f32 1e-05, %v2722_v33  ;;  %v2825_v13 = vsub.f32 %v5438_v41, %v6572_v1  ;;  %v2826_v34 = vsub.f32 %v5491_v52, %v6593_v15 }
 0x39d   : > { %3482 = vst [vmem:[%s5455_s9 + $0x270] sm:$0xff] %v3354_v61  ;;  %3483 = vst [vmem:[%s5455_s9 + $0x278] sm:$0xff] %v3355_v59  ;;  %v3356_v54 = vadd.f32 %v5376_v26, %v3216_v39  ;;  %v3357_v40 = vadd.f32 %v5333_v31, %v3217_v44  ;;  %v2659_v60 = vmul.f32 %v6645_v42, %v6645_v42  ;;  %v2595_v58 = vmul.f32 0.00390625, %v2435_v48 }
 0x39e   : > { %v3991_v16 = vpop.eup %3990  ;;  %3998 = vrsqrt.f32 %v2913_v57  ;;  %v2660_v55 = vmul.f32 %v6647_v20, %v6647_v20  ;;  %v2596_v41 = vmul.f32 0.00390625, %v2438_v25  ;;  %v2827_v52 = vsub.f32 %v5494_v47, %v6593_v15 }
 0x39f   : > { %v3993_v11 = vpop.eup %3992  ;;  %3484 = vst [vmem:[%s5455_s9 + $0x280] sm:$0xff] %v3356_v54  ;;  %3485 = vst [vmem:[%s5455_s9 + $0x288] sm:$0xff] %v3357_v40  ;;  %v3078_v46 = vmul.f32 %v3991_v16, %v2822_v35  ;;  %v3079_v43 = vmul.f32 %v3991_v16, %v2823_v2  ;;  %4000 = vrsqrt.f32 %v2914_v32  ;;  %v2723_v21 = vsub.f32 %v2595_v58, %v2659_v60  ;;  %v2124_v47 = vpop.xlane.xlu0 %2123 }
 0x3a0   : > { %v3080_v1 = vmul.f32 %v3993_v11, %v2824_v14  ;;  %v3081_v51 = vmul.f32 %v3993_v11, %v2825_v13  ;;  %v2828_v27 = vsub.f32 %v7289_v10, %v6595_v7  ;;  %v2724_v3 = vsub.f32 %v2596_v41, %v2660_v55 }
 0x3a1   : > { %v3218_v50 = vmul.f32 %v5361_v53, %v3078_v46  ;;  %v3219_v19 = vmul.f32 %v5364_v29, %v3079_v43  ;;  %v2829_v22 = vsub.f32 %v7290_v36, %v6595_v7  ;;  %v2915_v63 = vadd.f32 1e-05, %v2723_v21  ;;  %v7291_v43 = vld [vmem:[#allocation70_spill] sm:$0xff]  ;;  %v7293_v21 = vld [vmem:[#allocation72_spill] sm:$0xff] }
 0x3a2   : > { %v3220_v9 = vmul.f32 %v5361_v53, %v3080_v1  ;;  %v3221_v35 = vmul.f32 %v5364_v29, %v3081_v51  ;;  %v2916_v48 = vadd.f32 1e-05, %v2724_v3  ;;  %v6683_v24 = vmul.f32 0.00390625, %v2121_v5  ;;  %v7292_v1 = vld [vmem:[#allocation71_spill] sm:$0xff] }
 0x3a3   : > { %v3995_v15 = vpop.eup %3994  ;;  %v3358_v12 = vadd.f32 %v5376_v26, %v3218_v50  ;;  %v3359_v8 = vadd.f32 %v5333_v31, %v3219_v19  ;;  %v2441_v44 = vpop.xlane.xlu1 %2440  ;;  %4002 = vrsqrt.f32 %v2915_v63  ;;  %v6689_v28 = vmul.f32 0.00390625, %v2124_v47  ;;  %v7294_v19 = vld [vmem:[#allocation73_spill] sm:$0xff] }
 0x3a4   : > { %v3360_v33 = vadd.f32 %v5376_v26, %v3220_v9  ;;  %v3361_v61 = vadd.f32 %v5333_v31, %v3221_v35  ;;  %v3082_v59 = vmul.f32 %v3995_v15, %v2826_v34  ;;  %v3083_v39 = vmul.f32 %v3995_v15, %v2827_v52  ;;  %v3997_v7 = vpop.eup %3996 }
 0x3a5   : > { %3486 = vst [vmem:[%s5455_s9 + $0x290] sm:$0xff] %v3358_v12  ;;  %3487 = vst [vmem:[%s5455_s9 + $0x298] sm:$0xff] %v3359_v8  ;;  %v3084_v57 = vmul.f32 %v3997_v7, %v2828_v27  ;;  %v3085_v32 = vmul.f32 %v3997_v7, %v2829_v22  ;;  %4004 = vrsqrt.f32 %v2916_v48  ;;  %v2661_v25 = vmul.f32 %v6683_v24, %v6683_v24  ;;  %v7295_v7 = vld [vmem:[#allocation74_spill] sm:$0xff] }
 0x3a6   : > { %3488 = vst [vmem:[%s5455_s9 + $0x2a0] sm:$0xff] %v3360_v33  ;;  %3489 = vst [vmem:[%s5455_s9 + $0x2a8] sm:$0xff] %v3361_v61  ;;  %v3222_v2 = vmul.f32 %v5361_v53, %v3082_v59  ;;  %v3223_v14 = vmul.f32 %v5364_v29, %v3083_v39  ;;  %v2597_v54 = vmul.f32 0.00390625, %v2441_v44  ;;  %v2662_v55 = vmul.f32 %v6689_v28, %v6689_v28 }
 0x3a7   : > { %v3224_v34 = vmul.f32 %v5361_v53, %v3084_v57  ;;  %v3225_v16 = vmul.f32 %v5364_v29, %v3085_v32  ;;  %v2444_v60 = vpop.xlane.xlu0 %2443  ;;  %v2830_v41 = vsub.f32 %v7291_v43, %v6617_v49  ;;  %v2831_v51 = vsub.f32 %v7292_v1, %v6617_v49  ;;  %v2127_v9 = vpop.xlane.xlu1 %2126 }
 0x3a8   : > { %v3362_v40 = vadd.f32 %v5376_v26, %v3222_v2  ;;  %v3363_v13 = vadd.f32 %v5333_v31, %v3223_v14  ;;  %v2725_v58 = vsub.f32 %v2597_v54, %v2661_v25  ;;  %v2598_v5 = vmul.f32 0.00390625, %v2444_v60  ;;  %v7296_v14 = vld [vmem:[#allocation75_spill] sm:$0xff]  ;;  %v7298_v60 = vld [vmem:[#allocation77_spill] sm:$0xff] }
 0x3a9   : > { %v3364_v11 = vadd.f32 %v5376_v26, %v3224_v34  ;;  %v3365_v46 = vadd.f32 %v5333_v31, %v3225_v16  ;;  %v2832_v50 = vsub.f32 %v7293_v21, %v6623_v45  ;;  %v2833_v10 = vsub.f32 %v7294_v19, %v6623_v45  ;;  %v7297_v34 = vld [vmem:[#allocation76_spill] sm:$0xff] }
 0x3aa   : > { %3490 = vst [vmem:[%s5455_s9 + $0x2b0] sm:$0xff] %v3362_v40  ;;  %3491 = vst [vmem:[%s5455_s9 + $0x2b8] sm:$0xff] %v3363_v13  ;;  %v2917_v27 = vadd.f32 1e-05, %v2725_v58  ;;  %v2726_v3 = vsub.f32 %v2598_v5, %v2662_v55  ;;  %v6719_v8 = vmul.f32 0.00390625, %v2127_v9  ;;  %v2834_v2 = vsub.f32 %v7295_v7, %v6645_v42 }
 0x3ab   : > { %v3999_v52 = vpop.eup %3998  ;;  %3492 = vst [vmem:[%s5455_s9 + $0x2c0] sm:$0xff] %v3364_v11  ;;  %3493 = vst [vmem:[%s5455_s9 + $0x2c8] sm:$0xff] %v3365_v46  ;;  %v2130_v45 = vpop.xlane.xlu0 %2129  ;;  %v2835_v57 = vsub.f32 %v7296_v14, %v6645_v42  ;;  %v2836_v16 = vsub.f32 %v7297_v34, %v6647_v20  ;;  %v2837_v58 = vsub.f32 %v7298_v60, %v6647_v20 }
 0x3ac   : > { %v4001_v35 = vpop.eup %4000  ;;  %v3086_v36 = vmul.f32 %v3999_v52, %v2830_v41  ;;  %v3087_v22 = vmul.f32 %v3999_v52, %v2831_v51  ;;  %4006 = vrsqrt.f32 %v2917_v27  ;;  %v2918_v15 = vadd.f32 1e-05, %v2726_v3 }
 0x3ad   : > { %v3088_v63 = vmul.f32 %v4001_v35, %v2832_v50  ;;  %v3089_v47 = vmul.f32 %v4001_v35, %v2833_v10  ;;  %v6733_v54 = vmul.f32 0.00390625, %v2130_v45  ;;  %v2663_v40 = vmul.f32 %v6719_v8, %v6719_v8 }
 0x3ae   : > { %v3226_v49 = vmul.f32 %v5361_v53, %v3086_v36  ;;  %v3227_v12 = vmul.f32 %v5364_v29, %v3087_v22  ;;  %4008 = vrsqrt.f32 %v2918_v15  ;;  %v2839_v15 = vsub.f32 %v5758_v38, %v6683_v24 }
 0x3af   : > { %v3228_v48 = vmul.f32 %v5361_v53, %v3088_v63  ;;  %v3229_v33 = vmul.f32 %v5364_v29, %v3089_v47  ;;  %v2447_v32 = vpop.xlane.xlu1 %2446  ;;  %v2664_v50 = vmul.f32 %v6733_v54, %v6733_v54  ;;  %v2838_v47 = vsub.f32 %v5747_v4, %v6683_v24 }
 0x3b0   : > { %v3366_v61 = vadd.f32 %v5376_v26, %v3226_v49  ;;  %v3367_v59 = vadd.f32 %v5333_v31, %v3227_v12  ;;  %v4003_v25 = vpop.eup %4002  ;;  %v2599_v13 = vmul.f32 0.00390625, %v2447_v32 }
 0x3b1   : > { %v3368_v39 = vadd.f32 %v5376_v26, %v3228_v48  ;;  %v3369_v44 = vadd.f32 %v5333_v31, %v3229_v33  ;;  %v3090_v55 = vmul.f32 %v4003_v25, %v2834_v2  ;;  %v3091_v42 = vmul.f32 %v4003_v25, %v2835_v57  ;;  %v7299_v33 = vld [vmem:[#allocation78_spill] sm:$0xff] }
 0x3b2   : > { %3494 = vst [vmem:[%s5455_s9 + $0x2d0] sm:$0xff] %v3366_v61  ;;  %3495 = vst [vmem:[%s5455_s9 + $0x2d8] sm:$0xff] %v3367_v59  ;;  %v4005_v5 = vpop.eup %4004  ;;  %v2727_v11 = vsub.f32 %v2599_v13, %v2663_v40  ;;  %v2840_v48 = vsub.f32 %v5761_v17, %v6689_v28  ;;  %v2841_v61 = vsub.f32 %v7299_v33, %v6689_v28 }
 0x3b3   : > { %3496 = vst [vmem:[%s5455_s9 + $0x2e0] sm:$0xff] %v3368_v39  ;;  %3497 = vst [vmem:[%s5455_s9 + $0x2e8] sm:$0xff] %v3369_v44  ;;  %v2450_v46 = vpop.xlane.xlu0 %2449  ;;  %v3230_v43 = vmul.f32 %v5361_v53, %v3090_v55  ;;  %v3231_v41 = vmul.f32 %v5364_v29, %v3091_v42  ;;  %v3092_v1 = vmul.f32 %v4005_v5, %v2836_v16  ;;  %v2133_v52 = vpop.xlane.xlu1 %2132 }
 0x3b4   : > { %v3093_v51 = vmul.f32 %v4005_v5, %v2837_v58  ;;  %v2919_v21 = vadd.f32 1e-05, %v2727_v11  ;;  %v2600_v19 = vmul.f32 0.00390625, %v2450_v46  ;;  %v6751_v35 = vmul.f32 0.00390625, %v2133_v52 }
 0x3b5   : > { %v3370_v20 = vadd.f32 %v5376_v26, %v3230_v43  ;;  %v3371_v10 = vadd.f32 %v5333_v31, %v3231_v41  ;;  %v3232_v27 = vmul.f32 %v5361_v53, %v3092_v1  ;;  %v7300_v41 = vld [vmem:[#allocation79_spill] sm:$0xff] }
 0x3b6   : > { %v3233_v3 = vmul.f32 %v5364_v29, %v3093_v51  ;;  %4010 = vrsqrt.f32 %v2919_v21  ;;  %v2728_v9 = vsub.f32 %v2600_v19, %v2664_v50  ;;  %v2665_v4 = vmul.f32 %v6751_v35, %v6751_v35  ;;  %v7301_v51 = vld [vmem:[#allocation80_spill] sm:$0xff] }
 0x3b7   : > { %v2136_v36 = vpop.xlane.xlu0 %2135  ;;  %3498 = vst [vmem:[%s5455_s9 + $0x2f0] sm:$0xff] %v3370_v20  ;;  %3499 = vst [vmem:[%s5455_s9 + $0x2f8] sm:$0xff] %v3371_v10  ;;  %v3372_v22 = vadd.f32 %v5376_v26, %v3232_v27  ;;  %v2842_v1 = vsub.f32 %v7300_v41, %v6719_v8  ;;  %v2843_v52 = vsub.f32 %v7301_v51, %v6719_v8 }
 0x3b8   : > { %v3373_v63 = vadd.f32 %v5333_v31, %v3233_v3  ;;  %v2920_v12 = vadd.f32 1e-05, %v2728_v9  ;;  %v6761_v45 = vmul.f32 0.00390625, %v2136_v36  ;;  %v7302_v3 = vld [vmem:[#allocation81_spill] sm:$0xff] }
 0x3b9   : > { %v4007_v49 = vpop.eup %4006  ;;  %3500 = vst [vmem:[%s5455_s9 + $0x300] sm:$0xff] %v3372_v22  ;;  %v2453_v44 = vpop.xlane.xlu1 %2452  ;;  %v2844_v9 = vsub.f32 %v7302_v3, %v6733_v54  ;;  %v7303_v22 = vld [vmem:[#allocation82_spill] sm:$0xff] }
 0x3ba   : > { %3501 = vst [vmem:[%s5455_s9 + $0x308] sm:$0xff] %v3373_v63  ;;  %v3094_v59 = vmul.f32 %v4007_v49, %v2838_v47  ;;  %v3095_v39 = vmul.f32 %v4007_v49, %v2839_v15  ;;  %4012 = vrsqrt.f32 %v2920_v12  ;;  %v2601_v38 = vmul.f32 0.00390625, %v2453_v44 }
 0x3bb   : > { %v4009_v7 = vpop.eup %4008  ;;  %v2456_v57 = vpop.xlane.xlu0 %2455  ;;  %v2666_v28 = vmul.f32 %v6761_v45, %v6761_v45  ;;  %v2845_v63 = vsub.f32 %v7303_v22, %v6733_v54 }
 0x3bc   : > { %v3234_v24 = vmul.f32 %v5361_v53, %v3094_v59  ;;  %v3235_v2 = vmul.f32 %v5364_v29, %v3095_v39  ;;  %v3096_v14 = vmul.f32 %v4009_v7, %v2840_v48  ;;  %v3097_v17 = vmul.f32 %v4009_v7, %v2841_v61 }
 0x3bd   : > { %v2729_v32 = vsub.f32 %v2601_v38, %v2665_v4  ;;  %v2602_v25 = vmul.f32 0.00390625, %v2456_v57  ;;  %v2139_v60 = vpop.xlane.xlu1 %2138  ;;  %v7304_v57 = vld [vmem:[#allocation12_spill] sm:$0xff] }
 0x3be   : > { %v3374_v40 = vadd.f32 %v5376_v26, %v3234_v24  ;;  %v3375_v13 = vadd.f32 %v5333_v31, %v3235_v2  ;;  %v3236_v34 = vmul.f32 %v5361_v53, %v3096_v14  ;;  %v3237_v16 = vmul.f32 %v5364_v29, %v3097_v17 }
 0x3bf   : > { %v2921_v58 = vadd.f32 1e-05, %v2729_v32  ;;  %v2730_v55 = vsub.f32 %v2602_v25, %v2666_v28  ;;  %v6783_v46 = vmul.f32 0.00390625, %v2139_v60  ;;  %v2142_v43 = vpop.xlane.xlu0 %2141  ;;  %v2846_v32 = vsub.f32 %v7304_v57, %v6751_v35  ;;  %v7305_v28 = vld [vmem:[#allocation13_spill] sm:$0xff] }
 0x3c0   : > { %3502 = vst [vmem:[%s5455_s9 + $0x310] sm:$0xff] %v3374_v40  ;;  %3503 = vst [vmem:[%s5455_s9 + $0x318] sm:$0xff] %v3375_v13  ;;  %v3376_v42 = vadd.f32 %v5376_v26, %v3236_v34  ;;  %v3377_v5 = vadd.f32 %v5333_v31, %v3237_v16  ;;  %v6795_v36 = vmul.f32 0.00390625, %v2142_v43  ;;  %v2847_v25 = vsub.f32 %v7305_v28, %v6751_v35  ;;  %v7306_v16 = vld [vmem:[#allocation14_spill] sm:$0xff]  ;;  %v7310_v57 = vld [vmem:[#allocation17_spill] sm:$0xff] }
 0x3c1   : > { %4014 = vrsqrt.f32 %v2921_v58  ;;  %v2922_v11 = vadd.f32 1e-05, %v2730_v55  ;;  %v2667_v10 = vmul.f32 %v6783_v46, %v6783_v46  ;;  %v2848_v60 = vsub.f32 %v7306_v16, %v6761_v45  ;;  %v7307_v58 = vld [vmem:[#allocation15_spill] sm:$0xff] }
 0x3c2   : > { %3504 = vst [vmem:[%s5455_s9 + $0x320] sm:$0xff] %v3376_v42  ;;  %3505 = vst [vmem:[%s5455_s9 + $0x328] sm:$0xff] %v3377_v5  ;;  %v2668_v7 = vmul.f32 %v6795_v36, %v6795_v36  ;;  %v2849_v55 = vsub.f32 %v7307_v58, %v6761_v45 }
 0x3c3   : > { %4016 = vrsqrt.f32 %v2922_v11  ;;  %v4011_v21 = vpop.eup %4010  ;;  %v2459_v50 = vpop.xlane.xlu1 %2458 }
 0x3c4   : > { %v3098_v19 = vmul.f32 %v4011_v21, %v2842_v1  ;;  %v3099_v20 = vmul.f32 %v4011_v21, %v2843_v52  ;;  %v2603_v27 = vmul.f32 0.00390625, %v2459_v50 }
 0x3c6   : > { %v3238_v8 = vmul.f32 %v5361_v53, %v3098_v19  ;;  %v3239_v47 = vmul.f32 %v5364_v29, %v3099_v20  ;;  %v2731_v15 = vsub.f32 %v2603_v27, %v2667_v10 }
 0x3c7   : > { %v4013_v49 = vpop.eup %4012 }
 0x3c8   : > { %v2462_v12 = vpop.xlane.xlu0 %2461  ;;  %v3378_v48 = vadd.f32 %v5376_v26, %v3238_v8  ;;  %v3379_v33 = vadd.f32 %v5333_v31, %v3239_v47  ;;  %v3100_v61 = vmul.f32 %v4013_v49, %v2844_v9  ;;  %v3101_v59 = vmul.f32 %v4013_v49, %v2845_v63 }
 0x3c9   : > { %v2145_v39 = vpop.xlane.xlu1 %2144  ;;  %v2923_v44 = vadd.f32 1e-05, %v2731_v15  ;;  %v2604_v54 = vmul.f32 0.00390625, %v2462_v12 }
 0x3ca   : > { %3506 = vst [vmem:[%s5455_s9 + $0x330] sm:$0xff] %v3378_v48  ;;  %3507 = vst [vmem:[%s5455_s9 + $0x338] sm:$0xff] %v3379_v33  ;;  %v3240_v4 = vmul.f32 %v5361_v53, %v3100_v61  ;;  %v3241_v38 = vmul.f32 %v5364_v29, %v3101_v59  ;;  %v6809_v2 = vmul.f32 0.00390625, %v2145_v39  ;;  %v2850_v48 = vsub.f32 %v6033_v62, %v6783_v46  ;;  %v7308_v33 = vld [vmem:[#allocation16_spill] sm:$0xff] }
 0x3cb   : > { %4018 = vrsqrt.f32 %v2923_v44  ;;  %v2732_v24 = vsub.f32 %v2604_v54, %v2668_v7  ;;  %v2851_v61 = vsub.f32 %v7308_v33, %v6783_v46  ;;  %v2853_v46 = vsub.f32 %v7310_v57, %v6795_v36 }
 0x3cc   : > { %v3380_v14 = vadd.f32 %v5376_v26, %v3240_v4  ;;  %v3381_v17 = vadd.f32 %v5333_v31, %v3241_v38  ;;  %v2148_v40 = vpop.xlane.xlu0 %2147  ;;  %v2669_v35 = vmul.f32 %v6809_v2, %v6809_v2 }
 0x3cd   : > { %v2924_v34 = vadd.f32 1e-05, %v2732_v24  ;;  %v6823_v41 = vmul.f32 0.00390625, %v2148_v40 }
 0x3ce   : > { %v4015_v13 = vpop.eup %4014  ;;  %3508 = vst [vmem:[%s5455_s9 + $0x340] sm:$0xff] %v3380_v14  ;;  %3509 = vst [vmem:[%s5455_s9 + $0x348] sm:$0xff] %v3381_v17  ;;  %v7309_v17 = vld [vmem:[#allocation19_spill] sm:$0xff] }
 0x3cf   : > { %v3102_v42 = vmul.f32 %v4015_v13, %v2846_v32  ;;  %v3103_v5 = vmul.f32 %v4015_v13, %v2847_v25  ;;  %v2465_v11 = vpop.xlane.xlu1 %2464  ;;  %4020 = vrsqrt.f32 %v2924_v34  ;;  %v2670_v22 = vmul.f32 %v6823_v41, %v6823_v41 }
 0x3d0   : > { %v4017_v43 = vpop.eup %4016  ;;  %v2605_v1 = vmul.f32 0.00390625, %v2465_v11  ;;  %v2852_v62 = vsub.f32 %v7309_v17, %v6795_v36 }
 0x3d1   : > { %v3242_v51 = vmul.f32 %v5361_v53, %v3102_v42  ;;  %v3243_v52 = vmul.f32 %v5364_v29, %v3103_v5  ;;  %v3104_v21 = vmul.f32 %v4017_v43, %v2848_v60  ;;  %v3105_v50 = vmul.f32 %v4017_v43, %v2849_v55 }
 0x3d2   : > { %v2733_v45 = vsub.f32 %v2605_v1, %v2669_v35  ;;  %v2468_v3 = vpop.xlane.xlu0 %2467 }
 0x3d3   : > { %v3382_v19 = vadd.f32 %v5376_v26, %v3242_v51  ;;  %v3383_v20 = vadd.f32 %v5333_v31, %v3243_v52  ;;  %v3244_v10 = vmul.f32 %v5361_v53, %v3104_v21  ;;  %v3245_v27 = vmul.f32 %v5364_v29, %v3105_v50  ;;  %v7311_v52 = vld [vmem:[#allocation18_spill] sm:$0xff]  ;;  %v7312_v50 = vld [vmem:[#allocation20_spill] sm:$0xff] }
 0x3d4   : > { %v2925_v9 = vadd.f32 1e-05, %v2733_v45  ;;  %v2606_v63 = vmul.f32 0.00390625, %v2468_v3  ;;  %v2151_v8 = vpop.xlane.xlu1 %2150  ;;  %v2854_v21 = vsub.f32 %v7311_v52, %v6809_v2  ;;  %v2855_v45 = vsub.f32 %v7312_v50, %v6809_v2 }
 0x3d5   : > { %3510 = vst [vmem:[%s5455_s9 + $0x350] sm:$0xff] %v3382_v19  ;;  %3511 = vst [vmem:[%s5455_s9 + $0x358] sm:$0xff] %v3383_v20  ;;  %v3384_v47 = vadd.f32 %v5376_v26, %v3244_v10  ;;  %v3385_v15 = vadd.f32 %v5333_v31, %v3245_v27  ;;  %v6841_v12 = vmul.f32 0.00390625, %v2151_v8 }
 0x3d6   : > { %4022 = vrsqrt.f32 %v2925_v9  ;;  %v2734_v49 = vsub.f32 %v2606_v63, %v2670_v22  ;;  %v2154_v39 = vpop.xlane.xlu0 %2153  ;;  %v7313_v63 = vld [vmem:[#allocation23_spill] sm:$0xff] }
 0x3d7   : > { %3512 = vst [vmem:[%s5455_s9 + $0x360] sm:$0xff] %v3384_v47  ;;  %3513 = vst [vmem:[%s5455_s9 + $0x368] sm:$0xff] %v3385_v15  ;;  %v6847_v38 = vmul.f32 0.00390625, %v2154_v39  ;;  %v2671_v24 = vmul.f32 %v6841_v12, %v6841_v12  ;;  %v2856_v8 = vsub.f32 %v7313_v63, %v6823_v41  ;;  %v7314_v15 = vld [vmem:[#allocation21_spill] sm:$0xff] }
 0x3d8   : > { %v2926_v59 = vadd.f32 1e-05, %v2734_v49  ;;  %v4019_v44 = vpop.eup %4018  ;;  %v2857_v49 = vsub.f32 %v7314_v15, %v6823_v41 }
 0x3d9   : > { %v3106_v7 = vmul.f32 %v4019_v44, %v2850_v48  ;;  %v3107_v54 = vmul.f32 %v4019_v44, %v2851_v61  ;;  %v2672_v42 = vmul.f32 %v6847_v38, %v6847_v38 }
 0x3da   : > { %4024 = vrsqrt.f32 %v2926_v59  ;;  %v2471_v4 = vpop.xlane.xlu1 %2470 }
 0x3db   : > { %v2607_v14 = vmul.f32 0.00390625, %v2471_v4  ;;  %v3246_v32 = vmul.f32 %v5361_v53, %v3106_v7  ;;  %v3247_v28 = vmul.f32 %v5364_v29, %v3107_v54 }
 0x3dc   : > { %v4021_v25 = vpop.eup %4020 }
 0x3dd   : > { %v2735_v40 = vsub.f32 %v2607_v14, %v2671_v24  ;;  %v3386_v13 = vadd.f32 %v5376_v26, %v3246_v32  ;;  %v3387_v34 = vadd.f32 %v5333_v31, %v3247_v28  ;;  %v3108_v16 = vmul.f32 %v4021_v25, %v2852_v62 }
 0x3de   : > { %v3109_v60 = vmul.f32 %v4021_v25, %v2853_v46  ;;  %v2474_v58 = vpop.xlane.xlu0 %2473 }
 0x3df   : > { %v2927_v55 = vadd.f32 1e-05, %v2735_v40  ;;  %v2608_v5 = vmul.f32 0.00390625, %v2474_v58  ;;  %3514 = vst [vmem:[%s5455_s9 + $0x370] sm:$0xff] %v3386_v13  ;;  %3515 = vst [vmem:[%s5455_s9 + $0x378] sm:$0xff] %v3387_v34  ;;  %v3248_v36 = vmul.f32 %v5361_v53, %v3108_v16  ;;  %v7315_v34 = vld [vmem:[#allocation22_spill] sm:$0xff] }
 0x3e0   : > { %v2157_v11 = vpop.xlane.xlu1 %2156  ;;  %v3249_v43 = vmul.f32 %v5364_v29, %v3109_v60  ;;  %v2858_v16 = vsub.f32 %v7315_v34, %v6841_v12  ;;  %v7316_v60 = vld [vmem:[#allocation24_spill] sm:$0xff] }
 0x3e1   : > { %4026 = vrsqrt.f32 %v2927_v55  ;;  %v2736_v35 = vsub.f32 %v2608_v5, %v2672_v42  ;;  %v3388_v1 = vadd.f32 %v5376_v26, %v3248_v36  ;;  %v6871_v27 = vmul.f32 0.00390625, %v2157_v11 }
 0x3e2   : > { %v3389_v51 = vadd.f32 %v5333_v31, %v3249_v43  ;;  %v2160_v19 = vpop.xlane.xlu0 %2159  ;;  %v2859_v58 = vsub.f32 %v7316_v60, %v6841_v12  ;;  %v7317_v12 = vld [vmem:[#allocation25_spill] sm:$0xff] }
 0x3e3   : > { %v4023_v20 = vpop.eup %4022  ;;  %v2928_v10 = vadd.f32 1e-05, %v2736_v35  ;;  %v6873_v3 = vmul.f32 0.00390625, %v2160_v19  ;;  %3516 = vst [vmem:[%s5455_s9 + $0x380] sm:$0xff] %v3388_v1  ;;  %v2673_v39 = vmul.f32 %v6871_v27, %v6871_v27  ;;  %v2860_v1 = vsub.f32 %v6209_v37, %v6847_v38 }
 0x3e4   : > { %3517 = vst [vmem:[%s5455_s9 + $0x388] sm:$0xff] %v3389_v51  ;;  %v3110_v9 = vmul.f32 %v4023_v20, %v2854_v21  ;;  %v3111_v22 = vmul.f32 %v4023_v20, %v2855_v45  ;;  %v2861_v51 = vsub.f32 %v7317_v12, %v6847_v38 }
 0x3e5   : > { %4028 = vrsqrt.f32 %v2928_v10  ;;  %v2477_v47 = vpop.xlane.xlu1 %2476  ;;  %v2674_v44 = vmul.f32 %v6873_v3, %v6873_v3 }
 0x3e6   : > { %v3250_v2 = vmul.f32 %v5361_v53, %v3110_v9  ;;  %v3251_v48 = vmul.f32 %v5364_v29, %v3111_v22  ;;  %v2609_v33 = vmul.f32 0.00390625, %v2477_v47  ;;  %v2863_v47 = vsub.f32 %v6265_v0, %v6871_v27 }
 0x3e7   : > { %v2480_v61 = vpop.xlane.xlu0 %2479  ;;  %v4025_v59 = vpop.eup %4024 }
 0x3e8   : > { %v2610_v7 = vmul.f32 0.00390625, %v2480_v61  ;;  %v3390_v54 = vadd.f32 %v5376_v26, %v3250_v2  ;;  %v3391_v41 = vadd.f32 %v5333_v31, %v3251_v48  ;;  %v3112_v4 = vmul.f32 %v4025_v59, %v2856_v8 }
 0x3e9   : > { %v3113_v24 = vmul.f32 %v4025_v59, %v2857_v49  ;;  %v2737_v14 = vsub.f32 %v2609_v33, %v2673_v39  ;;  %v2163_v62 = vpop.xlane.xlu1 %2162  ;;  %v2862_v8 = vsub.f32 %v6262_v23, %v6871_v27  ;;  %v2864_v49 = vsub.f32 %v6268_v18, %v6873_v3 }
 0x3ea   : > { %v2738_v17 = vsub.f32 %v2610_v7, %v2674_v44  ;;  %3518 = vst [vmem:[%s5455_s9 + $0x390] sm:$0xff] %v3390_v54  ;;  %3519 = vst [vmem:[%s5455_s9 + $0x398] sm:$0xff] %v3391_v41  ;;  %v3252_v57 = vmul.f32 %v5361_v53, %v3112_v4  ;;  %v6893_v32 = vmul.f32 0.00390625, %v2163_v62  ;;  %v2865_v2 = vsub.f32 %v6271_v56, %v6873_v3 }
 0x3eb   : > { %v3253_v46 = vmul.f32 %v5364_v29, %v3113_v24  ;;  %v2929_v28 = vadd.f32 1e-05, %v2737_v14 }
 0x3ec   : > { %v2930_v25 = vadd.f32 1e-05, %v2738_v17  ;;  %v3392_v40 = vadd.f32 %v5376_v26, %v3252_v57  ;;  %v2675_v5 = vmul.f32 %v6893_v32, %v6893_v32  ;;  %v2866_v54 = vsub.f32 %v6350_v30, %v6893_v32 }
 0x3ed   : > { %v3393_v13 = vadd.f32 %v5333_v31, %v3253_v46  ;;  %4030 = vrsqrt.f32 %v2929_v28  ;;  %v2867_v41 = vsub.f32 %v6318_v6, %v6893_v32 }
 0x3ee   : > { %v2483_v55 = vpop.xlane.xlu1 %2482  ;;  %v4027_v42 = vpop.eup %4026  ;;  %3520 = vst [vmem:[%s5455_s9 + $0x3a0] sm:$0xff] %v3392_v40  ;;  %4032 = vrsqrt.f32 %v2930_v25 }
 0x3ef   : > { %3521 = vst [vmem:[%s5455_s9 + $0x3a8] sm:$0xff] %v3393_v13  ;;  %v2611_v11 = vmul.f32 0.00390625, %v2483_v55  ;;  %v3114_v36 = vmul.f32 %v4027_v42, %v2858_v16  ;;  %v3115_v43 = vmul.f32 %v4027_v42, %v2859_v58 }
 0x3f1   : > { %v2739_v35 = vsub.f32 %v2611_v11, %v2675_v5  ;;  %v3254_v52 = vmul.f32 %v5361_v53, %v3114_v36  ;;  %v3255_v21 = vmul.f32 %v5364_v29, %v3115_v43 }
 0x3f2   : > { %v4029_v50 = vpop.eup %4028 }
 0x3f3   : > { %v2931_v45 = vadd.f32 1e-05, %v2739_v35  ;;  %v3394_v19 = vadd.f32 %v5376_v26, %v3254_v52  ;;  %v3395_v20 = vadd.f32 %v5333_v31, %v3255_v21  ;;  %v3116_v10 = vmul.f32 %v4029_v50, %v2860_v1 }
 0x3f4   : > { %v3117_v9 = vmul.f32 %v4029_v50, %v2861_v51 }
 0x3f5   : > { %4034 = vrsqrt.f32 %v2931_v45  ;;  %3522 = vst [vmem:[%s5455_s9 + $0x3b0] sm:$0xff] %v3394_v19  ;;  %3523 = vst [vmem:[%s5455_s9 + $0x3b8] sm:$0xff] %v3395_v20  ;;  %v3256_v37 = vmul.f32 %v5361_v53, %v3116_v10 }
 0x3f6   : > { %v3257_v38 = vmul.f32 %v5364_v29, %v3117_v9 }
 0x3f7   : > { %v3396_v22 = vadd.f32 %v5376_v26, %v3256_v37 }
 0x3f8   : > { %v3397_v63 = vadd.f32 %v5333_v31, %v3257_v38 }
 0x3f9   : > { %3524 = vst [vmem:[%s5455_s9 + $0x3c0] sm:$0xff] %v3396_v22 }
 0x3fa   : > { %3525 = vst [vmem:[%s5455_s9 + $0x3c8] sm:$0xff] %v3397_v63  ;;  %v4031_v15 = vpop.eup %4030 }
 0x3fb   : > { %v4033_v48 = vpop.eup %4032  ;;  %v3118_v33 = vmul.f32 %v4031_v15, %v2862_v8  ;;  %v3119_v61 = vmul.f32 %v4031_v15, %v2863_v47 }
 0x3fc   : > { %v3120_v59 = vmul.f32 %v4033_v48, %v2864_v49  ;;  %v3121_v39 = vmul.f32 %v4033_v48, %v2865_v2 }
 0x3fd   : > { %v3258_v23 = vmul.f32 %v5361_v53, %v3118_v33  ;;  %v3259_v0 = vmul.f32 %v5364_v29, %v3119_v61 }
 0x3fe   : > { %v3260_v27 = vmul.f32 %v5361_v53, %v3120_v59  ;;  %v3261_v18 = vmul.f32 %v5364_v29, %v3121_v39 }
 0x3ff   : > { %v3398_v44 = vadd.f32 %v5376_v26, %v3258_v23  ;;  %v3399_v56 = vadd.f32 %v5333_v31, %v3259_v0 }
 0x400   : > { %v3400_v3 = vadd.f32 %v5376_v26, %v3260_v27  ;;  %v3401_v7 = vadd.f32 %v5333_v31, %v3261_v18 }
 0x401   : > { %3526 = vst [vmem:[%s5455_s9 + $0x3d0] sm:$0xff] %v3398_v44  ;;  %3527 = vst [vmem:[%s5455_s9 + $0x3d8] sm:$0xff] %v3399_v56 }
 0x402   : > { %v4035_v4 = vpop.eup %4034  ;;  %3528 = vst [vmem:[%s5455_s9 + $0x3e0] sm:$0xff] %v3400_v3  ;;  %3529 = vst [vmem:[%s5455_s9 + $0x3e8] sm:$0xff] %v3401_v7 }
 0x403   : > { %v3122_v24 = vmul.f32 %v4035_v4, %v2866_v54  ;;  %v3123_v14 = vmul.f32 %v4035_v4, %v2867_v41 }
 0x405   : > { %v3262_v17 = vmul.f32 %v5361_v53, %v3122_v24  ;;  %v3263_v62 = vmul.f32 %v5364_v29, %v3123_v14  ;;  %3539 = sbr.rel (!%p7318_p10) target bundleno = 1061 (0x425), region = 64 }
 0x407   : > { %v3402_v57 = vadd.f32 %v5376_v26, %v3262_v17  ;;  %v3403_v46 = vadd.f32 %v5333_v31, %v3263_v62 }
 0x409   : > { %3530 = vst [vmem:[%s5455_s9 + $0x3f0] sm:$0xff] %v3402_v57  ;;  %3531 = vst [vmem:[%s5455_s9 + $0x3f8] sm:$0xff] %v3403_v46 }
 0x40a   : > { %s7327_s3 = smov (!%p3542_p1, %s3541_s3), 64 }
 0x40b   : > { %s6955_s29 = sshll.u32 %s7327_s3, 8 }
 0x40c   : > { %s3547_s8 = ssub.s32 16384, %s6955_s29 }
 0x40d   : > { %3548 = vsyncadd %s3533_s16, %s3547_s8  ;;  %p3733_p3 = scmp.ne.s32.totalorder %s6955_s29, 0  ;;  %s3745_s13 = sshll.u32 %s4383_s28, 14 }
 0x40e   : > { %s6965_s15 = scalar_lea.hbm %s7020_s7, %s3745_s13  ;;  %s3554_s18 = sshll.u32 %s5455_s9, 4  ;;  %s6968_s18 = int_to_ptr.vmem [resolvable:$true] %s3554_s18 }
 0x40f   : > { %s4242_s22 = scalar_lea.vmem %s6968_s18, %s6955_s29  ;;  %s4319_s19 = smov [#allocation8]  }
 0x410   : > { %p4243_p7 = scmp.ne.s32.totalorder %s6968_s18, %s4242_s22  ;;  %s4246_s21 = sshll.u32 %s4319_s19, 4  ;;  %s4247_s21 = int_to_ptr.vmem [resolvable:$false] %s4246_s21 }
 0x411   : > { %s4248_s28 = scalar_lea.vmem %s4247_s21, 32768  ;;  %p4249_p4 = scmp.lt.s32.totalorder %s6968_s18, %s4247_s21 }
 0x412   : > { %p4244_p9 = pnand %p4243_p7, %p3733_p3  ;;  %p4250_p6 = scmp.lt.s32.totalorder %s4248_s28, %s4242_s22 }
 0x414   : > { %p4245_p12 = pneg %p4244_p9  ;;  %p4251_p11 = por %p4250_p6, %p4249_p4 }
 0x416   : > { %p4252_p0 = pnand %p4251_p11, %p4245_p12 }
 0x418   : > { %4255 = shalt.err (!%p4252_p0)
}
 0x419   : > { %s4256_s23 = scalar_lea.hbm %s6965_s15, %s6955_s29  ;;  %s4260_s1 = scalar_lea.hbm %s7020_s7, 20480 }
 0x41a   : > { %p4257_p2 = scmp.ne.s32.totalorder %s6965_s15, %s4256_s23  ;;  %p4261_p10 = scmp.lt.s32.totalorder %s6965_s15, %s7020_s7 }
 0x41b   : > { %p4262_p1 = scmp.lt.s32.totalorder %s4260_s1, %s4256_s23 }
 0x41c   : > { %p4258_p5 = pnand %p4257_p2, %p3733_p3 }
 0x41d   : > { %p4263_p7 = por %p4262_p1, %p4261_p10 }
 0x41e   : > { %p4259_p13 = pneg %p4258_p5 }
 0x420   : > { %p4264_p9 = pnand %p4263_p7, %p4259_p13 }
 0x422   : > { %4267 = shalt.err (!%p4264_p9)
}
 0x423   : > { %s4320_s13 = smov 256   ;;  %s4321_s20 = smov 16  }
 0x424   : > { %3560 = dma.vmem_to_hbm [thread:$0]  (%p3733_p3), %s6968_s18, %s6955_s29, %s6965_s15, %s3533_s16, %s4320_s13, %s4320_s13, %s4321_s20  }
 0x425 PF: > { %s3569_s12 = sand.u32 1, %s4298_s24   ;;  %p7319_p12 = scmp.ne.s32.totalorder %s7123_s14, 0 }
 0x426   : > { %s3570_s22 = scalar_lea.sflag [#allocation4], %s3569_s12 }
 0x427   : > { %p3764_p4 = pnand %p3650_p8, %p7319_p12 }
 0x429   : > { %p3765_p6 = pneg %p3764_p4 }
 0x42b   : > { %4293 = dma.done.wait (%p3765_p6), %s3570_s22, 16384  }
 0x42c   : > { %4295 = vsyncadd (%p3765_p6), %s3570_s22, 4294950912  ;;  %p21_p11 = scmp.ge.s32.totalorder %s4387_s30, 4   ;;  %s7320_s24 = smov %s4302_s25 }
 0x42d   : > { %s7321_s25 = smov %s4306_s26  ;;  %s7322_s26 = smov %s4399_s10 }
 0x42e   : > { %s7323_s27 = smov %s4387_s30  ;;  %23 = sbr.rel (!%p21_p11) target bundleno = 9 (0x9), region = 101 }
 0x433   :  { %3575 = vsyncpa [#allocation3], 1 }
 0x434   :  { %3577 = vsyncpa [#allocation3 + $0x1], 1 }
 0x435   :  { %3578 = vsyncpa [#allocation6], 1 }
 0x436   :  { %3579 = vsyncpa [#allocation4], 1 }
 0x437   :  { %3581 = vsyncpa [#allocation4 + $0x1], 1 }

// kernel: tpu_custom_call.1
= control target key start
LH: loop header
LB: loop body
LE: loop exit
PB: predicated region body
PF: predicated region fallthrough
CT: control target
= control target key end

     0   :  { %s7013_s0 = inlined_call_operand.hbm [shape: f32[640,256], index: 0, kind: input, shape index: {}]   ;;  %s7014_s1 = inlined_call_operand.hbm [shape: bf16[256,256], index: 1, kind: input, shape index: {}]   ;;  %s7015_s2 = inlined_call_operand.vmem [shape: f32[1,256], index: 2, kind: input, shape index: {}]   ;;  %s7016_s3 = inlined_call_operand.hbm [shape: bf16[256,256], index: 3, kind: input, shape index: {}]   ;;  %s7017_s4 = inlined_call_operand.vmem [shape: f32[1,256], index: 4, kind: input, shape index: {}]   ;;  %s7018_s5 = inlined_call_operand.vmem [shape: f32[1,256], index: 5, kind: input, shape index: {}]   ;;  %s7019_s6 = inlined_call_operand.vmem [shape: f32[1,256], index: 6, kind: input, shape index: {}]   ;;  %s7020_s7 = inlined_call_operand.hbm [shape: f32[640,256], index: 7, kind: output, shape index: {}]  }
   0x1   :  { %7118 = sst [smem:[#allocation83_spill]] %s7014_s1 }
   0x2   :  { %7119 = sst [smem:[#allocation84_spill]] %s7016_s3 }
   0x3   :  { %12 = vsyncpa [#allocation3], 0 }
   0x4   :  { %14 = vsyncpa [#allocation3 + $0x1], 0 }
   0x5   :  { %15 = vsyncpa [#allocation6], 0 }
   0x6   :  { %16 = vsyncpa [#allocation4], 0 }
   0x7   :  { %18 = vsyncpa [#allocation4 + $0x1], 0  ;;  %s4362_s24 = smov 0   ;;  %s4364_s25 = smov 0  }
   0x8   :  { %s4366_s26 = smov 0   ;;  %s4368_s27 = smov 0  }
   0x9 LB: > { %s4383_s28 = sadd.s32 4294967295, %s4310_s27   ;;  %s3646_s29 = sadd.s32 4294967294, %s4310_s27   ;;  %s4310_s27 = sphi %s4368_s27, %s7323_s27   ;;  %s4306_s26 = sphi %s4366_s26, %s7322_s26   ;;  %s4302_s25 = sphi %s4364_s25, %s7321_s25   ;;  %s4298_s24 = sphi %s4362_s24, %s7320_s24  }
   0xa   : > { %s4387_s30 = sadd.s32 1, %s4310_s27   ;;  %s31_s8 = sadd.s32 1, %s4306_s26 }
   0xb   : > { %s28_s9 = ssub.s32 %s4310_s27, %s4387_s30  ;;  %p38_p0 = scmp.ne.s32.totalorder %s4306_s26, %s4302_s25 }
   0xc   : > { %p29_p1 = scmp.eq.s32.totalorder %s28_s9, 0  ;;  %p39_p2 = scmp.eq.s32.totalorder %s4310_s27, 0 }
   0xd   : > { %p44_p3 = scmp.ne.s32.totalorder %s4302_s25, %s4298_s24  ;;  %p7021_p4 = scmp.eq.s32.totalorder %s4383_s28, 0 }
   0xe   : > { %s4399_s10 = scalar_select %p29_p1, %s4306_s26, %s31_s8  }
   0xf   : > { %p4401_p5 = por %p39_p2, %p38_p0  ;;  %p4407_p6 = por %p7021_p4, %p44_p3 }
  0x10   : > { %p194_p7 = scmp.eq.s32.totalorder %s4383_s28, 1  ;;  %p200_p8 = scmp.eq.s32.totalorder %s3646_s29, 1 }
  0x11   : > { %s7121_s12 = scalar_select %p4407_p6, 1, 0 }
  0x12   : > { %p3647_p9 = scmp.ge.s32.totalorder %s4310_s27, 1  ;;  %p207_p10 = scmp.lt.s32.totalorder %s4310_s27, 3 }
  0x13   : > { %p4414_p11 = por %p194_p7, %p38_p0  ;;  %p4418_p12 = por %p200_p8, %p44_p3 }
  0x14   : > { %p4422_p13 = pnand %p3647_p9, %p207_p10  ;;  %s4312_s16 = smov [#allocation5]  }
  0x15   : > { %s7122_s13 = scalar_select %p4414_p11, 1, 0 }
  0x16   : > { %s7123_s14 = scalar_select %p4418_p12, 1, 0 }
  0x17   : > { %p3756_p1 = pneg %p4422_p13  ;;  %s219_s17 = sshll.u32 %s4312_s16, 4  ;;  %s220_s17 = int_to_ptr.vmem [resolvable:$true] %s219_s17 }
  0x18   : > { %s4313_s19 = smov [#allocation7]   ;;  %s4175_s21 = scalar_lea.vmem %s220_s17, 4096 }
  0x19   : > { %p4430_p2 = pnand %p3756_p1, %p7021_p4  ;;  %s235_s20 = sshll.u32 %s4313_s19, 4  ;;  %s236_s20 = int_to_ptr.vmem [resolvable:$true] %s235_s20 }
  0x1a   : > { %p4176_p3 = scmp.ne.s32.totalorder %s220_s17, %s4175_s21  ;;  %p4183_p9 = scmp.lt.s32.totalorder %s220_s17, %s220_s17 }
  0x1b   : > { %p4166_p0 = pneg %p4430_p2  ;;  %p4184_p10 = scmp.lt.s32.totalorder %s4175_s21, %s4175_s21 }
  0x1d   : > { %p4178_p7 = pnand %p4176_p3, %p4166_p0  ;;  %p4185_p12 = por %p4184_p10, %p4183_p9 }
  0x1f   : > { %p4179_p8 = pneg %p4178_p7 }
  0x21   : > { %p4186_p1 = pnand %p4185_p12, %p4179_p8 }
  0x23   : > { %4189 = shalt.err (!%p4186_p1)
}
  0x24   : > { %s4314_s22 = smov 128   ;;  %s4315_s23 = smov 8  }
  0x25   : > { %s7126_s1 = sld [smem:[#allocation83_spill]]  ;;  %s4201_s9 = scalar_lea.vmem %s236_s20, 4096 }
  0x26   : > { %p4202_p4 = scmp.ne.s32.totalorder %s236_s20, %s4201_s9  ;;  %p4209_p11 = scmp.lt.s32.totalorder %s236_s20, %s236_s20 }
  0x27   : > { %p4210_p6 = scmp.lt.s32.totalorder %s4201_s9, %s4201_s9 }
  0x28   : > { %p4204_p3 = pnand %p4202_p4, %p4166_p0 }
  0x29   : > { %p4211_p9 = por %p4210_p6, %p4209_p11 }
  0x2a   : > { %p4205_p7 = pneg %p4204_p3 }
  0x2b   : > { %3759 = dma.hbm_to_vmem [thread:$0]  (!%p4430_p2), %s7126_s1, 4096, %s220_s17, [#allocation6], %s4314_s22, %s4314_s22, %s4315_s23  }
  0x2c   : > { %p4212_p12 = pnand %p4211_p9, %p4205_p7 }
  0x2e   : > { %4215 = shalt.err (!%p4212_p12)
}
  0x2f   : > { %s7127_s3 = sld [smem:[#allocation84_spill]]  ;;  %p3650_p8 = scmp.ge.s32.totalorder %s4310_s27, 2 }
  0x31   : > { %254 = sbr.rel (%p3650_p8) target bundleno = 86 (0x56), region = 40 }
  0x35   : > { %3762 = dma.hbm_to_vmem [thread:$0]  (!%p4430_p2), %s7127_s3, 4096, %s236_s20, [#allocation6], %s4314_s22, %s4314_s22, %s4315_s23  }
  0x36   : > { %257 = sbr.rel (!%p4401_p5) target bundleno = 86 (0x56), region = 44  ;;  %s258_s17 = sand.u32 (%p4401_p5), 1, %s4306_s26  }
  0x37   : > { %s3652_s21 = sshll.u32 (%p4401_p5), %s4310_s27, 6  ;;  %s3651_s29 = sshll.u32 (%p4401_p5), %s258_s17, 10 }
  0x38   : > { %s264_s8 = ssub.s32 (%p4401_p5), 80, %s3652_s21  ;;  %s4462_s22 = scalar_lea.sflag (%p4401_p5), [#allocation3], %s258_s17 }
  0x39   : > { %p265_p4 = scmp.lt.s32.totalorder (%p4401_p5), %s264_s8, 64  ;;  %s262_s23 = scalar_lea.vmem (%p4401_p5), [#allocation2], %s3651_s29 }
  0x3b   : > { %s7325_s8 = smov (!%p265_p4, %s264_s8), 64 }
  0x3c   : > { %s4459_s18 = sshll.u32 %s7325_s8, 8 }
  0x3d   : > { %s270_s20 = ssub.s32 16384, %s4459_s18 }
  0x3e   : > { %271 = vsyncadd %s4462_s22, %s270_s20  ;;  %p3655_p5 = scmp.ne.s32.totalorder %s4459_s18, 0  ;;  %s3742_s11 = sshll.u32 %s4310_s27, 14 }
  0x3f   : > { %s4470_s19 = scalar_lea.hbm %s7013_s0, %s3742_s11  ;;  %s277_s21 = sshll.u32 %s262_s23, 4  ;;  %s4472_s21 = int_to_ptr.vmem [resolvable:$true] %s277_s21 }
  0x40   : > { %s4216_s17 = scalar_lea.hbm %s4470_s19, %s4459_s18  ;;  %s4220_s20 = scalar_lea.hbm %s7013_s0, 20480 }
  0x41   : > { %p4217_p6 = scmp.ne.s32.totalorder %s4470_s19, %s4216_s17  ;;  %p4221_p0 = scmp.lt.s32.totalorder %s4470_s19, %s7013_s0 }
  0x42   : > { %p4222_p10 = scmp.lt.s32.totalorder %s4220_s20, %s4216_s17 }
  0x43   : > { %p4218_p11 = pnand %p4217_p6, %p3655_p5 }
  0x44   : > { %p4223_p1 = por %p4222_p10, %p4221_p0 }
  0x45   : > { %p4219_p2 = pneg %p4218_p11 }
  0x47   : > { %p4224_p3 = pnand %p4223_p1, %p4219_p2 }
  0x49   : > { %4227 = shalt.err (!%p4224_p3)
}
  0x4a   : > { %s4228_s23 = scalar_lea.vmem %s4472_s21, %s4459_s18  ;;  %s4316_s11 = smov [#allocation2]  }
  0x4b   : > { %p4229_p7 = scmp.ne.s32.totalorder %s4472_s21, %s4228_s23  ;;  %s4232_s9 = sshll.u32 %s4316_s11, 4  ;;  %s4233_s9 = int_to_ptr.vmem [resolvable:$false] %s4232_s9 }
  0x4c   : > { %s4234_s16 = scalar_lea.vmem %s4233_s9, 32768  ;;  %p4235_p4 = scmp.lt.s32.totalorder %s4472_s21, %s4233_s9 }
  0x4d   : > { %p4230_p9 = pnand %p4229_p7, %p3655_p5  ;;  %p4236_p6 = scmp.lt.s32.totalorder %s4234_s16, %s4228_s23 }
  0x4f   : > { %p4231_p12 = pneg %p4230_p9  ;;  %p4237_p11 = por %p4236_p6, %p4235_p4 }
  0x51   : > { %p4238_p0 = pnand %p4237_p11, %p4231_p12 }
  0x53   : > { %4241 = shalt.err (!%p4238_p0)
}
  0x54   : > { %s4317_s1 = smov 256   ;;  %s4318_s3 = smov 16  }
  0x55   : > { %283 = dma.hbm_to_vmem [thread:$0]  (%p3655_p5), %s4470_s19, %s4459_s18, %s4472_s21, %s4462_s22, %s4317_s1, %s4317_s1, %s4318_s3  }
  0x56 PF: > { %289 = sbr.rel (%p4422_p13) target bundleno = 1061 (0x425), region = 48 }
  0x5b   : > { %s4501_s17 = sand.u32 1, %s4302_s25   ;;  %p7128_p2 = scmp.ne.s32.totalorder %s7121_s12, 0 }
  0x5c   : > { %s3661_s29 = sshll.u32 %s4501_s17, 10  ;;  %s292_s8 = scalar_lea.sflag [#allocation3], %s4501_s17 }
  0x5d   : > { %s4507_s20 = scalar_lea.vmem [#allocation2], %s3661_s29 }
  0x5e   : > { %4285 = dma.done.wait (%p7128_p2), %s292_s8, 16384  }
  0x5f   : > { %4287 = vsyncadd (%p7128_p2), %s292_s8, 4294950912  ;;  %p7129_p5 = scmp.eq.s32.totalorder %s4383_s28, 0 }
  0x61   : > { %4289 = dma.done.wait (%p7129_p5), [#allocation6], 8192   ;;  %p7130_p13 = pmov %p7129_p5 }
  0x62   : > { %v3812_v0 = vld [vmem:[#allocation5 + $0x74] ss:$8 sps:$4 sm:$0xff]   ;;  %v3814_v1 = vld [vmem:[#allocation5 + $0x70] ss:$8 sps:$4 sm:$0xff]   ;;  %v3815_v2 = vld [vmem:[#allocation5 + $0x64] ss:$8 sps:$4 sm:$0xff]  }
  0x63   : > { %4291 = vsyncadd (%p7130_p13), [#allocation6], 4294959104  ;;  %742 = vmatprep.subr.bf16.mxu0 %v3812_v0  ;;  %v3817_v3 = vld [vmem:[#allocation5 + $0x60] ss:$8 sps:$4 sm:$0xff]   ;;  %v3818_v4 = vld [vmem:[#allocation5 + $0x54] ss:$8 sps:$4 sm:$0xff]  }
  0x64   : > { %743 = vmatpush1.bf16.msra.mxu0 %v3814_v1  ;;  %v3820_v5 = vld [vmem:[#allocation5 + $0x50] ss:$8 sps:$4 sm:$0xff]   ;;  %v3821_v6 = vld [vmem:[#allocation5 + $0x44] ss:$8 sps:$4 sm:$0xff]   ;;  %v3823_v7 = vld [vmem:[#allocation5 + $0x40] ss:$8 sps:$4 sm:$0xff]  }
  0x65   : > { %744 = vmatprep.subr.bf16.mxu0 %v3815_v2  ;;  %v3824_v8 = vld [vmem:[#allocation5 + $0x34] ss:$8 sps:$4 sm:$0xff]   ;;  %v3826_v9 = vld [vmem:[#allocation5 + $0x30] ss:$8 sps:$4 sm:$0xff]   ;;  %v3827_v10 = vld [vmem:[#allocation5 + $0x24] ss:$8 sps:$4 sm:$0xff]  }
  0x66   : > { %v3829_v11 = vld [vmem:[#allocation5 + $0x20] ss:$8 sps:$4 sm:$0xff]   ;;  %v3830_v12 = vld [vmem:[#allocation5 + $0x14] ss:$8 sps:$4 sm:$0xff]   ;;  %v3832_v16 = vld [vmem:[#allocation5 + $0x10] ss:$8 sps:$4 sm:$0xff]  }
  0x67   : > { %v347_v13 = vld [vmem:[%s4507_s20 + $0x8] sm:$0xff]  ;;  %v349_v14 = vld [vmem:[%s4507_s20 + $0x18] sm:$0xff]  ;;  %v346_v35 = vld [vmem:[%s4507_s20] sm:$0xff]  ;;  %s5455_s9 = scalar_lea.vmem [#allocation8], %s3661_s29  ;;  %s3533_s16 = scalar_lea.sflag [#allocation4], %s4501_s17 }
  0x68   : > { %745 = vmatpush1.bf16.msra.mxu0 %v3817_v3  ;;  %v475_v15 = vpack.c.bf16 %v349_v14, %v347_v13  ;;  %v3833_v17 = vld [vmem:[#allocation5 + $0x4] ss:$8 sps:$4 sm:$0xff]   ;;  %v3835_v18 = vld [vmem:[#allocation5] ss:$8 sps:$4 sm:$0xff]   ;;  %v3836_v19 = vld [vmem:[#allocation5 + $0xf4] ss:$8 sps:$4 sm:$0xff]  }
  0x69   : > { %746 = vmatprep.subr.bf16.mxu0 %v3818_v4  ;;  %v3838_v20 = vld [vmem:[#allocation5 + $0xf0] ss:$8 sps:$4 sm:$0xff]   ;;  %v3839_v21 = vld [vmem:[#allocation5 + $0xe4] ss:$8 sps:$4 sm:$0xff]   ;;  %v3841_v22 = vld [vmem:[#allocation5 + $0xe0] ss:$8 sps:$4 sm:$0xff]  }
  0x6a   : > { %774 = vmatprep.mubr.bf16.mxu0 %v475_v15  ;;  %v3842_v23 = vld [vmem:[#allocation5 + $0xd4] ss:$8 sps:$4 sm:$0xff]   ;;  %v3844_v24 = vld [vmem:[#allocation5 + $0xd0] ss:$8 sps:$4 sm:$0xff]   ;;  %v3845_v25 = vld [vmem:[#allocation5 + $0xc4] ss:$8 sps:$4 sm:$0xff]  }
  0x6b   : > { %v3847_v26 = vld [vmem:[#allocation5 + $0xc0] ss:$8 sps:$4 sm:$0xff]   ;;  %v3848_v27 = vld [vmem:[#allocation5 + $0xb4] ss:$8 sps:$4 sm:$0xff]   ;;  %v3850_v28 = vld [vmem:[#allocation5 + $0xb0] ss:$8 sps:$4 sm:$0xff]  }
  0x6c   : > { %747 = vmatpush1.bf16.msra.mxu0 %v3820_v5  ;;  %v3851_v29 = vld [vmem:[#allocation5 + $0xa4] ss:$8 sps:$4 sm:$0xff]   ;;  %v3853_v30 = vld [vmem:[#allocation5 + $0xa0] ss:$8 sps:$4 sm:$0xff]   ;;  %v3854_v31 = vld [vmem:[#allocation5 + $0x94] ss:$8 sps:$4 sm:$0xff]  }
  0x6d   : > { %748 = vmatprep.subr.bf16.mxu0 %v3821_v6  ;;  %v3856_v32 = vld [vmem:[#allocation5 + $0x90] ss:$8 sps:$4 sm:$0xff]   ;;  %v3857_v33 = vld [vmem:[#allocation5 + $0x84] ss:$8 sps:$4 sm:$0xff]   ;;  %v3859_v34 = vld [vmem:[#allocation5 + $0x80] ss:$8 sps:$4 sm:$0xff]  }
  0x6e   : > { %v348_v36 = vld [vmem:[%s4507_s20 + $0x10] sm:$0xff]  ;;  %v351_v37 = vld [vmem:[%s4507_s20 + $0x28] sm:$0xff]  ;;  %v353_v38 = vld [vmem:[%s4507_s20 + $0x38] sm:$0xff]  ;;  %p7318_p10 = scmp.ne.s32.totalorder %s7122_s13, 0 }
  0x6f   : > { %v474_v39 = vpack.c.bf16 %v348_v36, %v346_v35  ;;  %v477_v40 = vpack.c.bf16 %v353_v38, %v351_v37  ;;  %v350_v41 = vld [vmem:[%s4507_s20 + $0x20] sm:$0xff]  ;;  %v352_v42 = vld [vmem:[%s4507_s20 + $0x30] sm:$0xff]  ;;  %v355_v43 = vld [vmem:[%s4507_s20 + $0x48] sm:$0xff]  ;;  %s3730_s1 = sshll.u32 (%p7318_p10), %s4383_s28, 6 }
  0x70   : > { %749 = vmatpush1.bf16.msra.mxu0 %v3823_v7  ;;  %v357_v44 = vld [vmem:[%s4507_s20 + $0x58] sm:$0xff]  ;;  %v476_v45 = vpack.c.bf16 %v352_v42, %v350_v41  ;;  %v354_v48 = vld [vmem:[%s4507_s20 + $0x40] sm:$0xff]  ;;  %v356_v49 = vld [vmem:[%s4507_s20 + $0x50] sm:$0xff]  ;;  %s3541_s3 = ssub.s32 (%p7318_p10), 80, %s3730_s1 }
  0x71   : > { %750 = vmatprep.subr.bf16.mxu0 %v3824_v8  ;;  %v479_v46 = vpack.c.bf16 %v357_v44, %v355_v43  ;;  %v3860_v47 = vld [vmem:[#allocation7 + $0x74] ss:$8 sps:$4 sm:$0xff]   ;;  %v3862_v50 = vld [vmem:[#allocation7 + $0x70] ss:$8 sps:$4 sm:$0xff]   ;;  %v359_v51 = vld [vmem:[%s4507_s20 + $0x68] sm:$0xff]  ;;  %v478_v53 = vpack.c.bf16 %v356_v49, %v354_v48  ;;  %p3542_p1 = scmp.lt.s32.totalorder (%p7318_p10), %s3541_s3, 64 }
  0x72   : > { %v361_v52 = vld [vmem:[%s4507_s20 + $0x78] sm:$0xff]  ;;  %1491 = vmatprep.subr.bf16.mxu1 %v3860_v47  ;;  %v3863_v55 = vld [vmem:[#allocation7 + $0x64] ss:$8 sps:$4 sm:$0xff]   ;;  %v3865_v56 = vld [vmem:[#allocation7 + $0x60] ss:$8 sps:$4 sm:$0xff]  }
  0x73   : > { %1492 = vmatpush1.bf16.msra.mxu1 %v3862_v50  ;;  %v481_v54 = vpack.c.bf16 %v361_v52, %v359_v51  ;;  %v3866_v57 = vld [vmem:[#allocation7 + $0x54] ss:$8 sps:$4 sm:$0xff]   ;;  %v358_v58 = vld [vmem:[%s4507_s20 + $0x60] sm:$0xff]  ;;  %v363_v60 = vld [vmem:[%s4507_s20 + $0x88] sm:$0xff] }
  0x74   : > { %751 = vmatpush1.bf16.msra.mxu0 %v3826_v9  ;;  %v360_v59 = vld [vmem:[%s4507_s20 + $0x70] sm:$0xff]  ;;  %v365_v61 = vld [vmem:[%s4507_s20 + $0x98] sm:$0xff]  ;;  %1493 = vmatprep.subr.bf16.mxu1 %v3863_v55  ;;  %v3869_v1 = vld [vmem:[#allocation7 + $0x44] ss:$8 sps:$4 sm:$0xff]  }
  0x75   : > { %752 = vmatprep.subr.bf16.mxu0 %v3827_v10  ;;  %v3868_v62 = vld [vmem:[#allocation7 + $0x50] ss:$8 sps:$4 sm:$0xff]   ;;  %v480_v63 = vpack.c.bf16 %v360_v59, %v358_v58  ;;  %v483_v0 = vpack.c.bf16 %v365_v61, %v363_v60  ;;  %v3871_v2 = vld [vmem:[#allocation7 + $0x40] ss:$8 sps:$4 sm:$0xff]   ;;  %v3872_v3 = vld [vmem:[#allocation7 + $0x34] ss:$8 sps:$4 sm:$0xff]  }
  0x76   : > { %v362_v4 = vld [vmem:[%s4507_s20 + $0x80] sm:$0xff]  ;;  %v364_v5 = vld [vmem:[%s4507_s20 + $0x90] sm:$0xff]  ;;  %v367_v6 = vld [vmem:[%s4507_s20 + $0xa8] sm:$0xff] }
  0x77   : > { %1494 = vmatpush1.bf16.msra.mxu1 %v3865_v56  ;;  %v369_v7 = vld [vmem:[%s4507_s20 + $0xb8] sm:$0xff]  ;;  %v482_v9 = vpack.c.bf16 %v364_v5, %v362_v4  ;;  %v366_v14 = vld [vmem:[%s4507_s20 + $0xa0] sm:$0xff]  ;;  %v368_v15 = vld [vmem:[%s4507_s20 + $0xb0] sm:$0xff] }
  0x78   : > { %753 = vmatpush1.bf16.msra.mxu0 %v3829_v11  ;;  %1495 = vmatprep.subr.bf16.mxu1 %v3866_v57  ;;  %v3874_v8 = vld [vmem:[#allocation7 + $0x30] ss:$8 sps:$4 sm:$0xff]   ;;  %v485_v10 = vpack.c.bf16 %v369_v7, %v367_v6  ;;  %v3875_v11 = vld [vmem:[#allocation7 + $0x24] ss:$8 sps:$4 sm:$0xff]   ;;  %v3878_v13 = vld [vmem:[#allocation7 + $0x14] ss:$8 sps:$4 sm:$0xff]  }
  0x79   : > { %754 = vmatprep.subr.bf16.mxu0 %v3830_v12  ;;  %v3877_v12 = vld [vmem:[#allocation7 + $0x20] ss:$8 sps:$4 sm:$0xff]   ;;  %v376_v35 = vld [vmem:[%s4507_s20 + $0xf0] sm:$0xff]  ;;  %v381_v37 = vld [vmem:[%s4507_s20 + $0x118] sm:$0xff] }
  0x7a   : > { %v379_v36 = vld [vmem:[%s4507_s20 + $0x108] sm:$0xff]  ;;  %v3892_v38 = vld [vmem:[#allocation7 + $0xd0] ss:$8 sps:$4 sm:$0xff]   ;;  %v3896_v43 = vld [vmem:[#allocation7 + $0xb4] ss:$8 sps:$4 sm:$0xff]  }
  0x7b   : > { %1496 = vmatpush1.bf16.msra.mxu1 %v3868_v62  ;;  %v3893_v41 = vld [vmem:[#allocation7 + $0xc4] ss:$8 sps:$4 sm:$0xff]   ;;  %v3895_v42 = vld [vmem:[#allocation7 + $0xc0] ss:$8 sps:$4 sm:$0xff]   ;;  %v385_v47 = vld [vmem:[%s4507_s20 + $0x138] sm:$0xff] }
  0x7c   : > { %755 = vmatpush1.bf16.msra.mxu0 %v3832_v16  ;;  %1497 = vmatprep.subr.bf16.mxu1 %v3869_v1  ;;  %v371_v16 = vld [vmem:[%s4507_s20 + $0xc8] sm:$0xff]  ;;  %v378_v44 = vld [vmem:[%s4507_s20 + $0x100] sm:$0xff]  ;;  %v3898_v48 = vld [vmem:[#allocation7 + $0xb0] ss:$8 sps:$4 sm:$0xff]  }
  0x7d   : > { %756 = vmatprep.subr.bf16.mxu0 %v3833_v17  ;;  %v373_v17 = vld [vmem:[%s4507_s20 + $0xd8] sm:$0xff]  ;;  %v3899_v51 = vld [vmem:[#allocation7 + $0xa4] ss:$8 sps:$4 sm:$0xff]   ;;  %v392_v6 = vld [vmem:[%s4507_s20 + $0x170] sm:$0xff] }
  0x7e   : > { %v382_v52 = vld [vmem:[%s4507_s20 + $0x120] sm:$0xff]  ;;  %v387_v55 = vld [vmem:[%s4507_s20 + $0x148] sm:$0xff]  ;;  %v389_v56 = vld [vmem:[%s4507_s20 + $0x158] sm:$0xff] }
  0x7f   : > { %1498 = vmatpush1.bf16.msra.mxu1 %v3871_v2  ;;  %v3902_v58 = vld [vmem:[#allocation7 + $0x94] ss:$8 sps:$4 sm:$0xff]   ;;  %v495_v59 = vpack.c.bf16 %v389_v56, %v387_v55  ;;  %v3904_v60 = vld [vmem:[#allocation7 + $0x90] ss:$8 sps:$4 sm:$0xff]   ;;  %v3905_v61 = vld [vmem:[#allocation7 + $0x84] ss:$8 sps:$4 sm:$0xff]  }
  0x80   : > { %757 = vmatpush1.bf16.msra.mxu0 %v3835_v18  ;;  %1499 = vmatprep.subr.bf16.mxu1 %v3872_v3  ;;  %v3880_v18 = vld [vmem:[#allocation7 + $0x10] ss:$8 sps:$4 sm:$0xff]   ;;  %v386_v62 = vld [vmem:[%s4507_s20 + $0x140] sm:$0xff]  ;;  %v391_v1 = vld [vmem:[%s4507_s20 + $0x168] sm:$0xff] }
  0x81   : > { %758 = vmatprep.subr.bf16.mxu0 %v3836_v19  ;;  %v484_v19 = vpack.c.bf16 %v368_v15, %v366_v14  ;;  %v393_v2 = vld [vmem:[%s4507_s20 + $0x178] sm:$0xff]  ;;  %v390_v5 = vld [vmem:[%s4507_s20 + $0x160] sm:$0xff]  ;;  %v395_v7 = vld [vmem:[%s4507_s20 + $0x188] sm:$0xff] }
  0x82   : > { %v497_v4 = vpack.c.bf16 %v393_v2, %v391_v1  ;;  %v401_v14 = vld [vmem:[%s4507_s20 + $0x1b8] sm:$0xff]  ;;  %v427_v55 = vld [vmem:[%s4507_s20 + $0x288] sm:$0xff]  ;;  %v430_v1 = vld [vmem:[%s4507_s20 + $0x2a0] sm:$0xff] }
  0x83   : > { %1500 = vmatpush1.bf16.msra.mxu1 %v3874_v8  ;;  %v397_v8 = vld [vmem:[%s4507_s20 + $0x198] sm:$0xff]  ;;  %v432_v2 = vld [vmem:[%s4507_s20 + $0x2b0] sm:$0xff] }
  0x84   : > { %759 = vmatpush2.bf16.msra.mxu0 %v3838_v20  ;;  %1501 = vmatprep.subr.bf16.mxu1 %v3875_v11  ;;  %v487_v20 = vpack.c.bf16 %v373_v17, %v371_v16  ;;  %v394_v11 = vld [vmem:[%s4507_s20 + $0x180] sm:$0xff]  ;;  %v429_v56 = vld [vmem:[%s4507_s20 + $0x298] sm:$0xff] }
  0x85   : > { %760 = vmatprep.subr.bf16.mxu0 %v3839_v21  ;;  %v3881_v21 = vld [vmem:[#allocation7 + $0x4] ss:$8 sps:$4 sm:$0xff]  }
  0x86   : > { %v398_v17 = vld [vmem:[%s4507_s20 + $0x1a0] sm:$0xff] }
  0x87   : > { %1502 = vmatpush1.bf16.msra.mxu1 %v3877_v12  ;;  %v396_v12 = vld [vmem:[%s4507_s20 + $0x190] sm:$0xff] }
  0x88   : > { %761 = vmatpush2.bf16.msra.mxu0 %v3841_v22  ;;  %1503 = vmatprep.subr.bf16.mxu1 %v3878_v13  ;;  %v3883_v22 = vld [vmem:[#allocation7] ss:$8 sps:$4 sm:$0xff]   ;;  %v498_v15 = vpack.c.bf16 %v396_v12, %v394_v11 }
  0x89   : > { %762 = vmatprep.subr.bf16.mxu0 %v3842_v23  ;;  %v3884_v23 = vld [vmem:[#allocation7 + $0xf4] ss:$8 sps:$4 sm:$0xff]   ;;  %v399_v13 = vld [vmem:[%s4507_s20 + $0x1a8] sm:$0xff] }
  0x8a   : > { %v501_v16 = vpack.c.bf16 %v401_v14, %v399_v13  ;;  %v438_v13 = vld [vmem:[%s4507_s20 + $0x2e0] sm:$0xff]  ;;  %v440_v14 = vld [vmem:[%s4507_s20 + $0x2f0] sm:$0xff] }
  0x8b   : > { %1504 = vmatpush1.bf16.msra.mxu1 %v3880_v18  ;;  %v400_v18 = vld [vmem:[%s4507_s20 + $0x1b0] sm:$0xff] }
  0x8c   : > { %763 = vmatpush2.bf16.msra.mxu0 %v3844_v24  ;;  %v370_v24 = vld [vmem:[%s4507_s20 + $0xc0] sm:$0xff]  ;;  %1505 = vmatprep.subr.bf16.mxu1 %v3881_v21  ;;  %v500_v21 = vpack.c.bf16 %v400_v18, %v398_v17  ;;  %v520_v17 = vpack.c.bf16 %v440_v14, %v438_v13 }
  0x8d   : > { %764 = vmatprep.subr.bf16.mxu0 %v3845_v25  ;;  %v372_v25 = vld [vmem:[%s4507_s20 + $0xd0] sm:$0xff] }
  0x8f   : > { %1506 = vmatpush1.bf16.msra.mxu1 %v3883_v22 }
  0x90   : > { %765 = vmatpush2.bf16.msra.mxu0 %v3847_v26  ;;  %v375_v26 = vld [vmem:[%s4507_s20 + $0xe8] sm:$0xff]  ;;  %1507 = vmatprep.subr.bf16.mxu1 %v3884_v23  ;;  %v402_v23 = vld [vmem:[%s4507_s20 + $0x1c0] sm:$0xff] }
  0x91   : > { %766 = vmatprep.subr.bf16.mxu0 %v3848_v27  ;;  %v377_v27 = vld [vmem:[%s4507_s20 + $0xf8] sm:$0xff] }
  0x94   : > { %767 = vmatpush2.bf16.msra.mxu0 %v3850_v28  ;;  %v3886_v28 = vld [vmem:[#allocation7 + $0xf0] ss:$8 sps:$4 sm:$0xff]  }
  0x95   : > { %768 = vmatprep.subr.bf16.mxu0 %v3851_v29  ;;  %v486_v29 = vpack.c.bf16 %v372_v25, %v370_v24  ;;  %1508 = vmatpush2.bf16.msra.mxu1 %v3886_v28  ;;  %v404_v24 = vld [vmem:[%s4507_s20 + $0x1d0] sm:$0xff]  ;;  %v407_v25 = vld [vmem:[%s4507_s20 + $0x1e8] sm:$0xff] }
  0x98   : > { %769 = vmatpush2.bf16.msra.mxu0 %v3853_v30  ;;  %v489_v30 = vpack.c.bf16 %v377_v27, %v375_v26  ;;  %v409_v26 = vld [vmem:[%s4507_s20 + $0x1f8] sm:$0xff]  ;;  %v502_v27 = vpack.c.bf16 %v404_v24, %v402_v23  ;;  %v447_v23 = vld [vmem:[%s4507_s20 + $0x328] sm:$0xff] }
  0x99   : > { %770 = vmatprep.subr.bf16.mxu0 %v3854_v31  ;;  %v3887_v31 = vld [vmem:[#allocation7 + $0xe4] ss:$8 sps:$4 sm:$0xff]   ;;  %v505_v28 = vpack.c.bf16 %v409_v26, %v407_v25  ;;  %v449_v24 = vld [vmem:[%s4507_s20 + $0x338] sm:$0xff] }
  0x9a   : > { %1509 = vmatprep.subr.bf16.mxu1 %v3887_v31  ;;  %v411_v31 = vld [vmem:[%s4507_s20 + $0x208] sm:$0xff] }
  0x9c   : > { %771 = vmatpush2.bf16.msra.mxu0 %v3856_v32  ;;  %v3889_v32 = vld [vmem:[#allocation7 + $0xe0] ss:$8 sps:$4 sm:$0xff]  }
  0x9d   : > { %772 = vmatprep.subr.bf16.mxu0 %v3857_v33  ;;  %v3890_v33 = vld [vmem:[#allocation7 + $0xd4] ss:$8 sps:$4 sm:$0xff]   ;;  %1510 = vmatpush2.bf16.msra.mxu1 %v3889_v32 }
  0x9e   : > { %1511 = vmatprep.subr.bf16.mxu1 %v3890_v33  ;;  %v413_v32 = vld [vmem:[%s4507_s20 + $0x218] sm:$0xff] }
  0xa0   : > { %773 = vmatpush2.bf16.msra.mxu0 %v3859_v34  ;;  %v374_v34 = vld [vmem:[%s4507_s20 + $0xe0] sm:$0xff] }
  0xa1   : > { %1512 = vmatpush2.bf16.msra.mxu1 %v3892_v38  ;;  %v417_v38 = vld [vmem:[%s4507_s20 + $0x238] sm:$0xff] }
  0xa2   : > { %1513 = vmatprep.subr.bf16.mxu1 %v3893_v41  ;;  %v414_v41 = vld [vmem:[%s4507_s20 + $0x220] sm:$0xff] }
  0xa3   : > { %775 = vmatmul.mubr.bf16.vlgmr.msra.gmra.mxu0 %v474_v39  ;;  %v488_v39 = vpack.c.bf16 %v376_v35, %v374_v34  ;;  %v507_v34 = vpack.c.bf16 %v413_v32, %v411_v31  ;;  %v410_v35 = vld [vmem:[%s4507_s20 + $0x200] sm:$0xff] }
  0xa4   : > { %784 = vmatprep.mubr.bf16.mxu0 %v477_v40  ;;  %v491_v40 = vpack.c.bf16 %v381_v37, %v379_v36  ;;  %v412_v36 = vld [vmem:[%s4507_s20 + $0x210] sm:$0xff]  ;;  %v415_v37 = vld [vmem:[%s4507_s20 + $0x228] sm:$0xff]  ;;  %v446_v32 = vld [vmem:[%s4507_s20 + $0x320] sm:$0xff] }
  0xa5   : > { %1514 = vmatpush2.bf16.msra.mxu1 %v3895_v42  ;;  %v416_v42 = vld [vmem:[%s4507_s20 + $0x230] sm:$0xff] }
  0xa6   : > { %1515 = vmatprep.subr.bf16.mxu1 %v3896_v43  ;;  %v419_v43 = vld [vmem:[%s4507_s20 + $0x248] sm:$0xff] }
  0xa9   : > { %1516 = vmatpush2.bf16.msra.mxu1 %v3898_v48  ;;  %v420_v48 = vld [vmem:[%s4507_s20 + $0x250] sm:$0xff] }
  0xaa   : > { %1517 = vmatprep.subr.bf16.mxu1 %v3899_v51 }
  0xab   : > { %785 = vmatmul.mubr.bf16.gmra.mxu0 %v476_v45  ;;  %v380_v45 = vld [vmem:[%s4507_s20 + $0x110] sm:$0xff] }
  0xac   : > { %794 = vmatprep.mubr.bf16.mxu0 %v479_v46  ;;  %v383_v46 = vld [vmem:[%s4507_s20 + $0x128] sm:$0xff]  ;;  %v490_v49 = vpack.c.bf16 %v380_v45, %v378_v44  ;;  %v421_v44 = vld [vmem:[%s4507_s20 + $0x258] sm:$0xff]  ;;  %v508_v45 = vpack.c.bf16 %v416_v42, %v414_v41 }
  0xad   : > { %v493_v50 = vpack.c.bf16 %v385_v47, %v383_v46  ;;  %v511_v46 = vpack.c.bf16 %v421_v44, %v419_v43  ;;  %v418_v47 = vld [vmem:[%s4507_s20 + $0x240] sm:$0xff] }
  0xae   : > { %v510_v51 = vpack.c.bf16 %v420_v48, %v418_v47 }
  0xb3   : > { %795 = vmatmul.mubr.bf16.gmra.mxu0 %v478_v53  ;;  %v384_v53 = vld [vmem:[%s4507_s20 + $0x130] sm:$0xff] }
  0xb4   : > { %804 = vmatprep.mubr.bf16.mxu0 %v481_v54  ;;  %v3901_v54 = vld [vmem:[#allocation7 + $0xa0] ss:$8 sps:$4 sm:$0xff]   ;;  %v492_v57 = vpack.c.bf16 %v384_v53, %v382_v52 }
  0xb5   : > { %1518 = vmatpush2.bf16.msra.mxu1 %v3901_v54  ;;  %v422_v53 = vld [vmem:[%s4507_s20 + $0x260] sm:$0xff]  ;;  %v424_v54 = vld [vmem:[%s4507_s20 + $0x270] sm:$0xff] }
  0xb6   : > { %1519 = vmatprep.subr.bf16.mxu1 %v3902_v58  ;;  %v515_v58 = vpack.c.bf16 %v429_v56, %v427_v55  ;;  %v457_v55 = vld [vmem:[%s4507_s20 + $0x378] sm:$0xff] }
  0xb9   : > { %1520 = vmatpush2.bf16.msra.mxu1 %v3904_v60  ;;  %v428_v60 = vld [vmem:[%s4507_s20 + $0x290] sm:$0xff] }
  0xba   : > { %1521 = vmatprep.subr.bf16.mxu1 %v3905_v61  ;;  %v431_v61 = vld [vmem:[%s4507_s20 + $0x2a8] sm:$0xff] }
  0xbb   : > { %805 = vmatmul.mubr.bf16.gmra.mxu0 %v480_v63  ;;  %v388_v63 = vld [vmem:[%s4507_s20 + $0x150] sm:$0xff] }
  0xbc   : > { %814 = vmatprep.mubr.bf16.mxu0 %v483_v0  ;;  %v3907_v0 = vld [vmem:[#allocation7 + $0x80] ss:$8 sps:$4 sm:$0xff]   ;;  %v494_v3 = vpack.c.bf16 %v388_v63, %v386_v62  ;;  %v433_v62 = vld [vmem:[%s4507_s20 + $0x2b8] sm:$0xff] }
  0xbd   : > { %1522 = vmatpush2.bf16.msra.mxu1 %v3907_v0  ;;  %v517_v0 = vpack.c.bf16 %v433_v62, %v431_v61 }
  0xc3   : > { %815 = vmatmul.mubr.bf16.gmra.mxu0 %v482_v9  ;;  %v496_v9 = vpack.c.bf16 %v392_v6, %v390_v5  ;;  %v516_v5 = vpack.c.bf16 %v432_v2, %v430_v1 }
  0xc4   : > { %824 = vmatprep.mubr.bf16.mxu0 %v485_v10  ;;  %v499_v10 = vpack.c.bf16 %v397_v8, %v395_v7  ;;  %v434_v7 = vld [vmem:[%s4507_s20 + $0x2c0] sm:$0xff]  ;;  %v436_v8 = vld [vmem:[%s4507_s20 + $0x2d0] sm:$0xff] }
  0xc5   : > { %v518_v11 = vpack.c.bf16 %v436_v8, %v434_v7  ;;  %v456_v7 = vld [vmem:[%s4507_s20 + $0x370] sm:$0xff] }
  0xcb   : > { %825 = vmatmul.mubr.bf16.gmra.mxu0 %v484_v19  ;;  %v403_v19 = vld [vmem:[%s4507_s20 + $0x1c8] sm:$0xff] }
  0xcc   : > { %834 = vmatprep.mubr.bf16.mxu0 %v487_v20  ;;  %v405_v20 = vld [vmem:[%s4507_s20 + $0x1d8] sm:$0xff] }
  0xcd   : > { %v503_v22 = vpack.c.bf16 %v405_v20, %v403_v19  ;;  %v572_v19 = vlaneseq  ;;  %v442_v20 = vld [vmem:[%s4507_s20 + $0x300] sm:$0xff] }
  0xd3   : > { %835 = vmatmul.mubr.bf16.gmra.mxu0 %v486_v29  ;;  %v406_v29 = vld [vmem:[%s4507_s20 + $0x1e0] sm:$0xff] }
  0xd4   : > { %844 = vmatprep.mubr.bf16.mxu0 %v489_v30  ;;  %v408_v30 = vld [vmem:[%s4507_s20 + $0x1f0] sm:$0xff] }
  0xd5   : > { %v504_v33 = vpack.c.bf16 %v408_v30, %v406_v29  ;;  %v570_v29 = vld [vmem:[%s7015_s2] sm:$0x3] }
  0xdb   : > { %845 = vmatmul.mubr.bf16.gmra.mxu0 %v488_v39  ;;  %v506_v39 = vpack.c.bf16 %v412_v36, %v410_v35  ;;  %v451_v36 = vld [vmem:[%s4507_s20 + $0x348] sm:$0xff] }
  0xdc   : > { %854 = vmatprep.mubr.bf16.mxu0 %v491_v40  ;;  %v509_v40 = vpack.c.bf16 %v417_v38, %v415_v37  ;;  %v453_v37 = vld [vmem:[%s4507_s20 + $0x358] sm:$0xff] }
  0xdd   : > { %v527_v42 = vpack.c.bf16 %v453_v37, %v451_v36 }
  0xe3   : > { %855 = vmatmul.mubr.bf16.gmra.mxu0 %v490_v49  ;;  %v423_v49 = vld [vmem:[%s4507_s20 + $0x268] sm:$0xff] }
  0xe4   : > { %864 = vmatprep.mubr.bf16.mxu0 %v493_v50  ;;  %v425_v50 = vld [vmem:[%s4507_s20 + $0x278] sm:$0xff] }
  0xe5   : > { %v513_v52 = vpack.c.bf16 %v425_v50, %v423_v49  ;;  %v450_v50 = vld [vmem:[%s4507_s20 + $0x340] sm:$0xff] }
  0xeb   : > { %865 = vmatmul.mubr.bf16.gmra.mxu0 %v492_v57  ;;  %v512_v57 = vpack.c.bf16 %v424_v54, %v422_v53  ;;  %v455_v54 = vld [vmem:[%s4507_s20 + $0x368] sm:$0xff] }
  0xec   : > { %874 = vmatprep.mubr.bf16.mxu0 %v495_v59  ;;  %v426_v59 = vld [vmem:[%s4507_s20 + $0x280] sm:$0xff]  ;;  %v529_v62 = vpack.c.bf16 %v457_v55, %v455_v54  ;;  %v467_v54 = vld [vmem:[%s4507_s20 + $0x3c8] sm:$0xff]  ;;  %v469_v55 = vld [vmem:[%s4507_s20 + $0x3d8] sm:$0xff] }
  0xed   : > { %v514_v63 = vpack.c.bf16 %v428_v60, %v426_v59 }
  0xf3   : > { %875 = vmatmul.mubr.bf16.gmra.mxu0 %v494_v3  ;;  %v435_v3 = vld [vmem:[%s4507_s20 + $0x2c8] sm:$0xff] }
  0xf4   : > { %884 = vmatprep.mubr.bf16.mxu0 %v497_v4  ;;  %v437_v4 = vld [vmem:[%s4507_s20 + $0x2d8] sm:$0xff] }
  0xf5   : > { %v519_v6 = vpack.c.bf16 %v437_v4, %v435_v3 }
  0xfb   : > { %885 = vmatmul.mubr.bf16.gmra.mxu0 %v496_v9  ;;  %v439_v9 = vld [vmem:[%s4507_s20 + $0x2e8] sm:$0xff] }
  0xfc   : > { %894 = vmatprep.mubr.bf16.mxu0 %v499_v10  ;;  %v441_v10 = vld [vmem:[%s4507_s20 + $0x2f8] sm:$0xff] }
  0xfd   : > { %v521_v12 = vpack.c.bf16 %v441_v10, %v439_v9  ;;  %v459_v10 = vld [vmem:[%s4507_s20 + $0x388] sm:$0xff] }
 0x103   : > { %895 = vmatmul.mubr.bf16.gmra.mxu0 %v498_v15  ;;  %v443_v15 = vld [vmem:[%s4507_s20 + $0x308] sm:$0xff] }
 0x104   : > { %904 = vmatprep.mubr.bf16.mxu0 %v501_v16  ;;  %v445_v16 = vld [vmem:[%s4507_s20 + $0x318] sm:$0xff] }
 0x105   : > { %v523_v18 = vpack.c.bf16 %v445_v16, %v443_v15 }
 0x10b   : > { %905 = vmatmul.mubr.bf16.gmra.mxu0 %v500_v21  ;;  %v444_v21 = vld [vmem:[%s4507_s20 + $0x310] sm:$0xff] }
 0x10c   : > { %914 = vmatprep.mubr.bf16.mxu0 %v503_v22  ;;  %v573_v22 = vshrl.u32 %v572_v19, 7  ;;  %v522_v25 = vpack.c.bf16 %v444_v21, %v442_v20 }
 0x10e   : > { %v4619_v26 = vsub.s32 1, %v573_v22 }
 0x110   : > { %v4627_v31 = vrot.slane %v570_v29, %v4619_v26 }
 0x113   : > { %915 = vmatmul.mubr.bf16.gmra.mxu0 %v502_v27  ;;  %v525_v27 = vpack.c.bf16 %v449_v24, %v447_v23 }
 0x114   : > { %924 = vmatprep.mubr.bf16.mxu0 %v505_v28  ;;  %v4621_v28 = vsub.s32 0, %v573_v22 }
 0x11b   : > { %925 = vmatmul.mubr.bf16.gmra.mxu0 %v504_v33  ;;  %v448_v33 = vld [vmem:[%s4507_s20 + $0x330] sm:$0xff] }
 0x11c   : > { %934 = vmatprep.mubr.bf16.mxu0 %v507_v34  ;;  %v4632_v34 = vrot.slane %v570_v29, %v4621_v28  ;;  %v460_v29 = vld [vmem:[%s4507_s20 + $0x390] sm:$0xff] }
 0x123   : > { %935 = vmatmul.mubr.bf16.gmra.mxu0 %v506_v39  ;;  %v524_v39 = vpack.c.bf16 %v448_v33, %v446_v32  ;;  %v463_v33 = vld [vmem:[%s4507_s20 + $0x3a8] sm:$0xff] }
 0x124   : > { %944 = vmatprep.mubr.bf16.mxu0 %v509_v40 }
 0x12b   : > { %945 = vmatmul.mubr.bf16.gmra.mxu0 %v508_v45 }
 0x12c   : > { %954 = vmatprep.mubr.bf16.mxu0 %v511_v46 }
 0x133   : > { %955 = vmatmul.mubr.bf16.gmra.mxu0 %v510_v51  ;;  %v452_v51 = vld [vmem:[%s4507_s20 + $0x350] sm:$0xff] }
 0x134   : > { %964 = vmatprep.mubr.bf16.mxu0 %v513_v52  ;;  %v526_v59 = vpack.c.bf16 %v452_v51, %v450_v50  ;;  %v462_v50 = vld [vmem:[%s4507_s20 + $0x3a0] sm:$0xff]  ;;  %v464_v51 = vld [vmem:[%s4507_s20 + $0x3b0] sm:$0xff] }
 0x13b   : > { %965 = vmatmul.mubr.bf16.gmra.mxu0 %v512_v57 }
 0x13c   : > { %974 = vmatprep.mubr.bf16.mxu0 %v515_v58 }
 0x143   : > { %975 = vmatmul.mubr.bf16.gmra.mxu0 %v514_v63 }
 0x144   : > { %984 = vmatprep.mubr.bf16.mxu0 %v517_v0 }
 0x14b   : > { %985 = vmatmul.mubr.bf16.gmra.mxu0 %v516_v5 }
 0x14c   : > { %994 = vmatprep.mubr.bf16.mxu0 %v519_v6  ;;  %v454_v6 = vld [vmem:[%s4507_s20 + $0x360] sm:$0xff] }
 0x14d   : > { %v528_v15 = vpack.c.bf16 %v456_v7, %v454_v6  ;;  %v466_v6 = vld [vmem:[%s4507_s20 + $0x3c0] sm:$0xff]  ;;  %v468_v7 = vld [vmem:[%s4507_s20 + $0x3d0] sm:$0xff] }
 0x153   : > { %995 = vmatmul.mubr.bf16.gmra.mxu0 %v518_v11  ;;  %v461_v11 = vld [vmem:[%s4507_s20 + $0x398] sm:$0xff] }
 0x154   : > { %1004 = vmatprep.mubr.bf16.mxu0 %v521_v12 }
 0x15b   : > { %1005 = vmatmul.mubr.bf16.gmra.mxu0 %v520_v17 }
 0x15c   : > { %1014 = vmatprep.mubr.bf16.mxu0 %v523_v18  ;;  %v531_v18 = vpack.c.bf16 %v461_v11, %v459_v10  ;;  %v471_v10 = vld [vmem:[%s4507_s20 + $0x3e8] sm:$0xff]  ;;  %v473_v11 = vld [vmem:[%s4507_s20 + $0x3f8] sm:$0xff] }
 0x163   : > { %v776_v30 = vpop.f32.mrf.mxu0  ;;  %1015 = vmatmul.mubr.bf16.gmra.mxu0 %v522_v25 }
 0x164   : > { %1024 = vmatprep.mubr.bf16.mxu0 %v525_v27  ;;  %v777_v43 = vadd.f32 %v776_v30, %v4632_v34  ;;  %v458_v27 = vld [vmem:[%s4507_s20 + $0x380] sm:$0xff] }
 0x165   : > { %v778_v35 = vpop.f32.mrf.mxu0 }
 0x166   : > { %v779_v40 = vadd.f32 %v778_v35, %v4627_v31  ;;  %v1095_v52 = vmax.f32 %v777_v43, 0.0  ;;  %v465_v35 = vld [vmem:[%s4507_s20 + $0x3b8] sm:$0xff] }
 0x167   : > { %v780_v38 = vpop.f32.mrf.mxu0 }
 0x168   : > { %v781_v41 = vadd.f32 %v780_v38, %v4632_v34  ;;  %v1096_v48 = vmax.f32 %v779_v40, 0.0 }
 0x169   : > { %v782_v44 = vpop.f32.mrf.mxu0 }
 0x16a   : > { %v783_v45 = vadd.f32 %v782_v44, %v4627_v31  ;;  %v1097_v46 = vmax.f32 %v781_v41, 0.0 }
 0x16b   : > { %v786_v47 = vpop.f32.mrf.mxu0  ;;  %1025 = vmatmul.mubr.bf16.gmra.mxu0 %v524_v39  ;;  %v530_v39 = vpack.c.bf16 %v460_v29, %v458_v27  ;;  %v470_v27 = vld [vmem:[%s4507_s20 + $0x3e0] sm:$0xff]  ;;  %v472_v29 = vld [vmem:[%s4507_s20 + $0x3f0] sm:$0xff] }
 0x16c   : > { %v1098_v49 = vmax.f32 %v783_v45, 0.0  ;;  %1034 = vmatprep.mubr.bf16.mxu0 %v527_v42  ;;  %v1223_v57 = vpack.c.bf16 %v1097_v46, %v1095_v52  ;;  %v787_v63 = vadd.f32 %v786_v47, %v4632_v34  ;;  %v533_v42 = vpack.c.bf16 %v465_v35, %v463_v33 }
 0x16d   : > { %v788_v53 = vpop.f32.mrf.mxu0 }
 0x16e   : > { %v1224_v56 = vpack.c.bf16 %v1098_v49, %v1096_v48  ;;  %v789_v60 = vadd.f32 %v788_v53, %v4627_v31  ;;  %v1099_v8 = vmax.f32 %v787_v63, 0.0 }
 0x16f   : > { %v790_v58 = vpop.f32.mrf.mxu0 }
 0x170   : > { %v791_v61 = vadd.f32 %v790_v58, %v4632_v34  ;;  %1523 = vmatprep.mubr.bf16.mxu1 %v1224_v56  ;;  %v1100_v4 = vmax.f32 %v789_v60, 0.0 }
 0x171   : > { %v792_v0 = vpop.f32.mrf.mxu0  ;;  %1524 = vmatmul.mubr.bf16.vlgmr.msra.gmra.mxu1 %v1223_v57 }
 0x172   : > { %v793_v1 = vadd.f32 %v792_v0, %v4627_v31  ;;  %v1101_v2 = vmax.f32 %v791_v61, 0.0 }
 0x173   : > { %v796_v3 = vpop.f32.mrf.mxu0  ;;  %1035 = vmatmul.mubr.bf16.gmra.mxu0 %v526_v59  ;;  %v532_v59 = vpack.c.bf16 %v464_v51, %v462_v50 }
 0x174   : > { %v1102_v5 = vmax.f32 %v793_v1, 0.0  ;;  %1044 = vmatprep.mubr.bf16.mxu0 %v529_v62  ;;  %v1225_v13 = vpack.c.bf16 %v1101_v2, %v1099_v8  ;;  %v797_v19 = vadd.f32 %v796_v3, %v4632_v34  ;;  %v535_v62 = vpack.c.bf16 %v469_v55, %v467_v54 }
 0x175   : > { %v798_v9 = vpop.f32.mrf.mxu0 }
 0x176   : > { %v1226_v12 = vpack.c.bf16 %v1102_v5, %v1100_v4  ;;  %v799_v16 = vadd.f32 %v798_v9, %v4627_v31  ;;  %v1103_v30 = vmax.f32 %v797_v19, 0.0 }
 0x177   : > { %v800_v14 = vpop.f32.mrf.mxu0 }
 0x178   : > { %v801_v17 = vadd.f32 %v800_v14, %v4632_v34  ;;  %1533 = vmatprep.mubr.bf16.mxu1 %v1226_v12  ;;  %v1104_v24 = vmax.f32 %v799_v16, 0.0 }
 0x179   : > { %v802_v20 = vpop.f32.mrf.mxu0  ;;  %1534 = vmatmul.mubr.bf16.gmra.mxu1 %v1225_v13 }
 0x17a   : > { %v803_v21 = vadd.f32 %v802_v20, %v4627_v31  ;;  %v1105_v22 = vmax.f32 %v801_v17, 0.0 }
 0x17b   : > { %v806_v23 = vpop.f32.mrf.mxu0  ;;  %1045 = vmatmul.mubr.bf16.gmra.mxu0 %v528_v15  ;;  %v534_v15 = vpack.c.bf16 %v468_v7, %v466_v6 }
 0x17c   : > { %v1106_v25 = vmax.f32 %v803_v21, 0.0  ;;  %1054 = vmatprep.mubr.bf16.mxu0 %v531_v18  ;;  %v1227_v37 = vpack.c.bf16 %v1105_v22, %v1103_v30  ;;  %v807_v43 = vadd.f32 %v806_v23, %v4632_v34  ;;  %v537_v18 = vpack.c.bf16 %v473_v11, %v471_v10 }
 0x17d   : > { %v808_v32 = vpop.f32.mrf.mxu0 }
 0x17e   : > { %v1228_v36 = vpack.c.bf16 %v1106_v25, %v1104_v24  ;;  %v809_v40 = vadd.f32 %v808_v32, %v4627_v31  ;;  %v1107_v52 = vmax.f32 %v807_v43, 0.0 }
 0x17f   : > { %v810_v38 = vpop.f32.mrf.mxu0 }
 0x180   : > { %v811_v41 = vadd.f32 %v810_v38, %v4632_v34  ;;  %1543 = vmatprep.mubr.bf16.mxu1 %v1228_v36  ;;  %v1108_v48 = vmax.f32 %v809_v40, 0.0 }
 0x181   : > { %v812_v44 = vpop.f32.mrf.mxu0  ;;  %1544 = vmatmul.mubr.bf16.gmra.mxu1 %v1227_v37  ;;  %v536_v37 = vpack.c.bf16 %v472_v29, %v470_v27 }
 0x182   : > { %v813_v45 = vadd.f32 %v812_v44, %v4627_v31  ;;  %v1109_v46 = vmax.f32 %v811_v41, 0.0 }
 0x183   : > { %v816_v47 = vpop.f32.mrf.mxu0  ;;  %1055 = vmatmul.mubr.bf16.gmra.mxu0 %v530_v39 }
 0x184   : > { %v1110_v49 = vmax.f32 %v813_v45, 0.0  ;;  %1064 = vmatprep.mubr.bf16.mxu0 %v533_v42  ;;  %v1229_v57 = vpack.c.bf16 %v1109_v46, %v1107_v52  ;;  %v817_v63 = vadd.f32 %v816_v47, %v4632_v34 }
 0x185   : > { %v818_v53 = vpop.f32.mrf.mxu0 }
 0x186   : > { %v1230_v56 = vpack.c.bf16 %v1110_v49, %v1108_v48  ;;  %v819_v60 = vadd.f32 %v818_v53, %v4627_v31  ;;  %v1111_v8 = vmax.f32 %v817_v63, 0.0 }
 0x187   : > { %v820_v58 = vpop.f32.mrf.mxu0 }
 0x188   : > { %v821_v61 = vadd.f32 %v820_v58, %v4632_v34  ;;  %1553 = vmatprep.mubr.bf16.mxu1 %v1230_v56  ;;  %v1112_v4 = vmax.f32 %v819_v60, 0.0 }
 0x189   : > { %v822_v0 = vpop.f32.mrf.mxu0  ;;  %1554 = vmatmul.mubr.bf16.gmra.mxu1 %v1229_v57 }
 0x18a   : > { %v823_v1 = vadd.f32 %v822_v0, %v4627_v31  ;;  %v1113_v2 = vmax.f32 %v821_v61, 0.0 }
 0x18b   : > { %v826_v3 = vpop.f32.mrf.mxu0  ;;  %1065 = vmatmul.mubr.bf16.gmra.mxu0 %v532_v59 }
 0x18c   : > { %v1114_v5 = vmax.f32 %v823_v1, 0.0  ;;  %1074 = vmatprep.mubr.bf16.mxu0 %v535_v62  ;;  %v1231_v13 = vpack.c.bf16 %v1113_v2, %v1111_v8  ;;  %v827_v19 = vadd.f32 %v826_v3, %v4632_v34 }
 0x18d   : > { %v828_v9 = vpop.f32.mrf.mxu0 }
 0x18e   : > { %v1232_v12 = vpack.c.bf16 %v1114_v5, %v1112_v4  ;;  %v829_v16 = vadd.f32 %v828_v9, %v4627_v31  ;;  %v1115_v30 = vmax.f32 %v827_v19, 0.0 }
 0x18f   : > { %v830_v14 = vpop.f32.mrf.mxu0 }
 0x190   : > { %v831_v17 = vadd.f32 %v830_v14, %v4632_v34  ;;  %1563 = vmatprep.mubr.bf16.mxu1 %v1232_v12  ;;  %v1116_v24 = vmax.f32 %v829_v16, 0.0 }
 0x191   : > { %v832_v20 = vpop.f32.mrf.mxu0  ;;  %1564 = vmatmul.mubr.bf16.gmra.mxu1 %v1231_v13 }
 0x192   : > { %v833_v21 = vadd.f32 %v832_v20, %v4627_v31  ;;  %v1117_v22 = vmax.f32 %v831_v17, 0.0 }
 0x193   : > { %v836_v23 = vpop.f32.mrf.mxu0  ;;  %1075 = vmatmul.mubr.bf16.gmra.mxu0 %v534_v15 }
 0x194   : > { %v1118_v25 = vmax.f32 %v833_v21, 0.0  ;;  %1084 = vmatprep.mubr.bf16.mxu0 %v537_v18  ;;  %v1233_v35 = vpack.c.bf16 %v1117_v22, %v1115_v30  ;;  %v837_v40 = vadd.f32 %v836_v23, %v4632_v34 }
 0x195   : > { %v838_v32 = vpop.f32.mrf.mxu0 }
 0x196   : > { %v1234_v33 = vpack.c.bf16 %v1118_v25, %v1116_v24  ;;  %v839_v38 = vadd.f32 %v838_v32, %v4627_v31  ;;  %v1119_v47 = vmax.f32 %v837_v40, 0.0 }
 0x197   : > { %v840_v36 = vpop.f32.mrf.mxu0 }
 0x198   : > { %v841_v39 = vadd.f32 %v840_v36, %v4632_v34  ;;  %1573 = vmatprep.mubr.bf16.mxu1 %v1234_v33  ;;  %v1120_v45 = vmax.f32 %v839_v38, 0.0 }
 0x199   : > { %v842_v41 = vpop.f32.mrf.mxu0  ;;  %1574 = vmatmul.mubr.bf16.gmra.mxu1 %v1233_v35 }
 0x19a   : > { %v843_v42 = vadd.f32 %v842_v41, %v4627_v31  ;;  %v1121_v43 = vmax.f32 %v841_v39, 0.0 }
 0x19b   : > { %v846_v44 = vpop.f32.mrf.mxu0  ;;  %1085 = vmatmul.mubr.bf16.gmra.mxu0 %v536_v37 }
 0x19c   : > { %v1122_v46 = vmax.f32 %v843_v42, 0.0  ;;  %v1235_v50 = vpack.c.bf16 %v1121_v43, %v1119_v47  ;;  %v847_v54 = vadd.f32 %v846_v44, %v4632_v34 }
 0x19d   : > { %v848_v48 = vpop.f32.mrf.mxu0 }
 0x19e   : > { %v1236_v49 = vpack.c.bf16 %v1122_v46, %v1120_v45  ;;  %v849_v52 = vadd.f32 %v848_v48, %v4627_v31  ;;  %v1123_v61 = vmax.f32 %v847_v54, 0.0 }
 0x19f   : > { %v850_v51 = vpop.f32.mrf.mxu0 }
 0x1a0   : > { %v851_v53 = vadd.f32 %v850_v51, %v4632_v34  ;;  %1583 = vmatprep.mubr.bf16.mxu1 %v1236_v49  ;;  %v1124_v59 = vmax.f32 %v849_v52, 0.0 }
 0x1a1   : > { %v852_v55 = vpop.f32.mrf.mxu0  ;;  %1584 = vmatmul.mubr.bf16.gmra.mxu1 %v1235_v50 }
 0x1a2   : > { %v853_v56 = vadd.f32 %v852_v55, %v4627_v31  ;;  %v1125_v57 = vmax.f32 %v851_v53, 0.0 }
 0x1a3   : > { %v856_v58 = vpop.f32.mrf.mxu0 }
 0x1a4   : > { %v1126_v60 = vmax.f32 %v853_v56, 0.0  ;;  %v1237_v0 = vpack.c.bf16 %v1125_v57, %v1123_v61  ;;  %v857_v4 = vadd.f32 %v856_v58, %v4632_v34 }
 0x1a5   : > { %v858_v62 = vpop.f32.mrf.mxu0 }
 0x1a6   : > { %v1238_v63 = vpack.c.bf16 %v1126_v60, %v1124_v59  ;;  %v859_v2 = vadd.f32 %v858_v62, %v4627_v31  ;;  %v1127_v11 = vmax.f32 %v857_v4, 0.0 }
 0x1a7   : > { %v860_v1 = vpop.f32.mrf.mxu0 }
 0x1a8   : > { %v861_v3 = vadd.f32 %v860_v1, %v4632_v34  ;;  %1593 = vmatprep.mubr.bf16.mxu1 %v1238_v63  ;;  %v1128_v9 = vmax.f32 %v859_v2, 0.0 }
 0x1a9   : > { %v862_v5 = vpop.f32.mrf.mxu0  ;;  %1594 = vmatmul.mubr.bf16.gmra.mxu1 %v1237_v0 }
 0x1aa   : > { %v863_v6 = vadd.f32 %v862_v5, %v4627_v31  ;;  %v1129_v7 = vmax.f32 %v861_v3, 0.0 }
 0x1ab   : > { %v866_v8 = vpop.f32.mrf.mxu0 }
 0x1ac   : > { %v1130_v10 = vmax.f32 %v863_v6, 0.0  ;;  %v1239_v14 = vpack.c.bf16 %v1129_v7, %v1127_v11  ;;  %v867_v18 = vadd.f32 %v866_v8, %v4632_v34 }
 0x1ad   : > { %v868_v12 = vpop.f32.mrf.mxu0 }
 0x1ae   : > { %v1240_v13 = vpack.c.bf16 %v1130_v10, %v1128_v9  ;;  %v869_v16 = vadd.f32 %v868_v12, %v4627_v31  ;;  %v1131_v25 = vmax.f32 %v867_v18, 0.0 }
 0x1af   : > { %v870_v15 = vpop.f32.mrf.mxu0 }
 0x1b0   : > { %v871_v17 = vadd.f32 %v870_v15, %v4632_v34  ;;  %1603 = vmatprep.mubr.bf16.mxu1 %v1240_v13  ;;  %v1132_v23 = vmax.f32 %v869_v16, 0.0 }
 0x1b1   : > { %v872_v19 = vpop.f32.mrf.mxu0  ;;  %1604 = vmatmul.mubr.bf16.gmra.mxu1 %v1239_v14 }
 0x1b2   : > { %v873_v20 = vadd.f32 %v872_v19, %v4627_v31  ;;  %v1133_v21 = vmax.f32 %v871_v17, 0.0 }
 0x1b3   : > { %v876_v22 = vpop.f32.mrf.mxu0 }
 0x1b4   : > { %v1134_v24 = vmax.f32 %v873_v20, 0.0  ;;  %v1241_v30 = vpack.c.bf16 %v1133_v21, %v1131_v25  ;;  %v877_v36 = vadd.f32 %v876_v22, %v4632_v34 }
 0x1b5   : > { %v878_v27 = vpop.f32.mrf.mxu0 }
 0x1b6   : > { %v1242_v29 = vpack.c.bf16 %v1134_v24, %v1132_v23  ;;  %v879_v33 = vadd.f32 %v878_v27, %v4627_v31  ;;  %v1135_v43 = vmax.f32 %v877_v36, 0.0 }
 0x1b7   : > { %v880_v32 = vpop.f32.mrf.mxu0 }
 0x1b8   : > { %v881_v35 = vadd.f32 %v880_v32, %v4632_v34  ;;  %1613 = vmatprep.mubr.bf16.mxu1 %v1242_v29  ;;  %v1136_v41 = vmax.f32 %v879_v33, 0.0 }
 0x1b9   : > { %v882_v37 = vpop.f32.mrf.mxu0  ;;  %1614 = vmatmul.mubr.bf16.gmra.mxu1 %v1241_v30 }
 0x1ba   : > { %v883_v38 = vadd.f32 %v882_v37, %v4627_v31  ;;  %v1137_v39 = vmax.f32 %v881_v35, 0.0 }
 0x1bb   : > { %v886_v40 = vpop.f32.mrf.mxu0 }
 0x1bc   : > { %v1138_v42 = vmax.f32 %v883_v38, 0.0  ;;  %v1243_v46 = vpack.c.bf16 %v1137_v39, %v1135_v43  ;;  %v887_v50 = vadd.f32 %v886_v40, %v4632_v34 }
 0x1bd   : > { %v888_v44 = vpop.f32.mrf.mxu0 }
 0x1be   : > { %v1244_v45 = vpack.c.bf16 %v1138_v42, %v1136_v41  ;;  %v889_v48 = vadd.f32 %v888_v44, %v4627_v31  ;;  %v1139_v57 = vmax.f32 %v887_v50, 0.0 }
 0x1bf   : > { %v890_v47 = vpop.f32.mrf.mxu0 }
 0x1c0   : > { %v891_v49 = vadd.f32 %v890_v47, %v4632_v34  ;;  %1623 = vmatprep.mubr.bf16.mxu1 %v1244_v45  ;;  %v1140_v55 = vmax.f32 %v889_v48, 0.0 }
 0x1c1   : > { %v892_v51 = vpop.f32.mrf.mxu0  ;;  %1624 = vmatmul.mubr.bf16.gmra.mxu1 %v1243_v46 }
 0x1c2   : > { %v893_v52 = vadd.f32 %v892_v51, %v4627_v31  ;;  %v1141_v53 = vmax.f32 %v891_v49, 0.0 }
 0x1c3   : > { %v896_v54 = vpop.f32.mrf.mxu0 }
 0x1c4   : > { %v1142_v56 = vmax.f32 %v893_v52, 0.0  ;;  %v1245_v60 = vpack.c.bf16 %v1141_v53, %v1139_v57  ;;  %v897_v0 = vadd.f32 %v896_v54, %v4632_v34 }
 0x1c5   : > { %v898_v58 = vpop.f32.mrf.mxu0 }
 0x1c6   : > { %v1246_v59 = vpack.c.bf16 %v1142_v56, %v1140_v55  ;;  %v899_v62 = vadd.f32 %v898_v58, %v4627_v31  ;;  %v1143_v7 = vmax.f32 %v897_v0, 0.0 }
 0x1c7   : > { %v900_v61 = vpop.f32.mrf.mxu0 }
 0x1c8   : > { %v901_v63 = vadd.f32 %v900_v61, %v4632_v34  ;;  %1633 = vmatprep.mubr.bf16.mxu1 %v1246_v59  ;;  %v1144_v5 = vmax.f32 %v899_v62, 0.0 }
 0x1c9   : > { %v902_v1 = vpop.f32.mrf.mxu0  ;;  %1634 = vmatmul.mubr.bf16.gmra.mxu1 %v1245_v60 }
 0x1ca   : > { %v903_v2 = vadd.f32 %v902_v1, %v4627_v31  ;;  %v1145_v3 = vmax.f32 %v901_v63, 0.0 }
 0x1cb   : > { %v906_v4 = vpop.f32.mrf.mxu0 }
 0x1cc   : > { %v1146_v6 = vmax.f32 %v903_v2, 0.0  ;;  %v1247_v10 = vpack.c.bf16 %v1145_v3, %v1143_v7  ;;  %v907_v14 = vadd.f32 %v906_v4, %v4632_v34 }
 0x1cd   : > { %v908_v8 = vpop.f32.mrf.mxu0 }
 0x1ce   : > { %v1248_v9 = vpack.c.bf16 %v1146_v6, %v1144_v5  ;;  %v909_v12 = vadd.f32 %v908_v8, %v4627_v31  ;;  %v1147_v21 = vmax.f32 %v907_v14, 0.0 }
 0x1cf   : > { %v910_v11 = vpop.f32.mrf.mxu0 }
 0x1d0   : > { %v911_v13 = vadd.f32 %v910_v11, %v4632_v34  ;;  %1643 = vmatprep.mubr.bf16.mxu1 %v1248_v9  ;;  %v1148_v19 = vmax.f32 %v909_v12, 0.0 }
 0x1d1   : > { %v912_v15 = vpop.f32.mrf.mxu0  ;;  %1644 = vmatmul.mubr.bf16.gmra.mxu1 %v1247_v10 }
 0x1d2   : > { %v913_v16 = vadd.f32 %v912_v15, %v4627_v31  ;;  %v1149_v17 = vmax.f32 %v911_v13, 0.0 }
 0x1d3   : > { %v916_v18 = vpop.f32.mrf.mxu0 }
 0x1d4   : > { %v1150_v20 = vmax.f32 %v913_v16, 0.0  ;;  %v1249_v24 = vpack.c.bf16 %v1149_v17, %v1147_v21  ;;  %v917_v30 = vadd.f32 %v916_v18, %v4632_v34 }
 0x1d5   : > { %v918_v22 = vpop.f32.mrf.mxu0 }
 0x1d6   : > { %v1250_v23 = vpack.c.bf16 %v1150_v20, %v1148_v19  ;;  %v919_v27 = vadd.f32 %v918_v22, %v4627_v31  ;;  %v1151_v39 = vmax.f32 %v917_v30, 0.0 }
 0x1d7   : > { %v920_v25 = vpop.f32.mrf.mxu0 }
 0x1d8   : > { %v921_v29 = vadd.f32 %v920_v25, %v4632_v34  ;;  %1653 = vmatprep.mubr.bf16.mxu1 %v1250_v23  ;;  %v1152_v37 = vmax.f32 %v919_v27, 0.0 }
 0x1d9   : > { %v922_v32 = vpop.f32.mrf.mxu0  ;;  %1654 = vmatmul.mubr.bf16.gmra.mxu1 %v1249_v24 }
 0x1da   : > { %v923_v33 = vadd.f32 %v922_v32, %v4627_v31  ;;  %v1153_v35 = vmax.f32 %v921_v29, 0.0 }
 0x1db   : > { %v926_v36 = vpop.f32.mrf.mxu0 }
 0x1dc   : > { %v1154_v38 = vmax.f32 %v923_v33, 0.0  ;;  %v1251_v42 = vpack.c.bf16 %v1153_v35, %v1151_v39  ;;  %v927_v46 = vadd.f32 %v926_v36, %v4632_v34 }
 0x1dd   : > { %v928_v40 = vpop.f32.mrf.mxu0 }
 0x1de   : > { %v1252_v41 = vpack.c.bf16 %v1154_v38, %v1152_v37  ;;  %v929_v44 = vadd.f32 %v928_v40, %v4627_v31  ;;  %v1155_v53 = vmax.f32 %v927_v46, 0.0 }
 0x1df   : > { %v930_v43 = vpop.f32.mrf.mxu0 }
 0x1e0   : > { %v931_v45 = vadd.f32 %v930_v43, %v4632_v34  ;;  %1663 = vmatprep.mubr.bf16.mxu1 %v1252_v41  ;;  %v1156_v51 = vmax.f32 %v929_v44, 0.0 }
 0x1e1   : > { %v932_v47 = vpop.f32.mrf.mxu0  ;;  %1664 = vmatmul.mubr.bf16.gmra.mxu1 %v1251_v42 }
 0x1e2   : > { %v933_v48 = vadd.f32 %v932_v47, %v4627_v31  ;;  %v1157_v49 = vmax.f32 %v931_v45, 0.0 }
 0x1e3   : > { %v936_v50 = vpop.f32.mrf.mxu0 }
 0x1e4   : > { %v1158_v52 = vmax.f32 %v933_v48, 0.0  ;;  %v1253_v56 = vpack.c.bf16 %v1157_v49, %v1155_v53  ;;  %v937_v60 = vadd.f32 %v936_v50, %v4632_v34 }
 0x1e5   : > { %v938_v54 = vpop.f32.mrf.mxu0 }
 0x1e6   : > { %v1254_v55 = vpack.c.bf16 %v1158_v52, %v1156_v51  ;;  %v939_v58 = vadd.f32 %v938_v54, %v4627_v31  ;;  %v1159_v3 = vmax.f32 %v937_v60, 0.0 }
 0x1e7   : > { %v940_v57 = vpop.f32.mrf.mxu0 }
 0x1e8   : > { %v941_v59 = vadd.f32 %v940_v57, %v4632_v34  ;;  %1673 = vmatprep.mubr.bf16.mxu1 %v1254_v55  ;;  %v1160_v1 = vmax.f32 %v939_v58, 0.0 }
 0x1e9   : > { %v942_v61 = vpop.f32.mrf.mxu0  ;;  %1674 = vmatmul.mubr.bf16.gmra.mxu1 %v1253_v56 }
 0x1ea   : > { %v943_v62 = vadd.f32 %v942_v61, %v4627_v31  ;;  %v1161_v63 = vmax.f32 %v941_v59, 0.0 }
 0x1eb   : > { %v946_v0 = vpop.f32.mrf.mxu0 }
 0x1ec   : > { %v1162_v2 = vmax.f32 %v943_v62, 0.0  ;;  %v1255_v6 = vpack.c.bf16 %v1161_v63, %v1159_v3  ;;  %v947_v10 = vadd.f32 %v946_v0, %v4632_v34 }
 0x1ed   : > { %v948_v4 = vpop.f32.mrf.mxu0 }
 0x1ee   : > { %v1256_v5 = vpack.c.bf16 %v1162_v2, %v1160_v1  ;;  %v949_v8 = vadd.f32 %v948_v4, %v4627_v31  ;;  %v1163_v17 = vmax.f32 %v947_v10, 0.0 }
 0x1ef   : > { %v950_v7 = vpop.f32.mrf.mxu0 }
 0x1f0   : > { %v951_v9 = vadd.f32 %v950_v7, %v4632_v34  ;;  %1683 = vmatprep.mubr.bf16.mxu1 %v1256_v5  ;;  %v1164_v15 = vmax.f32 %v949_v8, 0.0 }
 0x1f1   : > { %v952_v11 = vpop.f32.mrf.mxu0  ;;  %1684 = vmatmul.mubr.bf16.gmra.mxu1 %v1255_v6 }
 0x1f2   : > { %v953_v12 = vadd.f32 %v952_v11, %v4627_v31  ;;  %v1165_v13 = vmax.f32 %v951_v9, 0.0 }
 0x1f3   : > { %v956_v14 = vpop.f32.mrf.mxu0 }
 0x1f4   : > { %v1166_v16 = vmax.f32 %v953_v12, 0.0  ;;  %v1257_v20 = vpack.c.bf16 %v1165_v13, %v1163_v17  ;;  %v957_v24 = vadd.f32 %v956_v14, %v4632_v34 }
 0x1f5   : > { %v958_v18 = vpop.f32.mrf.mxu0 }
 0x1f6   : > { %v1258_v19 = vpack.c.bf16 %v1166_v16, %v1164_v15  ;;  %v959_v22 = vadd.f32 %v958_v18, %v4627_v31  ;;  %v1167_v35 = vmax.f32 %v957_v24, 0.0 }
 0x1f7   : > { %v960_v21 = vpop.f32.mrf.mxu0 }
 0x1f8   : > { %v961_v23 = vadd.f32 %v960_v21, %v4632_v34  ;;  %1693 = vmatprep.mubr.bf16.mxu1 %v1258_v19  ;;  %v1168_v32 = vmax.f32 %v959_v22, 0.0 }
 0x1f9   : > { %v962_v25 = vpop.f32.mrf.mxu0  ;;  %1694 = vmatmul.mubr.bf16.gmra.mxu1 %v1257_v20 }
 0x1fa   : > { %v963_v27 = vadd.f32 %v962_v25, %v4627_v31  ;;  %v1169_v29 = vmax.f32 %v961_v23, 0.0 }
 0x1fb   : > { %v966_v30 = vpop.f32.mrf.mxu0 }
 0x1fc   : > { %v1170_v33 = vmax.f32 %v963_v27, 0.0  ;;  %v1259_v38 = vpack.c.bf16 %v1169_v29, %v1167_v35  ;;  %v967_v42 = vadd.f32 %v966_v30, %v4632_v34 }
 0x1fd   : > { %v968_v36 = vpop.f32.mrf.mxu0 }
 0x1fe   : > { %v1260_v37 = vpack.c.bf16 %v1170_v33, %v1168_v32  ;;  %v969_v40 = vadd.f32 %v968_v36, %v4627_v31  ;;  %v1171_v49 = vmax.f32 %v967_v42, 0.0 }
 0x1ff   : > { %v970_v39 = vpop.f32.mrf.mxu0 }
 0x200   : > { %v971_v41 = vadd.f32 %v970_v39, %v4632_v34  ;;  %1703 = vmatprep.mubr.bf16.mxu1 %v1260_v37  ;;  %v1172_v47 = vmax.f32 %v969_v40, 0.0 }
 0x201   : > { %v972_v43 = vpop.f32.mrf.mxu0  ;;  %1704 = vmatmul.mubr.bf16.gmra.mxu1 %v1259_v38 }
 0x202   : > { %v973_v44 = vadd.f32 %v972_v43, %v4627_v31  ;;  %v1173_v45 = vmax.f32 %v971_v41, 0.0 }
 0x203   : > { %v976_v46 = vpop.f32.mrf.mxu0 }
 0x204   : > { %v1174_v48 = vmax.f32 %v973_v44, 0.0  ;;  %v1261_v52 = vpack.c.bf16 %v1173_v45, %v1171_v49  ;;  %v977_v56 = vadd.f32 %v976_v46, %v4632_v34 }
 0x205   : > { %v978_v50 = vpop.f32.mrf.mxu0 }
 0x206   : > { %v1262_v51 = vpack.c.bf16 %v1174_v48, %v1172_v47  ;;  %v979_v54 = vadd.f32 %v978_v50, %v4627_v31  ;;  %v1175_v63 = vmax.f32 %v977_v56, 0.0 }
 0x207   : > { %v980_v53 = vpop.f32.mrf.mxu0 }
 0x208   : > { %v981_v55 = vadd.f32 %v980_v53, %v4632_v34  ;;  %1713 = vmatprep.mubr.bf16.mxu1 %v1262_v51  ;;  %v1176_v61 = vmax.f32 %v979_v54, 0.0 }
 0x209   : > { %v982_v57 = vpop.f32.mrf.mxu0  ;;  %1714 = vmatmul.mubr.bf16.gmra.mxu1 %v1261_v52 }
 0x20a   : > { %v983_v58 = vadd.f32 %v982_v57, %v4627_v31  ;;  %v1177_v59 = vmax.f32 %v981_v55, 0.0 }
 0x20b   : > { %v986_v60 = vpop.f32.mrf.mxu0 }
 0x20c   : > { %v1178_v62 = vmax.f32 %v983_v58, 0.0  ;;  %v1263_v2 = vpack.c.bf16 %v1177_v59, %v1175_v63  ;;  %v987_v6 = vadd.f32 %v986_v60, %v4632_v34  ;;  %v1319_v59 = vld [vmem:[%s7017_s4] sm:$0x3] }
 0x20d   : > { %v988_v0 = vpop.f32.mrf.mxu0 }
 0x20e   : > { %v1264_v1 = vpack.c.bf16 %v1178_v62, %v1176_v61  ;;  %v989_v4 = vadd.f32 %v988_v0, %v4627_v31  ;;  %v1179_v13 = vmax.f32 %v987_v6, 0.0 }
 0x20f   : > { %v990_v3 = vpop.f32.mrf.mxu0 }
 0x210   : > { %v991_v5 = vadd.f32 %v990_v3, %v4632_v34  ;;  %1723 = vmatprep.mubr.bf16.mxu1 %v1264_v1  ;;  %v1180_v11 = vmax.f32 %v989_v4, 0.0  ;;  %v4762_v1 = vrot.slane %v1319_v59, %v4621_v28 }
 0x211   : > { %v992_v7 = vpop.f32.mrf.mxu0  ;;  %1724 = vmatmul.mubr.bf16.gmra.mxu1 %v1263_v2 }
 0x212   : > { %v993_v8 = vadd.f32 %v992_v7, %v4627_v31  ;;  %v1181_v9 = vmax.f32 %v991_v5, 0.0  ;;  %v4768_v7 = vrot.slane %v1319_v59, %v4619_v26 }
 0x213   : > { %v996_v10 = vpop.f32.mrf.mxu0 }
 0x214   : > { %v1182_v12 = vmax.f32 %v993_v8, 0.0  ;;  %v1265_v16 = vpack.c.bf16 %v1181_v9, %v1179_v13  ;;  %v997_v20 = vadd.f32 %v996_v10, %v4632_v34 }
 0x215   : > { %v998_v14 = vpop.f32.mrf.mxu0 }
 0x216   : > { %v1266_v15 = vpack.c.bf16 %v1182_v12, %v1180_v11  ;;  %v999_v18 = vadd.f32 %v998_v14, %v4627_v31  ;;  %v1183_v29 = vmax.f32 %v997_v20, 0.0 }
 0x217   : > { %v1000_v17 = vpop.f32.mrf.mxu0 }
 0x218   : > { %v1001_v19 = vadd.f32 %v1000_v17, %v4632_v34  ;;  %1733 = vmatprep.mubr.bf16.mxu1 %v1266_v15  ;;  %v1184_v25 = vmax.f32 %v999_v18, 0.0 }
 0x219   : > { %v1002_v21 = vpop.f32.mrf.mxu0  ;;  %1734 = vmatmul.mubr.bf16.gmra.mxu1 %v1265_v16 }
 0x21a   : > { %v1003_v22 = vadd.f32 %v1002_v21, %v4627_v31  ;;  %v1185_v23 = vmax.f32 %v1001_v19, 0.0 }
 0x21b   : > { %v1006_v24 = vpop.f32.mrf.mxu0 }
 0x21c   : > { %v1186_v27 = vmax.f32 %v1003_v22, 0.0  ;;  %v1267_v33 = vpack.c.bf16 %v1185_v23, %v1183_v29  ;;  %v1007_v38 = vadd.f32 %v1006_v24, %v4632_v34  ;;  %v4036_v22 = vld [vmem:[%s4507_s20] sm:$0xff]  ;;  %v4037_v24 = vld [vmem:[%s4507_s20 + $0x8] sm:$0xff] }
 0x21d   : > { %v1008_v30 = vpop.f32.mrf.mxu0 }
 0x21e   : > { %v1268_v32 = vpack.c.bf16 %v1186_v27, %v1184_v25  ;;  %v1009_v36 = vadd.f32 %v1008_v30, %v4627_v31  ;;  %v1187_v45 = vmax.f32 %v1007_v38, 0.0 }
 0x21f   : > { %v1010_v35 = vpop.f32.mrf.mxu0 }
 0x220   : > { %v1011_v37 = vadd.f32 %v1010_v35, %v4632_v34  ;;  %1743 = vmatprep.mubr.bf16.mxu1 %v1268_v32  ;;  %v1188_v43 = vmax.f32 %v1009_v36, 0.0  ;;  %v4038_v36 = vld [vmem:[%s4507_s20 + $0x10] sm:$0xff] }
 0x221   : > { %v1012_v39 = vpop.f32.mrf.mxu0  ;;  %1744 = vmatmul.mubr.bf16.gmra.mxu1 %v1267_v33 }
 0x222   : > { %v1013_v40 = vadd.f32 %v1012_v39, %v4627_v31  ;;  %v1189_v41 = vmax.f32 %v1011_v37, 0.0 }
 0x223   : > { %v1016_v42 = vpop.f32.mrf.mxu0 }
 0x224   : > { %v1190_v44 = vmax.f32 %v1013_v40, 0.0  ;;  %v1269_v48 = vpack.c.bf16 %v1189_v41, %v1187_v45  ;;  %v1017_v52 = vadd.f32 %v1016_v42, %v4632_v34  ;;  %v4039_v42 = vld [vmem:[%s4507_s20 + $0x18] sm:$0xff] }
 0x225   : > { %v1018_v46 = vpop.f32.mrf.mxu0 }
 0x226   : > { %v1270_v47 = vpack.c.bf16 %v1190_v44, %v1188_v43  ;;  %v1019_v50 = vadd.f32 %v1018_v46, %v4627_v31  ;;  %v1191_v60 = vmax.f32 %v1017_v52, 0.0 }
 0x227   : > { %v1020_v49 = vpop.f32.mrf.mxu0 }
 0x228   : > { %v1021_v51 = vadd.f32 %v1020_v49, %v4632_v34  ;;  %1753 = vmatprep.mubr.bf16.mxu1 %v1270_v47  ;;  %v1192_v57 = vmax.f32 %v1019_v50, 0.0 }
 0x229   : > { %v1022_v53 = vpop.f32.mrf.mxu0  ;;  %1754 = vmatmul.mubr.bf16.gmra.mxu1 %v1269_v48 }
 0x22a   : > { %v1023_v54 = vadd.f32 %v1022_v53, %v4627_v31  ;;  %v1193_v55 = vmax.f32 %v1021_v51, 0.0 }
 0x22b   : > { %v1026_v56 = vpop.f32.mrf.mxu0 }
 0x22c   : > { %v1194_v58 = vmax.f32 %v1023_v54, 0.0  ;;  %v1271_v63 = vpack.c.bf16 %v1193_v55, %v1191_v60  ;;  %v1027_v4 = vadd.f32 %v1026_v56, %v4632_v34 }
 0x22d   : > { %v1028_v61 = vpop.f32.mrf.mxu0 }
 0x22e   : > { %v1272_v62 = vpack.c.bf16 %v1194_v58, %v1192_v57  ;;  %v1029_v2 = vadd.f32 %v1028_v61, %v4627_v31  ;;  %v1195_v15 = vmax.f32 %v1027_v4, 0.0  ;;  %v4040_v61 = vld [vmem:[%s4507_s20 + $0x20] sm:$0xff] }
 0x22f   : > { %v1030_v0 = vpop.f32.mrf.mxu0 }
 0x230   : > { %v1031_v3 = vadd.f32 %v1030_v0, %v4632_v34  ;;  %1763 = vmatprep.mubr.bf16.mxu1 %v1272_v62  ;;  %v1196_v13 = vmax.f32 %v1029_v2, 0.0 }
 0x231   : > { %v1032_v5 = vpop.f32.mrf.mxu0  ;;  %v1525_v6 = vpop.f32.mrf.mxu1  ;;  %1764 = vmatmul.mubr.bf16.gmra.mxu1 %v1271_v63  ;;  %v4041_v63 = vld [vmem:[%s4507_s20 + $0x28] sm:$0xff] }
 0x232   : > { %v1033_v8 = vadd.f32 %v1032_v5, %v4627_v31  ;;  %v1197_v9 = vmax.f32 %v1031_v3, 0.0  ;;  %v1526_v10 = vadd.f32 %v1525_v6, %v4762_v1 }
 0x233   : > { %v1036_v11 = vpop.f32.mrf.mxu0  ;;  %v1527_v12 = vpop.f32.mrf.mxu1 }
 0x234   : > { %v1198_v14 = vmax.f32 %v1033_v8, 0.0  ;;  %v1528_v16 = vadd.f32 %v1527_v12, %v4768_v7  ;;  %v1273_v21 = vpack.c.bf16 %v1197_v9, %v1195_v15  ;;  %v4775_v23 = vadd.f32 %v4036_v22, %v1526_v10 }
 0x235   : > { %v1038_v17 = vpop.f32.mrf.mxu0  ;;  %v1529_v18 = vpop.f32.mrf.mxu1  ;;  %v1037_v30 = vadd.f32 %v1036_v11, %v4632_v34 }
 0x236   : > { %v1274_v19 = vpack.c.bf16 %v1198_v14, %v1196_v13  ;;  %v1530_v20 = vadd.f32 %v1529_v18, %v4762_v1  ;;  %v4778_v25 = vadd.f32 %v4037_v24, %v1528_v16  ;;  %v1039_v32 = vadd.f32 %v1038_v17, %v4627_v31  ;;  %v4042_v17 = vld [vmem:[%s4507_s20 + $0x38] sm:$0xff] }
 0x237   : > { %v1040_v27 = vpop.f32.mrf.mxu0  ;;  %v1531_v29 = vpop.f32.mrf.mxu1  ;;  %v2164_v49 = vmul.f32 %v4775_v23, %v4775_v23  ;;  %v1199_v50 = vmax.f32 %v1037_v30, 0.0 }
 0x238   : > { %v1041_v33 = vadd.f32 %v1040_v27, %v4632_v34  ;;  %v1532_v35 = vadd.f32 %v1531_v29, %v4768_v7  ;;  %1773 = vmatprep.mubr.bf16.mxu1 %v1274_v19  ;;  %v4785_v37 = vadd.f32 %v4038_v36, %v1530_v20  ;;  %v1972_v40 = vadd.f32 %v4778_v25, %v4775_v23 }
 0x239   : > { %v1042_v38 = vpop.f32.mrf.mxu0  ;;  %v1535_v39 = vpop.f32.mrf.mxu1  ;;  %1774 = vmatmul.mubr.bf16.gmra.mxu1 %v1273_v21  ;;  %v2165_v41 = vmul.f32 %v4778_v25, %v4778_v25  ;;  %v1200_v51 = vmax.f32 %v1039_v32, 0.0  ;;  %v4043_v32 = vld [vmem:[%s4507_s20 + $0x30] sm:$0xff] }
 0x23a   : > { %v4792_v43 = vadd.f32 %v4039_v42, %v1532_v35  ;;  %v1043_v44 = vadd.f32 %v1042_v38, %v4627_v31  ;;  %v1201_v45 = vmax.f32 %v1041_v33, 0.0  ;;  %v1536_v46 = vadd.f32 %v1535_v39, %v4762_v1  ;;  %1973 = vadd.xlane.f32.xlu0 %v1972_v40 }
 0x23b   : > { %v1046_v47 = vpop.f32.mrf.mxu0  ;;  %v1537_v48 = vpop.f32.mrf.mxu1  ;;  %v2292_v56 = vadd.f32 %v2165_v41, %v2164_v49  ;;  %v2166_v57 = vmul.f32 %v4785_v37, %v4785_v37 }
 0x23c   : > { %v1202_v52 = vmax.f32 %v1043_v44, 0.0  ;;  %v1538_v53 = vadd.f32 %v1537_v48, %v4768_v7  ;;  %v2167_v58 = vmul.f32 %v4792_v43, %v4792_v43  ;;  %v1275_v60 = vpack.c.bf16 %v1201_v45, %v1199_v50  ;;  %v4044_v44 = vld [vmem:[%s4507_s20 + $0x40] sm:$0xff] }
 0x23d   : > { %v1048_v54 = vpop.f32.mrf.mxu0  ;;  %v1539_v55 = vpop.f32.mrf.mxu1  ;;  %v4804_v62 = vadd.f32 %v4040_v61, %v1536_v46  ;;  %v1047_v5 = vadd.f32 %v1046_v47, %v4632_v34  ;;  %v1975_v13 = vadd.f32 %v4792_v43, %v4785_v37  ;;  %v4045_v46 = vld [vmem:[%s4507_s20 + $0x48] sm:$0xff]  ;;  %v4046_v61 = vld [vmem:[%s4507_s20 + $0x50] sm:$0xff] }
 0x23e   : > { %v1276_v59 = vpack.c.bf16 %v1202_v52, %v1200_v51  ;;  %v4807_v0 = vadd.f32 %v4041_v63, %v1538_v53  ;;  %2293 = vadd.xlane.f32.xlu0 %v2292_v56  ;;  %v2295_v4 = vadd.f32 %v2167_v58, %v2166_v57  ;;  %v1049_v6 = vadd.f32 %v1048_v54, %v4627_v31 }
 0x23f   : > { %v1050_v2 = vpop.f32.mrf.mxu0  ;;  %v1541_v3 = vpop.f32.mrf.mxu1  ;;  %v1540_v10 = vadd.f32 %v1539_v55, %v4762_v1  ;;  %v2168_v24 = vmul.f32 %v4804_v62, %v4804_v62  ;;  %v1203_v27 = vmax.f32 %v1047_v5, 0.0 }
 0x240   : > { %v1051_v8 = vadd.f32 %v1050_v2, %v4632_v34  ;;  %v1542_v9 = vadd.f32 %v1541_v3, %v4768_v7  ;;  %1783 = vmatprep.mubr.bf16.mxu1 %v1276_v59  ;;  %2296 = vadd.xlane.f32.xlu1 %v2295_v4  ;;  %v2169_v14 = vmul.f32 %v4807_v0, %v4807_v0  ;;  %v1204_v29 = vmax.f32 %v1049_v6, 0.0  ;;  %v4047_v4 = vld [vmem:[%s4507_s20 + $0x58] sm:$0xff] }
 0x241   : > { %v1052_v11 = vpop.f32.mrf.mxu0  ;;  %v1545_v12 = vpop.f32.mrf.mxu1  ;;  %1784 = vmatmul.mubr.bf16.gmra.mxu1 %v1275_v60  ;;  %v1978_v22 = vadd.f32 %v4807_v0, %v4804_v62  ;;  %v4828_v33 = vadd.f32 %v4043_v32, %v1540_v10 }
 0x242   : > { %v1205_v15 = vmax.f32 %v1051_v8, 0.0  ;;  %v1053_v16 = vadd.f32 %v1052_v11, %v4627_v31  ;;  %v4820_v18 = vadd.f32 %v4042_v17, %v1542_v9  ;;  %v1546_v19 = vadd.f32 %v1545_v12, %v4762_v1  ;;  %1976 = vadd.xlane.f32.xlu0 %v1975_v13 }
 0x243   : > { %v1056_v20 = vpop.f32.mrf.mxu0  ;;  %v1547_v21 = vpop.f32.mrf.mxu1  ;;  %v2298_v39 = vadd.f32 %v2169_v14, %v2168_v24  ;;  %v2170_v59 = vmul.f32 %v4828_v33, %v4828_v33  ;;  %v4048_v24 = vld [vmem:[%s4507_s20 + $0x60] sm:$0xff] }
 0x244   : > { %v1206_v30 = vmax.f32 %v1053_v16, 0.0  ;;  %v1548_v35 = vadd.f32 %v1547_v21, %v4768_v7  ;;  %1979 = vadd.xlane.f32.xlu1 %v1978_v22  ;;  %v1277_v40 = vpack.c.bf16 %v1205_v15, %v1203_v27  ;;  %v4833_v45 = vadd.f32 %v4044_v44, %v1546_v19 }
 0x245   : > { %v1058_v36 = vpop.f32.mrf.mxu0  ;;  %v1549_v38 = vpop.f32.mrf.mxu1  ;;  %v1981_v50 = vadd.f32 %v4820_v18, %v4828_v33  ;;  %v2171_v51 = vmul.f32 %v4820_v18, %v4820_v18  ;;  %v1057_v52 = vadd.f32 %v1056_v20, %v4632_v34 }
 0x246   : > { %v1278_v41 = vpack.c.bf16 %v1206_v30, %v1204_v29  ;;  %v1550_v42 = vadd.f32 %v1549_v38, %v4762_v1  ;;  %v4836_v47 = vadd.f32 %v4045_v46, %v1548_v35  ;;  %2299 = vadd.xlane.f32.xlu0 %v2298_v39  ;;  %v1059_v53 = vadd.f32 %v1058_v36, %v4627_v31  ;;  %v4049_v29 = vld [vmem:[%s4507_s20 + $0x68] sm:$0xff] }
 0x247   : > { %v1060_v48 = vpop.f32.mrf.mxu0  ;;  %v1551_v49 = vpop.f32.mrf.mxu1  ;;  %v2301_v10 = vadd.f32 %v2171_v51, %v2170_v59  ;;  %v2172_v11 = vmul.f32 %v4833_v45, %v4833_v45  ;;  %v1207_v12 = vmax.f32 %v1057_v52, 0.0 }
 0x248   : > { %v1061_v54 = vadd.f32 %v1060_v48, %v4632_v34  ;;  %v1552_v55 = vadd.f32 %v1551_v49, %v4768_v7  ;;  %1793 = vmatprep.mubr.bf16.mxu1 %v1278_v41  ;;  %1982 = vadd.xlane.f32.xlu1 %v1981_v50  ;;  %v1984_v58 = vadd.f32 %v4836_v47, %v4833_v45  ;;  %v1208_v13 = vmax.f32 %v1059_v53, 0.0  ;;  %v4050_v53 = vld [vmem:[%s4507_s20 + $0x78] sm:$0xff] }
 0x249   : > { %v1062_v56 = vpop.f32.mrf.mxu0  ;;  %v1555_v57 = vpop.f32.mrf.mxu1  ;;  %1794 = vmatmul.mubr.bf16.gmra.mxu1 %v1277_v40  ;;  %v2173_v60 = vmul.f32 %v4836_v47, %v4836_v47  ;;  %v4853_v63 = vadd.f32 %v4046_v61, %v1550_v42 }
 0x24a   : > { %v1209_v2 = vmax.f32 %v1061_v54, 0.0  ;;  %v1063_v3 = vadd.f32 %v1062_v56, %v4627_v31  ;;  %v4857_v5 = vadd.f32 %v4047_v4, %v1552_v55  ;;  %v1556_v6 = vadd.f32 %v1555_v57, %v4762_v1  ;;  %1985 = vadd.xlane.f32.xlu0 %v1984_v58 }
 0x24b   : > { %v1066_v8 = vpop.f32.mrf.mxu0  ;;  %v1557_v9 = vpop.f32.mrf.mxu1  ;;  %v2304_v19 = vadd.f32 %v2173_v60, %v2172_v11  ;;  %v2174_v22 = vmul.f32 %v4853_v63, %v4853_v63 }
 0x24c   : > { %v1210_v14 = vmax.f32 %v1063_v3, 0.0  ;;  %v1558_v15 = vadd.f32 %v1557_v9, %v4768_v7  ;;  %2302 = vadd.xlane.f32.xlu1 %v2301_v10  ;;  %v1279_v20 = vpack.c.bf16 %v1209_v2, %v1207_v12  ;;  %v4866_v27 = vadd.f32 %v4048_v24, %v1556_v6  ;;  %v4051_v3 = vld [vmem:[%s4507_s20 + $0x70] sm:$0xff] }
 0x24d   : > { %v1068_v16 = vpop.f32.mrf.mxu0  ;;  %v1559_v17 = vpop.f32.mrf.mxu1  ;;  %v1987_v36 = vadd.f32 %v4857_v5, %v4853_v63  ;;  %v2175_v38 = vmul.f32 %v4857_v5, %v4857_v5  ;;  %v1067_v39 = vadd.f32 %v1066_v8, %v4632_v34 }
 0x24e   : > { %v1280_v21 = vpack.c.bf16 %v1210_v14, %v1208_v13  ;;  %v4869_v30 = vadd.f32 %v4049_v29, %v1558_v15  ;;  %2305 = vadd.xlane.f32.xlu0 %v2304_v19  ;;  %v1069_v40 = vadd.f32 %v1068_v16, %v4627_v31  ;;  %v1560_v44 = vadd.f32 %v1559_v17, %v4762_v1  ;;  %v4052_v14 = vld [vmem:[%s4507_s20 + $0x80] sm:$0xff]  ;;  %v4053_v16 = vld [vmem:[%s4507_s20 + $0x88] sm:$0xff] }
 0x24f   : > { %v1070_v32 = vpop.f32.mrf.mxu0  ;;  %v1561_v35 = vpop.f32.mrf.mxu1  ;;  %v2307_v58 = vadd.f32 %v2175_v38, %v2174_v22  ;;  %v2176_v59 = vmul.f32 %v4866_v27, %v4866_v27  ;;  %v1211_v60 = vmax.f32 %v1067_v39, 0.0 }
 0x250   : > { %v1071_v41 = vadd.f32 %v1070_v32, %v4632_v34  ;;  %v1562_v42 = vadd.f32 %v1561_v35, %v4768_v7  ;;  %1803 = vmatprep.mubr.bf16.mxu1 %v1280_v21  ;;  %1988 = vadd.xlane.f32.xlu1 %v1987_v36  ;;  %v1990_v49 = vadd.f32 %v4869_v30, %v4866_v27  ;;  %v1212_v61 = vmax.f32 %v1069_v40, 0.0 }
 0x251   : > { %v1072_v46 = vpop.f32.mrf.mxu0  ;;  %v1565_v48 = vpop.f32.mrf.mxu1  ;;  %1804 = vmatmul.mubr.bf16.gmra.mxu1 %v1279_v20  ;;  %v2177_v50 = vmul.f32 %v4869_v30, %v4869_v30  ;;  %v4892_v4 = vadd.f32 %v4051_v3, %v1560_v44 }
 0x252   : > { %v1213_v51 = vmax.f32 %v1071_v41, 0.0  ;;  %v1073_v52 = vadd.f32 %v1072_v46, %v4627_v31  ;;  %v4886_v54 = vadd.f32 %v4050_v53, %v1562_v42  ;;  %v1566_v55 = vadd.f32 %v1565_v48, %v4762_v1  ;;  %1991 = vadd.xlane.f32.xlu0 %v1990_v49  ;;  %v4054_v42 = vld [vmem:[%s4507_s20 + $0x90] sm:$0xff]  ;;  %v4055_v49 = vld [vmem:[%s4507_s20 + $0x98] sm:$0xff] }
 0x253   : > { %v1076_v56 = vpop.f32.mrf.mxu0  ;;  %v1567_v57 = vpop.f32.mrf.mxu1  ;;  %v2310_v10 = vadd.f32 %v2177_v50, %v2176_v59  ;;  %v2178_v40 = vmul.f32 %v4892_v4, %v4892_v4 }
 0x254   : > { %v1214_v2 = vmax.f32 %v1073_v52, 0.0  ;;  %v1568_v6 = vadd.f32 %v1567_v57, %v4768_v7  ;;  %2308 = vadd.xlane.f32.xlu1 %v2307_v58  ;;  %v1281_v11 = vpack.c.bf16 %v1213_v51, %v1211_v60  ;;  %v4897_v15 = vadd.f32 %v4052_v14, %v1566_v55 }
 0x255   : > { %v1078_v8 = vpop.f32.mrf.mxu0  ;;  %v1569_v9 = vpop.f32.mrf.mxu1  ;;  %v1993_v21 = vadd.f32 %v4886_v54, %v4892_v4  ;;  %v2179_v22 = vmul.f32 %v4886_v54, %v4886_v54  ;;  %v1077_v24 = vadd.f32 %v1076_v56, %v4632_v34 }
 0x256   : > { %v1282_v12 = vpack.c.bf16 %v1214_v2, %v1212_v61  ;;  %v1570_v13 = vadd.f32 %v1569_v9, %v4762_v1  ;;  %v4900_v17 = vadd.f32 %v4053_v16, %v1568_v6  ;;  %2311 = vadd.xlane.f32.xlu0 %v2310_v10  ;;  %v1079_v29 = vadd.f32 %v1078_v8, %v4627_v31  ;;  %v4056_v10 = vld [vmem:[%s4507_s20 + $0xa0] sm:$0xff] }
 0x257   : > { %v1080_v19 = vpop.f32.mrf.mxu0  ;;  %v1571_v20 = vpop.f32.mrf.mxu1  ;;  %v2313_v55 = vadd.f32 %v2179_v22, %v2178_v40  ;;  %v2180_v56 = vmul.f32 %v4897_v15, %v4897_v15  ;;  %v1215_v57 = vmax.f32 %v1077_v24, 0.0 }
 0x258   : > { %v1081_v32 = vadd.f32 %v1080_v19, %v4632_v34  ;;  %v1572_v35 = vadd.f32 %v1571_v20, %v4768_v7  ;;  %1813 = vmatprep.mubr.bf16.mxu1 %v1282_v12  ;;  %1994 = vadd.xlane.f32.xlu1 %v1993_v21  ;;  %v1996_v39 = vadd.f32 %v4900_v17, %v4897_v15  ;;  %v1216_v58 = vmax.f32 %v1079_v29, 0.0  ;;  %v4057_v12 = vld [vmem:[%s4507_s20 + $0xa8] sm:$0xff] }
 0x259   : > { %v1082_v36 = vpop.f32.mrf.mxu0  ;;  %v1575_v38 = vpop.f32.mrf.mxu1  ;;  %1814 = vmatmul.mubr.bf16.gmra.mxu1 %v1281_v11  ;;  %v2181_v41 = vmul.f32 %v4900_v17, %v4900_v17  ;;  %v4917_v44 = vadd.f32 %v4054_v42, %v1570_v13  ;;  %v4058_v42 = vld [vmem:[%s4507_s20 + $0xb8] sm:$0xff] }
 0x25a   : > { %v1217_v46 = vmax.f32 %v1081_v32, 0.0  ;;  %v1083_v48 = vadd.f32 %v1082_v36, %v4627_v31  ;;  %v4921_v50 = vadd.f32 %v4055_v49, %v1572_v35  ;;  %v1576_v51 = vadd.f32 %v1575_v38, %v4762_v1  ;;  %1997 = vadd.xlane.f32.xlu0 %v1996_v39 }
 0x25b   : > { %v1086_v52 = vpop.f32.mrf.mxu0  ;;  %v1577_v53 = vpop.f32.mrf.mxu1  ;;  %v2316_v3 = vadd.f32 %v2181_v41, %v2180_v56  ;;  %v2182_v9 = vmul.f32 %v4917_v44, %v4917_v44 }
 0x25c   : > { %v1218_v59 = vmax.f32 %v1083_v48, 0.0  ;;  %v1578_v60 = vadd.f32 %v1577_v53, %v4768_v7  ;;  %2314 = vadd.xlane.f32.xlu1 %v2313_v55  ;;  %v1283_v6 = vpack.c.bf16 %v1217_v46, %v1215_v57  ;;  %v4930_v11 = vadd.f32 %v4056_v10, %v1576_v51 }
 0x25d   : > { %v1088_v61 = vpop.f32.mrf.mxu0  ;;  %v1579_v2 = vpop.f32.mrf.mxu1  ;;  %v1999_v19 = vadd.f32 %v4921_v50, %v4917_v44  ;;  %v2183_v20 = vmul.f32 %v4921_v50, %v4921_v50  ;;  %v1087_v21 = vadd.f32 %v1086_v52, %v4632_v34 }
 0x25e   : > { %v1284_v8 = vpack.c.bf16 %v1218_v59, %v1216_v58  ;;  %v4933_v13 = vadd.f32 %v4057_v12, %v1578_v60  ;;  %2317 = vadd.xlane.f32.xlu0 %v2316_v3  ;;  %v1089_v22 = vadd.f32 %v1088_v61, %v4627_v31  ;;  %v1580_v32 = vadd.f32 %v1579_v2, %v4762_v1  ;;  %v4060_v61 = vld [vmem:[%s4507_s20 + $0xc0] sm:$0xff]  ;;  %v4061_v3 = vld [vmem:[%s4507_s20 + $0xc8] sm:$0xff] }
 0x25f   : > { %v1090_v14 = vpop.f32.mrf.mxu0  ;;  %v1581_v16 = vpop.f32.mrf.mxu1  ;;  %v2319_v49 = vadd.f32 %v2183_v20, %v2182_v9  ;;  %v2184_v51 = vmul.f32 %v4930_v11, %v4930_v11  ;;  %v1219_v56 = vmax.f32 %v1087_v21, 0.0 }
 0x260   : > { %v1091_v24 = vadd.f32 %v1090_v14, %v4632_v34  ;;  %v1582_v29 = vadd.f32 %v1581_v16, %v4768_v7  ;;  %1823 = vmatprep.mubr.bf16.mxu1 %v1284_v8  ;;  %2000 = vadd.xlane.f32.xlu1 %v1999_v19  ;;  %v2002_v38 = vadd.f32 %v4933_v13, %v4930_v11  ;;  %v1220_v52 = vmax.f32 %v1089_v22, 0.0 }
 0x261   : > { %v1092_v35 = vpop.f32.mrf.mxu0  ;;  %v1585_v36 = vpop.f32.mrf.mxu1  ;;  %1824 = vmatmul.mubr.bf16.gmra.mxu1 %v1283_v6  ;;  %v2185_v39 = vmul.f32 %v4933_v13, %v4933_v13 }
 0x262   : > { %v1093_v40 = vadd.f32 %v1092_v35, %v4627_v31  ;;  %v1586_v34 = vadd.f32 %v1585_v36, %v4762_v1  ;;  %v1221_v41 = vmax.f32 %v1091_v24, 0.0  ;;  %v4951_v46 = vadd.f32 %v4058_v42, %v1582_v29  ;;  %2003 = vadd.xlane.f32.xlu0 %v2002_v38  ;;  %v4059_v31 = vld [vmem:[%s4507_s20 + $0xb0] sm:$0xff]  ;;  %v4062_v29 = vld [vmem:[%s4507_s20 + $0xd8] sm:$0xff] }
 0x263   : > { %v1587_v48 = vpop.f32.mrf.mxu1  ;;  %v4957_v57 = vadd.f32 %v4059_v31, %v1580_v32  ;;  %v2322_v59 = vadd.f32 %v2185_v39, %v2184_v51  ;;  %v4065_v51 = vld [vmem:[%s4507_s20 + $0xe8] sm:$0xff] }
 0x264   : > { %v1222_v53 = vmax.f32 %v1093_v40, 0.0  ;;  %v1588_v55 = vadd.f32 %v1587_v48, %v4768_v7  ;;  %2320 = vadd.xlane.f32.xlu1 %v2319_v49  ;;  %v4960_v2 = vadd.f32 %v4060_v61, %v1586_v34  ;;  %v1285_v8 = vpack.c.bf16 %v1221_v41, %v1219_v56  ;;  %v4063_v40 = vld [vmem:[%s4507_s20 + $0xd0] sm:$0xff]  ;;  %v4064_v48 = vld [vmem:[%s4507_s20 + $0xe0] sm:$0xff] }
 0x265   : > { %v1589_v58 = vpop.f32.mrf.mxu1  ;;  %v2005_v10 = vadd.f32 %v4951_v46, %v4957_v57  ;;  %v2187_v12 = vmul.f32 %v4951_v46, %v4951_v46  ;;  %v2186_v21 = vmul.f32 %v4957_v57, %v4957_v57 }
 0x266   : > { %v1286_v60 = vpack.c.bf16 %v1222_v53, %v1220_v52  ;;  %v4963_v6 = vadd.f32 %v4061_v3, %v1588_v55  ;;  %2323 = vadd.xlane.f32.xlu0 %v2322_v59  ;;  %v1590_v19 = vadd.f32 %v1589_v58, %v4762_v1  ;;  %v2188_v38 = vmul.f32 %v4960_v2, %v4960_v2 }
 0x267   : > { %v1591_v9 = vpop.f32.mrf.mxu1  ;;  %v2325_v36 = vadd.f32 %v2187_v12, %v2186_v21 }
 0x268   : > { %v1592_v14 = vadd.f32 %v1591_v9, %v4768_v7  ;;  %1833 = vmatprep.mubr.bf16.mxu1 %v1286_v60  ;;  %v2008_v16 = vadd.f32 %v4963_v6, %v4960_v2  ;;  %2006 = vadd.xlane.f32.xlu1 %v2005_v10  ;;  %v2189_v22 = vmul.f32 %v4963_v6, %v4963_v6  ;;  %v4066_v9 = vld [vmem:[%s4507_s20 + $0xf8] sm:$0xff] }
 0x269   : > { %v1595_v20 = vpop.f32.mrf.mxu1  ;;  %1834 = vmatmul.mubr.bf16.gmra.mxu1 %v1285_v8  ;;  %v4985_v34 = vadd.f32 %v4063_v40, %v1590_v19 }
 0x26a   : > { %v1596_v24 = vadd.f32 %v1595_v20, %v4762_v1  ;;  %v4979_v32 = vadd.f32 %v4062_v29, %v1592_v14  ;;  %2009 = vadd.xlane.f32.xlu0 %v2008_v16  ;;  %v2328_v42 = vadd.f32 %v2189_v22, %v2188_v38  ;;  %v4067_v20 = vld [vmem:[%s4507_s20 + $0xf0] sm:$0xff]  ;;  %v4068_v29 = vld [vmem:[%s4507_s20 + $0x100] sm:$0xff] }
 0x26b   : > { %v1597_v35 = vpop.f32.mrf.mxu1  ;;  %v2190_v61 = vmul.f32 %v4985_v34, %v4985_v34 }
 0x26c   : > { %v1598_v39 = vadd.f32 %v1597_v35, %v4768_v7  ;;  %2326 = vadd.xlane.f32.xlu1 %v2325_v36  ;;  %v4988_v49 = vadd.f32 %v4064_v48, %v1596_v24  ;;  %v2011_v55 = vadd.f32 %v4979_v32, %v4985_v34  ;;  %v2191_v56 = vmul.f32 %v4979_v32, %v4979_v32  ;;  %v4069_v36 = vld [vmem:[%s4507_s20 + $0x108] sm:$0xff] }
 0x26d   : > { %v1599_v41 = vpop.f32.mrf.mxu1 }
 0x26e   : > { %7131 = vst [vmem:[#allocation12_spill] sm:$0xff] %v4988_v49  ;;  %v4991_v52 = vadd.f32 %v4065_v51, %v1598_v39  ;;  %2329 = vadd.xlane.f32.xlu0 %v2328_v42  ;;  %v1600_v59 = vadd.f32 %v1599_v41, %v4762_v1  ;;  %v2331_v14 = vadd.f32 %v2191_v56, %v2190_v61 }
 0x26f   : > { %v1601_v53 = vpop.f32.mrf.mxu1  ;;  %v2192_v16 = vmul.f32 %v4988_v49, %v4988_v49 }
 0x270   : > { %7132 = vst [vmem:[#allocation13_spill] sm:$0xff] %v4991_v52  ;;  %v1602_v31 = vadd.f32 %v1601_v53, %v4768_v7  ;;  %v2014_v58 = vadd.f32 %v4991_v52, %v4988_v49  ;;  %2012 = vadd.xlane.f32.xlu1 %v2011_v55  ;;  %v2193_v3 = vmul.f32 %v4991_v52, %v4991_v52 }
 0x271   : > { %v1605_v60 = vpop.f32.mrf.mxu1  ;;  %v5013_v21 = vadd.f32 %v4067_v20, %v1600_v59 }
 0x272   : > { %v1606_v8 = vadd.f32 %v1605_v60, %v4762_v1  ;;  %v5007_v10 = vadd.f32 %v4066_v9, %v1602_v31  ;;  %2015 = vadd.xlane.f32.xlu0 %v2014_v58  ;;  %v2334_v24 = vadd.f32 %v2193_v3, %v2192_v16  ;;  %v4070_v58 = vld [vmem:[%s4507_s20 + $0x118] sm:$0xff]  ;;  %v4071_v9 = vld [vmem:[%s4507_s20 + $0x110] sm:$0xff] }
 0x273   : > { %v1607_v12 = vpop.f32.mrf.mxu1  ;;  %7134 = vst [vmem:[#allocation15_spill] sm:$0xff] %v5013_v21  ;;  %v2194_v55 = vmul.f32 %v5013_v21, %v5013_v21 }
 0x274   : > { %7133 = vst [vmem:[#allocation14_spill] sm:$0xff] %v5007_v10  ;;  %v1608_v19 = vadd.f32 %v1607_v12, %v4768_v7  ;;  %2332 = vadd.xlane.f32.xlu1 %v2331_v14  ;;  %v5016_v35 = vadd.f32 %v4068_v29, %v1606_v8  ;;  %v2017_v40 = vadd.f32 %v5007_v10, %v5013_v21 }
 0x275   : > { %v1609_v22 = vpop.f32.mrf.mxu1  ;;  %v2195_v41 = vmul.f32 %v5007_v10, %v5007_v10 }
 0x276   : > { %7135 = vst [vmem:[#allocation16_spill] sm:$0xff] %v5016_v35  ;;  %v5019_v38 = vadd.f32 %v4069_v36, %v1608_v19  ;;  %2335 = vadd.xlane.f32.xlu0 %v2334_v24  ;;  %v1610_v51 = vadd.f32 %v1609_v22, %v4762_v1  ;;  %v2196_v3 = vmul.f32 %v5016_v35, %v5016_v35  ;;  %v4072_v19 = vld [vmem:[%s4507_s20 + $0x120] sm:$0xff]  ;;  %v4073_v22 = vld [vmem:[%s4507_s20 + $0x128] sm:$0xff] }
 0x277   : > { %v1611_v39 = vpop.f32.mrf.mxu1  ;;  %v2337_v61 = vadd.f32 %v2195_v41, %v2194_v55 }
 0x278   : > { %7136 = vst [vmem:[#allocation17_spill] sm:$0xff] %v5019_v38  ;;  %v1612_v42 = vadd.f32 %v1611_v39, %v4768_v7  ;;  %v2020_v48 = vadd.f32 %v5019_v38, %v5016_v35  ;;  %2018 = vadd.xlane.f32.xlu1 %v2017_v40  ;;  %v2197_v56 = vmul.f32 %v5019_v38, %v5019_v38 }
 0x279   : > { %v1615_v53 = vpop.f32.mrf.mxu1  ;;  %v5041_v12 = vadd.f32 %v4071_v9, %v1610_v51 }
 0x27a   : > { %v1616_v31 = vadd.f32 %v1615_v53, %v4762_v1  ;;  %v5035_v59 = vadd.f32 %v4070_v58, %v1612_v42  ;;  %2021 = vadd.xlane.f32.xlu0 %v2020_v48  ;;  %v2340_v16 = vadd.f32 %v2197_v56, %v2196_v3  ;;  %v4074_v56 = vld [vmem:[%s4507_s20 + $0x138] sm:$0xff] }
 0x27b   : > { %v1617_v60 = vpop.f32.mrf.mxu1  ;;  %7138 = vst [vmem:[#allocation19_spill] sm:$0xff] %v5041_v12  ;;  %v2198_v51 = vmul.f32 %v5041_v12, %v5041_v12 }
 0x27c   : > { %7137 = vst [vmem:[#allocation18_spill] sm:$0xff] %v5035_v59  ;;  %v1618_v8 = vadd.f32 %v1617_v60, %v4768_v7  ;;  %2338 = vadd.xlane.f32.xlu1 %v2337_v61  ;;  %v5044_v20 = vadd.f32 %v4072_v19, %v1616_v31  ;;  %v2023_v36 = vadd.f32 %v5035_v59, %v5041_v12  ;;  %v4076_v19 = vld [vmem:[%s4507_s20 + $0x140] sm:$0xff] }
 0x27d   : > { %v1619_v14 = vpop.f32.mrf.mxu1  ;;  %v2199_v39 = vmul.f32 %v5035_v59, %v5035_v59 }
 0x27e   : > { %7139 = vst [vmem:[#allocation20_spill] sm:$0xff] %v5044_v20  ;;  %v5047_v24 = vadd.f32 %v4073_v22, %v1618_v8  ;;  %2341 = vadd.xlane.f32.xlu0 %v2340_v16  ;;  %v1620_v42 = vadd.f32 %v1619_v14, %v4762_v1  ;;  %v2200_v61 = vmul.f32 %v5044_v20, %v5044_v20  ;;  %v4075_v8 = vld [vmem:[%s4507_s20 + $0x130] sm:$0xff] }
 0x27f   : > { %v1621_v29 = vpop.f32.mrf.mxu1  ;;  %v2343_v60 = vadd.f32 %v2199_v39, %v2198_v51 }
 0x280   : > { %7140 = vst [vmem:[#allocation21_spill] sm:$0xff] %v5047_v24  ;;  %v1622_v40 = vadd.f32 %v1621_v29, %v4768_v7  ;;  %v2026_v41 = vadd.f32 %v5047_v24, %v5044_v20  ;;  %2024 = vadd.xlane.f32.xlu1 %v2023_v36  ;;  %v2201_v53 = vmul.f32 %v5047_v24, %v5047_v24  ;;  %v4077_v29 = vld [vmem:[%s4507_s20 + $0x148] sm:$0xff] }
 0x281   : > { %v1625_v48 = vpop.f32.mrf.mxu1  ;;  %v5069_v9 = vadd.f32 %v4075_v8, %v1620_v42 }
 0x282   : > { %v1626_v55 = vadd.f32 %v1625_v48, %v4762_v1  ;;  %v5063_v31 = vadd.f32 %v4074_v56, %v1622_v40  ;;  %2027 = vadd.xlane.f32.xlu0 %v2026_v41  ;;  %v2346_v16 = vadd.f32 %v2201_v53, %v2200_v61 }
 0x283   : > { %v1627_v58 = vpop.f32.mrf.mxu1  ;;  %7142 = vst [vmem:[#allocation23_spill] sm:$0xff] %v5069_v9 }
 0x284   : > { %7141 = vst [vmem:[#allocation22_spill] sm:$0xff] %v5063_v31  ;;  %v1628_v3 = vadd.f32 %v1627_v58, %v4768_v7  ;;  %2344 = vadd.xlane.f32.xlu1 %v2343_v60  ;;  %v5072_v22 = vadd.f32 %v4076_v19, %v1626_v55  ;;  %v2029_v40 = vadd.f32 %v5063_v31, %v5069_v9  ;;  %v4078_v60 = vld [vmem:[%s4507_s20 + $0x158] sm:$0xff]  ;;  %v4079_v19 = vld [vmem:[%s4507_s20 + $0x150] sm:$0xff] }
 0x285   : > { %v1629_v14 = vpop.f32.mrf.mxu1  ;;  %v2203_v41 = vmul.f32 %v5063_v31, %v5063_v31  ;;  %v2202_v55 = vmul.f32 %v5069_v9, %v5069_v9  ;;  %v4108_v31 = vld [vmem:[%s4507_s20 + $0x240] sm:$0xff] }
 0x286   : > { %7143 = vst [vmem:[#allocation24_spill] sm:$0xff] %v5072_v22  ;;  %v5075_v36 = vadd.f32 %v4077_v29, %v1628_v3  ;;  %2347 = vadd.xlane.f32.xlu0 %v2346_v16  ;;  %v1630_v51 = vadd.f32 %v1629_v14, %v4762_v1  ;;  %v2204_v14 = vmul.f32 %v5072_v22, %v5072_v22 }
 0x287   : > { %v1631_v39 = vpop.f32.mrf.mxu1  ;;  %v2349_v8 = vadd.f32 %v2203_v41, %v2202_v55 }
 0x288   : > { %7144 = vst [vmem:[#allocation25_spill] sm:$0xff] %v5075_v36  ;;  %v1632_v42 = vadd.f32 %v1631_v39, %v4768_v7  ;;  %v2032_v48 = vadd.f32 %v5075_v36, %v5072_v22  ;;  %2030 = vadd.xlane.f32.xlu1 %v2029_v40  ;;  %v2205_v56 = vmul.f32 %v5075_v36, %v5075_v36  ;;  %v4080_v36 = vld [vmem:[%s4507_s20 + $0x160] sm:$0xff] }
 0x289   : > { %v1635_v53 = vpop.f32.mrf.mxu1  ;;  %v5097_v29 = vadd.f32 %v4079_v19, %v1630_v51  ;;  %v4084_v22 = vld [vmem:[%s4507_s20 + $0x180] sm:$0xff] }
 0x28a   : > { %v1636_v58 = vadd.f32 %v1635_v53, %v4762_v1  ;;  %v5091_v61 = vadd.f32 %v4078_v60, %v1632_v42  ;;  %2033 = vadd.xlane.f32.xlu0 %v2032_v48  ;;  %v2352_v40 = vadd.f32 %v2205_v56, %v2204_v14  ;;  %v4081_v42 = vld [vmem:[%s4507_s20 + $0x168] sm:$0xff] }
 0x28b   : > { %v1637_v3 = vpop.f32.mrf.mxu1  ;;  %7146 = vst [vmem:[#allocation27_spill] sm:$0xff] %v5097_v29 }
 0x28c   : > { %7145 = vst [vmem:[#allocation26_spill] sm:$0xff] %v5091_v61  ;;  %v1638_v16 = vadd.f32 %v1637_v3, %v4768_v7  ;;  %2350 = vadd.xlane.f32.xlu1 %v2349_v8  ;;  %v5100_v53 = vadd.f32 %v4080_v36, %v1636_v58  ;;  %v2035_v48 = vadd.f32 %v5091_v61, %v5097_v29 }
 0x28d   : > { %v1639_v39 = vpop.f32.mrf.mxu1  ;;  %v2207_v55 = vmul.f32 %v5091_v61, %v5091_v61  ;;  %v2206_v3 = vmul.f32 %v5097_v29, %v5097_v29 }
 0x28e   : > { %7147 = vst [vmem:[#allocation28_spill] sm:$0xff] %v5100_v53  ;;  %v5103_v60 = vadd.f32 %v4081_v42, %v1638_v16  ;;  %2353 = vadd.xlane.f32.xlu0 %v2352_v40  ;;  %v1640_v36 = vadd.f32 %v1639_v39, %v4762_v1  ;;  %v4082_v16 = vld [vmem:[%s4507_s20 + $0x178] sm:$0xff]  ;;  %v2208_v39 = vmul.f32 %v5100_v53, %v5100_v53 }
 0x28f   : > { %v1641_v41 = vpop.f32.mrf.mxu1  ;;  %v2355_v42 = vadd.f32 %v2207_v55, %v2206_v3 }
 0x290   : > { %7148 = vst [vmem:[#allocation29_spill] sm:$0xff] %v5103_v60  ;;  %v1642_v51 = vadd.f32 %v1641_v41, %v4768_v7  ;;  %v2038_v56 = vadd.f32 %v5103_v60, %v5100_v53  ;;  %2036 = vadd.xlane.f32.xlu1 %v2035_v48  ;;  %v2209_v8 = vmul.f32 %v5103_v60, %v5103_v60  ;;  %v4083_v48 = vld [vmem:[%s4507_s20 + $0x170] sm:$0xff]  ;;  %v4088_v53 = vld [vmem:[%s4507_s20 + $0x1a0] sm:$0xff] }
 0x291   : > { %v1645_v58 = vpop.f32.mrf.mxu1  ;;  %v5125_v61 = vadd.f32 %v4083_v48, %v1640_v36 }
 0x292   : > { %v1646_v14 = vadd.f32 %v1645_v58, %v4762_v1  ;;  %v5119_v19 = vadd.f32 %v4082_v16, %v1642_v51  ;;  %2039 = vadd.xlane.f32.xlu0 %v2038_v56  ;;  %v2358_v60 = vadd.f32 %v2209_v8, %v2208_v39  ;;  %v4085_v51 = vld [vmem:[%s4507_s20 + $0x188] sm:$0xff]  ;;  %v4086_v39 = vld [vmem:[%s4507_s20 + $0x198] sm:$0xff] }
 0x293   : > { %v1647_v40 = vpop.f32.mrf.mxu1  ;;  %7150 = vst [vmem:[#allocation31_spill] sm:$0xff] %v5125_v61 }
 0x294   : > { %7149 = vst [vmem:[#allocation30_spill] sm:$0xff] %v5119_v19  ;;  %v1648_v41 = vadd.f32 %v1647_v40, %v4768_v7  ;;  %2356 = vadd.xlane.f32.xlu1 %v2355_v42  ;;  %v5128_v58 = vadd.f32 %v4084_v22, %v1646_v14  ;;  %v2041_v56 = vadd.f32 %v5119_v19, %v5125_v61 }
 0x295   : > { %v1649_v29 = vpop.f32.mrf.mxu1  ;;  %v2211_v3 = vmul.f32 %v5119_v19, %v5119_v19 }
 0x296   : > { %7151 = vst [vmem:[#allocation32_spill] sm:$0xff] %v5128_v58  ;;  %v5131_v16 = vadd.f32 %v4085_v51, %v1648_v41  ;;  %2359 = vadd.xlane.f32.xlu0 %v2358_v60  ;;  %v1650_v22 = vadd.f32 %v1649_v29, %v4762_v1  ;;  %v2210_v60 = vmul.f32 %v5125_v61, %v5125_v61 }
 0x297   : > { %v1651_v55 = vpop.f32.mrf.mxu1  ;;  %v2212_v29 = vmul.f32 %v5128_v58, %v5128_v58 }
 0x298   : > { %7152 = vst [vmem:[#allocation33_spill] sm:$0xff] %v5131_v16  ;;  %v1652_v36 = vadd.f32 %v1651_v55, %v4768_v7  ;;  %v2044_v8 = vadd.f32 %v5131_v16, %v5128_v58  ;;  %2042 = vadd.xlane.f32.xlu1 %v2041_v56  ;;  %v2213_v40 = vmul.f32 %v5131_v16, %v5131_v16  ;;  %v4087_v56 = vld [vmem:[%s4507_s20 + $0x190] sm:$0xff]  ;;  %v4092_v58 = vld [vmem:[%s4507_s20 + $0x1c0] sm:$0xff] }
 0x299   : > { %v1655_v14 = vpop.f32.mrf.mxu1  ;;  %v2361_v51 = vadd.f32 %v2211_v3, %v2210_v60  ;;  %v5153_v19 = vadd.f32 %v4087_v56, %v1650_v22 }
 0x29a   : > { %v1656_v42 = vadd.f32 %v1655_v14, %v4762_v1  ;;  %v5147_v41 = vadd.f32 %v4086_v39, %v1652_v36  ;;  %2045 = vadd.xlane.f32.xlu0 %v2044_v8  ;;  %v2364_v16 = vadd.f32 %v2213_v40, %v2212_v29  ;;  %v4089_v36 = vld [vmem:[%s4507_s20 + $0x1a8] sm:$0xff]  ;;  %v4090_v29 = vld [vmem:[%s4507_s20 + $0x1b8] sm:$0xff] }
 0x29b   : > { %v1657_v48 = vpop.f32.mrf.mxu1  ;;  %7154 = vst [vmem:[#allocation35_spill] sm:$0xff] %v5153_v19 }
 0x29c   : > { %7153 = vst [vmem:[#allocation34_spill] sm:$0xff] %v5147_v41  ;;  %v1658_v55 = vadd.f32 %v1657_v48, %v4768_v7  ;;  %2362 = vadd.xlane.f32.xlu1 %v2361_v51  ;;  %v5156_v14 = vadd.f32 %v4088_v53, %v1656_v42  ;;  %v2047_v8 = vadd.f32 %v5147_v41, %v5153_v19 }
 0x29d   : > { %v1659_v61 = vpop.f32.mrf.mxu1  ;;  %v2215_v60 = vmul.f32 %v5147_v41, %v5147_v41 }
 0x29e   : > { %7155 = vst [vmem:[#allocation36_spill] sm:$0xff] %v5156_v14  ;;  %v5159_v39 = vadd.f32 %v4089_v36, %v1658_v55  ;;  %2365 = vadd.xlane.f32.xlu0 %v2364_v16  ;;  %v1660_v53 = vadd.f32 %v1659_v61, %v4762_v1  ;;  %v2214_v16 = vmul.f32 %v5153_v19, %v5153_v19 }
 0x29f   : > { %v1661_v3 = vpop.f32.mrf.mxu1  ;;  %v2216_v61 = vmul.f32 %v5156_v14, %v5156_v14 }
 0x2a0   : > { %7156 = vst [vmem:[#allocation37_spill] sm:$0xff] %v5159_v39  ;;  %v1662_v22 = vadd.f32 %v1661_v3, %v4768_v7  ;;  %v2050_v40 = vadd.f32 %v5159_v39, %v5156_v14  ;;  %2048 = vadd.xlane.f32.xlu1 %v2047_v8  ;;  %v2217_v48 = vmul.f32 %v5159_v39, %v5159_v39  ;;  %v4091_v8 = vld [vmem:[%s4507_s20 + $0x1b0] sm:$0xff]  ;;  %v4096_v14 = vld [vmem:[%s4507_s20 + $0x1e0] sm:$0xff] }
 0x2a1   : > { %v1665_v42 = vpop.f32.mrf.mxu1  ;;  %v2367_v36 = vadd.f32 %v2215_v60, %v2214_v16  ;;  %v5181_v41 = vadd.f32 %v4091_v8, %v1660_v53 }
 0x2a2   : > { %v1666_v51 = vadd.f32 %v1665_v42, %v4762_v1  ;;  %v5175_v55 = vadd.f32 %v4090_v29, %v1662_v22  ;;  %2051 = vadd.xlane.f32.xlu0 %v2050_v40  ;;  %v2370_v39 = vadd.f32 %v2217_v48, %v2216_v61  ;;  %v4093_v22 = vld [vmem:[%s4507_s20 + $0x1c8] sm:$0xff]  ;;  %v4094_v61 = vld [vmem:[%s4507_s20 + $0x1d8] sm:$0xff] }
 0x2a3   : > { %v1667_v56 = vpop.f32.mrf.mxu1  ;;  %7158 = vst [vmem:[#allocation39_spill] sm:$0xff] %v5181_v41 }
 0x2a4   : > { %7157 = vst [vmem:[#allocation38_spill] sm:$0xff] %v5175_v55  ;;  %v1668_v3 = vadd.f32 %v1667_v56, %v4768_v7  ;;  %2368 = vadd.xlane.f32.xlu1 %v2367_v36  ;;  %v5184_v42 = vadd.f32 %v4092_v58, %v1666_v51  ;;  %v2053_v40 = vadd.f32 %v5175_v55, %v5181_v41 }
 0x2a5   : > { %v1669_v19 = vpop.f32.mrf.mxu1  ;;  %v2219_v16 = vmul.f32 %v5175_v55, %v5175_v55 }
 0x2a6   : > { %7159 = vst [vmem:[#allocation40_spill] sm:$0xff] %v5184_v42  ;;  %v5187_v29 = vadd.f32 %v4093_v22, %v1668_v3  ;;  %2371 = vadd.xlane.f32.xlu0 %v2370_v39  ;;  %v1670_v58 = vadd.f32 %v1669_v19, %v4762_v1  ;;  %v2218_v39 = vmul.f32 %v5181_v41, %v5181_v41 }
 0x2a7   : > { %v1671_v60 = vpop.f32.mrf.mxu1  ;;  %v2220_v19 = vmul.f32 %v5184_v42, %v5184_v42 }
 0x2a8   : > { %7160 = vst [vmem:[#allocation41_spill] sm:$0xff] %v5187_v29  ;;  %v1672_v53 = vadd.f32 %v1671_v60, %v4768_v7  ;;  %v2056_v48 = vadd.f32 %v5187_v29, %v5184_v42  ;;  %2054 = vadd.xlane.f32.xlu1 %v2053_v40  ;;  %v2221_v56 = vmul.f32 %v5187_v29, %v5187_v29  ;;  %v4095_v40 = vld [vmem:[%s4507_s20 + $0x1d0] sm:$0xff]  ;;  %v4100_v42 = vld [vmem:[%s4507_s20 + $0x200] sm:$0xff] }
 0x2a9   : > { %v1675_v51 = vpop.f32.mrf.mxu1  ;;  %v2373_v22 = vadd.f32 %v2219_v16, %v2218_v39  ;;  %v5209_v55 = vadd.f32 %v4095_v40, %v1670_v58 }
 0x2aa   : > { %v1676_v36 = vadd.f32 %v1675_v51, %v4762_v1  ;;  %v5203_v3 = vadd.f32 %v4094_v61, %v1672_v53  ;;  %2057 = vadd.xlane.f32.xlu0 %v2056_v48  ;;  %v2376_v29 = vadd.f32 %v2221_v56, %v2220_v19  ;;  %v4097_v53 = vld [vmem:[%s4507_s20 + $0x1e8] sm:$0xff]  ;;  %v4098_v19 = vld [vmem:[%s4507_s20 + $0x1f8] sm:$0xff] }
 0x2ab   : > { %v1677_v8 = vpop.f32.mrf.mxu1  ;;  %7162 = vst [vmem:[#allocation43_spill] sm:$0xff] %v5209_v55 }
 0x2ac   : > { %7161 = vst [vmem:[#allocation42_spill] sm:$0xff] %v5203_v3  ;;  %v1678_v60 = vadd.f32 %v1677_v8, %v4768_v7  ;;  %2374 = vadd.xlane.f32.xlu1 %v2373_v22  ;;  %v5212_v51 = vadd.f32 %v4096_v14, %v1676_v36  ;;  %v2059_v48 = vadd.f32 %v5203_v3, %v5209_v55 }
 0x2ad   : > { %v1679_v41 = vpop.f32.mrf.mxu1  ;;  %v2223_v39 = vmul.f32 %v5203_v3, %v5203_v3 }
 0x2ae   : > { %7163 = vst [vmem:[#allocation44_spill] sm:$0xff] %v5212_v51  ;;  %v5215_v61 = vadd.f32 %v4097_v53, %v1678_v60  ;;  %2377 = vadd.xlane.f32.xlu0 %v2376_v29  ;;  %v1680_v14 = vadd.f32 %v1679_v41, %v4762_v1  ;;  %v2222_v29 = vmul.f32 %v5209_v55, %v5209_v55 }
 0x2af   : > { %v1681_v16 = vpop.f32.mrf.mxu1  ;;  %v2224_v41 = vmul.f32 %v5212_v51, %v5212_v51 }
 0x2b0   : > { %7164 = vst [vmem:[#allocation45_spill] sm:$0xff] %v5215_v61  ;;  %v1682_v58 = vadd.f32 %v1681_v16, %v4768_v7  ;;  %v2062_v56 = vadd.f32 %v5215_v61, %v5212_v51  ;;  %2060 = vadd.xlane.f32.xlu1 %v2059_v48  ;;  %v2225_v8 = vmul.f32 %v5215_v61, %v5215_v61  ;;  %v4099_v48 = vld [vmem:[%s4507_s20 + $0x1f0] sm:$0xff]  ;;  %v4104_v51 = vld [vmem:[%s4507_s20 + $0x220] sm:$0xff] }
 0x2b1   : > { %v1685_v36 = vpop.f32.mrf.mxu1  ;;  %v2379_v53 = vadd.f32 %v2223_v39, %v2222_v29  ;;  %v5237_v3 = vadd.f32 %v4099_v48, %v1680_v14 }
 0x2b2   : > { %v1686_v22 = vadd.f32 %v1685_v36, %v4762_v1  ;;  %v5231_v60 = vadd.f32 %v4098_v19, %v1682_v58  ;;  %2063 = vadd.xlane.f32.xlu0 %v2062_v56  ;;  %v2382_v61 = vadd.f32 %v2225_v8, %v2224_v41  ;;  %v4101_v58 = vld [vmem:[%s4507_s20 + $0x208] sm:$0xff]  ;;  %v4102_v41 = vld [vmem:[%s4507_s20 + $0x218] sm:$0xff] }
 0x2b3   : > { %v1687_v40 = vpop.f32.mrf.mxu1  ;;  %7166 = vst [vmem:[#allocation47_spill] sm:$0xff] %v5237_v3 }
 0x2b4   : > { %7165 = vst [vmem:[#allocation46_spill] sm:$0xff] %v5231_v60  ;;  %v1688_v16 = vadd.f32 %v1687_v40, %v4768_v7  ;;  %2380 = vadd.xlane.f32.xlu1 %v2379_v53  ;;  %v5240_v36 = vadd.f32 %v4100_v42, %v1686_v22  ;;  %v2065_v56 = vadd.f32 %v5231_v60, %v5237_v3 }
 0x2b5   : > { %v1689_v55 = vpop.f32.mrf.mxu1  ;;  %v2227_v29 = vmul.f32 %v5231_v60, %v5231_v60 }
 0x2b6   : > { %7167 = vst [vmem:[#allocation48_spill] sm:$0xff] %v5240_v36  ;;  %v5243_v19 = vadd.f32 %v4101_v58, %v1688_v16  ;;  %2383 = vadd.xlane.f32.xlu0 %v2382_v61  ;;  %v1690_v42 = vadd.f32 %v1689_v55, %v4762_v1  ;;  %v2226_v61 = vmul.f32 %v5237_v3, %v5237_v3 }
 0x2b7   : > { %v1691_v39 = vpop.f32.mrf.mxu1  ;;  %v2228_v55 = vmul.f32 %v5240_v36, %v5240_v36 }
 0x2b8   : > { %7168 = vst [vmem:[#allocation49_spill] sm:$0xff] %v5243_v19  ;;  %v1692_v14 = vadd.f32 %v1691_v39, %v4768_v7  ;;  %v2068_v8 = vadd.f32 %v5243_v19, %v5240_v36  ;;  %2066 = vadd.xlane.f32.xlu1 %v2065_v56  ;;  %v2229_v40 = vmul.f32 %v5243_v19, %v5243_v19  ;;  %v4103_v56 = vld [vmem:[%s4507_s20 + $0x210] sm:$0xff] }
 0x2b9   : > { %v1695_v22 = vpop.f32.mrf.mxu1  ;;  %v2385_v58 = vadd.f32 %v2227_v29, %v2226_v61  ;;  %v5265_v60 = vadd.f32 %v4103_v56, %v1690_v42 }
 0x2ba   : > { %v1696_v53 = vadd.f32 %v1695_v22, %v4762_v1  ;;  %v5259_v16 = vadd.f32 %v4102_v41, %v1692_v14  ;;  %2069 = vadd.xlane.f32.xlu0 %v2068_v8  ;;  %v2388_v19 = vadd.f32 %v2229_v40, %v2228_v55  ;;  %v4105_v14 = vld [vmem:[%s4507_s20 + $0x228] sm:$0xff]  ;;  %v4106_v55 = vld [vmem:[%s4507_s20 + $0x238] sm:$0xff] }
 0x2bb   : > { %v1697_v48 = vpop.f32.mrf.mxu1  ;;  %7170 = vst [vmem:[#allocation51_spill] sm:$0xff] %v5265_v60 }
 0x2bc   : > { %7169 = vst [vmem:[#allocation50_spill] sm:$0xff] %v5259_v16  ;;  %v1698_v39 = vadd.f32 %v1697_v48, %v4768_v7  ;;  %2386 = vadd.xlane.f32.xlu1 %v2385_v58  ;;  %v5268_v22 = vadd.f32 %v4104_v51, %v1696_v53  ;;  %v2071_v8 = vadd.f32 %v5259_v16, %v5265_v60 }
 0x2bd   : > { %v1699_v3 = vpop.f32.mrf.mxu1  ;;  %v2231_v61 = vmul.f32 %v5259_v16, %v5259_v16  ;;  %v4107_v16 = vld [vmem:[%s4507_s20 + $0x230] sm:$0xff] }
 0x2be   : > { %7171 = vst [vmem:[#allocation52_spill] sm:$0xff] %v5268_v22  ;;  %v5271_v41 = vadd.f32 %v4105_v14, %v1698_v39  ;;  %2389 = vadd.xlane.f32.xlu0 %v2388_v19  ;;  %v1700_v51 = vadd.f32 %v1699_v3, %v4762_v1  ;;  %v2230_v19 = vmul.f32 %v5265_v60, %v5265_v60 }
 0x2bf   : > { %v1701_v29 = vpop.f32.mrf.mxu1  ;;  %v2232_v3 = vmul.f32 %v5268_v22, %v5268_v22 }
 0x2c0   : > { %7172 = vst [vmem:[#allocation53_spill] sm:$0xff] %v5271_v41  ;;  %v1702_v42 = vadd.f32 %v1701_v29, %v4768_v7  ;;  %v2074_v40 = vadd.f32 %v5271_v41, %v5268_v22  ;;  %2072 = vadd.xlane.f32.xlu1 %v2071_v8  ;;  %v2233_v48 = vmul.f32 %v5271_v41, %v5271_v41 }
 0x2c1   : > { %v1705_v53 = vpop.f32.mrf.mxu1  ;;  %v2391_v14 = vadd.f32 %v2231_v61, %v2230_v19  ;;  %v5293_v60 = vadd.f32 %v4107_v16, %v1700_v51 }
 0x2c2   : > { %v1706_v58 = vadd.f32 %v1705_v53, %v4762_v1  ;;  %v5287_v39 = vadd.f32 %v4106_v55, %v1702_v42  ;;  %2075 = vadd.xlane.f32.xlu0 %v2074_v40  ;;  %v2394_v36 = vadd.f32 %v2233_v48, %v2232_v3  ;;  %v4109_v40 = vld [vmem:[%s4507_s20 + $0x248] sm:$0xff] }
 0x2c3   : > { %v1707_v56 = vpop.f32.mrf.mxu1  ;;  %v1974_v8 = vpop.xlane.xlu0 %1973  ;;  %7174 = vst [vmem:[#allocation55_spill] sm:$0xff] %v5293_v60  ;;  %v2234_v3 = vmul.f32 %v5293_v60, %v5293_v60 }
 0x2c4   : > { %7173 = vst [vmem:[#allocation54_spill] sm:$0xff] %v5287_v39  ;;  %v1708_v29 = vadd.f32 %v1707_v56, %v4768_v7  ;;  %v5295_v41 = vmul.f32 0.00390625, %v1974_v8  ;;  %2392 = vadd.xlane.f32.xlu1 %v2391_v14  ;;  %v5298_v42 = vadd.f32 %v4108_v31, %v1706_v58  ;;  %v2077_v55 = vadd.f32 %v5287_v39, %v5293_v60  ;;  %v4110_v8 = vld [vmem:[%s4507_s20 + $0x258] sm:$0xff] }
 0x2c5   : > { %v1709_v53 = vpop.f32.mrf.mxu1  ;;  %v2235_v16 = vmul.f32 %v5287_v39, %v5287_v39  ;;  %v3264_v39 = vld [vmem:[%s7019_s6] sm:$0x3] }
 0x2c6   : > { %7175 = vst [vmem:[#allocation56_spill] sm:$0xff] %v5298_v42  ;;  %v5301_v61 = vadd.f32 %v4109_v40, %v1708_v29  ;;  %2395 = vadd.xlane.f32.xlu0 %v2394_v36  ;;  %v1710_v51 = vadd.f32 %v1709_v53, %v4762_v1  ;;  %v2612_v58 = vmul.f32 %v5295_v41, %v5295_v41 }
 0x2c7   : > { %v1711_v19 = vpop.f32.mrf.mxu1  ;;  %v2294_v48 = vpop.xlane.xlu0 %2293  ;;  %v2397_v22 = vadd.f32 %v2235_v16, %v2234_v3  ;;  %v2236_v60 = vmul.f32 %v5298_v42, %v5298_v42 }
 0x2c8   : > { %7176 = vst [vmem:[#allocation57_spill] sm:$0xff] %v5301_v61  ;;  %v1712_v56 = vadd.f32 %v1711_v19, %v4768_v7  ;;  %v2080_v31 = vadd.f32 %v5301_v61, %v5298_v42  ;;  %v2548_v36 = vmul.f32 0.00390625, %v2294_v48  ;;  %2078 = vadd.xlane.f32.xlu1 %v2077_v55  ;;  %v2237_v29 = vmul.f32 %v5301_v61, %v5301_v61  ;;  %v4111_v61 = vld [vmem:[%s4507_s20 + $0x250] sm:$0xff] }
 0x2c9   : > { %v1715_v14 = vpop.f32.mrf.mxu1  ;;  %v2297_v19 = vpop.xlane.xlu1 %2296  ;;  %v5327_v9 = vadd.f32 %v4111_v61, %v1710_v51 }
 0x2ca   : > { %v5318_v53 = vadd.f32 %v4110_v8, %v1712_v56  ;;  %v1716_v40 = vadd.f32 %v1715_v14, %v4762_v1  ;;  %v2676_v48 = vsub.f32 %v2548_v36, %v2612_v58  ;;  %2081 = vadd.xlane.f32.xlu0 %v2080_v31  ;;  %v2400_v59 = vadd.f32 %v2237_v29, %v2236_v60  ;;  %v4112_v58 = vld [vmem:[%s4507_s20 + $0x260] sm:$0xff]  ;;  %v4113_v36 = vld [vmem:[%s4507_s20 + $0x268] sm:$0xff] }
 0x2cb   : > { %v1717_v55 = vpop.f32.mrf.mxu1  ;;  %7178 = vst [vmem:[#allocation59_spill] sm:$0xff] %v5327_v9  ;;  %v1977_v14 = vpop.xlane.xlu0 %1976  ;;  %v5333_v31 = vrot.slane %v3264_v39, %v4619_v26 }
 0x2cc   : > { %7177 = vst [vmem:[#allocation58_spill] sm:$0xff] %v5318_v53  ;;  %v1718_v56 = vadd.f32 %v1717_v55, %v4768_v7  ;;  %v2868_v8 = vadd.f32 1e-05, %v2676_v48  ;;  %v5330_v24 = vmul.f32 0.00390625, %v1977_v14  ;;  %2398 = vadd.xlane.f32.xlu1 %v2397_v22  ;;  %v5336_v16 = vadd.f32 %v4112_v58, %v1716_v40  ;;  %v3124_v48 = vld [vmem:[%s7018_s5] sm:$0x3] }
 0x2cd   : > { %v1719_v20 = vpop.f32.mrf.mxu1  ;;  %v1980_v61 = vpop.xlane.xlu1 %1979  ;;  %v2239_v51 = vmul.f32 %v5318_v53, %v5318_v53  ;;  %v2549_v22 = vmul.f32 0.00390625, %v2297_v19  ;;  %v2083_v40 = vadd.f32 %v5318_v53, %v5327_v9  ;;  %v2238_v19 = vmul.f32 %v5327_v9, %v5327_v9 }
 0x2ce   : > { %7179 = vst [vmem:[#allocation60_spill] sm:$0xff] %v5336_v16  ;;  %v5339_v3 = vadd.f32 %v4113_v36, %v1718_v56  ;;  %3908 = vrsqrt.f32 %v2868_v8  ;;  %v2613_v60 = vmul.f32 %v5330_v24, %v5330_v24  ;;  %2401 = vadd.xlane.f32.xlu0 %v2400_v59  ;;  %v5350_v55 = vmul.f32 0.00390625, %v1980_v61 }
 0x2cf   : > { %v1721_v29 = vpop.f32.mrf.mxu1  ;;  %v2300_v14 = vpop.xlane.xlu0 %2299  ;;  %v1720_v36 = vadd.f32 %v1719_v20, %v4762_v1  ;;  %v5361_v53 = vrot.slane %v3124_v48, %v4621_v28  ;;  %v4114_v20 = vld [vmem:[%s4507_s20 + $0x278] sm:$0xff]  ;;  %v2240_v9 = vmul.f32 %v5336_v16, %v5336_v16 }
 0x2d0   : > { %7180 = vst [vmem:[#allocation61_spill] sm:$0xff] %v5339_v3  ;;  %v1722_v56 = vadd.f32 %v1721_v29, %v4768_v7  ;;  %v2086_v58 = vadd.f32 %v5339_v3, %v5336_v16  ;;  %v2677_v8 = vsub.f32 %v2549_v22, %v2613_v60  ;;  %v2550_v59 = vmul.f32 0.00390625, %v2300_v14  ;;  %2084 = vadd.xlane.f32.xlu1 %v2083_v40 }
 0x2d1   : > { %v1725_v42 = vpop.f32.mrf.mxu1  ;;  %v2241_v61 = vmul.f32 %v5339_v3, %v5339_v3  ;;  %v5364_v29 = vrot.slane %v3124_v48, %v4619_v26  ;;  %v2614_v12 = vmul.f32 %v5350_v55, %v5350_v55  ;;  %v1983_v38 = vpop.xlane.xlu1 %1982  ;;  %v2403_v22 = vadd.f32 %v2239_v51, %v2238_v19 }
 0x2d2   : > { %v2869_v60 = vadd.f32 1e-05, %v2677_v8  ;;  %v5369_v14 = vadd.f32 %v4114_v20, %v1722_v56  ;;  %v5371_v40 = vmul.f32 0.00390625, %v1983_v38  ;;  %2087 = vadd.xlane.f32.xlu0 %v2086_v58  ;;  %v5376_v26 = vrot.slane %v3264_v39, %v4621_v28  ;;  %v4115_v38 = vld [vmem:[%s4507_s20 + $0x270] sm:$0xff]  ;;  %v4116_v39 = vld [vmem:[%s4507_s20 + $0x288] sm:$0xff] }
 0x2d3   : > { %v1727_v3 = vpop.f32.mrf.mxu1  ;;  %v2678_v48 = vsub.f32 %v2550_v59, %v2614_v12  ;;  %v1726_v35 = vadd.f32 %v1725_v42, %v4762_v1  ;;  %v1986_v19 = vpop.xlane.xlu0 %1985  ;;  %v2740_v56 = vsub.f32 %v4775_v23, %v5295_v41  ;;  %v5383_v58 = vadd.f32 %v4115_v38, %v1720_v36 }
 0x2d4   : > { %7181 = vst [vmem:[#allocation62_spill] sm:$0xff] %v5369_v14  ;;  %v1728_v51 = vadd.f32 %v1727_v3, %v4768_v7  ;;  %3910 = vrsqrt.f32 %v2869_v60  ;;  %2404 = vadd.xlane.f32.xlu1 %v2403_v22  ;;  %v2406_v20 = vadd.f32 %v2241_v61, %v2240_v9  ;;  %v2741_v28 = vsub.f32 %v4778_v25, %v5295_v41  ;;  %v4117_v22 = vld [vmem:[%s4507_s20 + $0x280] sm:$0xff] }
 0x2d5   : > { %7182 = vst [vmem:[#allocation63_spill] sm:$0xff] %v5383_v58  ;;  %v1729_v8 = vpop.f32.mrf.mxu1  ;;  %v2870_v12 = vadd.f32 1e-05, %v2678_v48  ;;  %v5390_v3 = vmul.f32 0.00390625, %v1986_v19  ;;  %v2303_v59 = vpop.xlane.xlu1 %2302  ;;  %v2615_v23 = vmul.f32 %v5371_v40, %v5371_v40  ;;  %v2089_v9 = vadd.f32 %v5369_v14, %v5383_v58 }
 0x2d6   : > { %v5388_v42 = vadd.f32 %v4116_v39, %v1728_v51  ;;  %v2551_v60 = vmul.f32 0.00390625, %v2303_v59  ;;  %2407 = vadd.xlane.f32.xlu0 %v2406_v20  ;;  %v2243_v61 = vmul.f32 %v5369_v14, %v5369_v14  ;;  %v5403_v48 = vadd.f32 %v4117_v22, %v1726_v35 }
 0x2d7   : > { %v1731_v36 = vpop.f32.mrf.mxu1  ;;  %3912 = vrsqrt.f32 %v2870_v12  ;;  %v2306_v51 = vpop.xlane.xlu0 %2305  ;;  %v2616_v38 = vmul.f32 %v5390_v3, %v5390_v3  ;;  %v2242_v59 = vmul.f32 %v5383_v58, %v5383_v58 }
 0x2d8   : > { %7183 = vst [vmem:[#allocation64_spill] sm:$0xff] %v5388_v42  ;;  %7184 = vst [vmem:[#allocation65_spill] sm:$0xff] %v5403_v48  ;;  %v2679_v19 = vsub.f32 %v2551_v60, %v2615_v23  ;;  %v2552_v20 = vmul.f32 0.00390625, %v2306_v51  ;;  %2090 = vadd.xlane.f32.xlu1 %v2089_v9  ;;  %v1732_v41 = vadd.f32 %v1731_v36, %v4768_v7 }
 0x2d9   : > { %v1735_v39 = vpop.f32.mrf.mxu1  ;;  %v1989_v12 = vpop.xlane.xlu1 %1988  ;;  %v2092_v35 = vadd.f32 %v5388_v42, %v5403_v48  ;;  %v2245_v23 = vmul.f32 %v5388_v42, %v5388_v42  ;;  %v1730_v60 = vadd.f32 %v1729_v8, %v4762_v1  ;;  %v2409_v14 = vadd.f32 %v2243_v61, %v2242_v59 }
 0x2da   : > { %v2871_v22 = vadd.f32 1e-05, %v2679_v19  ;;  %v2680_v9 = vsub.f32 %v2552_v20, %v2616_v38  ;;  %v1736_v16 = vadd.f32 %v1735_v39, %v4762_v1  ;;  %v5418_v25 = vmul.f32 0.00390625, %v1989_v12  ;;  %v4118_v38 = vld [vmem:[%s4507_s20 + $0x298] sm:$0xff] }
 0x2db   : > { %v1737_v51 = vpop.f32.mrf.mxu1  ;;  %v3909_v58 = vpop.eup %3908  ;;  %2093 = vadd.xlane.f32.xlu0 %v2092_v35  ;;  %v2244_v21 = vmul.f32 %v5403_v48, %v5403_v48  ;;  %v2745_v19 = vsub.f32 %v4807_v0, %v5350_v55  ;;  %v5426_v20 = vadd.f32 %v4118_v38, %v1732_v41  ;;  %v4120_v0 = vld [vmem:[%s4507_s20 + $0x2a8] sm:$0xff] }
 0x2dc   : > { %v1738_v36 = vadd.f32 %v1737_v51, %v4768_v7  ;;  %v1992_v10 = vpop.xlane.xlu0 %1991  ;;  %v2996_v42 = vmul.f32 %v3909_v58, %v2740_v56  ;;  %v2997_v52 = vmul.f32 %v3909_v58, %v2741_v28  ;;  %3914 = vrsqrt.f32 %v2871_v22  ;;  %2410 = vadd.xlane.f32.xlu1 %v2409_v14  ;;  %v4119_v28 = vld [vmem:[%s4507_s20 + $0x290] sm:$0xff]  ;;  %v4121_v51 = vld [vmem:[%s4507_s20 + $0x2a0] sm:$0xff] }
 0x2dd   : > { %v2872_v8 = vadd.f32 1e-05, %v2680_v9  ;;  %v1739_v61 = vpop.f32.mrf.mxu1  ;;  %7185 = vst [vmem:[#allocation66_spill] sm:$0xff] %v5426_v20  ;;  %v5428_v39 = vmul.f32 0.00390625, %v1992_v10  ;;  %v2309_v59 = vpop.xlane.xlu1 %2308  ;;  %v2412_v12 = vadd.f32 %v2245_v23, %v2244_v21  ;;  %v5435_v22 = vadd.f32 %v4119_v28, %v1730_v60 }
 0x2de   : > { %v3136_v35 = vmul.f32 %v5361_v53, %v2996_v42  ;;  %v3137_v56 = vmul.f32 %v5364_v29, %v2997_v52  ;;  %v5438_v41 = vadd.f32 %v4120_v0, %v1738_v36  ;;  %v2617_v10 = vmul.f32 %v5418_v25, %v5418_v25 }
 0x2df   : > { %3916 = vrsqrt.f32 %v2872_v8  ;;  %v1741_v14 = vpop.f32.mrf.mxu1  ;;  %7186 = vst [vmem:[#allocation67_spill] sm:$0xff] %v5435_v22  ;;  %v2553_v21 = vmul.f32 0.00390625, %v2309_v59  ;;  %2413 = vadd.xlane.f32.xlu0 %v2412_v12  ;;  %v5447_v60 = vadd.f32 %v4121_v51, %v1736_v16  ;;  %v2618_v28 = vmul.f32 %v5428_v39, %v5428_v39 }
 0x2e0   : > { %v2312_v42 = vpop.xlane.xlu0 %2311  ;;  %v3276_v52 = vadd.f32 %v5376_v26, %v3136_v35  ;;  %v3277_v23 = vadd.f32 %v5333_v31, %v3137_v56  ;;  %v2095_v59 = vadd.f32 %v5426_v20, %v5435_v22  ;;  %v7187_v16 = vsub.f32 %v4785_v37, %v5330_v24 }
 0x2e1   : > { %v1745_v8 = vpop.f32.mrf.mxu1  ;;  %v3911_v36 = vpop.eup %3910  ;;  %v2681_v38 = vsub.f32 %v2553_v21, %v2617_v10  ;;  %v2554_v0 = vmul.f32 0.00390625, %v2312_v42  ;;  %v7188_v56 = vsub.f32 %v4792_v43, %v5330_v24  ;;  %v1740_v42 = vadd.f32 %v1739_v61, %v4762_v1 }
 0x2e2   : > { %v1995_v12 = vpop.xlane.xlu1 %1994  ;;  %3404 = vst [vmem:[%s5455_s9] sm:$0xff] %v3276_v52  ;;  %3405 = vst [vmem:[%s5455_s9 + $0x8] sm:$0xff] %v3277_v23  ;;  %v2998_v35 = vmul.f32 %v3911_v36, %v7187_v16  ;;  %v1742_v58 = vadd.f32 %v1741_v14, %v4768_v7  ;;  %2096 = vadd.xlane.f32.xlu1 %v2095_v59  ;;  %v2098_v52 = vadd.f32 %v5438_v41, %v5447_v60 }
 0x2e3   : > { %v2999_v10 = vmul.f32 %v3911_v36, %v7188_v56  ;;  %v1747_v51 = vpop.f32.mrf.mxu1  ;;  %v2873_v9 = vadd.f32 1e-05, %v2681_v38  ;;  %v2682_v48 = vsub.f32 %v2554_v0, %v2618_v28  ;;  %v1746_v24 = vadd.f32 %v1745_v8, %v4762_v1 }
 0x2e4   : > { %v1998_v37 = vpop.xlane.xlu0 %1997  ;;  %v3913_v23 = vpop.eup %3912  ;;  %v3138_v16 = vmul.f32 %v5361_v53, %v2998_v35  ;;  %v5474_v36 = vmul.f32 0.00390625, %v1995_v12  ;;  %v7189_v38 = vsub.f32 %v4804_v62, %v5350_v55  ;;  %2099 = vadd.xlane.f32.xlu0 %v2098_v52  ;;  %v2749_v12 = vsub.f32 %v4836_v47, %v5390_v3 }
 0x2e5   : > { %v3139_v43 = vmul.f32 %v5364_v29, %v2999_v10  ;;  %v1749_v61 = vpop.f32.mrf.mxu1  ;;  %v3001_v28 = vmul.f32 %v3913_v23, %v2745_v19  ;;  %3918 = vrsqrt.f32 %v2873_v9  ;;  %v2874_v0 = vadd.f32 1e-05, %v2682_v48  ;;  %v4122_v10 = vld [vmem:[%s4507_s20 + $0x2b0] sm:$0xff] }
 0x2e6   : > { %v3000_v14 = vmul.f32 %v3913_v23, %v7189_v38  ;;  %v2315_v59 = vpop.xlane.xlu1 %2314  ;;  %v3278_v35 = vadd.f32 %v5376_v26, %v3138_v16  ;;  %v1748_v62 = vadd.f32 %v1747_v51, %v4768_v7  ;;  %v2246_v48 = vmul.f32 %v5435_v22, %v5435_v22  ;;  %v4123_v23 = vld [vmem:[%s4507_s20 + $0x2b8] sm:$0xff]  ;;  %v4124_v51 = vld [vmem:[%s4507_s20 + $0x2c0] sm:$0xff] }
 0x2e7   : > { %v3279_v8 = vadd.f32 %v5333_v31, %v3139_v43  ;;  %v1751_v55 = vpop.f32.mrf.mxu1  ;;  %v3141_v9 = vmul.f32 %v5364_v29, %v3001_v28  ;;  %3920 = vrsqrt.f32 %v2874_v0  ;;  %v5491_v52 = vadd.f32 %v4122_v10, %v1740_v42 }
 0x2e8   : > { %v3140_v19 = vmul.f32 %v5361_v53, %v3000_v14  ;;  %v2318_v56 = vpop.xlane.xlu0 %2317  ;;  %3406 = vst [vmem:[%s5455_s9 + $0x10] sm:$0xff] %v3278_v35  ;;  %v5494_v47 = vadd.f32 %v4123_v23, %v1742_v58  ;;  %v5497_v16 = vadd.f32 %v4124_v51, %v1746_v24  ;;  %v2247_v43 = vmul.f32 %v5426_v20, %v5426_v20  ;;  %v4125_v51 = vld [vmem:[%s4507_s20 + $0x2c8] sm:$0xff] }
 0x2e9   : > { %3407 = vst [vmem:[%s5455_s9 + $0x18] sm:$0xff] %v3279_v8  ;;  %v1755_v38 = vpop.f32.mrf.mxu1  ;;  %v3915_v14 = vpop.eup %3914  ;;  %v3281_v0 = vadd.f32 %v5333_v31, %v3141_v9  ;;  %v2619_v42 = vmul.f32 %v5474_v36, %v5474_v36  ;;  %v2555_v35 = vmul.f32 0.00390625, %v2315_v59  ;;  %v7191_v24 = vsub.f32 %v4828_v33, %v5371_v40 }
 0x2ea   : > { %7190 = vst [vmem:[#allocation68_spill] sm:$0xff] %v5497_v16  ;;  %v3280_v28 = vadd.f32 %v5376_v26, %v3140_v19  ;;  %v5505_v58 = vpop.xlane.xlu1 %2000  ;;  %v7192_v10 = vsub.f32 %v4820_v18, %v5371_v40  ;;  %v5514_v21 = vadd.f32 %v4125_v51, %v1748_v62  ;;  %v5516_v19 = vmul.f32 0.00390625, %v1998_v37 }
 0x2eb   : > { %v3002_v8 = vmul.f32 %v3915_v14, %v7191_v24  ;;  %v1757_v9 = vpop.f32.mrf.mxu1  ;;  %3409 = vst [vmem:[%s5455_s9 + $0x28] sm:$0xff] %v3281_v0  ;;  %v2415_v59 = vadd.f32 %v2247_v43, %v2246_v48  ;;  %v2683_v22 = vsub.f32 %v2555_v35, %v2619_v42  ;;  %v2248_v49 = vmul.f32 %v5447_v60, %v5447_v60 }
 0x2ec   : > { %v3003_v23 = vmul.f32 %v3915_v14, %v7192_v10  ;;  %7193 = vst [vmem:[#allocation69_spill] sm:$0xff] %v5514_v21  ;;  %v3917_v20 = vpop.eup %3916  ;;  %3408 = vst [vmem:[%s5455_s9 + $0x20] sm:$0xff] %v3280_v28  ;;  %v2249_v33 = vmul.f32 %v5438_v41, %v5438_v41  ;;  %v2004_v24 = vpop.xlane.xlu0 %2003  ;;  %v7194_v37 = vsub.f32 %v4833_v45, %v5390_v3 }
 0x2ed   : > { %v3142_v18 = vmul.f32 %v5361_v53, %v3002_v8  ;;  %v3005_v14 = vmul.f32 %v3917_v20, %v2749_v12  ;;  %v5529_v28 = vpop.f32.mrf.mxu1  ;;  %2416 = vadd.xlane.f32.xlu1 %v2415_v59  ;;  %v1750_v48 = vadd.f32 %v1749_v61, %v4762_v1  ;;  %v2875_v43 = vadd.f32 1e-05, %v2683_v22 }
 0x2ee   : > { %v3143_v40 = vmul.f32 %v5364_v29, %v3003_v23  ;;  %v3004_v62 = vmul.f32 %v3917_v20, %v7194_v37  ;;  %v2418_v0 = vadd.f32 %v2249_v33, %v2248_v49  ;;  %v1752_v42 = vadd.f32 %v1751_v55, %v4768_v7  ;;  %v5533_v35 = vpop.xlane.xlu1 %2320 }
 0x2ef   : > { %v3282_v8 = vadd.f32 %v5376_v26, %v3142_v18  ;;  %v3145_v3 = vmul.f32 %v5364_v29, %v3005_v14  ;;  %v5539_v20 = vpop.f32.mrf.mxu1  ;;  %3922 = vrsqrt.f32 %v2875_v43  ;;  %v2620_v22 = vmul.f32 %v5516_v19, %v5516_v19 }
 0x2f0   : > { %v3283_v10 = vadd.f32 %v5333_v31, %v3143_v40  ;;  %v3144_v45 = vmul.f32 %v5361_v53, %v3004_v62  ;;  %2419 = vadd.xlane.f32.xlu0 %v2418_v0  ;;  %v2556_v49 = vmul.f32 0.00390625, %v2318_v56  ;;  %v2101_v61 = vadd.f32 %v5494_v47, %v5491_v52  ;;  %v5545_v12 = vpop.xlane.xlu0 %2323 }
 0x2f1   : > { %3410 = vst [vmem:[%s5455_s9 + $0x30] sm:$0xff] %v3282_v8  ;;  %v3285_v23 = vadd.f32 %v5333_v31, %v3145_v3  ;;  %v2750_v51 = vsub.f32 %v4853_v63, %v5418_v25  ;;  %v2751_v56 = vsub.f32 %v4857_v5, %v5418_v25  ;;  %v5555_v59 = vpop.f32.mrf.mxu1  ;;  %v2752_v33 = vsub.f32 %v4866_v27, %v5428_v39  ;;  %v4126_v25 = vld [vmem:[%s4507_s20 + $0x2d0] sm:$0xff]  ;;  %v4127_v8 = vld [vmem:[%s4507_s20 + $0x2d8] sm:$0xff] }
 0x2f2   : > { %3411 = vst [vmem:[%s5455_s9 + $0x38] sm:$0xff] %v3283_v10  ;;  %v3284_v55 = vadd.f32 %v5376_v26, %v3144_v45  ;;  %v2753_v18 = vsub.f32 %v4869_v30, %v5428_v39  ;;  %v2684_v40 = vsub.f32 %v2556_v49, %v2620_v22  ;;  %2102 = vadd.xlane.f32.xlu1 %v2101_v61  ;;  %v5563_v62 = vpop.xlane.xlu1 %2006  ;;  %v3919_v63 = vpop.eup %3918 }
 0x2f3   : > { %v2104_v37 = vadd.f32 %v5514_v21, %v5497_v16  ;;  %3413 = vst [vmem:[%s5455_s9 + $0x48] sm:$0xff] %v3285_v23  ;;  %v2754_v5 = vsub.f32 %v4892_v4, %v5474_v36  ;;  %v5570_v14 = vadd.f32 %v4126_v25, %v1750_v48  ;;  %v1756_v27 = vadd.f32 %v1755_v38, %v4762_v1  ;;  %v5574_v39 = vpop.f32.mrf.mxu1 }
 0x2f4   : > { %3412 = vst [vmem:[%s5455_s9 + $0x40] sm:$0xff] %v3284_v55  ;;  %v1758_v30 = vadd.f32 %v1757_v9, %v4768_v7  ;;  %v3006_v43 = vmul.f32 %v3919_v63, %v2750_v51  ;;  %v3007_v0 = vmul.f32 %v3919_v63, %v2751_v56  ;;  %v5577_v10 = vadd.f32 %v4127_v8, %v1752_v42  ;;  %v5579_v3 = vpop.xlane.xlu0 %2009  ;;  %v3921_v22 = vpop.eup %3920 }
 0x2f5   : > { %7195 = vst [vmem:[#allocation70_spill] sm:$0xff] %v5570_v14  ;;  %v2876_v45 = vadd.f32 1e-05, %v2684_v40  ;;  %2105 = vadd.xlane.f32.xlu0 %v2104_v37  ;;  %v5582_v48 = vmul.f32 0.00390625, %v5505_v58  ;;  %v5584_v38 = vmul.f32 0.00390625, %v2004_v24  ;;  %v2250_v9 = vmul.f32 %v5491_v52, %v5491_v52  ;;  %v5590_v42 = vpop.f32.mrf.mxu1  ;;  %v4128_v58 = vld [vmem:[%s4507_s20 + $0x2e0] sm:$0xff] }
 0x2f6   : > { %7196 = vst [vmem:[#allocation71_spill] sm:$0xff] %v5577_v10  ;;  %v2251_v49 = vmul.f32 %v5494_v47, %v5494_v47  ;;  %v3146_v61 = vmul.f32 %v5361_v53, %v3006_v43  ;;  %v3147_v55 = vmul.f32 %v5364_v29, %v3007_v0  ;;  %v3008_v23 = vmul.f32 %v3921_v22, %v2752_v33  ;;  %v5594_v56 = vpop.xlane.xlu1 %2326  ;;  %v4129_v40 = vld [vmem:[%s4507_s20 + $0x2e8] sm:$0xff] }
 0x2f7   : > { %v3009_v51 = vmul.f32 %v3921_v22, %v2753_v18  ;;  %3924 = vrsqrt.f32 %v2876_v45  ;;  %v5597_v24 = vadd.f32 %v4128_v58, %v1756_v27  ;;  %v5600_v37 = vadd.f32 %v4129_v40, %v1758_v30  ;;  %v5602_v25 = vpop.f32.mrf.mxu1 }
 0x2f8   : > { %v2421_v63 = vadd.f32 %v2251_v49, %v2250_v9  ;;  %v3286_v43 = vadd.f32 %v5376_v26, %v3146_v61  ;;  %v3287_v0 = vadd.f32 %v5333_v31, %v3147_v55  ;;  %v3148_v33 = vmul.f32 %v5361_v53, %v3008_v23  ;;  %v5608_v8 = vpop.xlane.xlu0 %2329 }
 0x2f9   : > { %7197 = vst [vmem:[#allocation72_spill] sm:$0xff] %v5597_v24  ;;  %7198 = vst [vmem:[#allocation73_spill] sm:$0xff] %v5600_v37  ;;  %v3149_v18 = vmul.f32 %v5364_v29, %v3009_v51  ;;  %v2621_v27 = vmul.f32 %v5582_v48, %v5582_v48  ;;  %v2557_v30 = vmul.f32 0.00390625, %v5533_v35  ;;  %v2252_v45 = vmul.f32 %v5497_v16, %v5497_v16  ;;  %v5617_v9 = vpop.f32.mrf.mxu1 }
 0x2fa   : > { %2422 = vadd.xlane.f32.xlu1 %v2421_v63  ;;  %v2253_v22 = vmul.f32 %v5514_v21, %v5514_v21  ;;  %3414 = vst [vmem:[%s5455_s9 + $0x50] sm:$0xff] %v3286_v43  ;;  %3415 = vst [vmem:[%s5455_s9 + $0x58] sm:$0xff] %v3287_v0  ;;  %v3288_v49 = vadd.f32 %v5376_v26, %v3148_v33  ;;  %v2622_v55 = vmul.f32 %v5584_v38, %v5584_v38  ;;  %v5626_v23 = vpop.xlane.xlu1 %2012 }
 0x2fb   : > { %v3289_v61 = vadd.f32 %v5333_v31, %v3149_v18  ;;  %v2558_v35 = vmul.f32 0.00390625, %v5545_v12  ;;  %v1760_v51 = vadd.f32 %v5529_v28, %v4762_v1  ;;  %v2685_v58 = vsub.f32 %v2557_v30, %v2621_v27  ;;  %v5632_v43 = vpop.f32.mrf.mxu1 }
 0x2fc   : > { %v2424_v40 = vadd.f32 %v2253_v22, %v2252_v45  ;;  %v2107_v63 = vadd.f32 %v5577_v10, %v5570_v14  ;;  %3416 = vst [vmem:[%s5455_s9 + $0x60] sm:$0xff] %v3288_v49  ;;  %v2755_v0 = vsub.f32 %v4886_v54, %v5474_v36  ;;  %v2756_v12 = vsub.f32 %v4897_v15, %v5516_v19  ;;  %v5642_v28 = vpop.xlane.xlu0 %2015  ;;  %v3923_v27 = vpop.eup %3922 }
 0x2fd   : > { %3417 = vst [vmem:[%s5455_s9 + $0x68] sm:$0xff] %v3289_v61  ;;  %v2757_v33 = vsub.f32 %v4900_v17, %v5516_v19  ;;  %v2686_v18 = vsub.f32 %v2558_v35, %v2622_v55  ;;  %v2877_v30 = vadd.f32 1e-05, %v2685_v58  ;;  %v1762_v45 = vadd.f32 %v5539_v20, %v4768_v7  ;;  %v5650_v22 = vpop.f32.mrf.mxu1  ;;  %v4130_v55 = vld [vmem:[%s4507_s20 + $0x2f0] sm:$0xff] }
 0x2fe   : > { %2425 = vadd.xlane.f32.xlu0 %v2424_v40  ;;  %2108 = vadd.xlane.f32.xlu1 %v2107_v63  ;;  %v1766_v54 = vadd.f32 %v5555_v59, %v4762_v1  ;;  %v2110_v15 = vadd.f32 %v5600_v37, %v5597_v24  ;;  %v3010_v17 = vmul.f32 %v3923_v27, %v2754_v5  ;;  %v5656_v61 = vmul.f32 0.00390625, %v5563_v62  ;;  %v5658_v20 = vpop.xlane.xlu1 %2332  ;;  %v4131_v63 = vld [vmem:[%s4507_s20 + $0x2f8] sm:$0xff] }
 0x2ff   : > { %v3011_v19 = vmul.f32 %v3923_v27, %v2755_v0  ;;  %v2878_v49 = vadd.f32 1e-05, %v2686_v18  ;;  %v5663_v35 = vadd.f32 %v4130_v55, %v1760_v51  ;;  %3926 = vrsqrt.f32 %v2877_v30  ;;  %v5667_v36 = vpop.f32.mrf.mxu1  ;;  %v4132_v0 = vld [vmem:[%s4507_s20 + $0x300] sm:$0xff] }
 0x300   : > { %v1768_v4 = vadd.f32 %v5574_v39, %v4768_v7  ;;  %v3150_v5 = vmul.f32 %v5361_v53, %v3010_v17  ;;  %v5672_v62 = vmul.f32 0.00390625, %v5579_v3  ;;  %v5674_v40 = vpop.xlane.xlu0 %2335  ;;  %v5677_v51 = vadd.f32 %v4131_v63, %v1762_v45 }
 0x301   : > { %7199 = vst [vmem:[#allocation74_spill] sm:$0xff] %v5663_v35  ;;  %v3151_v58 = vmul.f32 %v5364_v29, %v3011_v19  ;;  %3928 = vrsqrt.f32 %v2878_v49  ;;  %v5680_v18 = vadd.f32 %v4132_v0, %v1766_v54  ;;  %v2254_v39 = vmul.f32 %v5570_v14, %v5570_v14  ;;  %v5686_v30 = vpop.f32.mrf.mxu1  ;;  %v4133_v19 = vld [vmem:[%s4507_s20 + $0x308] sm:$0xff] }
 0x302   : > { %7200 = vst [vmem:[#allocation75_spill] sm:$0xff] %v5677_v51  ;;  %2111 = vadd.xlane.f32.xlu0 %v2110_v15  ;;  %v2255_v27 = vmul.f32 %v5577_v10, %v5577_v10  ;;  %v3290_v3 = vadd.f32 %v5376_v26, %v3150_v5  ;;  %v2623_v45 = vmul.f32 %v5656_v61, %v5656_v61  ;;  %v2559_v54 = vmul.f32 0.00390625, %v5594_v56  ;;  %v5693_v15 = vpop.xlane.xlu1 %2018 }
 0x303   : > { %7201 = vst [vmem:[#allocation76_spill] sm:$0xff] %v5680_v18  ;;  %v3291_v17 = vadd.f32 %v5333_v31, %v3151_v58  ;;  %v5696_v49 = vadd.f32 %v4133_v19, %v1768_v4  ;;  %v2256_v63 = vmul.f32 %v5597_v24, %v5597_v24  ;;  %v2257_v0 = vmul.f32 %v5600_v37, %v5600_v37  ;;  %v5702_v5 = vpop.f32.mrf.mxu1 }
 0x304   : > { %v2427_v55 = vadd.f32 %v2255_v27, %v2254_v39  ;;  %v3925_v58 = vpop.eup %3924  ;;  %3418 = vst [vmem:[%s5455_s9 + $0x70] sm:$0xff] %v3290_v3  ;;  %v1770_v56 = vadd.f32 %v5590_v42, %v4762_v1  ;;  %v2687_v59 = vsub.f32 %v2559_v54, %v2623_v45  ;;  %v2624_v4 = vmul.f32 %v5672_v62, %v5672_v62  ;;  %v5711_v27 = vpop.xlane.xlu0 %2021 }
 0x305   : > { %7202 = vst [vmem:[#allocation77_spill] sm:$0xff] %v5696_v49  ;;  %3419 = vst [vmem:[%s5455_s9 + $0x78] sm:$0xff] %v3291_v17  ;;  %v2560_v39 = vmul.f32 0.00390625, %v5608_v8  ;;  %v3012_v19 = vmul.f32 %v3925_v58, %v2756_v12  ;;  %v3013_v24 = vmul.f32 %v3925_v58, %v2757_v33  ;;  %v2430_v37 = vadd.f32 %v2257_v0, %v2256_v63  ;;  %v5715_v3 = vpop.f32.mrf.mxu1  ;;  %v4134_v58 = vld [vmem:[%s4507_s20 + $0x310] sm:$0xff] }
 0x306   : > { %2428 = vadd.xlane.f32.xlu1 %v2427_v55  ;;  %v1772_v10 = vadd.f32 %v5602_v25, %v4768_v7  ;;  %v2879_v17 = vadd.f32 1e-05, %v2687_v59  ;;  %v2113_v42 = vadd.f32 %v5677_v51, %v5663_v35  ;;  %v1776_v45 = vadd.f32 %v5617_v9, %v4762_v1  ;;  %v5721_v8 = vpop.xlane.xlu1 %2338 }
 0x307   : > { %v2688_v14 = vsub.f32 %v2560_v39, %v2624_v4  ;;  %v3152_v12 = vmul.f32 %v5361_v53, %v3012_v19  ;;  %v3153_v33 = vmul.f32 %v5364_v29, %v3013_v24  ;;  %2431 = vadd.xlane.f32.xlu0 %v2430_v37  ;;  %v5726_v25 = vmul.f32 0.00390625, %v5626_v23  ;;  %v5730_v54 = vpop.f32.mrf.mxu1 }
 0x308   : > { %v2116_v59 = vadd.f32 %v5696_v49, %v5680_v18  ;;  %v2759_v55 = vsub.f32 %v4921_v50, %v5582_v48  ;;  %v2760_v9 = vsub.f32 %v4930_v11, %v5584_v38  ;;  %3930 = vrsqrt.f32 %v2879_v17  ;;  %v5736_v37 = vpop.xlane.xlu0 %2341 }
 0x309   : > { %v2880_v24 = vadd.f32 1e-05, %v2688_v14  ;;  %v3292_v23 = vadd.f32 %v5376_v26, %v3152_v12  ;;  %v3293_v63 = vadd.f32 %v5333_v31, %v3153_v33  ;;  %v2761_v0 = vsub.f32 %v4933_v13, %v5584_v38  ;;  %v5744_v11 = vpop.f32.mrf.mxu1  ;;  %v4135_v13 = vld [vmem:[%s4507_s20 + $0x318] sm:$0xff] }
 0x30a   : > { %2114 = vadd.xlane.f32.xlu1 %v2113_v42  ;;  %v1778_v50 = vadd.f32 %v5632_v43, %v4768_v7  ;;  %v5747_v4 = vadd.f32 %v4134_v58, %v1770_v56  ;;  %v2258_v14 = vmul.f32 %v5663_v35, %v5663_v35  ;;  %v2259_v39 = vmul.f32 %v5677_v51, %v5677_v51  ;;  %v5753_v19 = vpop.xlane.xlu1 %2024  ;;  %v4136_v43 = vld [vmem:[%s4507_s20 + $0x320] sm:$0xff] }
 0x30b   : > { %3932 = vrsqrt.f32 %v2880_v24  ;;  %3420 = vst [vmem:[%s5455_s9 + $0x80] sm:$0xff] %v3292_v23  ;;  %3421 = vst [vmem:[%s5455_s9 + $0x88] sm:$0xff] %v3293_v63  ;;  %v5758_v38 = vadd.f32 %v4135_v13, %v1772_v10  ;;  %v5761_v17 = vadd.f32 %v4136_v43, %v1776_v45  ;;  %2117 = vadd.xlane.f32.xlu0 %v2116_v59  ;;  %v2561_v42 = vmul.f32 0.00390625, %v5658_v20  ;;  %v5766_v12 = vpop.f32.mrf.mxu1  ;;  %v4137_v43 = vld [vmem:[%s4507_s20 + $0x328] sm:$0xff] }
 0x30c   : > { %v2625_v56 = vmul.f32 %v5726_v25, %v5726_v25  ;;  %v3927_v33 = vpop.eup %3926  ;;  %v5769_v24 = vmul.f32 0.00390625, %v5642_v28  ;;  %v2433_v23 = vadd.f32 %v2259_v39, %v2258_v14  ;;  %v2260_v10 = vmul.f32 %v5680_v18, %v5680_v18  ;;  %v5775_v63 = vpop.xlane.xlu0 %2027 }
 0x30d   : > { %v2261_v45 = vmul.f32 %v5696_v49, %v5696_v49  ;;  %v7203_v58 = vsub.f32 %v4917_v44, %v5582_v48  ;;  %v3015_v13 = vmul.f32 %v3927_v33, %v2759_v55  ;;  %v5781_v51 = vadd.f32 %v4137_v43, %v1778_v50  ;;  %v5783_v35 = vpop.f32.mrf.mxu1 }
 0x30e   : > { %v3929_v59 = vpop.eup %3928  ;;  %v2689_v28 = vsub.f32 %v2561_v42, %v2625_v56  ;;  %2434 = vadd.xlane.f32.xlu1 %v2433_v23  ;;  %v1780_v49 = vadd.f32 %v5650_v22, %v4762_v1  ;;  %v5787_v21 = vpop.xlane.xlu1 %2344  ;;  %v1782_v55 = vadd.f32 %v5667_v36, %v4768_v7  ;;  %v2626_v22 = vmul.f32 %v5769_v24, %v5769_v24 }
 0x30f   : > { %v3014_v20 = vmul.f32 %v3927_v33, %v7203_v58  ;;  %7204 = vst [vmem:[#allocation78_spill] sm:$0xff] %v5781_v51  ;;  %v3016_v14 = vmul.f32 %v3929_v59, %v2760_v9  ;;  %v3017_v39 = vmul.f32 %v3929_v59, %v2761_v0  ;;  %v2436_v18 = vadd.f32 %v2261_v45, %v2260_v10  ;;  %v5793_v50 = vpop.f32.mrf.mxu1 }
 0x310   : > { %v3155_v44 = vmul.f32 %v5364_v29, %v3015_v13  ;;  %v2881_v48 = vadd.f32 1e-05, %v2689_v28  ;;  %v2562_v56 = vmul.f32 0.00390625, %v5674_v40  ;;  %v5800_v42 = vpop.xlane.xlu0 %2347  ;;  %v2119_v23 = vadd.f32 %v5758_v38, %v5747_v4 }
 0x311   : > { %v3154_v16 = vmul.f32 %v5361_v53, %v3014_v20  ;;  %v3156_v9 = vmul.f32 %v5361_v53, %v3016_v14  ;;  %v3157_v0 = vmul.f32 %v5364_v29, %v3017_v39  ;;  %2437 = vadd.xlane.f32.xlu0 %v2436_v18  ;;  %v2762_v45 = vsub.f32 %v4957_v57, %v5656_v61  ;;  %v5823_v13 = vpop.f32.mrf.mxu1  ;;  %v4138_v14 = vld [vmem:[%s4507_s20 + $0x330] sm:$0xff] }
 0x312   : > { %v3295_v36 = vadd.f32 %v5333_v31, %v3155_v44  ;;  %3934 = vrsqrt.f32 %v2881_v48  ;;  %v2690_v40 = vsub.f32 %v2562_v56, %v2626_v22  ;;  %v5810_v59 = vpop.xlane.xlu1 %2030  ;;  %2120 = vadd.xlane.f32.xlu1 %v2119_v23  ;;  %v1786_v58 = vadd.f32 %v5686_v30, %v4762_v1  ;;  %v4139_v44 = vld [vmem:[%s4507_s20 + $0x338] sm:$0xff]  ;;  %v4140_v56 = vld [vmem:[%s4507_s20 + $0x340] sm:$0xff] }
 0x313   : > { %v3294_v33 = vadd.f32 %v5376_v26, %v3154_v16  ;;  %v3296_v10 = vadd.f32 %v5376_v26, %v3156_v9  ;;  %v3297_v18 = vadd.f32 %v5333_v31, %v3157_v0  ;;  %v2763_v16 = vsub.f32 %v4951_v46, %v5656_v61  ;;  %v5856_v23 = vpop.f32.mrf.mxu1 }
 0x314   : > { %3423 = vst [vmem:[%s5455_s9 + $0x98] sm:$0xff] %v3295_v36  ;;  %v5819_v20 = vmul.f32 0.00390625, %v5693_v15  ;;  %v2122_v57 = vadd.f32 %v5781_v51, %v5761_v17  ;;  %v2764_v43 = vsub.f32 %v4960_v2, %v5672_v62  ;;  %v2765_v46 = vsub.f32 %v4963_v6, %v5672_v62  ;;  %v5833_v15 = vpop.xlane.xlu0 %2033 }
 0x315   : > { %3422 = vst [vmem:[%s5455_s9 + $0x90] sm:$0xff] %v3294_v33  ;;  %3424 = vst [vmem:[%s5455_s9 + $0xa0] sm:$0xff] %v3296_v10  ;;  %v2882_v61 = vadd.f32 1e-05, %v2690_v40  ;;  %v2263_v30 = vmul.f32 %v5758_v38, %v5758_v38  ;;  %v3931_v28 = vpop.eup %3930  ;;  %v5836_v39 = vadd.f32 %v4138_v14, %v1780_v49  ;;  %v5839_v48 = vadd.f32 %v4139_v44, %v1782_v55 }
 0x316   : > { %3425 = vst [vmem:[%s5455_s9 + $0xa8] sm:$0xff] %v3297_v18  ;;  %2123 = vadd.xlane.f32.xlu0 %v2122_v57  ;;  %v1788_v2 = vadd.f32 %v5702_v5, %v4768_v7  ;;  %v2262_v6 = vmul.f32 %v5747_v4, %v5747_v4  ;;  %v3018_v62 = vmul.f32 %v3931_v28, %v2762_v45  ;;  %v5846_v0 = vmul.f32 0.00390625, %v5711_v27  ;;  %v5848_v22 = vpop.xlane.xlu1 %2350 }
 0x317   : > { %7205 = vst [vmem:[#allocation79_spill] sm:$0xff] %v5836_v39  ;;  %7206 = vst [vmem:[#allocation80_spill] sm:$0xff] %v5839_v48  ;;  %v3019_v9 = vmul.f32 %v3931_v28, %v2763_v16  ;;  %3936 = vrsqrt.f32 %v2882_v61  ;;  %v5851_v55 = vadd.f32 %v4140_v56, %v1786_v58  ;;  %v2627_v5 = vmul.f32 %v5819_v20, %v5819_v20  ;;  %v4141_v16 = vld [vmem:[%s4507_s20 + $0x348] sm:$0xff] }
 0x318   : > { %v3933_v49 = vpop.eup %3932  ;;  %v2439_v33 = vadd.f32 %v2263_v30, %v2262_v6  ;;  %v2563_v36 = vmul.f32 0.00390625, %v5721_v8  ;;  %v3158_v10 = vmul.f32 %v5361_v53, %v3018_v62  ;;  %v5860_v40 = vpop.xlane.xlu0 %2353  ;;  %v5863_v58 = vadd.f32 %v4141_v16, %v1788_v2 }
 0x319   : > { %7207 = vst [vmem:[#allocation81_spill] sm:$0xff] %v5851_v55  ;;  %v3159_v18 = vmul.f32 %v5364_v29, %v3019_v9  ;;  %v3020_v27 = vmul.f32 %v3933_v49, %v2764_v43  ;;  %v3021_v45 = vmul.f32 %v3933_v49, %v2765_v46  ;;  %v2264_v8 = vmul.f32 %v5761_v17, %v5761_v17  ;;  %v5879_v9 = vpop.f32.mrf.mxu1 }
 0x31a   : > { %7208 = vst [vmem:[#allocation82_spill] sm:$0xff] %v5863_v58  ;;  %2440 = vadd.xlane.f32.xlu1 %v2439_v33  ;;  %v2691_v57 = vsub.f32 %v2563_v36, %v2627_v5  ;;  %v2265_v61 = vmul.f32 %v5781_v51, %v5781_v51  ;;  %v3298_v30 = vadd.f32 %v5376_v26, %v3158_v10  ;;  %v5873_v14 = vpop.xlane.xlu1 %2036  ;;  %v2564_v33 = vmul.f32 0.00390625, %v5736_v37  ;;  %v7210_v37 = vld [vmem:[#allocation13_spill] sm:$0xff] }
 0x31b   : > { %v3299_v43 = vadd.f32 %v5333_v31, %v3159_v18  ;;  %v3160_v46 = vmul.f32 %v5361_v53, %v3020_v27  ;;  %v3161_v28 = vmul.f32 %v5364_v29, %v3021_v45  ;;  %v1790_v44 = vadd.f32 %v5715_v3, %v4762_v1  ;;  %v7209_v18 = vld [vmem:[#allocation12_spill] sm:$0xff] }
 0x31c   : > { %v2883_v2 = vadd.f32 1e-05, %v2691_v57  ;;  %v2442_v6 = vadd.f32 %v2265_v61, %v2264_v8  ;;  %v2628_v62 = vmul.f32 %v5846_v0, %v5846_v0  ;;  %3426 = vst [vmem:[%s5455_s9 + $0xb0] sm:$0xff] %v3298_v30  ;;  %v2125_v3 = vadd.f32 %v5839_v48, %v5836_v39  ;;  %v5888_v5 = vpop.xlane.xlu0 %2039  ;;  %v7211_v57 = vld [vmem:[#allocation15_spill] sm:$0xff] }
 0x31d   : > { %3427 = vst [vmem:[%s5455_s9 + $0xb8] sm:$0xff] %v3299_v43  ;;  %v3300_v49 = vadd.f32 %v5376_v26, %v3160_v46  ;;  %v3301_v56 = vadd.f32 %v5333_v31, %v3161_v28  ;;  %v2766_v36 = vsub.f32 %v4985_v34, %v5726_v25  ;;  %v2767_v10 = vsub.f32 %v4979_v32, %v5726_v25  ;;  %v7212_v43 = vld [vmem:[#allocation14_spill] sm:$0xff] }
 0x31e   : > { %v2768_v27 = vsub.f32 %v7209_v18, %v5769_v24  ;;  %3938 = vrsqrt.f32 %v2883_v2  ;;  %2443 = vadd.xlane.f32.xlu0 %v2442_v6  ;;  %v2769_v16 = vsub.f32 %v7210_v37, %v5769_v24  ;;  %v2692_v61 = vsub.f32 %v2564_v33, %v2628_v62  ;;  %2126 = vadd.xlane.f32.xlu1 %v2125_v3  ;;  %v5904_v34 = vpop.xlane.xlu1 %2356  ;;  %v5911_v2 = vpop.f32.mrf.mxu1  ;;  %v7213_v24 = vld [vmem:[#allocation16_spill] sm:$0xff]  ;;  %v4142_v62 = vld [vmem:[%s4507_s20 + $0x350] sm:$0xff] }
 0x31f   : > { %v3935_v45 = vpop.eup %3934  ;;  %3428 = vst [vmem:[%s5455_s9 + $0xc0] sm:$0xff] %v3300_v49  ;;  %3429 = vst [vmem:[%s5455_s9 + $0xc8] sm:$0xff] %v3301_v56  ;;  %v2128_v32 = vadd.f32 %v5863_v58, %v5851_v55  ;;  %v5909_v28 = vmul.f32 0.00390625, %v5753_v19  ;;  %v5916_v49 = vadd.f32 %v4142_v62, %v1790_v44  ;;  %v1792_v56 = vadd.f32 %v5730_v54, %v4768_v7 }
 0x320   : > { %v3022_v25 = vmul.f32 %v3935_v45, %v2766_v36  ;;  %v3023_v30 = vmul.f32 %v3935_v45, %v2767_v10  ;;  %v2884_v33 = vadd.f32 1e-05, %v2692_v61  ;;  %v5920_v3 = vpop.xlane.xlu0 %2359  ;;  %v1796_v19 = vadd.f32 %v5744_v11, %v4762_v1 }
 0x321   : > { %7214 = vst [vmem:[#allocation12_spill] sm:$0xff] %v5916_v49  ;;  %v1798_v18 = vadd.f32 %v5766_v12, %v4768_v7  ;;  %v5929_v44 = vmul.f32 0.00390625, %v5775_v63  ;;  %v2266_v54 = vmul.f32 %v5836_v39, %v5836_v39  ;;  %v2267_v45 = vmul.f32 %v5839_v48, %v5839_v48 }
 0x322   : > { %v3162_v36 = vmul.f32 %v5361_v53, %v3022_v25  ;;  %v3163_v10 = vmul.f32 %v5364_v29, %v3023_v30  ;;  %2129 = vadd.xlane.f32.xlu0 %v2128_v32  ;;  %3940 = vrsqrt.f32 %v2884_v33  ;;  %v5935_v37 = vpop.xlane.xlu1 %2042  ;;  %v2629_v63 = vmul.f32 %v5909_v28, %v5909_v28  ;;  %v5942_v25 = vpop.f32.mrf.mxu1  ;;  %v4143_v33 = vld [vmem:[%s4507_s20 + $0x358] sm:$0xff] }
 0x323   : > { %v2565_v32 = vmul.f32 0.00390625, %v5787_v21  ;;  %v5945_v6 = vadd.f32 %v4143_v33, %v1792_v56  ;;  %v2445_v46 = vadd.f32 %v2267_v45, %v2266_v54  ;;  %v2268_v21 = vmul.f32 %v5851_v55, %v5851_v55 }
 0x324   : > { %v3937_v11 = vpop.eup %3936  ;;  %v3302_v61 = vadd.f32 %v5376_v26, %v3162_v36  ;;  %v3303_v12 = vadd.f32 %v5333_v31, %v3163_v10  ;;  %v5947_v8 = vpop.xlane.xlu0 %2045  ;;  %v4144_v36 = vld [vmem:[%s4507_s20 + $0x368] sm:$0xff]  ;;  %v2630_v54 = vmul.f32 %v5929_v44, %v5929_v44  ;;  %v2566_v45 = vmul.f32 0.00390625, %v5800_v42 }
 0x325   : > { %v3024_v30 = vmul.f32 %v3937_v11, %v2768_v27  ;;  %v3025_v62 = vmul.f32 %v3937_v11, %v2769_v16  ;;  %7215 = vst [vmem:[#allocation13_spill] sm:$0xff] %v5945_v6  ;;  %v5952_v10 = vadd.f32 %v4144_v36, %v1798_v18  ;;  %v2693_v48 = vsub.f32 %v2565_v32, %v2629_v63  ;;  %v4145_v18 = vld [vmem:[%s4507_s20 + $0x360] sm:$0xff] }
 0x326   : > { %3430 = vst [vmem:[%s5455_s9 + $0xd0] sm:$0xff] %v3302_v61  ;;  %3431 = vst [vmem:[%s5455_s9 + $0xd8] sm:$0xff] %v3303_v12  ;;  %v2269_v27 = vmul.f32 %v5863_v58, %v5863_v58  ;;  %2446 = vadd.xlane.f32.xlu1 %v2445_v46  ;;  %v5963_v11 = vpop.xlane.xlu1 %2362  ;;  %v5966_v61 = vadd.f32 %v4145_v18, %v1796_v19  ;;  %v1802_v32 = vadd.f32 %v5793_v50, %v4768_v7  ;;  %v7218_v19 = vld [vmem:[#allocation17_spill] sm:$0xff]  ;;  %v4146_v58 = vld [vmem:[%s4507_s20 + $0x378] sm:$0xff] }
 0x327   : > { %7216 = vst [vmem:[#allocation15_spill] sm:$0xff] %v5952_v10  ;;  %v3164_v16 = vmul.f32 %v5361_v53, %v3024_v30  ;;  %v3165_v56 = vmul.f32 %v5364_v29, %v3025_v62  ;;  %v2885_v12 = vadd.f32 1e-05, %v2693_v48  ;;  %v5970_v30 = vpop.f32.mrf.mxu1  ;;  %v2694_v33 = vsub.f32 %v2566_v45, %v2630_v54  ;;  %v7220_v54 = vld [vmem:[#allocation18_spill] sm:$0xff] }
 0x328   : > { %7217 = vst [vmem:[#allocation14_spill] sm:$0xff] %v5966_v61  ;;  %v2448_v63 = vadd.f32 %v2269_v27, %v2268_v21  ;;  %v2131_v42 = vadd.f32 %v5945_v6, %v5916_v49  ;;  %v5976_v36 = vpop.xlane.xlu0 %2365  ;;  %v2773_v48 = vsub.f32 %v7218_v19, %v5846_v0  ;;  %v5981_v50 = vmul.f32 0.00390625, %v5810_v59 }
 0x329   : > { %v3304_v46 = vadd.f32 %v5376_v26, %v3164_v16  ;;  %v3305_v62 = vadd.f32 %v5333_v31, %v3165_v56  ;;  %3942 = vrsqrt.f32 %v2885_v12  ;;  %v2134_v21 = vadd.f32 %v5952_v10, %v5966_v61  ;;  %v7219_v16 = vld [vmem:[#allocation19_spill] sm:$0xff]  ;;  %v6006_v55 = vpop.f32.mrf.mxu1 }
 0x32a   : > { %2449 = vadd.xlane.f32.xlu0 %v2448_v63  ;;  %v1800_v18 = vadd.f32 %v5783_v35, %v4762_v1  ;;  %v2886_v12 = vadd.f32 1e-05, %v2694_v33  ;;  %2132 = vadd.xlane.f32.xlu1 %v2131_v42  ;;  %v5993_v63 = vpop.xlane.xlu1 %2048  ;;  %v7221_v59 = vsub.f32 %v7211_v57, %v5819_v20  ;;  %v6002_v56 = vadd.f32 %v4146_v58, %v1802_v32 }
 0x32b   : > { %v3939_v27 = vpop.eup %3938  ;;  %3432 = vst [vmem:[%s5455_s9 + $0xe0] sm:$0xff] %v3304_v46  ;;  %3433 = vst [vmem:[%s5455_s9 + $0xe8] sm:$0xff] %v3305_v62  ;;  %v7222_v46 = vsub.f32 %v7212_v43, %v5819_v20  ;;  %v1808_v45 = vadd.f32 %v5856_v23, %v4768_v7  ;;  %v1806_v35 = vadd.f32 %v5823_v13, %v4762_v1  ;;  %v6019_v32 = vmul.f32 0.00390625, %v5833_v15 }
 0x32c   : > { %v3026_v19 = vmul.f32 %v3939_v27, %v7221_v59  ;;  %7223 = vst [vmem:[#allocation16_spill] sm:$0xff] %v6002_v56  ;;  %3944 = vrsqrt.f32 %v2886_v12  ;;  %v2270_v57 = vmul.f32 %v5916_v49, %v5916_v49  ;;  %v2271_v20 = vmul.f32 %v5945_v6, %v5945_v6  ;;  %v6014_v43 = vpop.xlane.xlu0 %2051 }
 0x32d   : > { %v3027_v62 = vmul.f32 %v3939_v27, %v7222_v46  ;;  %v2631_v13 = vmul.f32 %v5981_v50, %v5981_v50  ;;  %v2567_v42 = vmul.f32 0.00390625, %v5848_v22  ;;  %v2272_v27 = vmul.f32 %v5966_v61, %v5966_v61  ;;  %v4147_v46 = vld [vmem:[%s4507_s20 + $0x370] sm:$0xff]  ;;  %v4148_v22 = vld [vmem:[%s4507_s20 + $0x388] sm:$0xff] }
 0x32e   : > { %v3166_v58 = vmul.f32 %v5361_v53, %v3026_v19  ;;  %2135 = vadd.xlane.f32.xlu0 %v2134_v21  ;;  %v2451_v33 = vadd.f32 %v2271_v20, %v2270_v57  ;;  %v2273_v12 = vmul.f32 %v5952_v10, %v5952_v10  ;;  %v6028_v59 = vpop.xlane.xlu1 %2368  ;;  %v6036_v57 = vadd.f32 %v4148_v22, %v1808_v45  ;;  %v6038_v20 = vpop.f32.mrf.mxu1 }
 0x32f   : > { %v3167_v23 = vmul.f32 %v5364_v29, %v3027_v62  ;;  %v3941_v21 = vpop.eup %3940  ;;  %v6033_v62 = vadd.f32 %v4147_v46, %v1800_v18  ;;  %v7225_v10 = vsub.f32 %v7213_v24, %v5846_v0  ;;  %v2695_v49 = vsub.f32 %v2567_v42, %v2631_v13 }
 0x330   : > { %v3306_v15 = vadd.f32 %v5376_v26, %v3166_v58  ;;  %7224 = vst [vmem:[#allocation17_spill] sm:$0xff] %v6036_v57  ;;  %v3029_v6 = vmul.f32 %v3941_v21, %v2773_v48  ;;  %2452 = vadd.xlane.f32.xlu1 %v2451_v33  ;;  %v2454_v39 = vadd.f32 %v2273_v12, %v2272_v27  ;;  %v6043_v51 = vpop.xlane.xlu0 %2371  ;;  %v4149_v58 = vld [vmem:[%s4507_s20 + $0x380] sm:$0xff]  ;;  %v2568_v0 = vmul.f32 0.00390625, %v5860_v40 }
 0x331   : > { %v3307_v19 = vadd.f32 %v5333_v31, %v3167_v23  ;;  %v3028_v61 = vmul.f32 %v3941_v21, %v7225_v10  ;;  %v6048_v18 = vadd.f32 %v4149_v58, %v1806_v35  ;;  %v1810_v45 = vadd.f32 %v5879_v9, %v4762_v1  ;;  %v7227_v35 = vld [vmem:[#allocation20_spill] sm:$0xff] }
 0x332   : > { %3434 = vst [vmem:[%s5455_s9 + $0xf0] sm:$0xff] %v3306_v15  ;;  %v2632_v23 = vmul.f32 %v6019_v32, %v6019_v32  ;;  %v3169_v10 = vmul.f32 %v5364_v29, %v3029_v6  ;;  %v2887_v48 = vadd.f32 1e-05, %v2695_v49  ;;  %2455 = vadd.xlane.f32.xlu0 %v2454_v39  ;;  %v2137_v13 = vadd.f32 %v6002_v56, %v6033_v62  ;;  %v6059_v33 = vpop.xlane.xlu1 %2054  ;;  %v6067_v6 = vpop.f32.mrf.mxu1  ;;  %v7229_v15 = vld [vmem:[#allocation23_spill] sm:$0xff] }
 0x333   : > { %3435 = vst [vmem:[%s5455_s9 + $0xf8] sm:$0xff] %v3307_v19  ;;  %7226 = vst [vmem:[#allocation19_spill] sm:$0xff] %v6048_v18  ;;  %v3168_v24 = vmul.f32 %v5361_v53, %v3028_v61  ;;  %v2776_v42 = vsub.f32 %v7227_v35, %v5929_v44  ;;  %v1812_v9 = vadd.f32 %v5911_v2, %v4768_v7  ;;  %v7228_v2 = vld [vmem:[#allocation21_spill] sm:$0xff]  ;;  %v6080_v22 = vmul.f32 0.00390625, %v5873_v14 }
 0x334   : > { %v2696_v40 = vsub.f32 %v2568_v0, %v2632_v23  ;;  %v2140_v61 = vadd.f32 %v6036_v57, %v6048_v18  ;;  %v3309_v49 = vadd.f32 %v5333_v31, %v3169_v10  ;;  %3946 = vrsqrt.f32 %v2887_v48  ;;  %2138 = vadd.xlane.f32.xlu1 %v2137_v13  ;;  %v6073_v12 = vpop.xlane.xlu0 %2057  ;;  %v7230_v23 = vld [vmem:[#allocation22_spill] sm:$0xff] }
 0x335   : > { %v3308_v39 = vadd.f32 %v5376_v26, %v3168_v24  ;;  %v1818_v27 = vadd.f32 %v5970_v30, %v4768_v7  ;;  %v2777_v21 = vsub.f32 %v7228_v2, %v5929_v44  ;;  %v4150_v0 = vld [vmem:[%s4507_s20 + $0x390] sm:$0xff]  ;;  %v2274_v44 = vmul.f32 %v6033_v62, %v6033_v62  ;;  %v4152_v2 = vld [vmem:[%s4507_s20 + $0x3a8] sm:$0xff] }
 0x336   : > { %v2888_v46 = vadd.f32 1e-05, %v2696_v40  ;;  %v3943_v58 = vpop.eup %3942  ;;  %3437 = vst [vmem:[%s5455_s9 + $0x108] sm:$0xff] %v3309_v49  ;;  %v6087_v24 = vadd.f32 %v4150_v0, %v1810_v45  ;;  %2141 = vadd.xlane.f32.xlu0 %v2140_v61  ;;  %v2275_v10 = vmul.f32 %v6002_v56, %v6002_v56  ;;  %v6093_v14 = vpop.xlane.xlu1 %2374  ;;  %v7232_v48 = vsub.f32 %v7219_v16, %v5909_v28 }
 0x337   : > { %3436 = vst [vmem:[%s5455_s9 + $0x100] sm:$0xff] %v3308_v39  ;;  %v7233_v35 = vsub.f32 %v7220_v54, %v5909_v28  ;;  %v1816_v45 = vadd.f32 %v5942_v25, %v4762_v1  ;;  %v1827_v61 = vpop.f32.mrf.mxu1  ;;  %v4151_v39 = vld [vmem:[%s4507_s20 + $0x398] sm:$0xff]  ;;  %v6107_v0 = vadd.f32 %v4152_v2, %v1818_v27  ;;  %v6110_v30 = vmul.f32 0.00390625, %v5888_v5 }
 0x338   : > { %7231 = vst [vmem:[#allocation18_spill] sm:$0xff] %v6087_v24  ;;  %v3030_v13 = vmul.f32 %v3943_v58, %v7232_v48  ;;  %3948 = vrsqrt.f32 %v2888_v46  ;;  %v6104_v49 = vadd.f32 %v4151_v39, %v1812_v9  ;;  %v2457_v16 = vadd.f32 %v2275_v10, %v2274_v44  ;;  %v6112_v48 = vpop.xlane.xlu0 %2377 }
 0x339   : > { %v3031_v40 = vmul.f32 %v3943_v58, %v7233_v35  ;;  %7235 = vst [vmem:[#allocation21_spill] sm:$0xff] %v6107_v0  ;;  %v3945_v28 = vpop.eup %3944  ;;  %v2633_v25 = vmul.f32 %v6080_v22, %v6080_v22  ;;  %v2569_v9 = vmul.f32 0.00390625, %v5904_v34  ;;  %v2276_v5 = vmul.f32 %v6048_v18, %v6048_v18 }
 0x33a   : > { %7234 = vst [vmem:[#allocation20_spill] sm:$0xff] %v6104_v49  ;;  %v3170_v54 = vmul.f32 %v5361_v53, %v3030_v13  ;;  %v3032_v58 = vmul.f32 %v3945_v28, %v2776_v42  ;;  %v3033_v27 = vmul.f32 %v3945_v28, %v2777_v21  ;;  %2458 = vadd.xlane.f32.xlu1 %v2457_v16  ;;  %v6123_v10 = vpop.xlane.xlu1 %2060  ;;  %v6130_v42 = vpop.f32.mrf.mxu1 }
 0x33b   : > { %v3171_v46 = vmul.f32 %v5364_v29, %v3031_v40  ;;  %v2277_v44 = vmul.f32 %v6036_v57, %v6036_v57  ;;  %v4153_v40 = vld [vmem:[%s4507_s20 + $0x3a0] sm:$0xff]  ;;  %v2697_v34 = vsub.f32 %v2569_v9, %v2633_v25  ;;  %v1820_v16 = vadd.f32 %v6006_v55, %v4762_v1 }
 0x33c   : > { %v3310_v13 = vadd.f32 %v5376_v26, %v3170_v54  ;;  %v6128_v39 = vadd.f32 %v4153_v40, %v1816_v45  ;;  %v3172_v21 = vmul.f32 %v5361_v53, %v3032_v58  ;;  %v3173_v2 = vmul.f32 %v5364_v29, %v3033_v27  ;;  %v6136_v19 = vpop.xlane.xlu0 %2063  ;;  %v1831_v40 = vpop.f32.mrf.mxu1 }
 0x33d   : > { %v3311_v35 = vadd.f32 %v5333_v31, %v3171_v46  ;;  %v2460_v28 = vadd.f32 %v2277_v44, %v2276_v5  ;;  %v2889_v54 = vadd.f32 1e-05, %v2697_v34  ;;  %v2634_v45 = vmul.f32 %v6110_v30, %v6110_v30  ;;  %v7237_v44 = vld [vmem:[#allocation24_spill] sm:$0xff] }
 0x33e   : > { %7236 = vst [vmem:[#allocation23_spill] sm:$0xff] %v6128_v39  ;;  %3438 = vst [vmem:[%s5455_s9 + $0x110] sm:$0xff] %v3310_v13  ;;  %v2570_v46 = vmul.f32 0.00390625, %v5920_v3  ;;  %v2143_v25 = vadd.f32 %v6104_v49, %v6087_v24  ;;  %v3312_v9 = vadd.f32 %v5376_v26, %v3172_v21  ;;  %v3313_v55 = vadd.f32 %v5333_v31, %v3173_v2  ;;  %v6151_v5 = vpop.xlane.xlu1 %2380  ;;  %v7239_v21 = vld [vmem:[#allocation27_spill] sm:$0xff] }
 0x33f   : > { %3439 = vst [vmem:[%s5455_s9 + $0x118] sm:$0xff] %v3311_v35  ;;  %2461 = vadd.xlane.f32.xlu0 %v2460_v28  ;;  %v1822_v58 = vadd.f32 %v6038_v20, %v4768_v7  ;;  %v2146_v27 = vadd.f32 %v6107_v0, %v6128_v39  ;;  %v2780_v3 = vsub.f32 %v7237_v44, %v6019_v32  ;;  %3950 = vrsqrt.f32 %v2889_v54  ;;  %v7238_v20 = vld [vmem:[#allocation25_spill] sm:$0xff]  ;;  %v7240_v28 = vld [vmem:[#allocation26_spill] sm:$0xff]  ;;  %v4155_v2 = vld [vmem:[%s4507_s20 + $0x3b8] sm:$0xff] }
 0x340   : > { %v2698_v13 = vsub.f32 %v2570_v46, %v2634_v45  ;;  %2144 = vadd.xlane.f32.xlu1 %v2143_v25  ;;  %v1828_v35 = vadd.f32 %v1827_v61, %v4768_v7  ;;  %3440 = vst [vmem:[%s5455_s9 + $0x120] sm:$0xff] %v3312_v9  ;;  %3441 = vst [vmem:[%s5455_s9 + $0x128] sm:$0xff] %v3313_v55  ;;  %v2781_v34 = vsub.f32 %v7238_v20, %v6019_v32  ;;  %v6167_v54 = vpop.xlane.xlu0 %2383  ;;  %v4154_v45 = vld [vmem:[%s4507_s20 + $0x3b0] sm:$0xff] }
 0x341   : > { %v6165_v44 = vmul.f32 0.00390625, %v5935_v37  ;;  %v3947_v61 = vpop.eup %3946  ;;  %v6170_v46 = vadd.f32 %v4154_v45, %v1820_v16  ;;  %v2278_v32 = vmul.f32 %v6087_v24, %v6087_v24  ;;  %v2279_v9 = vmul.f32 %v6104_v49, %v6104_v49  ;;  %v4156_v45 = vld [vmem:[%s4507_s20 + $0x3c8] sm:$0xff] }
 0x342   : > { %v2890_v25 = vadd.f32 1e-05, %v2698_v13  ;;  %v7242_v55 = vsub.f32 %v7229_v15, %v5981_v50  ;;  %v7243_v37 = vsub.f32 %v7230_v23, %v5981_v50  ;;  %v6183_v18 = vadd.f32 %v4155_v2, %v1822_v58  ;;  %v6187_v13 = vpop.xlane.xlu1 %2066  ;;  %v1835_v50 = vpop.f32.mrf.mxu1  ;;  %v4161_v24 = vld [vmem:[%s4507_s20 + $0x3e8] sm:$0xff] }
 0x343   : > { %7241 = vst [vmem:[#allocation22_spill] sm:$0xff] %v6170_v46  ;;  %v1826_v16 = vadd.f32 %v6067_v6, %v4762_v1  ;;  %2147 = vadd.xlane.f32.xlu0 %v2146_v27  ;;  %v6190_v49 = vadd.f32 %v4156_v45, %v1828_v35  ;;  %v6193_v15 = vmul.f32 0.00390625, %v5947_v8  ;;  %v2635_v6 = vmul.f32 %v6165_v44, %v6165_v44 }
 0x344   : > { %v3034_v20 = vmul.f32 %v3947_v61, %v7242_v55  ;;  %v3035_v57 = vmul.f32 %v3947_v61, %v7243_v37  ;;  %7244 = vst [vmem:[#allocation24_spill] sm:$0xff] %v6183_v18  ;;  %3952 = vrsqrt.f32 %v2890_v25  ;;  %v2463_v55 = vadd.f32 %v2279_v9, %v2278_v32  ;;  %v6200_v61 = vpop.xlane.xlu0 %2069 }
 0x345   : > { %7245 = vst [vmem:[#allocation25_spill] sm:$0xff] %v6190_v49  ;;  %v3949_v23 = vpop.eup %3948  ;;  %v2571_v27 = vmul.f32 0.00390625, %v5963_v11  ;;  %v2280_v8 = vmul.f32 %v6128_v39, %v6128_v39  ;;  %v2281_v32 = vmul.f32 %v6107_v0, %v6107_v0  ;;  %v1837_v39 = vpop.f32.mrf.mxu1 }
 0x346   : > { %v3174_v58 = vmul.f32 %v5361_v53, %v3034_v20  ;;  %v3175_v2 = vmul.f32 %v5364_v29, %v3035_v57  ;;  %v3036_v35 = vmul.f32 %v3949_v23, %v2780_v3  ;;  %v3037_v25 = vmul.f32 %v3949_v23, %v2781_v34  ;;  %2464 = vadd.xlane.f32.xlu1 %v2463_v55  ;;  %v4157_v20 = vld [vmem:[%s4507_s20 + $0x3c0] sm:$0xff]  ;;  %v6211_v45 = vpop.xlane.xlu1 %2386 }
 0x347   : > { %v6209_v37 = vadd.f32 %v4157_v20, %v1826_v16  ;;  %v2699_v11 = vsub.f32 %v2571_v27, %v2635_v6  ;;  %v1830_v55 = vadd.f32 %v6130_v42, %v4762_v1  ;;  %v2466_v23 = vadd.f32 %v2281_v32, %v2280_v8  ;;  %v7246_v20 = vld [vmem:[#allocation28_spill] sm:$0xff] }
 0x348   : > { %v3314_v57 = vadd.f32 %v5376_v26, %v3174_v58  ;;  %v3315_v9 = vadd.f32 %v5333_v31, %v3175_v2  ;;  %v3176_v3 = vmul.f32 %v5361_v53, %v3036_v35  ;;  %v3177_v34 = vmul.f32 %v5364_v29, %v3037_v25  ;;  %v6224_v27 = vpop.xlane.xlu0 %2389 }
 0x349   : > { %v2891_v58 = vadd.f32 1e-05, %v2699_v11  ;;  %v2636_v16 = vmul.f32 %v6193_v15, %v6193_v15  ;;  %v2572_v2 = vmul.f32 0.00390625, %v5976_v36  ;;  %v2149_v6 = vadd.f32 %v6183_v18, %v6170_v46  ;;  %2467 = vadd.xlane.f32.xlu0 %v2466_v23 }
 0x34a   : > { %3442 = vst [vmem:[%s5455_s9 + $0x130] sm:$0xff] %v3314_v57  ;;  %3443 = vst [vmem:[%s5455_s9 + $0x138] sm:$0xff] %v3315_v9  ;;  %v3316_v35 = vadd.f32 %v5376_v26, %v3176_v3  ;;  %v3317_v42 = vadd.f32 %v5333_v31, %v3177_v34  ;;  %v1832_v25 = vadd.f32 %v1831_v40, %v4768_v7  ;;  %v6233_v9 = vpop.xlane.xlu1 %2072  ;;  %v7247_v40 = vld [vmem:[#allocation29_spill] sm:$0xff]  ;;  %v7248_v34 = vld [vmem:[#allocation31_spill] sm:$0xff] }
 0x34b   : > { %v2152_v8 = vadd.f32 %v6190_v49, %v6209_v37  ;;  %3954 = vrsqrt.f32 %v2891_v58  ;;  %v2700_v32 = vsub.f32 %v2572_v2, %v2636_v16  ;;  %2150 = vadd.xlane.f32.xlu1 %v2149_v6  ;;  %v1836_v36 = vadd.f32 %v1835_v50, %v4762_v1 }
 0x34c   : > { %v1838_v57 = vadd.f32 %v1837_v39, %v4768_v7  ;;  %3444 = vst [vmem:[%s5455_s9 + $0x140] sm:$0xff] %v3316_v35  ;;  %3445 = vst [vmem:[%s5455_s9 + $0x148] sm:$0xff] %v3317_v42  ;;  %v2784_v11 = vsub.f32 %v7246_v20, %v6110_v30  ;;  %v2785_v3 = vsub.f32 %v7247_v40, %v6110_v30  ;;  %v6244_v58 = vmul.f32 0.00390625, %v5993_v63  ;;  %v1839_v39 = vpop.f32.mrf.mxu1  ;;  %v3951_v50 = vpop.eup %3950 }
 0x34d   : > { %v2892_v16 = vadd.f32 1e-05, %v2700_v32  ;;  %v6247_v2 = vmul.f32 0.00390625, %v6014_v43  ;;  %v2282_v6 = vmul.f32 %v6170_v46, %v6170_v46  ;;  %v2283_v30 = vmul.f32 %v6183_v18, %v6183_v18  ;;  %v6253_v35 = vpop.xlane.xlu0 %2075  ;;  %v4158_v32 = vld [vmem:[%s4507_s20 + $0x3d0] sm:$0xff]  ;;  %v4159_v43 = vld [vmem:[%s4507_s20 + $0x3d8] sm:$0xff]  ;;  %2153 = vadd.xlane.f32.xlu0 %v2152_v8  ;;  %v4160_v46 = vld [vmem:[%s4507_s20 + $0x3e0] sm:$0xff] }
 0x34e   : > { %v7249_v63 = vsub.f32 %v7239_v21, %v6080_v22  ;;  %v7250_v20 = vsub.f32 %v7240_v28, %v6080_v22  ;;  %v6262_v23 = vadd.f32 %v4158_v32, %v1830_v55  ;;  %v6265_v0 = vadd.f32 %v4159_v43, %v1832_v25  ;;  %v1841_v8 = vpop.f32.mrf.mxu1 }
 0x34f   : > { %3956 = vrsqrt.f32 %v2892_v16  ;;  %v6268_v18 = vadd.f32 %v4160_v46, %v1836_v36  ;;  %v6271_v56 = vadd.f32 %v4161_v24, %v1838_v57  ;;  %v2469_v21 = vadd.f32 %v2283_v30, %v2282_v6 }
 0x350   : > { %v3038_v42 = vmul.f32 %v3951_v50, %v7249_v63  ;;  %v3039_v40 = vmul.f32 %v3951_v50, %v7250_v20  ;;  %v6273_v63 = vpop.xlane.xlu1 %2392  ;;  %v2637_v55 = vmul.f32 %v6244_v58, %v6244_v58  ;;  %v2573_v25 = vmul.f32 0.00390625, %v6028_v59 }
 0x351   : > { %v3953_v50 = vpop.eup %3952  ;;  %2470 = vadd.xlane.f32.xlu1 %v2469_v21  ;;  %v2284_v24 = vmul.f32 %v6209_v37, %v6209_v37  ;;  %v2285_v46 = vmul.f32 %v6190_v49, %v6190_v49  ;;  %v2638_v36 = vmul.f32 %v6247_v2, %v6247_v2  ;;  %v2574_v57 = vmul.f32 0.00390625, %v6043_v51  ;;  %v6287_v16 = vpop.xlane.xlu0 %2395 }
 0x352   : > { %v3178_v22 = vmul.f32 %v5361_v53, %v3038_v42  ;;  %v3179_v28 = vmul.f32 %v5364_v29, %v3039_v40  ;;  %v3040_v30 = vmul.f32 %v3953_v50, %v2784_v11  ;;  %v3041_v42 = vmul.f32 %v3953_v50, %v2785_v3  ;;  %v7251_v3 = vld [vmem:[#allocation30_spill] sm:$0xff] }
 0x353   : > { %v2701_v20 = vsub.f32 %v2573_v25, %v2637_v55  ;;  %v2472_v40 = vadd.f32 %v2285_v46, %v2284_v24  ;;  %v1842_v32 = vadd.f32 %v1841_v8, %v4768_v7  ;;  %v2702_v43 = vsub.f32 %v2574_v57, %v2638_v36 }
 0x354   : > { %v3318_v59 = vadd.f32 %v5376_v26, %v3178_v22  ;;  %v3319_v6 = vadd.f32 %v5333_v31, %v3179_v28  ;;  %v6292_v21 = vpop.xlane.xlu1 %2078  ;;  %v3180_v49 = vmul.f32 %v5361_v53, %v3040_v30  ;;  %v3181_v51 = vmul.f32 %v5364_v29, %v3041_v42 }
 0x355   : > { %v2155_v22 = vadd.f32 %v6265_v0, %v6262_v23  ;;  %v6301_v11 = vmul.f32 0.00390625, %v6059_v33  ;;  %v2787_v28 = vsub.f32 %v7251_v3, %v6165_v44  ;;  %v2893_v7 = vadd.f32 1e-05, %v2701_v20  ;;  %2473 = vadd.xlane.f32.xlu0 %v2472_v40  ;;  %v6307_v8 = vpop.xlane.xlu0 %2081  ;;  %v7252_v33 = vld [vmem:[#allocation32_spill] sm:$0xff] }
 0x356   : > { %3446 = vst [vmem:[%s5455_s9 + $0x150] sm:$0xff] %v3318_v59  ;;  %3447 = vst [vmem:[%s5455_s9 + $0x158] sm:$0xff] %v3319_v6  ;;  %v2894_v55 = vadd.f32 1e-05, %v2702_v43  ;;  %v2158_v25 = vadd.f32 %v6271_v56, %v6268_v18  ;;  %v3320_v50 = vadd.f32 %v5376_v26, %v3180_v49  ;;  %v3321_v24 = vadd.f32 %v5333_v31, %v3181_v51  ;;  %v4162_v59 = vld [vmem:[%s4507_s20 + $0x3f8] sm:$0xff] }
 0x357   : > { %v2788_v46 = vsub.f32 %v7252_v33, %v6193_v15  ;;  %2156 = vadd.xlane.f32.xlu1 %v2155_v22  ;;  %v6314_v36 = vmul.f32 0.00390625, %v6073_v12  ;;  %v1840_v57 = vadd.f32 %v1839_v39, %v4762_v1  ;;  %3958 = vrsqrt.f32 %v2893_v7 }
 0x358   : > { %v6318_v6 = vadd.f32 %v4162_v59, %v1842_v32  ;;  %v2286_v30 = vmul.f32 %v6262_v23, %v6262_v23  ;;  %v6322_v42 = vpop.xlane.xlu1 %2398  ;;  %v3955_v49 = vpop.eup %3954  ;;  %3448 = vst [vmem:[%s5455_s9 + $0x160] sm:$0xff] %v3320_v50  ;;  %3449 = vst [vmem:[%s5455_s9 + $0x168] sm:$0xff] %v3321_v24  ;;  %3960 = vrsqrt.f32 %v2894_v55  ;;  %v2287_v20 = vmul.f32 %v6265_v0, %v6265_v0  ;;  %v4163_v59 = vld [vmem:[%s4507_s20 + $0x3f0] sm:$0xff] }
 0x359   : > { %v2639_v12 = vmul.f32 %v6301_v11, %v6301_v11  ;;  %v2575_v1 = vmul.f32 0.00390625, %v6093_v14  ;;  %v7253_v39 = vsub.f32 %v7248_v34, %v6165_v44  ;;  %v3043_v32 = vmul.f32 %v3955_v49, %v2787_v28  ;;  %2159 = vadd.xlane.f32.xlu0 %v2158_v25  ;;  %v6338_v22 = vpop.xlane.xlu0 %2401  ;;  %v7254_v44 = vld [vmem:[#allocation33_spill] sm:$0xff] }
 0x35a   : > { %v2288_v43 = vmul.f32 %v6268_v18, %v6268_v18  ;;  %v2289_v51 = vmul.f32 %v6271_v56, %v6271_v56  ;;  %v2475_v3 = vadd.f32 %v2287_v20, %v2286_v30  ;;  %v2640_v14 = vmul.f32 %v6314_v36, %v6314_v36 }
 0x35b   : > { %v3042_v40 = vmul.f32 %v3955_v49, %v7253_v39  ;;  %v2703_v7 = vsub.f32 %v2575_v1, %v2639_v12  ;;  %v2576_v55 = vmul.f32 0.00390625, %v6112_v48  ;;  %v2789_v34 = vsub.f32 %v7254_v44, %v6193_v15 }
 0x35c   : > { %v3183_v25 = vmul.f32 %v5364_v29, %v3043_v32  ;;  %v2478_v50 = vadd.f32 %v2289_v51, %v2288_v43  ;;  %v6347_v24 = vpop.xlane.xlu1 %2084  ;;  %v3957_v33 = vpop.eup %3956  ;;  %v6350_v30 = vadd.f32 %v4163_v59, %v1840_v57  ;;  %2476 = vadd.xlane.f32.xlu1 %v2475_v3  ;;  %v6353_v48 = vmul.f32 0.00390625, %v6123_v10 }
 0x35d   : > { %v3182_v28 = vmul.f32 %v5361_v53, %v3042_v40  ;;  %v2895_v49 = vadd.f32 1e-05, %v2703_v7  ;;  %v2704_v20 = vsub.f32 %v2576_v55, %v2640_v14  ;;  %v3044_v1 = vmul.f32 %v3957_v33, %v2788_v46  ;;  %v6357_v40 = vpop.xlane.xlu0 %2087  ;;  %v7255_v46 = vld [vmem:[#allocation35_spill] sm:$0xff]  ;;  %v7256_v7 = vld [vmem:[#allocation34_spill] sm:$0xff] }
 0x35e   : > { %v3323_v12 = vadd.f32 %v5333_v31, %v3183_v25  ;;  %v3045_v39 = vmul.f32 %v3957_v33, %v2789_v34  ;;  %2479 = vadd.xlane.f32.xlu0 %v2478_v50  ;;  %v2161_v57 = vadd.f32 %v6318_v6, %v6350_v30  ;;  %v6362_v43 = vmul.f32 0.00390625, %v6136_v19 }
 0x35f   : > { %v3322_v15 = vadd.f32 %v5376_v26, %v3182_v28  ;;  %3962 = vrsqrt.f32 %v2895_v49  ;;  %v2896_v32 = vadd.f32 1e-05, %v2704_v20  ;;  %v3184_v10 = vmul.f32 %v5361_v53, %v3044_v1  ;;  %v7257_v20 = vld [vmem:[#allocation36_spill] sm:$0xff] }
 0x360   : > { %3451 = vst [vmem:[%s5455_s9 + $0x178] sm:$0xff] %v3323_v12  ;;  %v3185_v51 = vmul.f32 %v5364_v29, %v3045_v39  ;;  %v2790_v3 = vsub.f32 %v7255_v46, %v6244_v58  ;;  %v2791_v14 = vsub.f32 %v7256_v7, %v6244_v58  ;;  %2162 = vadd.xlane.f32.xlu1 %v2161_v57  ;;  %v6376_v44 = vpop.xlane.xlu1 %2404  ;;  %v2577_v50 = vmul.f32 0.00390625, %v6151_v5  ;;  %v7258_v12 = vld [vmem:[#allocation37_spill] sm:$0xff] }
 0x361   : > { %3450 = vst [vmem:[%s5455_s9 + $0x170] sm:$0xff] %v3322_v15  ;;  %3964 = vrsqrt.f32 %v2896_v32  ;;  %v2290_v19 = vmul.f32 %v6350_v30, %v6350_v30  ;;  %v2291_v55 = vmul.f32 %v6318_v6, %v6318_v6  ;;  %v3324_v34 = vadd.f32 %v5376_v26, %v3184_v10  ;;  %v6398_v32 = vpop.xlane.xlu0 %2407 }
 0x362   : > { %v3325_v28 = vadd.f32 %v5333_v31, %v3185_v51  ;;  %v2641_v25 = vmul.f32 %v6353_v48, %v6353_v48  ;;  %v2642_v33 = vmul.f32 %v6362_v43, %v6362_v43  ;;  %v2578_v59 = vmul.f32 0.00390625, %v6167_v54  ;;  %v7259_v54 = vld [vmem:[#allocation39_spill] sm:$0xff] }
 0x363   : > { %v2481_v58 = vadd.f32 %v2291_v55, %v2290_v19  ;;  %v6387_v49 = vmul.f32 0.00390625, %v6187_v13  ;;  %3452 = vst [vmem:[%s5455_s9 + $0x180] sm:$0xff] %v3324_v34  ;;  %v2792_v15 = vsub.f32 %v7257_v20, %v6247_v2  ;;  %v2793_v1 = vsub.f32 %v7258_v12, %v6247_v2 }
 0x364   : > { %3453 = vst [vmem:[%s5455_s9 + $0x188] sm:$0xff] %v3325_v28  ;;  %v2705_v39 = vsub.f32 %v2577_v50, %v2641_v25  ;;  %v6396_v5 = vmul.f32 0.00390625, %v6200_v61  ;;  %v3959_v57 = vpop.eup %3958  ;;  %v2794_v10 = vsub.f32 %v7259_v54, %v6301_v11  ;;  %v2706_v13 = vsub.f32 %v2578_v59, %v2642_v33  ;;  %v6409_v20 = vpop.xlane.xlu1 %2090 }
 0x365   : > { %2482 = vadd.xlane.f32.xlu1 %v2481_v58  ;;  %v2579_v51 = vmul.f32 0.00390625, %v6211_v45  ;;  %v2580_v46 = vmul.f32 0.00390625, %v6224_v27  ;;  %v3961_v7 = vpop.eup %3960  ;;  %v3046_v19 = vmul.f32 %v3959_v57, %v2790_v3  ;;  %v3047_v55 = vmul.f32 %v3959_v57, %v2791_v14 }
 0x366   : > { %v2897_v2 = vadd.f32 1e-05, %v2705_v39  ;;  %v6405_v34 = vmul.f32 0.00390625, %v6233_v9  ;;  %v3048_v61 = vmul.f32 %v3961_v7, %v2792_v15  ;;  %v3049_v28 = vmul.f32 %v3961_v7, %v2793_v1  ;;  %v7260_v15 = vld [vmem:[#allocation38_spill] sm:$0xff]  ;;  %v6421_v39 = vpop.xlane.xlu0 %2093 }
 0x367   : > { %v2898_v25 = vadd.f32 1e-05, %v2706_v13  ;;  %v2643_v50 = vmul.f32 %v6387_v49, %v6387_v49  ;;  %v3186_v58 = vmul.f32 %v5361_v53, %v3046_v19  ;;  %v3187_v45 = vmul.f32 %v5364_v29, %v3047_v55  ;;  %v7261_v13 = vld [vmem:[#allocation40_spill] sm:$0xff] }
 0x368   : > { %3966 = vrsqrt.f32 %v2897_v2  ;;  %v2644_v27 = vmul.f32 %v6396_v5, %v6396_v5  ;;  %v3188_v9 = vmul.f32 %v5361_v53, %v3048_v61  ;;  %v3189_v3 = vmul.f32 %v5364_v29, %v3049_v28  ;;  %v7262_v61 = vld [vmem:[#allocation41_spill] sm:$0xff] }
 0x369   : > { %3968 = vrsqrt.f32 %v2898_v25  ;;  %v2707_v14 = vsub.f32 %v2579_v51, %v2643_v50  ;;  %v3326_v33 = vadd.f32 %v5376_v26, %v3186_v58  ;;  %v3327_v59 = vadd.f32 %v5333_v31, %v3187_v45  ;;  %v6439_v58 = vpop.xlane.xlu1 %2410 }
 0x36a   : > { %v2795_v12 = vsub.f32 %v7260_v15, %v6301_v11  ;;  %v2708_v1 = vsub.f32 %v2580_v46, %v2644_v27  ;;  %v3328_v57 = vadd.f32 %v5376_v26, %v3188_v9  ;;  %v3329_v54 = vadd.f32 %v5333_v31, %v3189_v3  ;;  %v7263_v27 = vld [vmem:[#allocation43_spill] sm:$0xff] }
 0x36b   : > { %v2796_v7 = vsub.f32 %v7261_v13, %v6314_v36  ;;  %v2899_v51 = vadd.f32 1e-05, %v2707_v14  ;;  %3454 = vst [vmem:[%s5455_s9 + $0x190] sm:$0xff] %v3326_v33  ;;  %3455 = vst [vmem:[%s5455_s9 + $0x198] sm:$0xff] %v3327_v59  ;;  %v6430_v2 = vmul.f32 0.00390625, %v6253_v35  ;;  %v2645_v11 = vmul.f32 %v6405_v34, %v6405_v34 }
 0x36c   : > { %v3963_v19 = vpop.eup %3962  ;;  %v2900_v55 = vadd.f32 1e-05, %v2708_v1  ;;  %v2581_v46 = vmul.f32 0.00390625, %v6273_v63  ;;  %3456 = vst [vmem:[%s5455_s9 + $0x1a0] sm:$0xff] %v3328_v57  ;;  %3457 = vst [vmem:[%s5455_s9 + $0x1a8] sm:$0xff] %v3329_v54  ;;  %v2797_v28 = vsub.f32 %v7262_v61, %v6314_v36  ;;  %v2798_v35 = vsub.f32 %v7263_v27, %v6353_v48  ;;  %v6454_v1 = vpop.xlane.xlu0 %2413 }
 0x36d   : > { %v3050_v25 = vmul.f32 %v3963_v19, %v2794_v10  ;;  %v3051_v50 = vmul.f32 %v3963_v19, %v2795_v12  ;;  %3970 = vrsqrt.f32 %v2899_v51  ;;  %v2582_v3 = vmul.f32 0.00390625, %v6287_v16  ;;  %v7265_v19 = vld [vmem:[#allocation44_spill] sm:$0xff] }
 0x36e   : > { %v3965_v45 = vpop.eup %3964  ;;  %3972 = vrsqrt.f32 %v2900_v55  ;;  %v2709_v9 = vsub.f32 %v2581_v46, %v2645_v11  ;;  %v2646_v59 = vmul.f32 %v6430_v2, %v6430_v2  ;;  %v6449_v15 = vmul.f32 0.00390625, %v6292_v21  ;;  %v7266_v46 = vld [vmem:[#allocation45_spill] sm:$0xff] }
 0x36f   : > { %v3190_v63 = vmul.f32 %v5361_v53, %v3050_v25  ;;  %v3191_v14 = vmul.f32 %v5364_v29, %v3051_v50  ;;  %v3052_v33 = vmul.f32 %v3965_v45, %v2796_v7  ;;  %v3053_v36 = vmul.f32 %v3965_v45, %v2797_v28  ;;  %v7264_v7 = vld [vmem:[#allocation42_spill] sm:$0xff]  ;;  %v7267_v28 = vld [vmem:[#allocation47_spill] sm:$0xff] }
 0x370   : > { %v2901_v10 = vadd.f32 1e-05, %v2709_v9  ;;  %v6452_v12 = vmul.f32 0.00390625, %v6307_v8  ;;  %v2799_v51 = vsub.f32 %v7264_v7, %v6353_v48  ;;  %v2800_v21 = vsub.f32 %v7265_v19, %v6362_v43  ;;  %v6472_v48 = vpop.xlane.xlu1 %2096  ;;  %v7268_v50 = vld [vmem:[#allocation46_spill] sm:$0xff]  ;;  %v7271_v19 = vld [vmem:[#allocation51_spill] sm:$0xff] }
 0x371   : > { %v3330_v16 = vadd.f32 %v5376_v26, %v3190_v63  ;;  %v3331_v57 = vadd.f32 %v5333_v31, %v3191_v14  ;;  %v3192_v54 = vmul.f32 %v5361_v53, %v3052_v33  ;;  %v3193_v13 = vmul.f32 %v5364_v29, %v3053_v36  ;;  %v7269_v14 = vld [vmem:[#allocation48_spill] sm:$0xff]  ;;  %v7270_v33 = vld [vmem:[#allocation49_spill] sm:$0xff] }
 0x372   : > { %3974 = vrsqrt.f32 %v2901_v10  ;;  %v2710_v8 = vsub.f32 %v2582_v3, %v2646_v59  ;;  %v2801_v61 = vsub.f32 %v7266_v46, %v6362_v43  ;;  %v2802_v25 = vsub.f32 %v7267_v28, %v6387_v49 }
 0x373   : > { %3458 = vst [vmem:[%s5455_s9 + $0x1b0] sm:$0xff] %v3330_v16  ;;  %3459 = vst [vmem:[%s5455_s9 + $0x1b8] sm:$0xff] %v3331_v57  ;;  %v3332_v55 = vadd.f32 %v5376_v26, %v3192_v54  ;;  %v3333_v11 = vadd.f32 %v5333_v31, %v3193_v13  ;;  %v2803_v45 = vsub.f32 %v7268_v50, %v6387_v49  ;;  %v2583_v3 = vmul.f32 0.00390625, %v6322_v42  ;;  %v6488_v42 = vpop.xlane.xlu0 %2099 }
 0x374   : > { %v2902_v27 = vadd.f32 1e-05, %v2710_v8  ;;  %v2647_v9 = vmul.f32 %v6449_v15, %v6449_v15  ;;  %v2804_v43 = vsub.f32 %v7269_v14, %v6396_v5  ;;  %v2805_v36 = vsub.f32 %v7270_v33, %v6396_v5 }
 0x375   : > { %v3967_v63 = vpop.eup %3966  ;;  %3460 = vst [vmem:[%s5455_s9 + $0x1c0] sm:$0xff] %v3332_v55  ;;  %3461 = vst [vmem:[%s5455_s9 + $0x1c8] sm:$0xff] %v3333_v11  ;;  %v2648_v10 = vmul.f32 %v6452_v12, %v6452_v12  ;;  %v2584_v49 = vmul.f32 0.00390625, %v6338_v22  ;;  %v2806_v8 = vsub.f32 %v7271_v19, %v6405_v34  ;;  %v6495_v22 = vmul.f32 0.00390625, %v6347_v24 }
 0x376   : > { %v3969_v59 = vpop.eup %3968  ;;  %v3054_v16 = vmul.f32 %v3967_v63, %v2798_v35  ;;  %v3055_v57 = vmul.f32 %v3967_v63, %v2799_v51  ;;  %3976 = vrsqrt.f32 %v2902_v27  ;;  %v2711_v54 = vsub.f32 %v2583_v3, %v2647_v9  ;;  %v6502_v28 = vpop.xlane.xlu1 %2416 }
 0x377   : > { %v3056_v13 = vmul.f32 %v3969_v59, %v2800_v21  ;;  %v3057_v7 = vmul.f32 %v3969_v59, %v2801_v61  ;;  %v2712_v55 = vsub.f32 %v2584_v49, %v2648_v10  ;;  %v6500_v61 = vmul.f32 0.00390625, %v6357_v40 }
 0x378   : > { %v3194_v5 = vmul.f32 %v5361_v53, %v3054_v16  ;;  %v3195_v11 = vmul.f32 %v5364_v29, %v3055_v57  ;;  %v2903_v46 = vadd.f32 1e-05, %v2711_v54  ;;  %v2585_v24 = vmul.f32 0.00390625, %v6376_v44  ;;  %v7272_v54 = vld [vmem:[#allocation50_spill] sm:$0xff] }
 0x379   : > { %v3196_v35 = vmul.f32 %v5361_v53, %v3056_v13  ;;  %v3197_v51 = vmul.f32 %v5364_v29, %v3057_v7  ;;  %v2904_v21 = vadd.f32 1e-05, %v2712_v55  ;;  %v2649_v59 = vmul.f32 %v6495_v22, %v6495_v22  ;;  %v6513_v16 = vpop.xlane.xlu0 %2419 }
 0x37a   : > { %v3971_v50 = vpop.eup %3970  ;;  %v3334_v27 = vadd.f32 %v5376_v26, %v3194_v5  ;;  %v3335_v9 = vadd.f32 %v5333_v31, %v3195_v11  ;;  %3978 = vrsqrt.f32 %v2903_v46  ;;  %v2807_v13 = vsub.f32 %v7272_v54, %v6405_v34 }
 0x37b   : > { %v3973_v3 = vpop.eup %3972  ;;  %v3336_v63 = vadd.f32 %v5376_v26, %v3196_v35  ;;  %v3337_v14 = vadd.f32 %v5333_v31, %v3197_v51  ;;  %v3058_v33 = vmul.f32 %v3971_v50, %v2802_v25  ;;  %v3059_v40 = vmul.f32 %v3971_v50, %v2803_v45  ;;  %v6526_v19 = vpop.xlane.xlu1 %2102  ;;  %v7273_v50 = vld [vmem:[#allocation52_spill] sm:$0xff] }
 0x37c   : > { %3462 = vst [vmem:[%s5455_s9 + $0x1d0] sm:$0xff] %v3334_v27  ;;  %3463 = vst [vmem:[%s5455_s9 + $0x1d8] sm:$0xff] %v3335_v9  ;;  %v3060_v10 = vmul.f32 %v3973_v3, %v2804_v43  ;;  %v3061_v49 = vmul.f32 %v3973_v3, %v2805_v36  ;;  %3980 = vrsqrt.f32 %v2904_v21  ;;  %v2650_v25 = vmul.f32 %v6500_v61, %v6500_v61 }
 0x37d   : > { %3464 = vst [vmem:[%s5455_s9 + $0x1e0] sm:$0xff] %v3336_v63  ;;  %3465 = vst [vmem:[%s5455_s9 + $0x1e8] sm:$0xff] %v3337_v14  ;;  %v3198_v44 = vmul.f32 %v5361_v53, %v3058_v33  ;;  %v3199_v57 = vmul.f32 %v5364_v29, %v3059_v40  ;;  %v2586_v45 = vmul.f32 0.00390625, %v6398_v32  ;;  %v2713_v7 = vsub.f32 %v2585_v24, %v2649_v59  ;;  %v7275_v33 = vld [vmem:[#allocation55_spill] sm:$0xff]  ;;  %v7276_v59 = vld [vmem:[#allocation54_spill] sm:$0xff] }
 0x37e   : > { %v3200_v43 = vmul.f32 %v5361_v53, %v3060_v10  ;;  %v3201_v36 = vmul.f32 %v5364_v29, %v3061_v49  ;;  %v6531_v32 = vmul.f32 0.00390625, %v6409_v20  ;;  %v2808_v27 = vsub.f32 %v7273_v50, %v6430_v2  ;;  %v7274_v20 = vld [vmem:[#allocation53_spill] sm:$0xff]  ;;  %v2106_v10 = vpop.xlane.xlu0 %2105 }
 0x37f   : > { %v3975_v55 = vpop.eup %3974  ;;  %v3338_v5 = vadd.f32 %v5376_v26, %v3198_v44  ;;  %v3339_v11 = vadd.f32 %v5333_v31, %v3199_v57  ;;  %v2714_v46 = vsub.f32 %v2586_v45, %v2650_v25  ;;  %v2905_v9 = vadd.f32 1e-05, %v2713_v7 }
 0x380   : > { %v3340_v35 = vadd.f32 %v5376_v26, %v3200_v43  ;;  %v3341_v51 = vadd.f32 %v5333_v31, %v3201_v36  ;;  %v3062_v21 = vmul.f32 %v3975_v55, %v2806_v8  ;;  %v3063_v34 = vmul.f32 %v3975_v55, %v2807_v13  ;;  %v7277_v55 = vld [vmem:[#allocation56_spill] sm:$0xff] }
 0x381   : > { %3466 = vst [vmem:[%s5455_s9 + $0x1f0] sm:$0xff] %v3338_v5  ;;  %3467 = vst [vmem:[%s5455_s9 + $0x1f8] sm:$0xff] %v3339_v11  ;;  %v2906_v24 = vadd.f32 1e-05, %v2714_v46  ;;  %v6540_v3 = vmul.f32 0.00390625, %v6421_v39  ;;  %v2809_v63 = vsub.f32 %v7274_v20, %v6430_v2  ;;  %v2810_v40 = vsub.f32 %v7275_v33, %v6449_v15  ;;  %v7278_v11 = vld [vmem:[#allocation57_spill] sm:$0xff] }
 0x382   : > { %3468 = vst [vmem:[%s5455_s9 + $0x200] sm:$0xff] %v3340_v35  ;;  %3469 = vst [vmem:[%s5455_s9 + $0x208] sm:$0xff] %v3341_v51  ;;  %v3202_v14 = vmul.f32 %v5361_v53, %v3062_v21  ;;  %v3203_v8 = vmul.f32 %v5364_v29, %v3063_v34  ;;  %v2811_v39 = vsub.f32 %v7276_v59, %v6449_v15  ;;  %3982 = vrsqrt.f32 %v2905_v9 }
 0x383   : > { %v3977_v49 = vpop.eup %3976  ;;  %v2651_v44 = vmul.f32 %v6531_v32, %v6531_v32  ;;  %v2587_v2 = vmul.f32 0.00390625, %v6439_v58  ;;  %v2423_v36 = vpop.xlane.xlu1 %2422  ;;  %3984 = vrsqrt.f32 %v2906_v24  ;;  %v2652_v13 = vmul.f32 %v6540_v3, %v6540_v3 }
 0x384   : > { %v3342_v57 = vadd.f32 %v5376_v26, %v3202_v14  ;;  %v3343_v25 = vadd.f32 %v5333_v31, %v3203_v8  ;;  %v3064_v45 = vmul.f32 %v3977_v49, %v2808_v27  ;;  %v3065_v43 = vmul.f32 %v3977_v49, %v2809_v63 }
 0x385   : > { %v2715_v54 = vsub.f32 %v2587_v2, %v2651_v44  ;;  %v2588_v15 = vmul.f32 0.00390625, %v6454_v1  ;;  %v2812_v5 = vsub.f32 %v7277_v55, %v6452_v12  ;;  %v2813_v46 = vsub.f32 %v7278_v11, %v6452_v12  ;;  %v7279_v12 = vld [vmem:[#allocation59_spill] sm:$0xff]  ;;  %v7280_v11 = vld [vmem:[#allocation58_spill] sm:$0xff] }
 0x386   : > { %3470 = vst [vmem:[%s5455_s9 + $0x210] sm:$0xff] %v3342_v57  ;;  %3471 = vst [vmem:[%s5455_s9 + $0x218] sm:$0xff] %v3343_v25  ;;  %v3204_v7 = vmul.f32 %v5361_v53, %v3064_v45  ;;  %v3205_v58 = vmul.f32 %v5364_v29, %v3065_v43  ;;  %v6569_v34 = vmul.f32 0.00390625, %v6472_v48  ;;  %v6572_v1 = vmul.f32 0.00390625, %v6488_v42 }
 0x387   : > { %v3979_v35 = vpop.eup %3978  ;;  %v2907_v51 = vadd.f32 1e-05, %v2715_v54  ;;  %v2716_v21 = vsub.f32 %v2588_v15, %v2652_v13  ;;  %v2426_v20 = vpop.xlane.xlu0 %2425  ;;  %v2814_v14 = vsub.f32 %v7279_v12, %v6495_v22  ;;  %v2589_v33 = vmul.f32 0.00390625, %v6502_v28 }
 0x388   : > { %v3344_v50 = vadd.f32 %v5376_v26, %v3204_v7  ;;  %v3345_v27 = vadd.f32 %v5333_v31, %v3205_v58  ;;  %v3066_v9 = vmul.f32 %v3979_v35, %v2810_v40  ;;  %v3067_v24 = vmul.f32 %v3979_v35, %v2811_v39  ;;  %v2109_v40 = vpop.xlane.xlu1 %2108  ;;  %v7281_v35 = vld [vmem:[#allocation60_spill] sm:$0xff] }
 0x389   : > { %v3981_v63 = vpop.eup %3980  ;;  %3986 = vrsqrt.f32 %v2907_v51  ;;  %v2908_v8 = vadd.f32 1e-05, %v2716_v21  ;;  %v2653_v39 = vmul.f32 %v6569_v34, %v6569_v34  ;;  %v2654_v44 = vmul.f32 %v6572_v1, %v6572_v1 }
 0x38a   : > { %3472 = vst [vmem:[%s5455_s9 + $0x220] sm:$0xff] %v3344_v50  ;;  %3473 = vst [vmem:[%s5455_s9 + $0x228] sm:$0xff] %v3345_v27  ;;  %v3206_v48 = vmul.f32 %v5361_v53, %v3066_v9  ;;  %v3207_v42 = vmul.f32 %v5364_v29, %v3067_v24  ;;  %v3068_v49 = vmul.f32 %v3981_v63, %v2812_v5  ;;  %v2590_v28 = vmul.f32 0.00390625, %v6513_v16  ;;  %v7283_v9 = vld [vmem:[#allocation63_spill] sm:$0xff] }
 0x38b   : > { %v3069_v59 = vmul.f32 %v3981_v63, %v2813_v46  ;;  %3988 = vrsqrt.f32 %v2908_v8  ;;  %v2112_v43 = vpop.xlane.xlu0 %2111  ;;  %v2717_v54 = vsub.f32 %v2589_v33, %v2653_v39  ;;  %v6593_v15 = vmul.f32 0.00390625, %v6526_v19  ;;  %v7284_v8 = vld [vmem:[#allocation62_spill] sm:$0xff] }
 0x38c   : > { %v3346_v2 = vadd.f32 %v5376_v26, %v3206_v48  ;;  %v3347_v57 = vadd.f32 %v5333_v31, %v3207_v42  ;;  %v3208_v25 = vmul.f32 %v5361_v53, %v3068_v49  ;;  %v2718_v13 = vsub.f32 %v2590_v28, %v2654_v44 }
 0x38d   : > { %v3209_v45 = vmul.f32 %v5364_v29, %v3069_v59  ;;  %v6595_v7 = vmul.f32 0.00390625, %v2106_v10  ;;  %v2591_v55 = vmul.f32 0.00390625, %v2423_v36  ;;  %v2592_v5 = vmul.f32 0.00390625, %v2426_v20  ;;  %v7282_v10 = vld [vmem:[#allocation61_spill] sm:$0xff] }
 0x38e   : > { %3474 = vst [vmem:[%s5455_s9 + $0x230] sm:$0xff] %v3346_v2  ;;  %3475 = vst [vmem:[%s5455_s9 + $0x238] sm:$0xff] %v3347_v57  ;;  %v3348_v16 = vadd.f32 %v5376_v26, %v3208_v25  ;;  %v2815_v46 = vsub.f32 %v7280_v11, %v6495_v22  ;;  %v2816_v51 = vsub.f32 %v7281_v35, %v6500_v61  ;;  %v2909_v21 = vadd.f32 1e-05, %v2717_v54 }
 0x38f   : > { %v3349_v58 = vadd.f32 %v5333_v31, %v3209_v45  ;;  %v2910_v50 = vadd.f32 1e-05, %v2718_v13  ;;  %v3983_v19 = vpop.eup %3982  ;;  %v2817_v27 = vsub.f32 %v7282_v10, %v6500_v61  ;;  %v2818_v24 = vsub.f32 %v7283_v9, %v6531_v32  ;;  %v2429_v20 = vpop.xlane.xlu1 %2428 }
 0x390   : > { %3476 = vst [vmem:[%s5455_s9 + $0x240] sm:$0xff] %v3348_v16  ;;  %v2655_v36 = vmul.f32 %v6593_v15, %v6593_v15  ;;  %v2656_v22 = vmul.f32 %v6595_v7, %v6595_v7  ;;  %v3070_v63 = vmul.f32 %v3983_v19, %v2814_v14  ;;  %v3071_v12 = vmul.f32 %v3983_v19, %v2815_v46  ;;  %v3985_v48 = vpop.eup %3984  ;;  %v2432_v59 = vpop.xlane.xlu0 %2431  ;;  %v7285_v14 = vld [vmem:[#allocation65_spill] sm:$0xff]  ;;  %v7287_v46 = vld [vmem:[#allocation67_spill] sm:$0xff] }
 0x391   : > { %3477 = vst [vmem:[%s5455_s9 + $0x248] sm:$0xff] %v3349_v58  ;;  %v2819_v33 = vsub.f32 %v7284_v8, %v6531_v32  ;;  %3990 = vrsqrt.f32 %v2909_v21  ;;  %v6617_v49 = vmul.f32 0.00390625, %v2109_v40  ;;  %v3072_v28 = vmul.f32 %v3985_v48, %v2816_v51 }
 0x392   : > { %3992 = vrsqrt.f32 %v2910_v50  ;;  %v2719_v42 = vsub.f32 %v2591_v55, %v2655_v36  ;;  %v2720_v61 = vsub.f32 %v2592_v5, %v2656_v22  ;;  %v3210_v39 = vmul.f32 %v5361_v53, %v3070_v63  ;;  %v7286_v5 = vld [vmem:[#allocation64_spill] sm:$0xff] }
 0x393   : > { %v3211_v44 = vmul.f32 %v5364_v29, %v3071_v12  ;;  %v3073_v2 = vmul.f32 %v3985_v48, %v2817_v27  ;;  %v2820_v57 = vsub.f32 %v7285_v14, %v6540_v3  ;;  %v6623_v45 = vmul.f32 0.00390625, %v2112_v43  ;;  %v2115_v54 = vpop.xlane.xlu1 %2114 }
 0x394   : > { %v2911_v32 = vadd.f32 1e-05, %v2719_v42  ;;  %v2912_v25 = vadd.f32 1e-05, %v2720_v61  ;;  %v3350_v40 = vadd.f32 %v5376_v26, %v3210_v39  ;;  %v3212_v16 = vmul.f32 %v5361_v53, %v3072_v28  ;;  %v2118_v51 = vpop.xlane.xlu0 %2117  ;;  %v7288_v28 = vld [vmem:[#allocation66_spill] sm:$0xff] }
 0x395   : > { %v3351_v13 = vadd.f32 %v5333_v31, %v3211_v44  ;;  %v3213_v58 = vmul.f32 %v5364_v29, %v3073_v2  ;;  %v2821_v11 = vsub.f32 %v7286_v5, %v6540_v3  ;;  %v2822_v35 = vsub.f32 %v7287_v46, %v6569_v34 }
 0x396   : > { %v3987_v55 = vpop.eup %3986  ;;  %3994 = vrsqrt.f32 %v2911_v32  ;;  %v2657_v43 = vmul.f32 %v6617_v49, %v6617_v49  ;;  %3478 = vst [vmem:[%s5455_s9 + $0x250] sm:$0xff] %v3350_v40  ;;  %v3352_v21 = vadd.f32 %v5376_v26, %v3212_v16  ;;  %v2593_v3 = vmul.f32 0.00390625, %v2429_v20 }
 0x397   : > { %3479 = vst [vmem:[%s5455_s9 + $0x258] sm:$0xff] %v3351_v13  ;;  %v3353_v50 = vadd.f32 %v5333_v31, %v3213_v58  ;;  %v3074_v19 = vmul.f32 %v3987_v55, %v2818_v24  ;;  %v3075_v10 = vmul.f32 %v3987_v55, %v2819_v33  ;;  %3996 = vrsqrt.f32 %v2912_v25  ;;  %v2435_v48 = vpop.xlane.xlu1 %2434 }
 0x398   : > { %v3989_v27 = vpop.eup %3988  ;;  %v2658_v9 = vmul.f32 %v6623_v45, %v6623_v45  ;;  %v2594_v36 = vmul.f32 0.00390625, %v2432_v59  ;;  %3480 = vst [vmem:[%s5455_s9 + $0x260] sm:$0xff] %v3352_v21  ;;  %v2721_v24 = vsub.f32 %v2593_v3, %v2657_v43  ;;  %v6645_v42 = vmul.f32 0.00390625, %v2115_v54 }
 0x399   : > { %3481 = vst [vmem:[%s5455_s9 + $0x268] sm:$0xff] %v3353_v50  ;;  %v3214_v22 = vmul.f32 %v5361_v53, %v3074_v19  ;;  %v3215_v63 = vmul.f32 %v5364_v29, %v3075_v10  ;;  %v3076_v12 = vmul.f32 %v3989_v27, %v2820_v57  ;;  %v3077_v8 = vmul.f32 %v3989_v27, %v2821_v11  ;;  %v7289_v10 = vld [vmem:[#allocation68_spill] sm:$0xff] }
 0x39a   : > { %v2722_v33 = vsub.f32 %v2594_v36, %v2658_v9  ;;  %v6647_v20 = vmul.f32 0.00390625, %v2118_v51  ;;  %v2823_v2 = vsub.f32 %v7288_v28, %v6569_v34  ;;  %v2824_v14 = vsub.f32 %v5447_v60, %v6572_v1  ;;  %v2438_v25 = vpop.xlane.xlu0 %2437  ;;  %v7290_v36 = vld [vmem:[#allocation69_spill] sm:$0xff] }
 0x39b   : > { %v3354_v61 = vadd.f32 %v5376_v26, %v3214_v22  ;;  %v3355_v59 = vadd.f32 %v5333_v31, %v3215_v63  ;;  %v3216_v39 = vmul.f32 %v5361_v53, %v3076_v12  ;;  %v3217_v44 = vmul.f32 %v5364_v29, %v3077_v8  ;;  %v2121_v5 = vpop.xlane.xlu1 %2120 }
 0x39c   : > { %v2913_v57 = vadd.f32 1e-05, %v2721_v24  ;;  %v2914_v32 = vadd.f32 1e-05, %v2722_v33  ;;  %v2825_v13 = vsub.f32 %v5438_v41, %v6572_v1  ;;  %v2826_v34 = vsub.f32 %v5491_v52, %v6593_v15 }
 0x39d   : > { %3482 = vst [vmem:[%s5455_s9 + $0x270] sm:$0xff] %v3354_v61  ;;  %3483 = vst [vmem:[%s5455_s9 + $0x278] sm:$0xff] %v3355_v59  ;;  %v3356_v54 = vadd.f32 %v5376_v26, %v3216_v39  ;;  %v3357_v40 = vadd.f32 %v5333_v31, %v3217_v44  ;;  %v2659_v60 = vmul.f32 %v6645_v42, %v6645_v42  ;;  %v2595_v58 = vmul.f32 0.00390625, %v2435_v48 }
 0x39e   : > { %v3991_v16 = vpop.eup %3990  ;;  %3998 = vrsqrt.f32 %v2913_v57  ;;  %v2660_v55 = vmul.f32 %v6647_v20, %v6647_v20  ;;  %v2596_v41 = vmul.f32 0.00390625, %v2438_v25  ;;  %v2827_v52 = vsub.f32 %v5494_v47, %v6593_v15 }
 0x39f   : > { %v3993_v11 = vpop.eup %3992  ;;  %3484 = vst [vmem:[%s5455_s9 + $0x280] sm:$0xff] %v3356_v54  ;;  %3485 = vst [vmem:[%s5455_s9 + $0x288] sm:$0xff] %v3357_v40  ;;  %v3078_v46 = vmul.f32 %v3991_v16, %v2822_v35  ;;  %v3079_v43 = vmul.f32 %v3991_v16, %v2823_v2  ;;  %4000 = vrsqrt.f32 %v2914_v32  ;;  %v2723_v21 = vsub.f32 %v2595_v58, %v2659_v60  ;;  %v2124_v47 = vpop.xlane.xlu0 %2123 }
 0x3a0   : > { %v3080_v1 = vmul.f32 %v3993_v11, %v2824_v14  ;;  %v3081_v51 = vmul.f32 %v3993_v11, %v2825_v13  ;;  %v2828_v27 = vsub.f32 %v7289_v10, %v6595_v7  ;;  %v2724_v3 = vsub.f32 %v2596_v41, %v2660_v55 }
 0x3a1   : > { %v3218_v50 = vmul.f32 %v5361_v53, %v3078_v46  ;;  %v3219_v19 = vmul.f32 %v5364_v29, %v3079_v43  ;;  %v2829_v22 = vsub.f32 %v7290_v36, %v6595_v7  ;;  %v2915_v63 = vadd.f32 1e-05, %v2723_v21  ;;  %v7291_v43 = vld [vmem:[#allocation70_spill] sm:$0xff]  ;;  %v7293_v21 = vld [vmem:[#allocation72_spill] sm:$0xff] }
 0x3a2   : > { %v3220_v9 = vmul.f32 %v5361_v53, %v3080_v1  ;;  %v3221_v35 = vmul.f32 %v5364_v29, %v3081_v51  ;;  %v2916_v48 = vadd.f32 1e-05, %v2724_v3  ;;  %v6683_v24 = vmul.f32 0.00390625, %v2121_v5  ;;  %v7292_v1 = vld [vmem:[#allocation71_spill] sm:$0xff] }
 0x3a3   : > { %v3995_v15 = vpop.eup %3994  ;;  %v3358_v12 = vadd.f32 %v5376_v26, %v3218_v50  ;;  %v3359_v8 = vadd.f32 %v5333_v31, %v3219_v19  ;;  %v2441_v44 = vpop.xlane.xlu1 %2440  ;;  %4002 = vrsqrt.f32 %v2915_v63  ;;  %v6689_v28 = vmul.f32 0.00390625, %v2124_v47  ;;  %v7294_v19 = vld [vmem:[#allocation73_spill] sm:$0xff] }
 0x3a4   : > { %v3360_v33 = vadd.f32 %v5376_v26, %v3220_v9  ;;  %v3361_v61 = vadd.f32 %v5333_v31, %v3221_v35  ;;  %v3082_v59 = vmul.f32 %v3995_v15, %v2826_v34  ;;  %v3083_v39 = vmul.f32 %v3995_v15, %v2827_v52  ;;  %v3997_v7 = vpop.eup %3996 }
 0x3a5   : > { %3486 = vst [vmem:[%s5455_s9 + $0x290] sm:$0xff] %v3358_v12  ;;  %3487 = vst [vmem:[%s5455_s9 + $0x298] sm:$0xff] %v3359_v8  ;;  %v3084_v57 = vmul.f32 %v3997_v7, %v2828_v27  ;;  %v3085_v32 = vmul.f32 %v3997_v7, %v2829_v22  ;;  %4004 = vrsqrt.f32 %v2916_v48  ;;  %v2661_v25 = vmul.f32 %v6683_v24, %v6683_v24  ;;  %v7295_v7 = vld [vmem:[#allocation74_spill] sm:$0xff] }
 0x3a6   : > { %3488 = vst [vmem:[%s5455_s9 + $0x2a0] sm:$0xff] %v3360_v33  ;;  %3489 = vst [vmem:[%s5455_s9 + $0x2a8] sm:$0xff] %v3361_v61  ;;  %v3222_v2 = vmul.f32 %v5361_v53, %v3082_v59  ;;  %v3223_v14 = vmul.f32 %v5364_v29, %v3083_v39  ;;  %v2597_v54 = vmul.f32 0.00390625, %v2441_v44  ;;  %v2662_v55 = vmul.f32 %v6689_v28, %v6689_v28 }
 0x3a7   : > { %v3224_v34 = vmul.f32 %v5361_v53, %v3084_v57  ;;  %v3225_v16 = vmul.f32 %v5364_v29, %v3085_v32  ;;  %v2444_v60 = vpop.xlane.xlu0 %2443  ;;  %v2830_v41 = vsub.f32 %v7291_v43, %v6617_v49  ;;  %v2831_v51 = vsub.f32 %v7292_v1, %v6617_v49  ;;  %v2127_v9 = vpop.xlane.xlu1 %2126 }
 0x3a8   : > { %v3362_v40 = vadd.f32 %v5376_v26, %v3222_v2  ;;  %v3363_v13 = vadd.f32 %v5333_v31, %v3223_v14  ;;  %v2725_v58 = vsub.f32 %v2597_v54, %v2661_v25  ;;  %v2598_v5 = vmul.f32 0.00390625, %v2444_v60  ;;  %v7296_v14 = vld [vmem:[#allocation75_spill] sm:$0xff]  ;;  %v7298_v60 = vld [vmem:[#allocation77_spill] sm:$0xff] }
 0x3a9   : > { %v3364_v11 = vadd.f32 %v5376_v26, %v3224_v34  ;;  %v3365_v46 = vadd.f32 %v5333_v31, %v3225_v16  ;;  %v2832_v50 = vsub.f32 %v7293_v21, %v6623_v45  ;;  %v2833_v10 = vsub.f32 %v7294_v19, %v6623_v45  ;;  %v7297_v34 = vld [vmem:[#allocation76_spill] sm:$0xff] }
 0x3aa   : > { %3490 = vst [vmem:[%s5455_s9 + $0x2b0] sm:$0xff] %v3362_v40  ;;  %3491 = vst [vmem:[%s5455_s9 + $0x2b8] sm:$0xff] %v3363_v13  ;;  %v2917_v27 = vadd.f32 1e-05, %v2725_v58  ;;  %v2726_v3 = vsub.f32 %v2598_v5, %v2662_v55  ;;  %v6719_v8 = vmul.f32 0.00390625, %v2127_v9  ;;  %v2834_v2 = vsub.f32 %v7295_v7, %v6645_v42 }
 0x3ab   : > { %v3999_v52 = vpop.eup %3998  ;;  %3492 = vst [vmem:[%s5455_s9 + $0x2c0] sm:$0xff] %v3364_v11  ;;  %3493 = vst [vmem:[%s5455_s9 + $0x2c8] sm:$0xff] %v3365_v46  ;;  %v2130_v45 = vpop.xlane.xlu0 %2129  ;;  %v2835_v57 = vsub.f32 %v7296_v14, %v6645_v42  ;;  %v2836_v16 = vsub.f32 %v7297_v34, %v6647_v20  ;;  %v2837_v58 = vsub.f32 %v7298_v60, %v6647_v20 }
 0x3ac   : > { %v4001_v35 = vpop.eup %4000  ;;  %v3086_v36 = vmul.f32 %v3999_v52, %v2830_v41  ;;  %v3087_v22 = vmul.f32 %v3999_v52, %v2831_v51  ;;  %4006 = vrsqrt.f32 %v2917_v27  ;;  %v2918_v15 = vadd.f32 1e-05, %v2726_v3 }
 0x3ad   : > { %v3088_v63 = vmul.f32 %v4001_v35, %v2832_v50  ;;  %v3089_v47 = vmul.f32 %v4001_v35, %v2833_v10  ;;  %v6733_v54 = vmul.f32 0.00390625, %v2130_v45  ;;  %v2663_v40 = vmul.f32 %v6719_v8, %v6719_v8 }
 0x3ae   : > { %v3226_v49 = vmul.f32 %v5361_v53, %v3086_v36  ;;  %v3227_v12 = vmul.f32 %v5364_v29, %v3087_v22  ;;  %4008 = vrsqrt.f32 %v2918_v15  ;;  %v2839_v15 = vsub.f32 %v5758_v38, %v6683_v24 }
 0x3af   : > { %v3228_v48 = vmul.f32 %v5361_v53, %v3088_v63  ;;  %v3229_v33 = vmul.f32 %v5364_v29, %v3089_v47  ;;  %v2447_v32 = vpop.xlane.xlu1 %2446  ;;  %v2664_v50 = vmul.f32 %v6733_v54, %v6733_v54  ;;  %v2838_v47 = vsub.f32 %v5747_v4, %v6683_v24 }
 0x3b0   : > { %v3366_v61 = vadd.f32 %v5376_v26, %v3226_v49  ;;  %v3367_v59 = vadd.f32 %v5333_v31, %v3227_v12  ;;  %v4003_v25 = vpop.eup %4002  ;;  %v2599_v13 = vmul.f32 0.00390625, %v2447_v32 }
 0x3b1   : > { %v3368_v39 = vadd.f32 %v5376_v26, %v3228_v48  ;;  %v3369_v44 = vadd.f32 %v5333_v31, %v3229_v33  ;;  %v3090_v55 = vmul.f32 %v4003_v25, %v2834_v2  ;;  %v3091_v42 = vmul.f32 %v4003_v25, %v2835_v57  ;;  %v7299_v33 = vld [vmem:[#allocation78_spill] sm:$0xff] }
 0x3b2   : > { %3494 = vst [vmem:[%s5455_s9 + $0x2d0] sm:$0xff] %v3366_v61  ;;  %3495 = vst [vmem:[%s5455_s9 + $0x2d8] sm:$0xff] %v3367_v59  ;;  %v4005_v5 = vpop.eup %4004  ;;  %v2727_v11 = vsub.f32 %v2599_v13, %v2663_v40  ;;  %v2840_v48 = vsub.f32 %v5761_v17, %v6689_v28  ;;  %v2841_v61 = vsub.f32 %v7299_v33, %v6689_v28 }
 0x3b3   : > { %3496 = vst [vmem:[%s5455_s9 + $0x2e0] sm:$0xff] %v3368_v39  ;;  %3497 = vst [vmem:[%s5455_s9 + $0x2e8] sm:$0xff] %v3369_v44  ;;  %v2450_v46 = vpop.xlane.xlu0 %2449  ;;  %v3230_v43 = vmul.f32 %v5361_v53, %v3090_v55  ;;  %v3231_v41 = vmul.f32 %v5364_v29, %v3091_v42  ;;  %v3092_v1 = vmul.f32 %v4005_v5, %v2836_v16  ;;  %v2133_v52 = vpop.xlane.xlu1 %2132 }
 0x3b4   : > { %v3093_v51 = vmul.f32 %v4005_v5, %v2837_v58  ;;  %v2919_v21 = vadd.f32 1e-05, %v2727_v11  ;;  %v2600_v19 = vmul.f32 0.00390625, %v2450_v46  ;;  %v6751_v35 = vmul.f32 0.00390625, %v2133_v52 }
 0x3b5   : > { %v3370_v20 = vadd.f32 %v5376_v26, %v3230_v43  ;;  %v3371_v10 = vadd.f32 %v5333_v31, %v3231_v41  ;;  %v3232_v27 = vmul.f32 %v5361_v53, %v3092_v1  ;;  %v7300_v41 = vld [vmem:[#allocation79_spill] sm:$0xff] }
 0x3b6   : > { %v3233_v3 = vmul.f32 %v5364_v29, %v3093_v51  ;;  %4010 = vrsqrt.f32 %v2919_v21  ;;  %v2728_v9 = vsub.f32 %v2600_v19, %v2664_v50  ;;  %v2665_v4 = vmul.f32 %v6751_v35, %v6751_v35  ;;  %v7301_v51 = vld [vmem:[#allocation80_spill] sm:$0xff] }
 0x3b7   : > { %v2136_v36 = vpop.xlane.xlu0 %2135  ;;  %3498 = vst [vmem:[%s5455_s9 + $0x2f0] sm:$0xff] %v3370_v20  ;;  %3499 = vst [vmem:[%s5455_s9 + $0x2f8] sm:$0xff] %v3371_v10  ;;  %v3372_v22 = vadd.f32 %v5376_v26, %v3232_v27  ;;  %v2842_v1 = vsub.f32 %v7300_v41, %v6719_v8  ;;  %v2843_v52 = vsub.f32 %v7301_v51, %v6719_v8 }
 0x3b8   : > { %v3373_v63 = vadd.f32 %v5333_v31, %v3233_v3  ;;  %v2920_v12 = vadd.f32 1e-05, %v2728_v9  ;;  %v6761_v45 = vmul.f32 0.00390625, %v2136_v36  ;;  %v7302_v3 = vld [vmem:[#allocation81_spill] sm:$0xff] }
 0x3b9   : > { %v4007_v49 = vpop.eup %4006  ;;  %3500 = vst [vmem:[%s5455_s9 + $0x300] sm:$0xff] %v3372_v22  ;;  %v2453_v44 = vpop.xlane.xlu1 %2452  ;;  %v2844_v9 = vsub.f32 %v7302_v3, %v6733_v54  ;;  %v7303_v22 = vld [vmem:[#allocation82_spill] sm:$0xff] }
 0x3ba   : > { %3501 = vst [vmem:[%s5455_s9 + $0x308] sm:$0xff] %v3373_v63  ;;  %v3094_v59 = vmul.f32 %v4007_v49, %v2838_v47  ;;  %v3095_v39 = vmul.f32 %v4007_v49, %v2839_v15  ;;  %4012 = vrsqrt.f32 %v2920_v12  ;;  %v2601_v38 = vmul.f32 0.00390625, %v2453_v44 }
 0x3bb   : > { %v4009_v7 = vpop.eup %4008  ;;  %v2456_v57 = vpop.xlane.xlu0 %2455  ;;  %v2666_v28 = vmul.f32 %v6761_v45, %v6761_v45  ;;  %v2845_v63 = vsub.f32 %v7303_v22, %v6733_v54 }
 0x3bc   : > { %v3234_v24 = vmul.f32 %v5361_v53, %v3094_v59  ;;  %v3235_v2 = vmul.f32 %v5364_v29, %v3095_v39  ;;  %v3096_v14 = vmul.f32 %v4009_v7, %v2840_v48  ;;  %v3097_v17 = vmul.f32 %v4009_v7, %v2841_v61 }
 0x3bd   : > { %v2729_v32 = vsub.f32 %v2601_v38, %v2665_v4  ;;  %v2602_v25 = vmul.f32 0.00390625, %v2456_v57  ;;  %v2139_v60 = vpop.xlane.xlu1 %2138  ;;  %v7304_v57 = vld [vmem:[#allocation12_spill] sm:$0xff] }
 0x3be   : > { %v3374_v40 = vadd.f32 %v5376_v26, %v3234_v24  ;;  %v3375_v13 = vadd.f32 %v5333_v31, %v3235_v2  ;;  %v3236_v34 = vmul.f32 %v5361_v53, %v3096_v14  ;;  %v3237_v16 = vmul.f32 %v5364_v29, %v3097_v17 }
 0x3bf   : > { %v2921_v58 = vadd.f32 1e-05, %v2729_v32  ;;  %v2730_v55 = vsub.f32 %v2602_v25, %v2666_v28  ;;  %v6783_v46 = vmul.f32 0.00390625, %v2139_v60  ;;  %v2142_v43 = vpop.xlane.xlu0 %2141  ;;  %v2846_v32 = vsub.f32 %v7304_v57, %v6751_v35  ;;  %v7305_v28 = vld [vmem:[#allocation13_spill] sm:$0xff] }
 0x3c0   : > { %3502 = vst [vmem:[%s5455_s9 + $0x310] sm:$0xff] %v3374_v40  ;;  %3503 = vst [vmem:[%s5455_s9 + $0x318] sm:$0xff] %v3375_v13  ;;  %v3376_v42 = vadd.f32 %v5376_v26, %v3236_v34  ;;  %v3377_v5 = vadd.f32 %v5333_v31, %v3237_v16  ;;  %v6795_v36 = vmul.f32 0.00390625, %v2142_v43  ;;  %v2847_v25 = vsub.f32 %v7305_v28, %v6751_v35  ;;  %v7306_v16 = vld [vmem:[#allocation14_spill] sm:$0xff]  ;;  %v7310_v57 = vld [vmem:[#allocation17_spill] sm:$0xff] }
 0x3c1   : > { %4014 = vrsqrt.f32 %v2921_v58  ;;  %v2922_v11 = vadd.f32 1e-05, %v2730_v55  ;;  %v2667_v10 = vmul.f32 %v6783_v46, %v6783_v46  ;;  %v2848_v60 = vsub.f32 %v7306_v16, %v6761_v45  ;;  %v7307_v58 = vld [vmem:[#allocation15_spill] sm:$0xff] }
 0x3c2   : > { %3504 = vst [vmem:[%s5455_s9 + $0x320] sm:$0xff] %v3376_v42  ;;  %3505 = vst [vmem:[%s5455_s9 + $0x328] sm:$0xff] %v3377_v5  ;;  %v2668_v7 = vmul.f32 %v6795_v36, %v6795_v36  ;;  %v2849_v55 = vsub.f32 %v7307_v58, %v6761_v45 }
 0x3c3   : > { %4016 = vrsqrt.f32 %v2922_v11  ;;  %v4011_v21 = vpop.eup %4010  ;;  %v2459_v50 = vpop.xlane.xlu1 %2458 }
 0x3c4   : > { %v3098_v19 = vmul.f32 %v4011_v21, %v2842_v1  ;;  %v3099_v20 = vmul.f32 %v4011_v21, %v2843_v52  ;;  %v2603_v27 = vmul.f32 0.00390625, %v2459_v50 }
 0x3c6   : > { %v3238_v8 = vmul.f32 %v5361_v53, %v3098_v19  ;;  %v3239_v47 = vmul.f32 %v5364_v29, %v3099_v20  ;;  %v2731_v15 = vsub.f32 %v2603_v27, %v2667_v10 }
 0x3c7   : > { %v4013_v49 = vpop.eup %4012 }
 0x3c8   : > { %v2462_v12 = vpop.xlane.xlu0 %2461  ;;  %v3378_v48 = vadd.f32 %v5376_v26, %v3238_v8  ;;  %v3379_v33 = vadd.f32 %v5333_v31, %v3239_v47  ;;  %v3100_v61 = vmul.f32 %v4013_v49, %v2844_v9  ;;  %v3101_v59 = vmul.f32 %v4013_v49, %v2845_v63 }
 0x3c9   : > { %v2145_v39 = vpop.xlane.xlu1 %2144  ;;  %v2923_v44 = vadd.f32 1e-05, %v2731_v15  ;;  %v2604_v54 = vmul.f32 0.00390625, %v2462_v12 }
 0x3ca   : > { %3506 = vst [vmem:[%s5455_s9 + $0x330] sm:$0xff] %v3378_v48  ;;  %3507 = vst [vmem:[%s5455_s9 + $0x338] sm:$0xff] %v3379_v33  ;;  %v3240_v4 = vmul.f32 %v5361_v53, %v3100_v61  ;;  %v3241_v38 = vmul.f32 %v5364_v29, %v3101_v59  ;;  %v6809_v2 = vmul.f32 0.00390625, %v2145_v39  ;;  %v2850_v48 = vsub.f32 %v6033_v62, %v6783_v46  ;;  %v7308_v33 = vld [vmem:[#allocation16_spill] sm:$0xff] }
 0x3cb   : > { %4018 = vrsqrt.f32 %v2923_v44  ;;  %v2732_v24 = vsub.f32 %v2604_v54, %v2668_v7  ;;  %v2851_v61 = vsub.f32 %v7308_v33, %v6783_v46  ;;  %v2853_v46 = vsub.f32 %v7310_v57, %v6795_v36 }
 0x3cc   : > { %v3380_v14 = vadd.f32 %v5376_v26, %v3240_v4  ;;  %v3381_v17 = vadd.f32 %v5333_v31, %v3241_v38  ;;  %v2148_v40 = vpop.xlane.xlu0 %2147  ;;  %v2669_v35 = vmul.f32 %v6809_v2, %v6809_v2 }
 0x3cd   : > { %v2924_v34 = vadd.f32 1e-05, %v2732_v24  ;;  %v6823_v41 = vmul.f32 0.00390625, %v2148_v40 }
 0x3ce   : > { %v4015_v13 = vpop.eup %4014  ;;  %3508 = vst [vmem:[%s5455_s9 + $0x340] sm:$0xff] %v3380_v14  ;;  %3509 = vst [vmem:[%s5455_s9 + $0x348] sm:$0xff] %v3381_v17  ;;  %v7309_v17 = vld [vmem:[#allocation19_spill] sm:$0xff] }
 0x3cf   : > { %v3102_v42 = vmul.f32 %v4015_v13, %v2846_v32  ;;  %v3103_v5 = vmul.f32 %v4015_v13, %v2847_v25  ;;  %v2465_v11 = vpop.xlane.xlu1 %2464  ;;  %4020 = vrsqrt.f32 %v2924_v34  ;;  %v2670_v22 = vmul.f32 %v6823_v41, %v6823_v41 }
 0x3d0   : > { %v4017_v43 = vpop.eup %4016  ;;  %v2605_v1 = vmul.f32 0.00390625, %v2465_v11  ;;  %v2852_v62 = vsub.f32 %v7309_v17, %v6795_v36 }
 0x3d1   : > { %v3242_v51 = vmul.f32 %v5361_v53, %v3102_v42  ;;  %v3243_v52 = vmul.f32 %v5364_v29, %v3103_v5  ;;  %v3104_v21 = vmul.f32 %v4017_v43, %v2848_v60  ;;  %v3105_v50 = vmul.f32 %v4017_v43, %v2849_v55 }
 0x3d2   : > { %v2733_v45 = vsub.f32 %v2605_v1, %v2669_v35  ;;  %v2468_v3 = vpop.xlane.xlu0 %2467 }
 0x3d3   : > { %v3382_v19 = vadd.f32 %v5376_v26, %v3242_v51  ;;  %v3383_v20 = vadd.f32 %v5333_v31, %v3243_v52  ;;  %v3244_v10 = vmul.f32 %v5361_v53, %v3104_v21  ;;  %v3245_v27 = vmul.f32 %v5364_v29, %v3105_v50  ;;  %v7311_v52 = vld [vmem:[#allocation18_spill] sm:$0xff]  ;;  %v7312_v50 = vld [vmem:[#allocation20_spill] sm:$0xff] }
 0x3d4   : > { %v2925_v9 = vadd.f32 1e-05, %v2733_v45  ;;  %v2606_v63 = vmul.f32 0.00390625, %v2468_v3  ;;  %v2151_v8 = vpop.xlane.xlu1 %2150  ;;  %v2854_v21 = vsub.f32 %v7311_v52, %v6809_v2  ;;  %v2855_v45 = vsub.f32 %v7312_v50, %v6809_v2 }
 0x3d5   : > { %3510 = vst [vmem:[%s5455_s9 + $0x350] sm:$0xff] %v3382_v19  ;;  %3511 = vst [vmem:[%s5455_s9 + $0x358] sm:$0xff] %v3383_v20  ;;  %v3384_v47 = vadd.f32 %v5376_v26, %v3244_v10  ;;  %v3385_v15 = vadd.f32 %v5333_v31, %v3245_v27  ;;  %v6841_v12 = vmul.f32 0.00390625, %v2151_v8 }
 0x3d6   : > { %4022 = vrsqrt.f32 %v2925_v9  ;;  %v2734_v49 = vsub.f32 %v2606_v63, %v2670_v22  ;;  %v2154_v39 = vpop.xlane.xlu0 %2153  ;;  %v7313_v63 = vld [vmem:[#allocation23_spill] sm:$0xff] }
 0x3d7   : > { %3512 = vst [vmem:[%s5455_s9 + $0x360] sm:$0xff] %v3384_v47  ;;  %3513 = vst [vmem:[%s5455_s9 + $0x368] sm:$0xff] %v3385_v15  ;;  %v6847_v38 = vmul.f32 0.00390625, %v2154_v39  ;;  %v2671_v24 = vmul.f32 %v6841_v12, %v6841_v12  ;;  %v2856_v8 = vsub.f32 %v7313_v63, %v6823_v41  ;;  %v7314_v15 = vld [vmem:[#allocation21_spill] sm:$0xff] }
 0x3d8   : > { %v2926_v59 = vadd.f32 1e-05, %v2734_v49  ;;  %v4019_v44 = vpop.eup %4018  ;;  %v2857_v49 = vsub.f32 %v7314_v15, %v6823_v41 }
 0x3d9   : > { %v3106_v7 = vmul.f32 %v4019_v44, %v2850_v48  ;;  %v3107_v54 = vmul.f32 %v4019_v44, %v2851_v61  ;;  %v2672_v42 = vmul.f32 %v6847_v38, %v6847_v38 }
 0x3da   : > { %4024 = vrsqrt.f32 %v2926_v59  ;;  %v2471_v4 = vpop.xlane.xlu1 %2470 }
 0x3db   : > { %v2607_v14 = vmul.f32 0.00390625, %v2471_v4  ;;  %v3246_v32 = vmul.f32 %v5361_v53, %v3106_v7  ;;  %v3247_v28 = vmul.f32 %v5364_v29, %v3107_v54 }
 0x3dc   : > { %v4021_v25 = vpop.eup %4020 }
 0x3dd   : > { %v2735_v40 = vsub.f32 %v2607_v14, %v2671_v24  ;;  %v3386_v13 = vadd.f32 %v5376_v26, %v3246_v32  ;;  %v3387_v34 = vadd.f32 %v5333_v31, %v3247_v28  ;;  %v3108_v16 = vmul.f32 %v4021_v25, %v2852_v62 }
 0x3de   : > { %v3109_v60 = vmul.f32 %v4021_v25, %v2853_v46  ;;  %v2474_v58 = vpop.xlane.xlu0 %2473 }
 0x3df   : > { %v2927_v55 = vadd.f32 1e-05, %v2735_v40  ;;  %v2608_v5 = vmul.f32 0.00390625, %v2474_v58  ;;  %3514 = vst [vmem:[%s5455_s9 + $0x370] sm:$0xff] %v3386_v13  ;;  %3515 = vst [vmem:[%s5455_s9 + $0x378] sm:$0xff] %v3387_v34  ;;  %v3248_v36 = vmul.f32 %v5361_v53, %v3108_v16  ;;  %v7315_v34 = vld [vmem:[#allocation22_spill] sm:$0xff] }
 0x3e0   : > { %v2157_v11 = vpop.xlane.xlu1 %2156  ;;  %v3249_v43 = vmul.f32 %v5364_v29, %v3109_v60  ;;  %v2858_v16 = vsub.f32 %v7315_v34, %v6841_v12  ;;  %v7316_v60 = vld [vmem:[#allocation24_spill] sm:$0xff] }
 0x3e1   : > { %4026 = vrsqrt.f32 %v2927_v55  ;;  %v2736_v35 = vsub.f32 %v2608_v5, %v2672_v42  ;;  %v3388_v1 = vadd.f32 %v5376_v26, %v3248_v36  ;;  %v6871_v27 = vmul.f32 0.00390625, %v2157_v11 }
 0x3e2   : > { %v3389_v51 = vadd.f32 %v5333_v31, %v3249_v43  ;;  %v2160_v19 = vpop.xlane.xlu0 %2159  ;;  %v2859_v58 = vsub.f32 %v7316_v60, %v6841_v12  ;;  %v7317_v12 = vld [vmem:[#allocation25_spill] sm:$0xff] }
 0x3e3   : > { %v4023_v20 = vpop.eup %4022  ;;  %v2928_v10 = vadd.f32 1e-05, %v2736_v35  ;;  %v6873_v3 = vmul.f32 0.00390625, %v2160_v19  ;;  %3516 = vst [vmem:[%s5455_s9 + $0x380] sm:$0xff] %v3388_v1  ;;  %v2673_v39 = vmul.f32 %v6871_v27, %v6871_v27  ;;  %v2860_v1 = vsub.f32 %v6209_v37, %v6847_v38 }
 0x3e4   : > { %3517 = vst [vmem:[%s5455_s9 + $0x388] sm:$0xff] %v3389_v51  ;;  %v3110_v9 = vmul.f32 %v4023_v20, %v2854_v21  ;;  %v3111_v22 = vmul.f32 %v4023_v20, %v2855_v45  ;;  %v2861_v51 = vsub.f32 %v7317_v12, %v6847_v38 }
 0x3e5   : > { %4028 = vrsqrt.f32 %v2928_v10  ;;  %v2477_v47 = vpop.xlane.xlu1 %2476  ;;  %v2674_v44 = vmul.f32 %v6873_v3, %v6873_v3 }
 0x3e6   : > { %v3250_v2 = vmul.f32 %v5361_v53, %v3110_v9  ;;  %v3251_v48 = vmul.f32 %v5364_v29, %v3111_v22  ;;  %v2609_v33 = vmul.f32 0.00390625, %v2477_v47  ;;  %v2863_v47 = vsub.f32 %v6265_v0, %v6871_v27 }
 0x3e7   : > { %v2480_v61 = vpop.xlane.xlu0 %2479  ;;  %v4025_v59 = vpop.eup %4024 }
 0x3e8   : > { %v2610_v7 = vmul.f32 0.00390625, %v2480_v61  ;;  %v3390_v54 = vadd.f32 %v5376_v26, %v3250_v2  ;;  %v3391_v41 = vadd.f32 %v5333_v31, %v3251_v48  ;;  %v3112_v4 = vmul.f32 %v4025_v59, %v2856_v8 }
 0x3e9   : > { %v3113_v24 = vmul.f32 %v4025_v59, %v2857_v49  ;;  %v2737_v14 = vsub.f32 %v2609_v33, %v2673_v39  ;;  %v2163_v62 = vpop.xlane.xlu1 %2162  ;;  %v2862_v8 = vsub.f32 %v6262_v23, %v6871_v27  ;;  %v2864_v49 = vsub.f32 %v6268_v18, %v6873_v3 }
 0x3ea   : > { %v2738_v17 = vsub.f32 %v2610_v7, %v2674_v44  ;;  %3518 = vst [vmem:[%s5455_s9 + $0x390] sm:$0xff] %v3390_v54  ;;  %3519 = vst [vmem:[%s5455_s9 + $0x398] sm:$0xff] %v3391_v41  ;;  %v3252_v57 = vmul.f32 %v5361_v53, %v3112_v4  ;;  %v6893_v32 = vmul.f32 0.00390625, %v2163_v62  ;;  %v2865_v2 = vsub.f32 %v6271_v56, %v6873_v3 }
 0x3eb   : > { %v3253_v46 = vmul.f32 %v5364_v29, %v3113_v24  ;;  %v2929_v28 = vadd.f32 1e-05, %v2737_v14 }
 0x3ec   : > { %v2930_v25 = vadd.f32 1e-05, %v2738_v17  ;;  %v3392_v40 = vadd.f32 %v5376_v26, %v3252_v57  ;;  %v2675_v5 = vmul.f32 %v6893_v32, %v6893_v32  ;;  %v2866_v54 = vsub.f32 %v6350_v30, %v6893_v32 }
 0x3ed   : > { %v3393_v13 = vadd.f32 %v5333_v31, %v3253_v46  ;;  %4030 = vrsqrt.f32 %v2929_v28  ;;  %v2867_v41 = vsub.f32 %v6318_v6, %v6893_v32 }
 0x3ee   : > { %v2483_v55 = vpop.xlane.xlu1 %2482  ;;  %v4027_v42 = vpop.eup %4026  ;;  %3520 = vst [vmem:[%s5455_s9 + $0x3a0] sm:$0xff] %v3392_v40  ;;  %4032 = vrsqrt.f32 %v2930_v25 }
 0x3ef   : > { %3521 = vst [vmem:[%s5455_s9 + $0x3a8] sm:$0xff] %v3393_v13  ;;  %v2611_v11 = vmul.f32 0.00390625, %v2483_v55  ;;  %v3114_v36 = vmul.f32 %v4027_v42, %v2858_v16  ;;  %v3115_v43 = vmul.f32 %v4027_v42, %v2859_v58 }
 0x3f1   : > { %v2739_v35 = vsub.f32 %v2611_v11, %v2675_v5  ;;  %v3254_v52 = vmul.f32 %v5361_v53, %v3114_v36  ;;  %v3255_v21 = vmul.f32 %v5364_v29, %v3115_v43 }
 0x3f2   : > { %v4029_v50 = vpop.eup %4028 }
 0x3f3   : > { %v2931_v45 = vadd.f32 1e-05, %v2739_v35  ;;  %v3394_v19 = vadd.f32 %v5376_v26, %v3254_v52  ;;  %v3395_v20 = vadd.f32 %v5333_v31, %v3255_v21  ;;  %v3116_v10 = vmul.f32 %v4029_v50, %v2860_v1 }
 0x3f4   : > { %v3117_v9 = vmul.f32 %v4029_v50, %v2861_v51 }
 0x3f5   : > { %4034 = vrsqrt.f32 %v2931_v45  ;;  %3522 = vst [vmem:[%s5455_s9 + $0x3b0] sm:$0xff] %v3394_v19  ;;  %3523 = vst [vmem:[%s5455_s9 + $0x3b8] sm:$0xff] %v3395_v20  ;;  %v3256_v37 = vmul.f32 %v5361_v53, %v3116_v10 }
 0x3f6   : > { %v3257_v38 = vmul.f32 %v5364_v29, %v3117_v9 }
 0x3f7   : > { %v3396_v22 = vadd.f32 %v5376_v26, %v3256_v37 }
 0x3f8   : > { %v3397_v63 = vadd.f32 %v5333_v31, %v3257_v38 }
 0x3f9   : > { %3524 = vst [vmem:[%s5455_s9 + $0x3c0] sm:$0xff] %v3396_v22 }
 0x3fa   : > { %3525 = vst [vmem:[%s5455_s9 + $0x3c8] sm:$0xff] %v3397_v63  ;;  %v4031_v15 = vpop.eup %4030 }
 0x3fb   : > { %v4033_v48 = vpop.eup %4032  ;;  %v3118_v33 = vmul.f32 %v4031_v15, %v2862_v8  ;;  %v3119_v61 = vmul.f32 %v4031_v15, %v2863_v47 }
 0x3fc   : > { %v3120_v59 = vmul.f32 %v4033_v48, %v2864_v49  ;;  %v3121_v39 = vmul.f32 %v4033_v48, %v2865_v2 }
 0x3fd   : > { %v3258_v23 = vmul.f32 %v5361_v53, %v3118_v33  ;;  %v3259_v0 = vmul.f32 %v5364_v29, %v3119_v61 }
 0x3fe   : > { %v3260_v27 = vmul.f32 %v5361_v53, %v3120_v59  ;;  %v3261_v18 = vmul.f32 %v5364_v29, %v3121_v39 }
 0x3ff   : > { %v3398_v44 = vadd.f32 %v5376_v26, %v3258_v23  ;;  %v3399_v56 = vadd.f32 %v5333_v31, %v3259_v0 }
 0x400   : > { %v3400_v3 = vadd.f32 %v5376_v26, %v3260_v27  ;;  %v3401_v7 = vadd.f32 %v5333_v31, %v3261_v18 }
 0x401   : > { %3526 = vst [vmem:[%s5455_s9 + $0x3d0] sm:$0xff] %v3398_v44  ;;  %3527 = vst [vmem:[%s5455_s9 + $0x3d8] sm:$0xff] %v3399_v56 }
 0x402   : > { %v4035_v4 = vpop.eup %4034  ;;  %3528 = vst [vmem:[%s5455_s9 + $0x3e0] sm:$0xff] %v3400_v3  ;;  %3529 = vst [vmem:[%s5455_s9 + $0x3e8] sm:$0xff] %v3401_v7 }
 0x403   : > { %v3122_v24 = vmul.f32 %v4035_v4, %v2866_v54  ;;  %v3123_v14 = vmul.f32 %v4035_v4, %v2867_v41 }
 0x405   : > { %v3262_v17 = vmul.f32 %v5361_v53, %v3122_v24  ;;  %v3263_v62 = vmul.f32 %v5364_v29, %v3123_v14  ;;  %3539 = sbr.rel (!%p7318_p10) target bundleno = 1061 (0x425), region = 64 }
 0x407   : > { %v3402_v57 = vadd.f32 %v5376_v26, %v3262_v17  ;;  %v3403_v46 = vadd.f32 %v5333_v31, %v3263_v62 }
 0x409   : > { %3530 = vst [vmem:[%s5455_s9 + $0x3f0] sm:$0xff] %v3402_v57  ;;  %3531 = vst [vmem:[%s5455_s9 + $0x3f8] sm:$0xff] %v3403_v46 }
 0x40a   : > { %s7327_s3 = smov (!%p3542_p1, %s3541_s3), 64 }
 0x40b   : > { %s6955_s29 = sshll.u32 %s7327_s3, 8 }
 0x40c   : > { %s3547_s8 = ssub.s32 16384, %s6955_s29 }
 0x40d   : > { %3548 = vsyncadd %s3533_s16, %s3547_s8  ;;  %p3733_p3 = scmp.ne.s32.totalorder %s6955_s29, 0  ;;  %s3745_s13 = sshll.u32 %s4383_s28, 14 }
 0x40e   : > { %s6965_s15 = scalar_lea.hbm %s7020_s7, %s3745_s13  ;;  %s3554_s18 = sshll.u32 %s5455_s9, 4  ;;  %s6968_s18 = int_to_ptr.vmem [resolvable:$true] %s3554_s18 }
 0x40f   : > { %s4242_s22 = scalar_lea.vmem %s6968_s18, %s6955_s29  ;;  %s4319_s19 = smov [#allocation8]  }
 0x410   : > { %p4243_p7 = scmp.ne.s32.totalorder %s6968_s18, %s4242_s22  ;;  %s4246_s21 = sshll.u32 %s4319_s19, 4  ;;  %s4247_s21 = int_to_ptr.vmem [resolvable:$false] %s4246_s21 }
 0x411   : > { %s4248_s28 = scalar_lea.vmem %s4247_s21, 32768  ;;  %p4249_p4 = scmp.lt.s32.totalorder %s6968_s18, %s4247_s21 }
 0x412   : > { %p4244_p9 = pnand %p4243_p7, %p3733_p3  ;;  %p4250_p6 = scmp.lt.s32.totalorder %s4248_s28, %s4242_s22 }
 0x414   : > { %p4245_p12 = pneg %p4244_p9  ;;  %p4251_p11 = por %p4250_p6, %p4249_p4 }
 0x416   : > { %p4252_p0 = pnand %p4251_p11, %p4245_p12 }
 0x418   : > { %4255 = shalt.err (!%p4252_p0)
}
 0x419   : > { %s4256_s23 = scalar_lea.hbm %s6965_s15, %s6955_s29  ;;  %s4260_s1 = scalar_lea.hbm %s7020_s7, 20480 }
 0x41a   : > { %p4257_p2 = scmp.ne.s32.totalorder %s6965_s15, %s4256_s23  ;;  %p4261_p10 = scmp.lt.s32.totalorder %s6965_s15, %s7020_s7 }
 0x41b   : > { %p4262_p1 = scmp.lt.s32.totalorder %s4260_s1, %s4256_s23 }
 0x41c   : > { %p4258_p5 = pnand %p4257_p2, %p3733_p3 }
 0x41d   : > { %p4263_p7 = por %p4262_p1, %p4261_p10 }
 0x41e   : > { %p4259_p13 = pneg %p4258_p5 }
 0x420   : > { %p4264_p9 = pnand %p4263_p7, %p4259_p13 }
 0x422   : > { %4267 = shalt.err (!%p4264_p9)
}
 0x423   : > { %s4320_s13 = smov 256   ;;  %s4321_s20 = smov 16  }
 0x424   : > { %3560 = dma.vmem_to_hbm [thread:$0]  (%p3733_p3), %s6968_s18, %s6955_s29, %s6965_s15, %s3533_s16, %s4320_s13, %s4320_s13, %s4321_s20  }
 0x425 PF: > { %s3569_s12 = sand.u32 1, %s4298_s24   ;;  %p7319_p12 = scmp.ne.s32.totalorder %s7123_s14, 0 }
 0x426   : > { %s3570_s22 = scalar_lea.sflag [#allocation4], %s3569_s12 }
 0x427   : > { %p3764_p4 = pnand %p3650_p8, %p7319_p12 }
 0x429   : > { %p3765_p6 = pneg %p3764_p4 }
 0x42b   : > { %4293 = dma.done.wait (%p3765_p6), %s3570_s22, 16384  }
 0x42c   : > { %4295 = vsyncadd (%p3765_p6), %s3570_s22, 4294950912  ;;  %p21_p11 = scmp.ge.s32.totalorder %s4387_s30, 4   ;;  %s7320_s24 = smov %s4302_s25 }
 0x42d   : > { %s7321_s25 = smov %s4306_s26  ;;  %s7322_s26 = smov %s4399_s10 }
 0x42e   : > { %s7323_s27 = smov %s4387_s30  ;;  %23 = sbr.rel (!%p21_p11) target bundleno = 9 (0x9), region = 101 }
 0x433   :  { %3575 = vsyncpa [#allocation3], 1 }
 0x434   :  { %3577 = vsyncpa [#allocation3 + $0x1], 1 }
 0x435   :  { %3578 = vsyncpa [#allocation6], 1 }
 0x436   :  { %3579 = vsyncpa [#allocation4], 1 }
 0x437   :  { %3581 = vsyncpa [#allocation4 + $0x1], 1 }

</bundles_post_ra>
